<compile_context>
chip_gen: v7x
topology: tpu7x:2x2x1
jax: 0.10.0
libtpu: 0.0.40
codegen_flags: <defaults>
</compile_context>

<pallas_src>
import jax
import jax.numpy as jnp
from jax.experimental import pallas as pl
from jax.experimental.pallas import tpu as pltpu

# ----------------------------- configuration -------------------------------
SHAPE_IN = 2               # cfg_shape_net['input_dim']  (== PARAM_IN, see forward slicing)
SHAPE_OUT = 1              # cfg_shape_net['output_dim']
SHAPE_HIDDEN = (32, 32)    # cfg_shape_net['hidden_units']
PARAM_IN = 2               # cfg_param_net['input_dim']
PARAM_HIDDEN = (32, 32)    # cfg_param_net['hidden_units']
LATENT_DIM = sum(SHAPE_HIDDEN)   # 64
IN_DIM = SHAPE_IN + PARAM_IN     # 4
TILE_CAP = 8192            # max batch lanes per grid step (keeps VMEM ~7 MiB/step)

# Row offsets inside the packed K=32 weight slab ([*, 32], stacked on sublanes).
_W_PW2 = 0        # param-net hidden 2   [32, 32]
_W_PWL = 32       # latent projection    [64, 32]
_W_SW2 = 96       # shape-net hidden 2   [32, 32]
_W_SWO = 128      # shape-net output     [1, 32]
_W_ROWS = 136     # padded to a multiple of 8 sublanes

# Row offsets inside the packed bias slab ([*, 1]).
_B_F1 = 0         # fused first-layer bias [64, 1]  (= [sb1; pb1])
_B_PB2 = 64       # [32, 1]
_B_PBL = 96       # [64, 1]
_B_SB2 = 160      # [32, 1]
_B_SBO = 192      # [1, 1]
_B_ROWS = 200


# ------------------------------- kernel ------------------------------------
def nif_kernel(x_ref, wf1_ref, w_ref, b_ref, o_ref):
    # x: [4, T] -- rows 0:2 = shape-net coords, rows 2:4 = param-net coords.
    x = x_ref[...]
    w = w_ref[...]            # packed [136, 32] weight slab (one DMA)
    b = b_ref[...]            # packed [200, 1]  bias   slab (one DMA)

    # Fused first layers (shape L1 (+) param L1): block-diagonal [64,4] @ [4,T].
    f = jnp.dot(wf1_ref[...], x,
                preferred_element_type=jnp.float32) + b[_B_F1:_B_F1 + 64, :]
    s_pre = f[:32, :]                     # shape-net layer-1 pre-activation
    h = jnp.tanh(f[32:64, :])             # param-net hidden 1 (EUP tanh)

    # Parameter network -> latent codes (single [64,32] matmul, 8-aligned split).
    h = jnp.tanh(jnp.dot(w[_W_PW2:_W_PW2 + 32, :], h,
                         preferred_element_type=jnp.float32)
                 + b[_B_PB2:_B_PB2 + 32, :])
    lat = jnp.dot(w[_W_PWL:_W_PWL + 64, :], h,
                  preferred_element_type=jnp.float32) + b[_B_PBL:_B_PBL + 64, :]

    # Shape network, hidden layers modulated by the latent codes.
    s = jnp.tanh(s_pre * lat[:32, :])
    s = jnp.dot(w[_W_SW2:_W_SW2 + 32, :], s,
                preferred_element_type=jnp.float32) + b[_B_SB2:_B_SB2 + 32, :]
    s = jnp.tanh(s * lat[32:64, :])

    # Plain output layer: latent codes are exhausted, no modulation remains.
    # TODO(synk): an M=1 matmul barely uses the MXU; a VPU-mul + sublane reduce
    # would also work, but the MXU path is kept for proven lowering.
    out = jnp.dot(w[_W_SWO:_W_SWO + 1, :], s,
                  preferred_element_type=jnp.float32) + b[_B_SBO:_B_SBO + 1, :]
    o_ref[...] = out.astype(o_ref.dtype)


# --------------------------- parameter packing ------------------------------
def prepare_params(p):
    """Pack the logical NIF parameters into the three constant slabs the
    lane-dense kernel consumes.  Do this once, outside the hot path."""
    # Fused first layer: block-diagonal [64, 4] acting on [shape_in; param_in].
    wf1 = jnp.zeros((SHAPE_HIDDEN[0] + PARAM_HIDDEN[0], IN_DIM), jnp.float32)
    wf1 = wf1.at[:SHAPE_HIDDEN[0], :SHAPE_IN].set(p["sw1"].T)
    wf1 = wf1.at[SHAPE_HIDDEN[0]:, SHAPE_IN:].set(p["pw1"].T)

    # All K=32 matmul weights stacked along sublanes: [136, 32].
    w_slab = jnp.zeros((_W_ROWS, 32), jnp.float32)
    w_slab = w_slab.at[_W_PW2:_W_PW2 + 32, :].set(p["pw2"].T)
    w_slab = w_slab.at[_W_PWL:_W_PWL + 64, :].set(p["pwl"].T)
    w_slab = w_slab.at[_W_SW2:_W_SW2 + 32, :].set(p["sw2"].T)
    w_slab = w_slab.at[_W_SWO:_W_SWO + 1, :].set(p["swo"].T)

    # All biases as one [200, 1] column slab.
    b_slab = jnp.zeros((_B_ROWS, 1), jnp.float32)
    b_slab = b_slab.at[_B_F1:_B_F1 + 32, :].set(p["sb1"].reshape(-1, 1))
    b_slab = b_slab.at[_B_F1 + 32:_B_F1 + 64, :].set(p["pb1"].reshape(-1, 1))
    b_slab = b_slab.at[_B_PB2:_B_PB2 + 32, :].set(p["pb2"].reshape(-1, 1))
    b_slab = b_slab.at[_B_PBL:_B_PBL + 64, :].set(p["pbl"].reshape(-1, 1))
    b_slab = b_slab.at[_B_SB2:_B_SB2 + 32, :].set(p["sb2"].reshape(-1, 1))
    b_slab = b_slab.at[_B_SBO:_B_SBO + 1, :].set(p["sbo"].reshape(-1, 1))
    return wf1, w_slab, b_slab


# ------------------------------- grid sizing --------------------------------
def _num_tensorcores():
    """Best-effort count of TensorCores addressable by one kernel launch
    (megacore / v7x-style chips expose 2; v5e / v6e expose 1)."""
    try:
        kind = jax.devices()[0].device_kind.lower()
    except Exception:
        return 1
    return 2 if any(t in kind for t in ("v4", "v5p", "v7", "7x")) else 1


def _choose_tile(n, num_tc, cap=TILE_CAP):
    # One grid step per TensorCore; split further only to respect the VMEM cap.
    steps = num_tc if n % (num_tc * 128) == 0 else 1
    while n // steps > cap and n % (steps * 2 * 128) == 0:
        steps *= 2
    tile = n // steps
    assert tile % 128 == 0 and n % tile == 0
    return tile


# ------------------------------- wrapper ------------------------------------
def nif_forward(inputs_dn, packed_params):
    """Lane-major NIF forward.

    inputs_dn: [IN_DIM, N] float32 (SoA layout: rows 0:2 = shape-net coords,
               rows 2:4 = param-net coords; N multiple of 128).
    returns:   [1, N] float32 -- batch stays on the lane axis end-to-end, so
               there are no relayout ops anywhere in the forward path.
    """
    wf1, w_slab, b_slab = packed_params
    d, n = inputs_dn.shape
    assert d == IN_DIM, "expected lane-major [IN_DIM, N] inputs"
    assert n % 128 == 0, "batch must be lane-aligned (multiple of 128)"
    tile_n = _choose_tile(n, _num_tensorcores())

    def full_spec(a):
        return pl.BlockSpec(a.shape, lambda i, _nd=a.ndim: (0,) * _nd)

    return pl.pallas_call(
        nif_kernel,
        out_shape=jax.ShapeDtypeStruct((SHAPE_OUT, n), jnp.float32),
        grid_spec=pltpu.PrefetchScalarGridSpec(
            num_scalar_prefetch=0,
            grid=(n // tile_n,),
            in_specs=[pl.BlockSpec((d, tile_n), lambda i: (0, i)),
                      full_spec(wf1), full_spec(w_slab), full_spec(b_slab)],
            out_specs=pl.BlockSpec((SHAPE_OUT, tile_n), lambda i: (0, i)),
        ),
        compiler_params=pltpu.CompilerParams(
            dimension_semantics=("parallel",)),
    )(inputs_dn, wf1, w_slab, b_slab)


def nif_forward_rowmajor(inputs_nd, packed_params):
    """Compatibility wrapper for the original [N, D] -> [N, 1] contract.
    The two transposes it adds are exactly the relayouts the lane-major entry
    point avoids -- prefer nif_forward for performance."""
    return nif_forward(inputs_nd.T, packed_params).T


# --------------------------- parameter init ---------------------------------
def _linear_init(key, fan_in, fan_out):
    kw, kb = jax.random.split(key)
    bound = 1.0 / jnp.sqrt(jnp.float32(fan_in))
    w = jax.random.uniform(kw, (fan_in, fan_out), jnp.float32, -bound, bound)
    b = jax.random.uniform(kb, (1, fan_out), jnp.float32, -bound, bound)
    return w, b


def init_params(key):
    ks = jax.random.split(key, 6)
    pw1, pb1 = _linear_init(ks[0], PARAM_IN, PARAM_HIDDEN[0])
    pw2, pb2 = _linear_init(ks[1], PARAM_HIDDEN[0], PARAM_HIDDEN[1])
    pwl, pbl = _linear_init(ks[2], PARAM_HIDDEN[1], LATENT_DIM)
    sw1, sb1 = _linear_init(ks[3], SHAPE_IN, SHAPE_HIDDEN[0])
    sw2, sb2 = _linear_init(ks[4], SHAPE_HIDDEN[0], SHAPE_HIDDEN[1])
    swo, sbo = _linear_init(ks[5], SHAPE_HIDDEN[1], SHAPE_OUT)
    return dict(pw1=pw1, pb1=pb1, pw2=pw2, pb2=pb2, pwl=pwl, pbl=pbl,
                sw1=sw1, sb1=sb1, sw2=sw2, sb2=sb2, swo=swo, sbo=sbo)


# ------------------------------ reference -----------------------------------
def nif_reference(inputs_nd, p):
    shape_in = inputs_nd[:, :PARAM_IN]
    param_in = inputs_nd[:, PARAM_IN:]
    h = jnp.tanh(param_in @ p["pw1"] + p["pb1"])
    h = jnp.tanh(h @ p["pw2"] + p["pb2"])
    latent = h @ p["pwl"] + p["pbl"]
    s = shape_in @ p["sw1"] + p["sb1"]
    s = jnp.tanh(s * latent[:, :SHAPE_HIDDEN[0]])
    s = s @ p["sw2"] + p["sb2"]
    s = jnp.tanh(s * latent[:, SHAPE_HIDDEN[0]:SHAPE_HIDDEN[0] + SHAPE_HIDDEN[1]])
    return s @ p["swo"] + p["sbo"]


# --------------------------------- main --------------------------------------
if __name__ == "__main__":
    key = jax.random.PRNGKey(0)
    k_in, k_p = jax.random.split(key)

    N = 4096                               # lane-aligned batch of query points
    # Lane-major (SoA) inputs: rows 0:2 = shape-net coords, rows 2:4 = param coords.
    inputs_dn = jax.random.normal(k_in, (IN_DIM, N), jnp.float32)
    params = init_params(k_p)
    packed = prepare_params(params)        # one-time weight packing, off the hot path

    out = nif_forward(inputs_dn, packed)   # [1, N], lane-dense, no relayouts
    out = jax.block_until_ready(out)

    ref = nif_reference(inputs_dn.T, params)   # reference consumes the AoS view
    assert out.shape == (SHAPE_OUT, N)
    assert jnp.allclose(out[0], ref[:, 0], atol=1e-5, rtol=1e-5), \
        "mismatch vs pure-JAX reference"

    print("KERNEL_OK")
</pallas_src>

<mosaic_0001>
module attributes {stable_mosaic.version = 11 : i64} {
  func.func @nif_kernel(%arg0: i32, %arg1: memref<4x4096xf32, #tpu.memory_space<vmem>>, %arg2: memref<64x4xf32, #tpu.memory_space<vmem>>, %arg3: memref<136x32xf32, #tpu.memory_space<vmem>>, %arg4: memref<200x1xf32, #tpu.memory_space<vmem>>, %arg5: memref<1x4096xf32, #tpu.memory_space<vmem>>) attributes {dimension_semantics = [#tpu.dimension_semantics<parallel>], iteration_bounds = array<i64: 1>, scalar_prefetch = 0 : i64, scratch_operands = 0 : i64, tpu.core_type = #tpu.core_type<tc>, window_params = [{transform_indices = @transform_0, window_bounds = array<i64: 4, 4096>}, {pipeline_mode = #tpu.pipeline_mode<synchronous>, transform_indices = @transform_1, window_bounds = array<i64: 64, 4>}, {pipeline_mode = #tpu.pipeline_mode<synchronous>, transform_indices = @transform_2, window_bounds = array<i64: 136, 32>}, {pipeline_mode = #tpu.pipeline_mode<synchronous>, transform_indices = @transform_3, window_bounds = array<i64: 200, 1>}, {transform_indices = @transform_4, window_bounds = array<i64: 1, 4096>}]} {
    %c0 = arith.constant 0 : index
    %c0_0 = arith.constant 0 : index
    %0 = vector.load %arg1[%c0, %c0_0] : memref<4x4096xf32, #tpu.memory_space<vmem>>, vector<4x4096xf32>
    %c0_1 = arith.constant 0 : index
    %c0_2 = arith.constant 0 : index
    %1 = vector.load %arg3[%c0_1, %c0_2] : memref<136x32xf32, #tpu.memory_space<vmem>>, vector<136x32xf32>
    %c0_3 = arith.constant 0 : index
    %c0_4 = arith.constant 0 : index
    %2 = vector.load %arg4[%c0_3, %c0_4] : memref<200x1xf32, #tpu.memory_space<vmem>>, vector<200x1xf32>
    %c0_5 = arith.constant 0 : index
    %c0_6 = arith.constant 0 : index
    %3 = vector.load %arg2[%c0_5, %c0_6] : memref<64x4xf32, #tpu.memory_space<vmem>>, vector<64x4xf32>
    %cst = arith.constant dense<0.000000e+00> : vector<64x4096xf32>
    %4 = tpu.matmul %3, %0, %cst {dimension_numbers = #tpu.dot_dimension_numbers<[1], [0], [0], [1], [0, 0, 1, 1], [], []>} : vector<64x4xf32>, vector<4x4096xf32>, vector<64x4096xf32> -> vector<64x4096xf32>
    %5 = vector.extract_strided_slice %2 {offsets = [0, 0], sizes = [64, 1], strides = [1, 1]} : vector<200x1xf32> to vector<64x1xf32>
    %6 = vector.broadcast %5 : vector<64x1xf32> to vector<64x4096xf32>
    %7 = arith.addf %4, %6 : vector<64x4096xf32>
    %8 = vector.extract_strided_slice %7 {offsets = [0, 0], sizes = [32, 4096], strides = [1, 1]} : vector<64x4096xf32> to vector<32x4096xf32>
    %9 = vector.extract_strided_slice %7 {offsets = [32, 0], sizes = [32, 4096], strides = [1, 1]} : vector<64x4096xf32> to vector<32x4096xf32>
    %10 = math.tanh %9 : vector<32x4096xf32>
    %11 = vector.extract_strided_slice %1 {offsets = [0, 0], sizes = [32, 32], strides = [1, 1]} : vector<136x32xf32> to vector<32x32xf32>
    %cst_7 = arith.constant dense<0.000000e+00> : vector<32x4096xf32>
    %12 = tpu.matmul %11, %10, %cst_7 {dimension_numbers = #tpu.dot_dimension_numbers<[1], [0], [0], [1], [0, 0, 1, 1], [], []>} : vector<32x32xf32>, vector<32x4096xf32>, vector<32x4096xf32> -> vector<32x4096xf32>
    %13 = vector.extract_strided_slice %2 {offsets = [64, 0], sizes = [32, 1], strides = [1, 1]} : vector<200x1xf32> to vector<32x1xf32>
    %14 = vector.broadcast %13 : vector<32x1xf32> to vector<32x4096xf32>
    %15 = arith.addf %12, %14 : vector<32x4096xf32>
    %16 = math.tanh %15 : vector<32x4096xf32>
    %17 = vector.extract_strided_slice %1 {offsets = [32, 0], sizes = [64, 32], strides = [1, 1]} : vector<136x32xf32> to vector<64x32xf32>
    %cst_8 = arith.constant dense<0.000000e+00> : vector<64x4096xf32>
    %18 = tpu.matmul %17, %16, %cst_8 {dimension_numbers = #tpu.dot_dimension_numbers<[1], [0], [0], [1], [0, 0, 1, 1], [], []>} : vector<64x32xf32>, vector<32x4096xf32>, vector<64x4096xf32> -> vector<64x4096xf32>
    %19 = vector.extract_strided_slice %2 {offsets = [96, 0], sizes = [64, 1], strides = [1, 1]} : vector<200x1xf32> to vector<64x1xf32>
    %20 = vector.broadcast %19 : vector<64x1xf32> to vector<64x4096xf32>
    %21 = arith.addf %18, %20 : vector<64x4096xf32>
    %22 = vector.extract_strided_slice %21 {offsets = [0, 0], sizes = [32, 4096], strides = [1, 1]} : vector<64x4096xf32> to vector<32x4096xf32>
    %23 = arith.mulf %8, %22 : vector<32x4096xf32>
    %24 = math.tanh %23 : vector<32x4096xf32>
    %25 = vector.extract_strided_slice %1 {offsets = [96, 0], sizes = [32, 32], strides = [1, 1]} : vector<136x32xf32> to vector<32x32xf32>
    %cst_9 = arith.constant dense<0.000000e+00> : vector<32x4096xf32>
    %26 = tpu.matmul %25, %24, %cst_9 {dimension_numbers = #tpu.dot_dimension_numbers<[1], [0], [0], [1], [0, 0, 1, 1], [], []>} : vector<32x32xf32>, vector<32x4096xf32>, vector<32x4096xf32> -> vector<32x4096xf32>
    %27 = vector.extract_strided_slice %2 {offsets = [160, 0], sizes = [32, 1], strides = [1, 1]} : vector<200x1xf32> to vector<32x1xf32>
    %28 = vector.broadcast %27 : vector<32x1xf32> to vector<32x4096xf32>
    %29 = arith.addf %26, %28 : vector<32x4096xf32>
    %30 = vector.extract_strided_slice %21 {offsets = [32, 0], sizes = [32, 4096], strides = [1, 1]} : vector<64x4096xf32> to vector<32x4096xf32>
    %31 = arith.mulf %29, %30 : vector<32x4096xf32>
    %32 = math.tanh %31 : vector<32x4096xf32>
    %33 = vector.extract_strided_slice %1 {offsets = [128, 0], sizes = [1, 32], strides = [1, 1]} : vector<136x32xf32> to vector<1x32xf32>
    %cst_10 = arith.constant dense<0.000000e+00> : vector<1x4096xf32>
    %34 = tpu.matmul %33, %32, %cst_10 {dimension_numbers = #tpu.dot_dimension_numbers<[1], [0], [0], [1], [0, 0, 1, 1], [], []>} : vector<1x32xf32>, vector<32x4096xf32>, vector<1x4096xf32> -> vector<1x4096xf32>
    %35 = vector.extract_strided_slice %2 {offsets = [192, 0], sizes = [1, 1], strides = [1, 1]} : vector<200x1xf32> to vector<1x1xf32>
    %36 = vector.broadcast %35 : vector<1x1xf32> to vector<1x4096xf32>
    %37 = arith.addf %34, %36 : vector<1x4096xf32>
    %c0_11 = arith.constant 0 : index
    %c0_12 = arith.constant 0 : index
    %38 = vector.load %arg5[%c0_11, %c0_12] : memref<1x4096xf32, #tpu.memory_space<vmem>>, vector<1x4096xf32>
    tpu.vector_store %arg5[%c0_11, %c0_12], %37 {strides = array<i32>} : memref<1x4096xf32, #tpu.memory_space<vmem>>, vector<1x4096xf32>,
    return
  }
  func.func @transform_0(%arg0: i32) -> (i32, i32) {
    %c0_i32 = arith.constant 0 : i32
    %c0_i32_0 = arith.constant 0 : i32
    return %c0_i32, %arg0 : i32, i32
  }
  func.func @transform_1(%arg0: i32) -> (i32, i32) {
    %c0_i32 = arith.constant 0 : i32
    %c0_i32_0 = arith.constant 0 : i32
    %c0_i32_1 = arith.constant 0 : i32
    return %c0_i32, %c0_i32_0 : i32, i32
  }
  func.func @transform_2(%arg0: i32) -> (i32, i32) {
    %c0_i32 = arith.constant 0 : i32
    %c0_i32_0 = arith.constant 0 : i32
    %c0_i32_1 = arith.constant 0 : i32
    return %c0_i32, %c0_i32_0 : i32, i32
  }
  func.func @transform_3(%arg0: i32) -> (i32, i32) {
    %c0_i32 = arith.constant 0 : i32
    %c0_i32_0 = arith.constant 0 : i32
    %c0_i32_1 = arith.constant 0 : i32
    return %c0_i32, %c0_i32_0 : i32, i32
  }
  func.func @transform_4(%arg0: i32) -> (i32, i32) {
    %c0_i32 = arith.constant 0 : i32
    %c0_i32_0 = arith.constant 0 : i32
    return %c0_i32, %arg0 : i32, i32
  }
}

</mosaic_0001>

<bundles_post_ra>
// kernel: tpu_custom_call.1
= control target key start
LH: loop header
LB: loop body
LE: loop exit
PB: predicated region body
PF: predicated region fallthrough
CT: control target
= control target key end

     0   :  { %vm181_vm0 = vcmask 1043456   ;;  %v14322_v4 = vmov 0.0   ;;  %vm156_vm1 = vcmask 31744   ;;  %v11033_v7 = vmov 0   ;;  %s14317_s0 = inlined_call_operand.vmem [shape: f32[4,4096], index: 0, kind: input, shape index: {}]   ;;  %s14318_s1 = inlined_call_operand.vmem [shape: f32[64,4], index: 1, kind: input, shape index: {}]   ;;  %s14319_s2 = inlined_call_operand.vmem [shape: f32[136,32], index: 2, kind: input, shape index: {}]   ;;  %s14320_s3 = inlined_call_operand.vmem [shape: f32[200,1], index: 3, kind: input, shape index: {}]   ;;  %s14321_s4 = inlined_call_operand.hbm [shape: f32[1,4096], index: 4, kind: output, shape index: {}]  }
   0x1   :  { %v18_v0 = vld [vmem:[%s14317_s0] sm:$0xff]  ;;  %v19_v1 = vld [vmem:[%s14317_s0 + $0x8] sm:$0xff]  ;;  %310 = vmatprep.mubr.f32.mxu0 %v14322_v4  ;;  %423 = vmatprep.mubr.f32.mxu1 %v14322_v4  ;;  %v20_v6 = vld [vmem:[%s14317_s0 + $0x10] sm:$0xff] }
   0x2   :  { %v140_v2 = vcombine.high %v18_v0, %v18_v0  ;;  %v141_v3 = vcombine.high %v19_v1, %v19_v1  ;;  %v11072_v5 = vld [vmem:[%s14318_s1] sm:$0xff]  ;;  %9949 = vset.pattern.permute.xlu0 %v11033_v7  ;;  %9950 = vset.pattern.permute.xlu1 %v11033_v7  ;;  %v142_v8 = vcombine.high %v20_v6, %v20_v6  ;;  %v21_v9 = vld [vmem:[%s14317_s0 + $0x18] sm:$0xff]  ;;  %v11092_v12 = vld [vmem:[%s14317_s0 + $0x28] sm:$0xff] }
   0x3   :  { %v143_v10 = vcombine.high %v21_v9, %v21_v9  ;;  %v11087_v11 = vld [vmem:[%s14317_s0 + $0x20] sm:$0xff]  ;;  %v11103_v13 = vld [vmem:[%s14318_s1 + $0x8] sm:$0xff]  ;;  %v145_v15 = vcombine.high %v11092_v12, %v11092_v12  ;;  %v57_v17 = vld [vmem:[%s14320_s3 + $0x30] sm:$0xff] }
   0x4   :  { %9001 = vmatprep.subr.msk.mxu0 %vm181_vm0, %v140_v2  ;;  %9011 = vmatprep.subr.msk.mxu1 %vm181_vm0, %v141_v3  ;;  %v144_v14 = vcombine.high %v11087_v11, %v11087_v11  ;;  %v55_v16 = vld [vmem:[%s14320_s3 + $0x20] sm:$0xff]  ;;  %v11128_v18 = vld [vmem:[%s14318_s1 + $0x10] sm:$0xff]  ;;  %v56_v19 = vld [vmem:[%s14320_s3 + $0x28] sm:$0xff] }
   0x5   :  { %9002 = vmatpush1.msk.msra.mxu0 %vm181_vm0, %v18_v0  ;;  %9012 = vmatpush1.msk.msra.mxu1 %vm181_vm0, %v19_v1  ;;  %v58_v20 = vld [vmem:[%s14320_s3 + $0x38] sm:$0xff] }
   0x6   :  { %9003 = vmatmul.mubr.msk.f32.vlgmr.msra.gmra.mrb[0].mxu0 %vm156_vm1, %v11072_v5  ;;  %9013 = vmatmul.mubr.msk.f32.vlgmr.msra.gmra.mrb[0].mxu1 %vm156_vm1, %v11072_v5  ;;  %v11147_v21 = vld [vmem:[%s14318_s1 + $0x18] sm:$0xff] }
   0x7   :  { %316 = vmatprep.mubr.f32.mxu0 %v14322_v4  ;;  %429 = vmatprep.mubr.f32.mxu1 %v14322_v4 }
   0x8   :  { %9021 = vmatprep.subr.msk.mxu0 %vm181_vm0, %v142_v8  ;;  %9031 = vmatprep.subr.msk.mxu1 %vm181_vm0, %v143_v10 }
   0x9   :  { %9022 = vmatpush1.msk.msra.mxu0 %vm181_vm0, %v20_v6  ;;  %9032 = vmatpush1.msk.msra.mxu1 %vm181_vm0, %v21_v9 }
   0xa   :  { %9004 = vmatmul.mubr.msk.f32.gmra.mrb[2].mxu0 %vm156_vm1, %v11103_v13  ;;  %9014 = vmatmul.mubr.msk.f32.gmra.mrb[2].mxu1 %vm156_vm1, %v11103_v13 }
   0xb   :  { %322 = vmatprep.mubr.f32.mxu0 %v14322_v4  ;;  %435 = vmatprep.mubr.f32.mxu1 %v14322_v4 }
   0xc   :  { %9041 = vmatprep.subr.msk.mxu0 %vm181_vm0, %v144_v14  ;;  %9051 = vmatprep.subr.msk.mxu1 %vm181_vm0, %v145_v15 }
   0xd   :  { %106 = vperm.xlu0 %9949, %v55_v16   ;;  %116 = vperm.xlu1 %9950, %v57_v17  }
   0xe   :  { %9005 = vmatmul.mubr.msk.f32.gmra.mrb[4].mxu0 %vm156_vm1, %v11128_v18  ;;  %9015 = vmatmul.mubr.msk.f32.gmra.mrb[4].mxu1 %vm156_vm1, %v11128_v18 }
   0xf   :  { %328 = vmatprep.mubr.f32.mxu0 %v14322_v4  ;;  %441 = vmatprep.mubr.f32.mxu1 %v14322_v4 }
  0x10   :  { %9 = vsyncpa [#allocation3], 0  ;;  %v59_v22 = vld [vmem:[%s14320_s3 + $0x40] sm:$0xff]  ;;  %v60_v23 = vld [vmem:[%s14320_s3 + $0x48] sm:$0xff]  ;;  %vm2202_vm2 = vcmask 261120  }
  0x11   :  { %111 = vperm.xlu0 %9949, %v56_v19   ;;  %121 = vperm.xlu1 %9950, %v58_v20   ;;  %v11164_v24 = vld [vmem:[%s14318_s1 + $0x20] sm:$0xff]  ;;  %v61_v25 = vld [vmem:[%s14320_s3 + $0x50] sm:$0xff]  ;;  %v62_v26 = vld [vmem:[%s14320_s3 + $0x58] sm:$0xff] }
  0x12   :  { %9006 = vmatmul.mubr.msk.f32.gmra.mrb[6].mxu0 %vm156_vm1, %v11147_v21  ;;  %9016 = vmatmul.mubr.msk.f32.gmra.mrb[6].mxu1 %vm156_vm1, %v11147_v21  ;;  %v11181_v27 = vld [vmem:[%s14318_s1 + $0x28] sm:$0xff]  ;;  %v51_v28 = vld [vmem:[%s14320_s3] sm:$0xff]  ;;  %v11198_v30 = vld [vmem:[%s14318_s1 + $0x30] sm:$0xff] }
  0x13   :  { %334 = vmatprep.mubr.f32.mxu0 %v14322_v4  ;;  %447 = vmatprep.mubr.f32.mxu1 %v14322_v4  ;;  %v52_v29 = vld [vmem:[%s14320_s3 + $0x8] sm:$0xff]  ;;  %v63_v31 = vld [vmem:[%s14320_s3 + $0x60] sm:$0xff]  ;;  %v11215_v33 = vld [vmem:[%s14318_s1 + $0x38] sm:$0xff] }
  0x14   :  { %v64_v32 = vld [vmem:[%s14320_s3 + $0x68] sm:$0xff]  ;;  %v53_v34 = vld [vmem:[%s14320_s3 + $0x10] sm:$0xff]  ;;  %v54_v36 = vld [vmem:[%s14320_s3 + $0x18] sm:$0xff] }
  0x15   :  { %2184 = vperm.xlu0 %9949, %v59_v22   ;;  %2189 = vperm.xlu1 %9950, %v60_v23   ;;  %v11227_v35 = vld [vmem:[%s14317_s0 + $0x30] sm:$0xff]  ;;  %v11239_v38 = vld [vmem:[%s14317_s0 + $0x38] sm:$0xff]  ;;  %v67_v42 = vld [vmem:[%s14320_s3 + $0x80] sm:$0xff] }
  0x16   :  { %9007 = vmatmul.mubr.msk.f32.gmra.mrb[8].mxu0 %vm156_vm1, %v11164_v24  ;;  %9017 = vmatmul.mubr.msk.f32.gmra.mrb[8].mxu1 %vm156_vm1, %v11164_v24  ;;  %v146_v37 = vcombine.high %v11227_v35, %v11227_v35  ;;  %v65_v39 = vld [vmem:[%s14320_s3 + $0x70] sm:$0xff]  ;;  %v147_v40 = vcombine.high %v11239_v38, %v11239_v38  ;;  %v66_v41 = vld [vmem:[%s14320_s3 + $0x78] sm:$0xff]  ;;  %v68_v43 = vld [vmem:[%s14320_s3 + $0x88] sm:$0xff] }
  0x17   :  { %340 = vmatprep.mubr.f32.mxu0 %v14322_v4  ;;  %453 = vmatprep.mubr.f32.mxu1 %v14322_v4  ;;  %v71_v44 = vld [vmem:[%s14320_s3 + $0xa0] sm:$0xff]  ;;  %v72_v45 = vld [vmem:[%s14320_s3 + $0xa8] sm:$0xff]  ;;  %v69_v46 = vld [vmem:[%s14320_s3 + $0x90] sm:$0xff] }
  0x18   :  { %v70_v47 = vld [vmem:[%s14320_s3 + $0x98] sm:$0xff]  ;;  %v73_v48 = vld [vmem:[%s14320_s3 + $0xb0] sm:$0xff]  ;;  %v75_v50 = vld [vmem:[%s14320_s3 + $0xc0] sm:$0xff] }
  0x19   :  { %2194 = vperm.xlu0 %9949, %v61_v25   ;;  %2199 = vperm.xlu1 %9950, %v62_v26   ;;  %v74_v49 = vld [vmem:[%s14320_s3 + $0xb8] sm:$0xff]  ;;  %v26_v51 = vld [vmem:[%s14317_s0 + $0x40] sm:$0xff]  ;;  %v27_v52 = vld [vmem:[%s14317_s0 + $0x48] sm:$0xff] }
  0x1a   :  { %9008 = vmatmul.mubr.msk.f32.gmra.mrb[10].mxu0 %vm156_vm1, %v11181_v27  ;;  %9018 = vmatmul.mubr.msk.f32.gmra.mrb[10].mxu1 %vm156_vm1, %v11181_v27  ;;  %v148_v53 = vcombine.high %v26_v51, %v26_v51  ;;  %v149_v54 = vcombine.high %v27_v52, %v27_v52  ;;  %v28_v55 = vld [vmem:[%s14317_s0 + $0x50] sm:$0xff]  ;;  %v29_v56 = vld [vmem:[%s14317_s0 + $0x58] sm:$0xff]  ;;  %v30_v59 = vld [vmem:[%s14317_s0 + $0x60] sm:$0xff] }
  0x1b   :  { %346 = vmatprep.mubr.f32.mxu0 %v14322_v4  ;;  %459 = vmatprep.mubr.f32.mxu1 %v14322_v4  ;;  %v150_v57 = vcombine.high %v28_v55, %v28_v55  ;;  %v151_v58 = vcombine.high %v29_v56, %v29_v56  ;;  %v31_v60 = vld [vmem:[%s14317_s0 + $0x68] sm:$0xff]  ;;  %v152_v61 = vcombine.high %v30_v59, %v30_v59  ;;  %v32_v63 = vld [vmem:[%s14317_s0 + $0x70] sm:$0xff]  ;;  %v33_v0 = vld [vmem:[%s14317_s0 + $0x78] sm:$0xff] }
  0x1c   :  { %v153_v62 = vcombine.high %v31_v60, %v31_v60  ;;  %v154_v1 = vcombine.high %v32_v63, %v32_v63  ;;  %v155_v2 = vcombine.high %v33_v0, %v33_v0 }
  0x1d   :  { %86 = vperm.xlu0 %9949, %v51_v28   ;;  %91 = vperm.xlu1 %9950, %v52_v29  }
  0x1e   :  { %9009 = vmatmul.mubr.msk.f32.gmra.mrb[12].mxu0 %vm156_vm1, %v11198_v30  ;;  %9019 = vmatmul.mubr.msk.f32.gmra.mrb[12].mxu1 %vm156_vm1, %v11198_v30 }
  0x1f   :  { %352 = vmatprep.mubr.f32.mxu0 %v14322_v4  ;;  %465 = vmatprep.mubr.f32.mxu1 %v14322_v4 }
  0x21   :  { %3769 = vperm.xlu0 %9949, %v63_v31   ;;  %3774 = vperm.xlu1 %9950, %v64_v32  }
  0x22   :  { %9010 = vmatmul.mubr.msk.f32.gmra.mrb[14].mxu0 %vm156_vm1, %v11215_v33  ;;  %9020 = vmatmul.mubr.msk.f32.gmra.mrb[14].mxu1 %vm156_vm1, %v11215_v33 }
  0x23   :  { %536 = vmatprep.mubr.f32.mxu0 %v14322_v4  ;;  %649 = vmatprep.mubr.f32.mxu1 %v14322_v4 }
  0x25   :  { %96 = vperm.xlu0 %9949, %v53_v34   ;;  %101 = vperm.xlu1 %9950, %v54_v36  }
  0x26   :  { %9023 = vmatmul.mubr.msk.f32.vlgmr.msra.gmra.mrb[16].mxu0 %vm156_vm1, %v11072_v5  ;;  %9033 = vmatmul.mubr.msk.f32.vlgmr.msra.gmra.mrb[16].mxu1 %vm156_vm1, %v11072_v5 }
  0x27   :  { %542 = vmatprep.mubr.f32.mxu0 %v14322_v4  ;;  %655 = vmatprep.mubr.f32.mxu1 %v14322_v4 }
  0x28   :  { %9042 = vmatpush1.msk.msra.mxu0 %vm181_vm0, %v11087_v11  ;;  %9052 = vmatpush1.msk.msra.mxu1 %vm181_vm0, %v11092_v12 }
  0x29   :  { %3779 = vperm.xlu0 %9949, %v65_v39   ;;  %9061 = vmatprep.subr.msk.mxu0 %vm181_vm0, %v146_v37 }
  0x2a   :  { %9024 = vmatmul.mubr.msk.f32.gmra.mrb[18].mxu0 %vm156_vm1, %v11103_v13  ;;  %9034 = vmatmul.mubr.msk.f32.gmra.mrb[18].mxu1 %vm156_vm1, %v11103_v13 }
  0x2b   :  { %548 = vmatprep.mubr.f32.mxu0 %v14322_v4  ;;  %661 = vmatprep.mubr.f32.mxu1 %v14322_v4 }
  0x2c   :  { %9071 = vmatprep.subr.msk.mxu1 %vm181_vm0, %v147_v40  ;;  %3784 = vperm.xlu1 %9950, %v66_v41  }
  0x2d   :  { %3789 = vperm.xlu0 %9949, %v67_v42  }
  0x2e   :  { %9025 = vmatmul.mubr.msk.f32.gmra.mrb[20].mxu0 %vm156_vm1, %v11128_v18  ;;  %9035 = vmatmul.mubr.msk.f32.gmra.mrb[20].mxu1 %vm156_vm1, %v11128_v18 }
  0x2f   :  { %554 = vmatprep.mubr.f32.mxu0 %v14322_v4  ;;  %667 = vmatprep.mubr.f32.mxu1 %v14322_v4 }
  0x30   :  { %3794 = vperm.xlu1 %9950, %v68_v43  }
  0x31   :  { %5897 = vperm.xlu0 %9949, %v71_v44  }
  0x32   :  { %9026 = vmatmul.mubr.msk.f32.gmra.mrb[22].mxu0 %vm156_vm1, %v11147_v21  ;;  %9036 = vmatmul.mubr.msk.f32.gmra.mrb[22].mxu1 %vm156_vm1, %v11147_v21 }
  0x33   :  { %560 = vmatprep.mubr.f32.mxu0 %v14322_v4  ;;  %673 = vmatprep.mubr.f32.mxu1 %v14322_v4 }
  0x34   :  { %5902 = vperm.xlu1 %9950, %v72_v45  }
  0x35   :  { %3799 = vperm.xlu0 %9949, %v69_v46  }
  0x36   :  { %9027 = vmatmul.mubr.msk.f32.gmra.mrb[24].mxu0 %vm156_vm1, %v11164_v24  ;;  %9037 = vmatmul.mubr.msk.f32.gmra.mrb[24].mxu1 %vm156_vm1, %v11164_v24 }
  0x37   :  { %566 = vmatprep.mubr.f32.mxu0 %v14322_v4  ;;  %679 = vmatprep.mubr.f32.mxu1 %v14322_v4 }
  0x38   :  { %3804 = vperm.xlu1 %9950, %v70_v47  }
  0x39   :  { %5907 = vperm.xlu0 %9949, %v73_v48  }
  0x3a   :  { %9028 = vmatmul.mubr.msk.f32.gmra.mrb[26].mxu0 %vm156_vm1, %v11181_v27  ;;  %9038 = vmatmul.mubr.msk.f32.gmra.mrb[26].mxu1 %vm156_vm1, %v11181_v27 }
  0x3b   :  { %572 = vmatprep.mubr.f32.mxu0 %v14322_v4  ;;  %685 = vmatprep.mubr.f32.mxu1 %v14322_v4 }
  0x3c   :  { %5912 = vperm.xlu1 %9950, %v74_v49  }
  0x3d   :  { %7609 = vperm.xlu0 %9949, %v75_v50  }
  0x3e   :  { %9029 = vmatmul.mubr.msk.f32.gmra.mrb[28].mxu0 %vm156_vm1, %v11198_v30  ;;  %9039 = vmatmul.mubr.msk.f32.gmra.mrb[28].mxu1 %vm156_vm1, %v11198_v30 }
  0x3f   :  { %578 = vmatprep.mubr.f32.mxu0 %v14322_v4  ;;  %691 = vmatprep.mubr.f32.mxu1 %v14322_v4 }
  0x42   :  { %9030 = vmatmul.mubr.msk.f32.gmra.mrb[30].mxu0 %vm156_vm1, %v11215_v33  ;;  %9040 = vmatmul.mubr.msk.f32.gmra.mrb[30].mxu1 %vm156_vm1, %v11215_v33 }
  0x43   :  { %762 = vmatprep.mubr.f32.mxu0 %v14322_v4  ;;  %875 = vmatprep.mubr.f32.mxu1 %v14322_v4 }
  0x46   :  { %9043 = vmatmul.mubr.msk.f32.vlgmr.msra.gmra.mrb[32].mxu0 %vm156_vm1, %v11072_v5  ;;  %9053 = vmatmul.mubr.msk.f32.vlgmr.msra.gmra.mrb[32].mxu1 %vm156_vm1, %v11072_v5 }
  0x47   :  { %768 = vmatprep.mubr.f32.mxu0 %v14322_v4  ;;  %881 = vmatprep.mubr.f32.mxu1 %v14322_v4 }
  0x48   :  { %9062 = vmatpush1.msk.msra.mxu0 %vm181_vm0, %v11227_v35  ;;  %9072 = vmatpush1.msk.msra.mxu1 %vm181_vm0, %v11239_v38 }
  0x49   :  { %9081 = vmatprep.subr.msk.mxu0 %vm181_vm0, %v148_v53  ;;  %9091 = vmatprep.subr.msk.mxu1 %vm181_vm0, %v149_v54 }
  0x4a   :  { %9044 = vmatmul.mubr.msk.f32.gmra.mrb[34].mxu0 %vm156_vm1, %v11103_v13  ;;  %9054 = vmatmul.mubr.msk.f32.gmra.mrb[34].mxu1 %vm156_vm1, %v11103_v13 }
  0x4b   :  { %774 = vmatprep.mubr.f32.mxu0 %v14322_v4  ;;  %887 = vmatprep.mubr.f32.mxu1 %v14322_v4 }
  0x4e   :  { %9045 = vmatmul.mubr.msk.f32.gmra.mrb[36].mxu0 %vm156_vm1, %v11128_v18  ;;  %9055 = vmatmul.mubr.msk.f32.gmra.mrb[36].mxu1 %vm156_vm1, %v11128_v18 }
  0x4f   :  { %780 = vmatprep.mubr.f32.mxu0 %v14322_v4  ;;  %893 = vmatprep.mubr.f32.mxu1 %v14322_v4 }
  0x52   :  { %9046 = vmatmul.mubr.msk.f32.gmra.mrb[38].mxu0 %vm156_vm1, %v11147_v21  ;;  %9056 = vmatmul.mubr.msk.f32.gmra.mrb[38].mxu1 %vm156_vm1, %v11147_v21 }
  0x53   :  { %786 = vmatprep.mubr.f32.mxu0 %v14322_v4  ;;  %899 = vmatprep.mubr.f32.mxu1 %v14322_v4 }
  0x56   :  { %9047 = vmatmul.mubr.msk.f32.gmra.mrb[40].mxu0 %vm156_vm1, %v11164_v24  ;;  %9057 = vmatmul.mubr.msk.f32.gmra.mrb[40].mxu1 %vm156_vm1, %v11164_v24 }
  0x57   :  { %792 = vmatprep.mubr.f32.mxu0 %v14322_v4  ;;  %905 = vmatprep.mubr.f32.mxu1 %v14322_v4 }
  0x5a   :  { %9048 = vmatmul.mubr.msk.f32.gmra.mrb[42].mxu0 %vm156_vm1, %v11181_v27  ;;  %9058 = vmatmul.mubr.msk.f32.gmra.mrb[42].mxu1 %vm156_vm1, %v11181_v27 }
  0x5b   :  { %798 = vmatprep.mubr.f32.mxu0 %v14322_v4  ;;  %911 = vmatprep.mubr.f32.mxu1 %v14322_v4 }
  0x5e   :  { %9049 = vmatmul.mubr.msk.f32.gmra.mrb[44].mxu0 %vm156_vm1, %v11198_v30  ;;  %9059 = vmatmul.mubr.msk.f32.gmra.mrb[44].mxu1 %vm156_vm1, %v11198_v30 }
  0x5f   :  { %804 = vmatprep.mubr.f32.mxu0 %v14322_v4  ;;  %917 = vmatprep.mubr.f32.mxu1 %v14322_v4 }
  0x62   :  { %9050 = vmatmul.mubr.msk.f32.gmra.mrb[46].mxu0 %vm156_vm1, %v11215_v33  ;;  %9060 = vmatmul.mubr.msk.f32.gmra.mrb[46].mxu1 %vm156_vm1, %v11215_v33 }
  0x63   :  { %988 = vmatprep.mubr.f32.mxu0 %v14322_v4  ;;  %1101 = vmatprep.mubr.f32.mxu1 %v14322_v4 }
  0x66   :  { %9063 = vmatmul.mubr.msk.f32.vlgmr.msra.gmra.mrb[48].mxu0 %vm156_vm1, %v11072_v5  ;;  %9073 = vmatmul.mubr.msk.f32.vlgmr.msra.gmra.mrb[48].mxu1 %vm156_vm1, %v11072_v5 }
  0x67   :  { %994 = vmatprep.mubr.f32.mxu0 %v14322_v4  ;;  %1107 = vmatprep.mubr.f32.mxu1 %v14322_v4 }
  0x68   :  { %9082 = vmatpush1.msk.msra.mxu0 %vm181_vm0, %v26_v51  ;;  %9092 = vmatpush1.msk.msra.mxu1 %vm181_vm0, %v27_v52 }
  0x69   :  { %9101 = vmatprep.subr.msk.mxu0 %vm181_vm0, %v150_v57  ;;  %9111 = vmatprep.subr.msk.mxu1 %vm181_vm0, %v151_v58 }
  0x6a   :  { %9064 = vmatmul.mubr.msk.f32.gmra.mrb[50].mxu0 %vm156_vm1, %v11103_v13  ;;  %9074 = vmatmul.mubr.msk.f32.gmra.mrb[50].mxu1 %vm156_vm1, %v11103_v13 }
  0x6b   :  { %1000 = vmatprep.mubr.f32.mxu0 %v14322_v4  ;;  %1113 = vmatprep.mubr.f32.mxu1 %v14322_v4 }
  0x6e   :  { %9065 = vmatmul.mubr.msk.f32.gmra.mrb[52].mxu0 %vm156_vm1, %v11128_v18  ;;  %9075 = vmatmul.mubr.msk.f32.gmra.mrb[52].mxu1 %vm156_vm1, %v11128_v18 }
  0x6f   :  { %1006 = vmatprep.mubr.f32.mxu0 %v14322_v4  ;;  %1119 = vmatprep.mubr.f32.mxu1 %v14322_v4 }
  0x72   :  { %9066 = vmatmul.mubr.msk.f32.gmra.mrb[54].mxu0 %vm156_vm1, %v11147_v21  ;;  %9076 = vmatmul.mubr.msk.f32.gmra.mrb[54].mxu1 %vm156_vm1, %v11147_v21 }
  0x73   :  { %1012 = vmatprep.mubr.f32.mxu0 %v14322_v4  ;;  %1125 = vmatprep.mubr.f32.mxu1 %v14322_v4 }
  0x76   :  { %9067 = vmatmul.mubr.msk.f32.gmra.mrb[56].mxu0 %vm156_vm1, %v11164_v24  ;;  %9077 = vmatmul.mubr.msk.f32.gmra.mrb[56].mxu1 %vm156_vm1, %v11164_v24 }
  0x77   :  { %1018 = vmatprep.mubr.f32.mxu0 %v14322_v4  ;;  %1131 = vmatprep.mubr.f32.mxu1 %v14322_v4 }
  0x7a   :  { %9068 = vmatmul.mubr.msk.f32.gmra.mrb[58].mxu0 %vm156_vm1, %v11181_v27  ;;  %9078 = vmatmul.mubr.msk.f32.gmra.mrb[58].mxu1 %vm156_vm1, %v11181_v27 }
  0x7b   :  { %1024 = vmatprep.mubr.f32.mxu0 %v14322_v4  ;;  %1137 = vmatprep.mubr.f32.mxu1 %v14322_v4 }
  0x7e   :  { %9069 = vmatmul.mubr.msk.f32.gmra.mrb[60].mxu0 %vm156_vm1, %v11198_v30  ;;  %9079 = vmatmul.mubr.msk.f32.gmra.mrb[60].mxu1 %vm156_vm1, %v11198_v30 }
  0x7f   :  { %1030 = vmatprep.mubr.f32.mxu0 %v14322_v4  ;;  %1143 = vmatprep.mubr.f32.mxu1 %v14322_v4 }
  0x82   :  { %9070 = vmatmul.mubr.msk.f32.gmra.mrb[62].mxu0 %vm156_vm1, %v11215_v33  ;;  %9080 = vmatmul.mubr.msk.f32.gmra.mrb[62].mxu1 %vm156_vm1, %v11215_v33 }
  0x83   :  { %1214 = vmatprep.mubr.f32.mxu0 %v14322_v4  ;;  %1327 = vmatprep.mubr.f32.mxu1 %v14322_v4 }
  0x86   :  { %9083 = vmatmul.mubr.msk.f32.vlgmr.msra.gmra.mrb[64].mxu0 %vm156_vm1, %v11072_v5  ;;  %9093 = vmatmul.mubr.msk.f32.vlgmr.msra.gmra.mrb[64].mxu1 %vm156_vm1, %v11072_v5 }
  0x87   :  { %1220 = vmatprep.mubr.f32.mxu0 %v14322_v4  ;;  %1333 = vmatprep.mubr.f32.mxu1 %v14322_v4 }
  0x88   :  { %9102 = vmatpush1.msk.msra.mxu0 %vm181_vm0, %v28_v55  ;;  %9112 = vmatpush1.msk.msra.mxu1 %vm181_vm0, %v29_v56 }
  0x89   :  { %9121 = vmatprep.subr.msk.mxu0 %vm181_vm0, %v152_v61  ;;  %9131 = vmatprep.subr.msk.mxu1 %vm181_vm0, %v153_v62 }
  0x8a   :  { %9084 = vmatmul.mubr.msk.f32.gmra.mrb[66].mxu0 %vm156_vm1, %v11103_v13  ;;  %9094 = vmatmul.mubr.msk.f32.gmra.mrb[66].mxu1 %vm156_vm1, %v11103_v13 }
  0x8b   :  { %1226 = vmatprep.mubr.f32.mxu0 %v14322_v4  ;;  %1339 = vmatprep.mubr.f32.mxu1 %v14322_v4 }
  0x8c   :  { %v11638_v19 = vpop.permute.xlu0 %106  ;;  %v11666_v37 = vpop.permute.xlu1 %116 }
  0x8e   :  { %9085 = vmatmul.mubr.msk.f32.gmra.mrb[68].mxu0 %vm156_vm1, %v11128_v18  ;;  %9095 = vmatmul.mubr.msk.f32.gmra.mrb[68].mxu1 %vm156_vm1, %v11128_v18 }
  0x8f   :  { %1232 = vmatprep.mubr.f32.mxu0 %v14322_v4  ;;  %1345 = vmatprep.mubr.f32.mxu1 %v14322_v4 }
  0x90   :  { %v11664_v36 = vpop.permute.xlu0 %111  ;;  %v11688_v52 = vpop.permute.xlu1 %121 }
  0x92   :  { %9086 = vmatmul.mubr.msk.f32.gmra.mrb[70].mxu0 %vm156_vm1, %v11147_v21  ;;  %9096 = vmatmul.mubr.msk.f32.gmra.mrb[70].mxu1 %vm156_vm1, %v11147_v21 }
  0x93   :  { %1238 = vmatprep.mubr.f32.mxu0 %v14322_v4  ;;  %1351 = vmatprep.mubr.f32.mxu1 %v14322_v4 }
  0x96   :  { %9087 = vmatmul.mubr.msk.f32.gmra.mrb[72].mxu0 %vm156_vm1, %v11164_v24  ;;  %9097 = vmatmul.mubr.msk.f32.gmra.mrb[72].mxu1 %vm156_vm1, %v11164_v24 }
  0x97   :  { %1244 = vmatprep.mubr.f32.mxu0 %v14322_v4  ;;  %1357 = vmatprep.mubr.f32.mxu1 %v14322_v4 }
  0x9a   :  { %9088 = vmatmul.mubr.msk.f32.gmra.mrb[74].mxu0 %vm156_vm1, %v11181_v27  ;;  %9098 = vmatmul.mubr.msk.f32.gmra.mrb[74].mxu1 %vm156_vm1, %v11181_v27 }
  0x9b   :  { %1250 = vmatprep.mubr.f32.mxu0 %v14322_v4  ;;  %1363 = vmatprep.mubr.f32.mxu1 %v14322_v4 }
  0x9e   :  { %9089 = vmatmul.mubr.msk.f32.gmra.mrb[76].mxu0 %vm156_vm1, %v11198_v30  ;;  %9099 = vmatmul.mubr.msk.f32.gmra.mrb[76].mxu1 %vm156_vm1, %v11198_v30 }
  0x9f   :  { %1256 = vmatprep.mubr.f32.mxu0 %v14322_v4  ;;  %1369 = vmatprep.mubr.f32.mxu1 %v14322_v4 }
  0xa2   :  { %9090 = vmatmul.mubr.msk.f32.gmra.mrb[78].mxu0 %vm156_vm1, %v11215_v33  ;;  %9100 = vmatmul.mubr.msk.f32.gmra.mrb[78].mxu1 %vm156_vm1, %v11215_v33 }
  0xa3   :  { %1440 = vmatprep.mubr.f32.mxu0 %v14322_v4  ;;  %1553 = vmatprep.mubr.f32.mxu1 %v14322_v4 }
  0xa6   :  { %9103 = vmatmul.mubr.msk.f32.vlgmr.msra.gmra.mrb[80].mxu0 %vm156_vm1, %v11072_v5  ;;  %9113 = vmatmul.mubr.msk.f32.vlgmr.msra.gmra.mrb[80].mxu1 %vm156_vm1, %v11072_v5 }
  0xa7   :  { %1446 = vmatprep.mubr.f32.mxu0 %v14322_v4  ;;  %1559 = vmatprep.mubr.f32.mxu1 %v14322_v4 }
  0xa8   :  { %9122 = vmatpush1.msk.msra.mxu0 %vm181_vm0, %v30_v59  ;;  %9132 = vmatpush1.msk.msra.mxu1 %vm181_vm0, %v31_v60 }
  0xa9   :  { %9141 = vmatprep.subr.msk.mxu0 %vm181_vm0, %v154_v1  ;;  %9151 = vmatprep.subr.msk.mxu1 %vm181_vm0, %v155_v2 }
  0xaa   :  { %9104 = vmatmul.mubr.msk.f32.gmra.mrb[82].mxu0 %vm156_vm1, %v11103_v13  ;;  %9114 = vmatmul.mubr.msk.f32.gmra.mrb[82].mxu1 %vm156_vm1, %v11103_v13 }
  0xab   :  { %1452 = vmatprep.mubr.f32.mxu0 %v14322_v4  ;;  %1565 = vmatprep.mubr.f32.mxu1 %v14322_v4 }
  0xae   :  { %9105 = vmatmul.mubr.msk.f32.gmra.mrb[84].mxu0 %vm156_vm1, %v11128_v18  ;;  %9115 = vmatmul.mubr.msk.f32.gmra.mrb[84].mxu1 %vm156_vm1, %v11128_v18 }
  0xaf   :  { %1458 = vmatprep.mubr.f32.mxu0 %v14322_v4  ;;  %1571 = vmatprep.mubr.f32.mxu1 %v14322_v4 }
  0xb2   :  { %9106 = vmatmul.mubr.msk.f32.gmra.mrb[86].mxu0 %vm156_vm1, %v11147_v21  ;;  %9116 = vmatmul.mubr.msk.f32.gmra.mrb[86].mxu1 %vm156_vm1, %v11147_v21 }
  0xb3   :  { %1464 = vmatprep.mubr.f32.mxu0 %v14322_v4  ;;  %1577 = vmatprep.mubr.f32.mxu1 %v14322_v4 }
  0xb6   :  { %9107 = vmatmul.mubr.msk.f32.gmra.mrb[88].mxu0 %vm156_vm1, %v11164_v24  ;;  %9117 = vmatmul.mubr.msk.f32.gmra.mrb[88].mxu1 %vm156_vm1, %v11164_v24 }
  0xb7   :  { %1470 = vmatprep.mubr.f32.mxu0 %v14322_v4  ;;  %1583 = vmatprep.mubr.f32.mxu1 %v14322_v4 }
  0xba   :  { %9108 = vmatmul.mubr.msk.f32.gmra.mrb[90].mxu0 %vm156_vm1, %v11181_v27  ;;  %9118 = vmatmul.mubr.msk.f32.gmra.mrb[90].mxu1 %vm156_vm1, %v11181_v27 }
  0xbb   :  { %1476 = vmatprep.mubr.f32.mxu0 %v14322_v4  ;;  %1589 = vmatprep.mubr.f32.mxu1 %v14322_v4 }
  0xbe   :  { %9109 = vmatmul.mubr.msk.f32.gmra.mrb[92].mxu0 %vm156_vm1, %v11198_v30  ;;  %9119 = vmatmul.mubr.msk.f32.gmra.mrb[92].mxu1 %vm156_vm1, %v11198_v30 }
  0xbf   :  { %1482 = vmatprep.mubr.f32.mxu0 %v14322_v4  ;;  %1595 = vmatprep.mubr.f32.mxu1 %v14322_v4 }
  0xc2   :  { %9110 = vmatmul.mubr.msk.f32.gmra.mrb[94].mxu0 %vm156_vm1, %v11215_v33  ;;  %9120 = vmatmul.mubr.msk.f32.gmra.mrb[94].mxu1 %vm156_vm1, %v11215_v33 }
  0xc3   :  { %1666 = vmatprep.mubr.f32.mxu0 %v14322_v4  ;;  %1779 = vmatprep.mubr.f32.mxu1 %v14322_v4 }
  0xc6   :  { %9123 = vmatmul.mubr.msk.f32.vlgmr.msra.gmra.mrb[96].mxu0 %vm156_vm1, %v11072_v5  ;;  %9133 = vmatmul.mubr.msk.f32.vlgmr.msra.gmra.mrb[96].mxu1 %vm156_vm1, %v11072_v5 }
  0xc7   :  { %1672 = vmatprep.mubr.f32.mxu0 %v14322_v4  ;;  %1785 = vmatprep.mubr.f32.mxu1 %v14322_v4 }
  0xc8   :  { %9142 = vmatpush1.msk.msra.mxu0 %vm181_vm0, %v32_v63  ;;  %9152 = vmatpush1.msk.msra.mxu1 %vm181_vm0, %v33_v0 }
  0xca   :  { %9124 = vmatmul.mubr.msk.f32.gmra.mrb[98].mxu0 %vm156_vm1, %v11103_v13  ;;  %9134 = vmatmul.mubr.msk.f32.gmra.mrb[98].mxu1 %vm156_vm1, %v11103_v13 }
  0xcb   :  { %1678 = vmatprep.mubr.f32.mxu0 %v14322_v4  ;;  %1791 = vmatprep.mubr.f32.mxu1 %v14322_v4 }
  0xce   :  { %9125 = vmatmul.mubr.msk.f32.gmra.mrb[100].mxu0 %vm156_vm1, %v11128_v18  ;;  %9135 = vmatmul.mubr.msk.f32.gmra.mrb[100].mxu1 %vm156_vm1, %v11128_v18 }
  0xcf   :  { %1684 = vmatprep.mubr.f32.mxu0 %v14322_v4  ;;  %1797 = vmatprep.mubr.f32.mxu1 %v14322_v4 }
  0xd2   :  { %9126 = vmatmul.mubr.msk.f32.gmra.mrb[102].mxu0 %vm156_vm1, %v11147_v21  ;;  %9136 = vmatmul.mubr.msk.f32.gmra.mrb[102].mxu1 %vm156_vm1, %v11147_v21 }
  0xd3   :  { %1690 = vmatprep.mubr.f32.mxu0 %v14322_v4  ;;  %1803 = vmatprep.mubr.f32.mxu1 %v14322_v4 }
  0xd6   :  { %9127 = vmatmul.mubr.msk.f32.gmra.mrb[104].mxu0 %vm156_vm1, %v11164_v24  ;;  %9137 = vmatmul.mubr.msk.f32.gmra.mrb[104].mxu1 %vm156_vm1, %v11164_v24 }
  0xd7   :  { %1696 = vmatprep.mubr.f32.mxu0 %v14322_v4  ;;  %1809 = vmatprep.mubr.f32.mxu1 %v14322_v4 }
  0xd9   :  { %v11596_v3 = vpop.f32.mrb[0].mxu0  ;;  %v11598_v6 = vpop.f32.mrb[0].mxu1 }
  0xda   :  { %v11600_v7 = vpop.f32.mrb[1].mxu0  ;;  %v11602_v8 = vpop.f32.mrb[1].mxu1  ;;  %9128 = vmatmul.mubr.msk.f32.gmra.mrb[106].mxu0 %vm156_vm1, %v11181_v27  ;;  %9138 = vmatmul.mubr.msk.f32.gmra.mrb[106].mxu1 %vm156_vm1, %v11181_v27 }
  0xdb   :  { %1702 = vmatprep.mubr.f32.mxu0 %v14322_v4  ;;  %1815 = vmatprep.mubr.f32.mxu1 %v14322_v4 }
  0xdd   :  { %v11610_v9 = vpop.f32.mrb[2].mxu0  ;;  %v11612_v10 = vpop.f32.mrb[2].mxu1 }
  0xde   :  { %v11614_v11 = vpop.f32.mrb[3].mxu0  ;;  %v11616_v12 = vpop.f32.mrb[3].mxu1  ;;  %9129 = vmatmul.mubr.msk.f32.gmra.mrb[108].mxu0 %vm156_vm1, %v11198_v30  ;;  %9139 = vmatmul.mubr.msk.f32.gmra.mrb[108].mxu1 %vm156_vm1, %v11198_v30 }
  0xdf   :  { %1708 = vmatprep.mubr.f32.mxu0 %v14322_v4  ;;  %1821 = vmatprep.mubr.f32.mxu1 %v14322_v4 }
  0xe1   :  { %v11624_v14 = vpop.f32.mrb[4].mxu0  ;;  %v11626_v15 = vpop.f32.mrb[4].mxu1 }
  0xe2   :  { %v11628_v16 = vpop.f32.mrb[5].mxu0  ;;  %v11630_v17 = vpop.f32.mrb[5].mxu1  ;;  %9130 = vmatmul.mubr.msk.f32.gmra.mrb[110].mxu0 %vm156_vm1, %v11215_v33  ;;  %9140 = vmatmul.mubr.msk.f32.gmra.mrb[110].mxu1 %vm156_vm1, %v11215_v33 }
  0xe3   :  { %1892 = vmatprep.mubr.f32.mxu0 %v14322_v4  ;;  %2005 = vmatprep.mubr.f32.mxu1 %v14322_v4 }
  0xe5   :  { %v11640_v20 = vpop.f32.mrb[6].mxu0  ;;  %v11642_v22 = vpop.f32.mrb[6].mxu1 }
  0xe6   :  { %v11644_v23 = vpop.f32.mrb[7].mxu0  ;;  %v11646_v25 = vpop.f32.mrb[7].mxu1  ;;  %9143 = vmatmul.mubr.msk.f32.vlgmr.msra.gmra.mrb[112].mxu0 %vm156_vm1, %v11072_v5  ;;  %9153 = vmatmul.mubr.msk.f32.vlgmr.msra.gmra.mrb[112].mxu1 %vm156_vm1, %v11072_v5 }
  0xe7   :  { %1898 = vmatprep.mubr.f32.mxu0 %v14322_v4  ;;  %2011 = vmatprep.mubr.f32.mxu1 %v14322_v4 }
  0xe9   :  { %v336_v26 = vpop.f32.mrb[8].mxu0  ;;  %v449_v28 = vpop.f32.mrb[8].mxu1 }
  0xea   :  { %v337_v29 = vadd.f32 %v336_v26, %v11638_v19  ;;  %v450_v31 = vadd.f32 %v449_v28, %v11638_v19  ;;  %v338_v32 = vpop.f32.mrb[9].mxu0  ;;  %v451_v34 = vpop.f32.mrb[9].mxu1  ;;  %9144 = vmatmul.mubr.msk.f32.gmra.mrb[114].mxu0 %vm156_vm1, %v11103_v13  ;;  %9154 = vmatmul.mubr.msk.f32.gmra.mrb[114].mxu1 %vm156_vm1, %v11103_v13 }
  0xeb   :  { %v339_v5 = vadd.f32 %v338_v32, %v11638_v19  ;;  %v452_v35 = vadd.f32 %v451_v34, %v11638_v19  ;;  %1904 = vmatprep.mubr.f32.mxu0 %v14322_v4  ;;  %2017 = vmatprep.mubr.f32.mxu1 %v14322_v4 }
  0xec   :  { %9967 = vtanh.f32 %v337_v29 }
  0xed   :  { %9969 = vtanh.f32 %v450_v31  ;;  %v342_v38 = vpop.f32.mrb[10].mxu0  ;;  %v455_v39 = vpop.f32.mrb[10].mxu1 }
  0xee   :  { %9971 = vtanh.f32 %v339_v5  ;;  %v343_v40 = vadd.f32 %v342_v38, %v11664_v36  ;;  %v456_v13 = vadd.f32 %v455_v39, %v11664_v36  ;;  %v344_v41 = vpop.f32.mrb[11].mxu0  ;;  %v457_v42 = vpop.f32.mrb[11].mxu1  ;;  %9145 = vmatmul.mubr.msk.f32.gmra.mrb[116].mxu0 %vm156_vm1, %v11128_v18  ;;  %9155 = vmatmul.mubr.msk.f32.gmra.mrb[116].mxu1 %vm156_vm1, %v11128_v18 }
  0xef   :  { %9973 = vtanh.f32 %v452_v35  ;;  %v345_v43 = vadd.f32 %v344_v41, %v11664_v36  ;;  %v458_v44 = vadd.f32 %v457_v42, %v11664_v36  ;;  %1910 = vmatprep.mubr.f32.mxu0 %v14322_v4  ;;  %2023 = vmatprep.mubr.f32.mxu1 %v14322_v4 }
  0xf0   :  { %9975 = vtanh.f32 %v343_v40 }
  0xf1   :  { %9977 = vtanh.f32 %v456_v13  ;;  %v348_v45 = vpop.f32.mrb[12].mxu0  ;;  %v461_v46 = vpop.f32.mrb[12].mxu1 }
  0xf2   :  { %9979 = vtanh.f32 %v345_v43  ;;  %v349_v47 = vadd.f32 %v348_v45, %v11666_v37  ;;  %v462_v48 = vadd.f32 %v461_v46, %v11666_v37  ;;  %v350_v49 = vpop.f32.mrb[13].mxu0  ;;  %v463_v18 = vpop.f32.mrb[13].mxu1  ;;  %9146 = vmatmul.mubr.msk.f32.gmra.mrb[118].mxu0 %vm156_vm1, %v11147_v21  ;;  %9156 = vmatmul.mubr.msk.f32.gmra.mrb[118].mxu1 %vm156_vm1, %v11147_v21 }
  0xf3   :  { %9981 = vtanh.f32 %v458_v44  ;;  %v351_v50 = vadd.f32 %v350_v49, %v11666_v37  ;;  %v464_v51 = vadd.f32 %v463_v18, %v11666_v37  ;;  %1916 = vmatprep.mubr.f32.mxu0 %v14322_v4  ;;  %2029 = vmatprep.mubr.f32.mxu1 %v14322_v4 }
  0xf4   :  { %9983 = vtanh.f32 %v349_v47 }
  0xf5   :  { %9985 = vtanh.f32 %v462_v48  ;;  %v354_v53 = vpop.f32.mrb[14].mxu0  ;;  %v467_v54 = vpop.f32.mrb[14].mxu1 }
  0xf6   :  { %v9968_v55 = vpop.eup %9967  ;;  %9987 = vtanh.f32 %v351_v50  ;;  %v355_v56 = vadd.f32 %v354_v53, %v11688_v52  ;;  %v468_v21 = vadd.f32 %v467_v54, %v11688_v52  ;;  %v356_v57 = vpop.f32.mrb[15].mxu0  ;;  %9147 = vmatmul.mubr.msk.f32.gmra.mrb[120].mxu0 %vm156_vm1, %v11164_v24  ;;  %9157 = vmatmul.mubr.msk.f32.gmra.mrb[120].mxu1 %vm156_vm1, %v11164_v24 }
  0xf7   :  { %v469_v58 = vpop.f32.mrb[15].mxu1  ;;  %v9970_v59 = vpop.eup %9969  ;;  %9989 = vtanh.f32 %v464_v51  ;;  %v357_v60 = vadd.f32 %v356_v57, %v11688_v52  ;;  %1922 = vmatprep.mubr.f32.mxu0 %v14322_v4  ;;  %2035 = vmatprep.mubr.f32.mxu1 %v14322_v4 }
  0xf8   :  { %v470_v61 = vadd.f32 %v469_v58, %v11688_v52  ;;  %v9972_v62 = vpop.eup %9971  ;;  %9991 = vtanh.f32 %v355_v56 }
  0xf9   :  { %v9974_v63 = vpop.eup %9973  ;;  %9993 = vtanh.f32 %v468_v21  ;;  %v11700_v0 = vpop.f32.mrb[16].mxu0 }
  0xfa   :  { %v11702_v1 = vpop.f32.mrb[16].mxu1  ;;  %v9976_v2 = vpop.eup %9975  ;;  %9995 = vtanh.f32 %v357_v60  ;;  %9148 = vmatmul.mubr.msk.f32.gmra.mrb[122].mxu0 %vm156_vm1, %v11181_v27  ;;  %9158 = vmatmul.mubr.msk.f32.gmra.mrb[122].mxu1 %vm156_vm1, %v11181_v27 }
  0xfb   :  { %v11704_v24 = vpop.f32.mrb[17].mxu0  ;;  %v11706_v26 = vpop.f32.mrb[17].mxu1  ;;  %9997 = vtanh.f32 %v470_v61  ;;  %1928 = vmatprep.mubr.f32.mxu0 %v14322_v4  ;;  %2041 = vmatprep.mubr.f32.mxu1 %v14322_v4  ;;  %v9435_v29 = vpack.c.bf16 %v9976_v2, %v9968_v55 }
  0xfc   :  { %v9978_v28 = vpop.eup %9977 }
  0xfd   :  { %v9980_v31 = vpop.eup %9979  ;;  %v9443_v32 = vpack.c.bf16 %v9978_v28, %v9970_v59  ;;  %v11714_v5 = vpop.f32.mrb[18].mxu0 }
  0xfe   :  { %v9982_v34 = vpop.eup %9981  ;;  %v11716_v35 = vpop.f32.mrb[18].mxu1  ;;  %v9433_v38 = vpack.c.bf16 %v9980_v31, %v9972_v62  ;;  %9149 = vmatmul.mubr.msk.f32.gmra.mrb[124].mxu0 %vm156_vm1, %v11198_v30  ;;  %9159 = vmatmul.mubr.msk.f32.gmra.mrb[124].mxu1 %vm156_vm1, %v11198_v30 }
  0xff   :  { %v9984_v39 = vpop.eup %9983  ;;  %v11718_v40 = vpop.f32.mrb[19].mxu0  ;;  %v9441_v27 = vpack.c.bf16 %v9982_v34, %v9974_v63  ;;  %1934 = vmatprep.mubr.f32.mxu0 %v14322_v4  ;;  %2047 = vmatprep.mubr.f32.mxu1 %v14322_v4 }
 0x100   :  { %v11720_v13 = vpop.f32.mrb[19].mxu1  ;;  %v9986_v41 = vpop.eup %9985  ;;  %9434 = vmatprep.subr.bf16.mxu0 %v9433_v38 }
 0x101   :  { %v9988_v42 = vpop.eup %9987  ;;  %9442 = vmatprep.subr.bf16.mxu1 %v9441_v27  ;;  %9436 = vmatpush1.bf16.msra.mxu0 %v9435_v29  ;;  %v11727_v44 = vpop.f32.mrb[20].mxu0  ;;  %v11767_v29 = vld [vmem:[%s14319_s2 + $0x8] sm:$0xff] }
 0x102   :  { %v9990_v43 = vpop.eup %9989  ;;  %9444 = vmatpush1.bf16.msra.mxu1 %v9443_v32  ;;  %v11729_v45 = vpop.f32.mrb[20].mxu1  ;;  %9150 = vmatmul.mubr.msk.f32.gmra.mrb[126].mxu0 %vm156_vm1, %v11215_v33 }
 0x103   :  { %v9992_v46 = vpop.eup %9991  ;;  %v11732_v47 = vpop.f32.mrb[21].mxu0  ;;  %9160 = vmatmul.mubr.msk.f32.gmra.mrb[126].mxu1 %vm156_vm1, %v11215_v33  ;;  %2279 = vmatprep.mubr.f32.mxu0 %v14322_v4  ;;  %v11753_v33 = vld [vmem:[%s14319_s2] sm:$0xff] }
 0x104   :  { %v11734_v30 = vpop.f32.mrb[21].mxu1  ;;  %v9994_v48 = vpop.eup %9993  ;;  %v9439_v49 = vpack.c.bf16 %v9992_v46, %v9984_v39  ;;  %2368 = vmatprep.mubr.f32.mxu1 %v14322_v4 }
 0x105   :  { %v9996_v18 = vpop.eup %9995  ;;  %v9447_v50 = vpack.c.bf16 %v9994_v48, %v9986_v41  ;;  %v11742_v53 = vpop.f32.mrb[22].mxu0 }
 0x106   :  { %v9998_v51 = vpop.eup %9997  ;;  %v11744_v54 = vpop.f32.mrb[22].mxu1  ;;  %v9437_v55 = vpack.c.bf16 %v9996_v18, %v9988_v42 }
 0x107   :  { %14324 = vst [vmem:[#allocation5_spill] sm:$0xff] %v11744_v54  ;;  %v11746_v56 = vpop.f32.mrb[23].mxu0  ;;  %v11748_v21 = vpop.f32.mrb[23].mxu1  ;;  %v9445_v57 = vpack.c.bf16 %v9998_v51, %v9990_v43  ;;  %v11782_v43 = vld [vmem:[%s14319_s2 + $0x10] sm:$0xff] }
 0x108   :  { %14325 = vst [vmem:[#allocation6_spill] sm:$0xff] %v11746_v56  ;;  %14326 = vst [vmem:[#allocation7_spill] sm:$0xff] %v11748_v21  ;;  %9438 = vmatprep.subr.bf16.mxu0 %v9437_v55 }
 0x109   :  { %9446 = vmatprep.subr.bf16.mxu1 %v9445_v57  ;;  %9440 = vmatpush1.bf16.msra.mxu0 %v9439_v49  ;;  %v562_v58 = vpop.f32.mrb[24].mxu0  ;;  %v675_v59 = vpop.f32.mrb[24].mxu1 }
 0x10a   :  { %9448 = vmatpush1.bf16.msra.mxu1 %v9447_v50  ;;  %v563_v60 = vadd.f32 %v562_v58, %v11638_v19  ;;  %v676_v61 = vadd.f32 %v675_v59, %v11638_v19  ;;  %v564_v62 = vpop.f32.mrb[25].mxu0  ;;  %v677_v63 = vpop.f32.mrb[25].mxu1  ;;  %v11797_v58 = vld [vmem:[%s14319_s2 + $0x18] sm:$0xff] }
 0x10b   :  { %v565_v2 = vadd.f32 %v564_v62, %v11638_v19  ;;  %v678_v28 = vadd.f32 %v677_v63, %v11638_v19 }
 0x10c   :  { %9161 = vmatmul.mubr.msk.f32.vlgmr.msra.gmra.mrb[128].mxu0 %vm2202_vm2, %v11753_v33  ;;  %9999 = vtanh.f32 %v563_v60 }
 0x10d   :  { %9165 = vmatmul.mubr.msk.f32.vlgmr.msra.gmra.mrb[128].mxu1 %vm2202_vm2, %v11753_v33  ;;  %2285 = vmatprep.mubr.f32.mxu0 %v14322_v4  ;;  %10001 = vtanh.f32 %v676_v61  ;;  %v568_v31 = vpop.f32.mrb[26].mxu0  ;;  %v681_v32 = vpop.f32.mrb[26].mxu1 }
 0x10e   :  { %2374 = vmatprep.mubr.f32.mxu1 %v14322_v4  ;;  %10003 = vtanh.f32 %v565_v2  ;;  %v569_v34 = vadd.f32 %v568_v31, %v11664_v36  ;;  %v682_v38 = vadd.f32 %v681_v32, %v11664_v36  ;;  %v570_v39 = vpop.f32.mrb[27].mxu0  ;;  %v683_v27 = vpop.f32.mrb[27].mxu1 }
 0x10f   :  { %10005 = vtanh.f32 %v678_v28  ;;  %v571_v41 = vadd.f32 %v570_v39, %v11664_v36  ;;  %v684_v42 = vadd.f32 %v683_v27, %v11664_v36 }
 0x110   :  { %9162 = vmatmul.mubr.msk.f32.gmra.mrb[130].mxu0 %vm2202_vm2, %v11767_v29  ;;  %10007 = vtanh.f32 %v569_v34 }
 0x111   :  { %9166 = vmatmul.mubr.msk.f32.gmra.mrb[130].mxu1 %vm2202_vm2, %v11767_v29  ;;  %2291 = vmatprep.mubr.f32.mxu0 %v14322_v4  ;;  %10009 = vtanh.f32 %v682_v38  ;;  %v574_v46 = vpop.f32.mrb[28].mxu0  ;;  %v687_v48 = vpop.f32.mrb[28].mxu1 }
 0x112   :  { %2380 = vmatprep.mubr.f32.mxu1 %v14322_v4  ;;  %10011 = vtanh.f32 %v571_v41  ;;  %v575_v49 = vadd.f32 %v574_v46, %v11666_v37  ;;  %v688_v18 = vadd.f32 %v687_v48, %v11666_v37  ;;  %v576_v50 = vpop.f32.mrb[29].mxu0  ;;  %v689_v51 = vpop.f32.mrb[29].mxu1 }
 0x113   :  { %10013 = vtanh.f32 %v684_v42  ;;  %v577_v55 = vadd.f32 %v576_v50, %v11666_v37  ;;  %v690_v57 = vadd.f32 %v689_v51, %v11666_v37 }
 0x114   :  { %9163 = vmatmul.mubr.msk.f32.gmra.mrb[132].mxu0 %vm2202_vm2, %v11782_v43  ;;  %10015 = vtanh.f32 %v575_v49 }
 0x115   :  { %9167 = vmatmul.mubr.msk.f32.gmra.mrb[132].mxu1 %vm2202_vm2, %v11782_v43  ;;  %2297 = vmatprep.mubr.f32.mxu0 %v14322_v4  ;;  %10017 = vtanh.f32 %v688_v18  ;;  %v580_v59 = vpop.f32.mrb[30].mxu0  ;;  %v693_v60 = vpop.f32.mrb[30].mxu1 }
 0x116   :  { %2386 = vmatprep.mubr.f32.mxu1 %v14322_v4  ;;  %v10000_v61 = vpop.eup %9999  ;;  %10019 = vtanh.f32 %v577_v55  ;;  %v581_v62 = vadd.f32 %v580_v59, %v11688_v52  ;;  %v694_v63 = vadd.f32 %v693_v60, %v11688_v52  ;;  %v582_v2 = vpop.f32.mrb[31].mxu0 }
 0x117   :  { %v695_v28 = vpop.f32.mrb[31].mxu1  ;;  %v10002_v31 = vpop.eup %10001  ;;  %10021 = vtanh.f32 %v690_v57  ;;  %v583_v32 = vadd.f32 %v582_v2, %v11688_v52 }
 0x118   :  { %v696_v34 = vadd.f32 %v695_v28, %v11688_v52  ;;  %9164 = vmatmul.mubr.msk.f32.gmra.mrb[134].mxu0 %vm2202_vm2, %v11797_v58  ;;  %v10004_v38 = vpop.eup %10003  ;;  %10023 = vtanh.f32 %v581_v62 }
 0x119   :  { %9168 = vmatmul.mubr.msk.f32.gmra.mrb[134].mxu1 %vm2202_vm2, %v11797_v58  ;;  %2457 = vmatprep.mubr.f32.mxu0 %v14322_v4  ;;  %v10006_v39 = vpop.eup %10005  ;;  %10025 = vtanh.f32 %v694_v63  ;;  %v11809_v27 = vpop.f32.mrb[32].mxu0 }
 0x11a   :  { %14327 = vst [vmem:[#allocation8_spill] sm:$0xff] %v11809_v27  ;;  %v11811_v41 = vpop.f32.mrb[32].mxu1  ;;  %2546 = vmatprep.mubr.f32.mxu1 %v14322_v4  ;;  %v10008_v42 = vpop.eup %10007  ;;  %10027 = vtanh.f32 %v583_v32 }
 0x11b   :  { %14328 = vst [vmem:[#allocation9_spill] sm:$0xff] %v11811_v41  ;;  %v11814_v46 = vpop.f32.mrb[33].mxu0  ;;  %v11816_v48 = vpop.f32.mrb[33].mxu1  ;;  %10029 = vtanh.f32 %v696_v34  ;;  %v9451_v18 = vpack.c.bf16 %v10008_v42, %v10000_v61 }
 0x11c   :  { %14329 = vst [vmem:[#allocation10_spill] sm:$0xff] %v11814_v46  ;;  %14330 = vst [vmem:[#allocation11_spill] sm:$0xff] %v11816_v48  ;;  %v10010_v49 = vpop.eup %10009 }
 0x11d   :  { %v10012_v50 = vpop.eup %10011  ;;  %v9459_v51 = vpack.c.bf16 %v10010_v49, %v10002_v31  ;;  %v11818_v57 = vpop.f32.mrb[34].mxu0 }
 0x11e   :  { %v10014_v55 = vpop.eup %10013  ;;  %14331 = vst [vmem:[#allocation12_spill] sm:$0xff] %v11818_v57  ;;  %v11820_v59 = vpop.f32.mrb[34].mxu1  ;;  %v9449_v60 = vpack.c.bf16 %v10012_v50, %v10004_v38 }
 0x11f   :  { %14332 = vst [vmem:[#allocation13_spill] sm:$0xff] %v11820_v59  ;;  %v10016_v62 = vpop.eup %10015  ;;  %v11822_v63 = vpop.f32.mrb[35].mxu0  ;;  %v9457_v28 = vpack.c.bf16 %v10014_v55, %v10006_v39 }
 0x120   :  { %14333 = vst [vmem:[#allocation14_spill] sm:$0xff] %v11822_v63  ;;  %v11824_v2 = vpop.f32.mrb[35].mxu1  ;;  %v10018_v32 = vpop.eup %10017  ;;  %9450 = vmatprep.subr.bf16.mxu0 %v9449_v60 }
 0x121   :  { %14334 = vst [vmem:[#allocation15_spill] sm:$0xff] %v11824_v2  ;;  %v10020_v4 = vpop.eup %10019  ;;  %9458 = vmatprep.subr.bf16.mxu1 %v9457_v28  ;;  %9452 = vmatpush1.bf16.msra.mxu0 %v9451_v18  ;;  %v11826_v31 = vpop.f32.mrb[36].mxu0 }
 0x122   :  { %v10022_v61 = vpop.eup %10021  ;;  %9460 = vmatpush1.bf16.msra.mxu1 %v9459_v51  ;;  %14335 = vst [vmem:[#allocation16_spill] sm:$0xff] %v11826_v31  ;;  %v11828_v34 = vpop.f32.mrb[36].mxu1 }
 0x123   :  { %14336 = vst [vmem:[#allocation17_spill] sm:$0xff] %v11828_v34  ;;  %v10024_v42 = vpop.eup %10023  ;;  %v11830_v49 = vpop.f32.mrb[37].mxu0 }
 0x124   :  { %14337 = vst [vmem:[#allocation18_spill] sm:$0xff] %v11830_v49  ;;  %v11832_v38 = vpop.f32.mrb[37].mxu1  ;;  %v10026_v50 = vpop.eup %10025  ;;  %v9455_v63 = vpack.c.bf16 %v10024_v42, %v10016_v62 }
 0x125   :  { %14338 = vst [vmem:[#allocation19_spill] sm:$0xff] %v11832_v38  ;;  %v10028_v2 = vpop.eup %10027  ;;  %v9463_v39 = vpack.c.bf16 %v10026_v50, %v10018_v32  ;;  %v11834_v60 = vpop.f32.mrb[38].mxu0 }
 0x126   :  { %v10030_v55 = vpop.eup %10029  ;;  %14339 = vst [vmem:[#allocation20_spill] sm:$0xff] %v11834_v60  ;;  %v11836_v28 = vpop.f32.mrb[38].mxu1  ;;  %v9453_v18 = vpack.c.bf16 %v10028_v2, %v10020_v4 }
 0x127   :  { %14340 = vst [vmem:[#allocation21_spill] sm:$0xff] %v11836_v28  ;;  %v11838_v51 = vpop.f32.mrb[39].mxu0  ;;  %v11840_v31 = vpop.f32.mrb[39].mxu1  ;;  %v9461_v34 = vpack.c.bf16 %v10030_v55, %v10022_v61 }
 0x128   :  { %14341 = vst [vmem:[#allocation22_spill] sm:$0xff] %v11838_v51  ;;  %14342 = vst [vmem:[#allocation23_spill] sm:$0xff] %v11840_v31  ;;  %9454 = vmatprep.subr.bf16.mxu0 %v9453_v18 }
 0x129   :  { %9462 = vmatprep.subr.bf16.mxu1 %v9461_v34  ;;  %9456 = vmatpush1.bf16.msra.mxu0 %v9455_v63  ;;  %v788_v38 = vpop.f32.mrb[40].mxu0  ;;  %v901_v49 = vpop.f32.mrb[40].mxu1  ;;  %v14343_v63 = vmov 0.0  }
 0x12a   :  { %9464 = vmatpush1.bf16.msra.mxu1 %v9463_v39  ;;  %v789_v62 = vadd.f32 %v788_v38, %v11638_v19  ;;  %v902_v32 = vadd.f32 %v901_v49, %v11638_v19  ;;  %v790_v42 = vpop.f32.mrb[41].mxu0  ;;  %v903_v50 = vpop.f32.mrb[41].mxu1 }
 0x12b   :  { %v791_v28 = vadd.f32 %v790_v42, %v11638_v19  ;;  %v904_v4 = vadd.f32 %v903_v50, %v11638_v19 }
 0x12c   :  { %9169 = vmatmul.mubr.msk.f32.vlgmr.msra.gmra.mrb[136].mxu0 %vm2202_vm2, %v11753_v33  ;;  %10031 = vtanh.f32 %v789_v62 }
 0x12d   :  { %9173 = vmatmul.mubr.msk.f32.vlgmr.msra.gmra.mrb[136].mxu1 %vm2202_vm2, %v11753_v33  ;;  %2463 = vmatprep.mubr.f32.mxu0 %v14343_v63  ;;  %10033 = vtanh.f32 %v902_v32  ;;  %v794_v2 = vpop.f32.mrb[42].mxu0  ;;  %v907_v61 = vpop.f32.mrb[42].mxu1 }
 0x12e   :  { %2552 = vmatprep.mubr.f32.mxu1 %v14343_v63  ;;  %10035 = vtanh.f32 %v791_v28  ;;  %v795_v34 = vadd.f32 %v794_v2, %v11664_v36  ;;  %v908_v49 = vadd.f32 %v907_v61, %v11664_v36  ;;  %v796_v38 = vpop.f32.mrb[43].mxu0  ;;  %v909_v39 = vpop.f32.mrb[43].mxu1 }
 0x12f   :  { %10037 = vtanh.f32 %v904_v4  ;;  %v797_v55 = vadd.f32 %v796_v38, %v11664_v36  ;;  %v910_v18 = vadd.f32 %v909_v39, %v11664_v36 }
 0x130   :  { %9170 = vmatmul.mubr.msk.f32.gmra.mrb[138].mxu0 %vm2202_vm2, %v11767_v29  ;;  %10039 = vtanh.f32 %v795_v34 }
 0x131   :  { %9174 = vmatmul.mubr.msk.f32.gmra.mrb[138].mxu1 %vm2202_vm2, %v11767_v29  ;;  %2469 = vmatprep.mubr.f32.mxu0 %v14343_v63  ;;  %10041 = vtanh.f32 %v908_v49  ;;  %v800_v28 = vpop.f32.mrb[44].mxu0  ;;  %v913_v62 = vpop.f32.mrb[44].mxu1 }
 0x132   :  { %2558 = vmatprep.mubr.f32.mxu1 %v14343_v63  ;;  %10043 = vtanh.f32 %v797_v55  ;;  %v801_v32 = vadd.f32 %v800_v28, %v11666_v37  ;;  %v914_v42 = vadd.f32 %v913_v62, %v11666_v37  ;;  %v802_v50 = vpop.f32.mrb[45].mxu0  ;;  %v915_v4 = vpop.f32.mrb[45].mxu1 }
 0x133   :  { %10045 = vtanh.f32 %v910_v18  ;;  %v803_v2 = vadd.f32 %v802_v50, %v11666_v37  ;;  %v916_v61 = vadd.f32 %v915_v4, %v11666_v37 }
 0x134   :  { %9171 = vmatmul.mubr.msk.f32.gmra.mrb[140].mxu0 %vm2202_vm2, %v11782_v43  ;;  %10047 = vtanh.f32 %v801_v32 }
 0x135   :  { %9175 = vmatmul.mubr.msk.f32.gmra.mrb[140].mxu1 %vm2202_vm2, %v11782_v43  ;;  %2475 = vmatprep.mubr.f32.mxu0 %v14343_v63  ;;  %10049 = vtanh.f32 %v914_v42  ;;  %v806_v34 = vpop.f32.mrb[46].mxu0  ;;  %v919_v49 = vpop.f32.mrb[46].mxu1 }
 0x136   :  { %2564 = vmatprep.mubr.f32.mxu1 %v14343_v63  ;;  %v10032_v38 = vpop.eup %10031  ;;  %10051 = vtanh.f32 %v803_v2  ;;  %v807_v39 = vadd.f32 %v806_v34, %v11688_v52  ;;  %v920_v55 = vadd.f32 %v919_v49, %v11688_v52  ;;  %v808_v18 = vpop.f32.mrb[47].mxu0 }
 0x137   :  { %v921_v28 = vpop.f32.mrb[47].mxu1  ;;  %v10034_v62 = vpop.eup %10033  ;;  %10053 = vtanh.f32 %v916_v61  ;;  %v809_v32 = vadd.f32 %v808_v18, %v11688_v52 }
 0x138   :  { %v922_v50 = vadd.f32 %v921_v28, %v11688_v52  ;;  %9172 = vmatmul.mubr.msk.f32.gmra.mrb[142].mxu0 %vm2202_vm2, %v11797_v58  ;;  %v10036_v42 = vpop.eup %10035  ;;  %10055 = vtanh.f32 %v807_v39 }
 0x139   :  { %9176 = vmatmul.mubr.msk.f32.gmra.mrb[142].mxu1 %vm2202_vm2, %v11797_v58  ;;  %2635 = vmatprep.mubr.f32.mxu0 %v14343_v63  ;;  %v10038_v4 = vpop.eup %10037  ;;  %10057 = vtanh.f32 %v920_v55  ;;  %v11881_v2 = vpop.f32.mrb[48].mxu0 }
 0x13a   :  { %14344 = vst [vmem:[#allocation24_spill] sm:$0xff] %v11881_v2  ;;  %v11883_v34 = vpop.f32.mrb[48].mxu1  ;;  %2724 = vmatprep.mubr.f32.mxu1 %v14343_v63  ;;  %v10040_v61 = vpop.eup %10039  ;;  %10059 = vtanh.f32 %v809_v32 }
 0x13b   :  { %14345 = vst [vmem:[#allocation25_spill] sm:$0xff] %v11883_v34  ;;  %v11886_v49 = vpop.f32.mrb[49].mxu0  ;;  %v11888_v18 = vpop.f32.mrb[49].mxu1  ;;  %10061 = vtanh.f32 %v922_v50  ;;  %v9467_v28 = vpack.c.bf16 %v10040_v61, %v10032_v38 }
 0x13c   :  { %14346 = vst [vmem:[#allocation26_spill] sm:$0xff] %v11886_v49  ;;  %14347 = vst [vmem:[#allocation27_spill] sm:$0xff] %v11888_v18  ;;  %v10042_v39 = vpop.eup %10041 }
 0x13d   :  { %v10044_v31 = vpop.eup %10043  ;;  %v9475_v51 = vpack.c.bf16 %v10042_v39, %v10034_v62  ;;  %v11890_v59 = vpop.f32.mrb[50].mxu0 }
 0x13e   :  { %v10046_v60 = vpop.eup %10045  ;;  %14348 = vst [vmem:[#allocation28_spill] sm:$0xff] %v11890_v59  ;;  %v11892_v55 = vpop.f32.mrb[50].mxu1  ;;  %v9465_v2 = vpack.c.bf16 %v10044_v31, %v10036_v42 }
 0x13f   :  { %14349 = vst [vmem:[#allocation29_spill] sm:$0xff] %v11892_v55  ;;  %v10048_v34 = vpop.eup %10047  ;;  %v11894_v57 = vpop.f32.mrb[51].mxu0  ;;  %v9473_v32 = vpack.c.bf16 %v10046_v60, %v10038_v4 }
 0x140   :  { %14350 = vst [vmem:[#allocation30_spill] sm:$0xff] %v11894_v57  ;;  %v11896_v48 = vpop.f32.mrb[51].mxu1  ;;  %v10050_v49 = vpop.eup %10049  ;;  %9466 = vmatprep.subr.bf16.mxu0 %v9465_v2 }
 0x141   :  { %14351 = vst [vmem:[#allocation31_spill] sm:$0xff] %v11896_v48  ;;  %v10052_v18 = vpop.eup %10051  ;;  %9474 = vmatprep.subr.bf16.mxu1 %v9473_v32  ;;  %9468 = vmatpush1.bf16.msra.mxu0 %v9467_v28  ;;  %v11898_v62 = vpop.f32.mrb[52].mxu0 }
 0x142   :  { %v10054_v38 = vpop.eup %10053  ;;  %9476 = vmatpush1.bf16.msra.mxu1 %v9475_v51  ;;  %14352 = vst [vmem:[#allocation32_spill] sm:$0xff] %v11898_v62  ;;  %v11900_v50 = vpop.f32.mrb[52].mxu1 }
 0x143   :  { %14353 = vst [vmem:[#allocation33_spill] sm:$0xff] %v11900_v50  ;;  %v10056_v61 = vpop.eup %10055  ;;  %v11902_v39 = vpop.f32.mrb[53].mxu0 }
 0x144   :  { %14354 = vst [vmem:[#allocation34_spill] sm:$0xff] %v11902_v39  ;;  %v11904_v31 = vpop.f32.mrb[53].mxu1  ;;  %v10058_v42 = vpop.eup %10057  ;;  %v9471_v57 = vpack.c.bf16 %v10056_v61, %v10048_v34 }
 0x145   :  { %14355 = vst [vmem:[#allocation35_spill] sm:$0xff] %v11904_v31  ;;  %v10060_v48 = vpop.eup %10059  ;;  %v9479_v60 = vpack.c.bf16 %v10058_v42, %v10050_v49  ;;  %v11906_v2 = vpop.f32.mrb[54].mxu0 }
 0x146   :  { %v10062_v4 = vpop.eup %10061  ;;  %14356 = vst [vmem:[#allocation36_spill] sm:$0xff] %v11906_v2  ;;  %v11908_v32 = vpop.f32.mrb[54].mxu1  ;;  %v9469_v28 = vpack.c.bf16 %v10060_v48, %v10052_v18 }
 0x147   :  { %14357 = vst [vmem:[#allocation37_spill] sm:$0xff] %v11908_v32  ;;  %v11910_v51 = vpop.f32.mrb[55].mxu0  ;;  %v11912_v62 = vpop.f32.mrb[55].mxu1  ;;  %v9477_v50 = vpack.c.bf16 %v10062_v4, %v10054_v38 }
 0x148   :  { %14358 = vst [vmem:[#allocation38_spill] sm:$0xff] %v11910_v51  ;;  %14359 = vst [vmem:[#allocation39_spill] sm:$0xff] %v11912_v62  ;;  %9470 = vmatprep.subr.bf16.mxu0 %v9469_v28 }
 0x149   :  { %9478 = vmatprep.subr.bf16.mxu1 %v9477_v50  ;;  %9472 = vmatpush1.bf16.msra.mxu0 %v9471_v57  ;;  %v1014_v31 = vpop.f32.mrb[56].mxu0  ;;  %v1127_v39 = vpop.f32.mrb[56].mxu1 }
 0x14a   :  { %9480 = vmatpush1.bf16.msra.mxu1 %v9479_v60  ;;  %v1015_v34 = vadd.f32 %v1014_v31, %v11638_v19  ;;  %v1128_v49 = vadd.f32 %v1127_v39, %v11638_v19  ;;  %v1016_v61 = vpop.f32.mrb[57].mxu0  ;;  %v1129_v42 = vpop.f32.mrb[57].mxu1 }
 0x14b   :  { %v1017_v32 = vadd.f32 %v1016_v61, %v11638_v19  ;;  %v1130_v48 = vadd.f32 %v1129_v42, %v11638_v19 }
 0x14c   :  { %9177 = vmatmul.mubr.msk.f32.vlgmr.msra.gmra.mrb[144].mxu0 %vm2202_vm2, %v11753_v33  ;;  %10063 = vtanh.f32 %v1015_v34 }
 0x14d   :  { %9181 = vmatmul.mubr.msk.f32.vlgmr.msra.gmra.mrb[144].mxu1 %vm2202_vm2, %v11753_v33  ;;  %2641 = vmatprep.mubr.f32.mxu0 %v14343_v63  ;;  %10065 = vtanh.f32 %v1128_v49  ;;  %v1020_v57 = vpop.f32.mrb[58].mxu0  ;;  %v1133_v18 = vpop.f32.mrb[58].mxu1 }
 0x14e   :  { %2730 = vmatprep.mubr.f32.mxu1 %v14343_v63  ;;  %10067 = vtanh.f32 %v1017_v32  ;;  %v1021_v38 = vadd.f32 %v1020_v57, %v11664_v36  ;;  %v1134_v50 = vadd.f32 %v1133_v18, %v11664_v36  ;;  %v1022_v39 = vpop.f32.mrb[59].mxu0  ;;  %v1135_v31 = vpop.f32.mrb[59].mxu1 }
 0x14f   :  { %10069 = vtanh.f32 %v1130_v48  ;;  %v1023_v60 = vadd.f32 %v1022_v39, %v11664_v36  ;;  %v1136_v4 = vadd.f32 %v1135_v31, %v11664_v36 }
 0x150   :  { %9178 = vmatmul.mubr.msk.f32.gmra.mrb[146].mxu0 %vm2202_vm2, %v11767_v29  ;;  %10071 = vtanh.f32 %v1021_v38 }
 0x151   :  { %9182 = vmatmul.mubr.msk.f32.gmra.mrb[146].mxu1 %vm2202_vm2, %v11767_v29  ;;  %2647 = vmatprep.mubr.f32.mxu0 %v14343_v63  ;;  %10073 = vtanh.f32 %v1134_v50  ;;  %v1026_v32 = vpop.f32.mrb[60].mxu0  ;;  %v1139_v28 = vpop.f32.mrb[60].mxu1 }
 0x152   :  { %2736 = vmatprep.mubr.f32.mxu1 %v14343_v63  ;;  %10075 = vtanh.f32 %v1023_v60  ;;  %v1027_v34 = vadd.f32 %v1026_v32, %v11666_v37  ;;  %v1140_v49 = vadd.f32 %v1139_v28, %v11666_v37  ;;  %v1028_v61 = vpop.f32.mrb[61].mxu0  ;;  %v1141_v42 = vpop.f32.mrb[61].mxu1 }
 0x153   :  { %10077 = vtanh.f32 %v1136_v4  ;;  %v1029_v48 = vadd.f32 %v1028_v61, %v11666_v37  ;;  %v1142_v57 = vadd.f32 %v1141_v42, %v11666_v37 }
 0x154   :  { %9179 = vmatmul.mubr.msk.f32.gmra.mrb[148].mxu0 %vm2202_vm2, %v11782_v43  ;;  %10079 = vtanh.f32 %v1027_v34 }
 0x155   :  { %9183 = vmatmul.mubr.msk.f32.gmra.mrb[148].mxu1 %vm2202_vm2, %v11782_v43  ;;  %2653 = vmatprep.mubr.f32.mxu0 %v14343_v63  ;;  %10081 = vtanh.f32 %v1140_v49  ;;  %v1032_v18 = vpop.f32.mrb[62].mxu0  ;;  %v1145_v38 = vpop.f32.mrb[62].mxu1 }
 0x156   :  { %2742 = vmatprep.mubr.f32.mxu1 %v14343_v63  ;;  %v10064_v50 = vpop.eup %10063  ;;  %10083 = vtanh.f32 %v1029_v48  ;;  %v1033_v39 = vadd.f32 %v1032_v18, %v11688_v52  ;;  %v1146_v31 = vadd.f32 %v1145_v38, %v11688_v52  ;;  %v1034_v60 = vpop.f32.mrb[63].mxu0 }
 0x157   :  { %v1147_v4 = vpop.f32.mrb[63].mxu1  ;;  %v10066_v32 = vpop.eup %10065  ;;  %10085 = vtanh.f32 %v1142_v57  ;;  %v1035_v28 = vadd.f32 %v1034_v60, %v11688_v52 }
 0x158   :  { %v1148_v34 = vadd.f32 %v1147_v4, %v11688_v52  ;;  %9180 = vmatmul.mubr.msk.f32.gmra.mrb[150].mxu0 %vm2202_vm2, %v11797_v58  ;;  %v10068_v49 = vpop.eup %10067  ;;  %10087 = vtanh.f32 %v1033_v39 }
 0x159   :  { %9184 = vmatmul.mubr.msk.f32.gmra.mrb[150].mxu1 %vm2202_vm2, %v11797_v58  ;;  %2813 = vmatprep.mubr.f32.mxu0 %v14343_v63  ;;  %v10070_v61 = vpop.eup %10069  ;;  %10089 = vtanh.f32 %v1146_v31  ;;  %v11953_v42 = vpop.f32.mrb[64].mxu0 }
 0x15a   :  { %14360 = vst [vmem:[#allocation40_spill] sm:$0xff] %v11953_v42  ;;  %v11955_v48 = vpop.f32.mrb[64].mxu1  ;;  %2902 = vmatprep.mubr.f32.mxu1 %v14343_v63  ;;  %v10072_v57 = vpop.eup %10071  ;;  %10091 = vtanh.f32 %v1035_v28 }
 0x15b   :  { %14361 = vst [vmem:[#allocation41_spill] sm:$0xff] %v11955_v48  ;;  %v11958_v18 = vpop.f32.mrb[65].mxu0  ;;  %v11960_v38 = vpop.f32.mrb[65].mxu1  ;;  %10093 = vtanh.f32 %v1148_v34  ;;  %v9483_v60 = vpack.c.bf16 %v10072_v57, %v10064_v50 }
 0x15c   :  { %14362 = vst [vmem:[#allocation42_spill] sm:$0xff] %v11958_v18  ;;  %14363 = vst [vmem:[#allocation43_spill] sm:$0xff] %v11960_v38  ;;  %v10074_v39 = vpop.eup %10073 }
 0x15d   :  { %v10076_v4 = vpop.eup %10075  ;;  %v9491_v62 = vpack.c.bf16 %v10074_v39, %v10066_v32  ;;  %v11962_v2 = vpop.f32.mrb[66].mxu0 }
 0x15e   :  { %v10078_v51 = vpop.eup %10077  ;;  %14364 = vst [vmem:[#allocation44_spill] sm:$0xff] %v11962_v2  ;;  %v11964_v31 = vpop.f32.mrb[66].mxu1  ;;  %v9481_v42 = vpack.c.bf16 %v10076_v4, %v10068_v49 }
 0x15f   :  { %14365 = vst [vmem:[#allocation45_spill] sm:$0xff] %v11964_v31  ;;  %v10080_v48 = vpop.eup %10079  ;;  %v11966_v55 = vpop.f32.mrb[67].mxu0  ;;  %v9489_v28 = vpack.c.bf16 %v10078_v51, %v10070_v61 }
 0x160   :  { %14366 = vst [vmem:[#allocation46_spill] sm:$0xff] %v11966_v55  ;;  %v11968_v59 = vpop.f32.mrb[67].mxu1  ;;  %v10082_v18 = vpop.eup %10081  ;;  %9482 = vmatprep.subr.bf16.mxu0 %v9481_v42 }
 0x161   :  { %14367 = vst [vmem:[#allocation47_spill] sm:$0xff] %v11968_v59  ;;  %v10084_v38 = vpop.eup %10083  ;;  %9490 = vmatprep.subr.bf16.mxu1 %v9489_v28  ;;  %9484 = vmatpush1.bf16.msra.mxu0 %v9483_v60  ;;  %v11970_v32 = vpop.f32.mrb[68].mxu0 }
 0x162   :  { %v10086_v50 = vpop.eup %10085  ;;  %9492 = vmatpush1.bf16.msra.mxu1 %v9491_v62  ;;  %14368 = vst [vmem:[#allocation48_spill] sm:$0xff] %v11970_v32  ;;  %v11972_v34 = vpop.f32.mrb[68].mxu1 }
 0x163   :  { %14369 = vst [vmem:[#allocation49_spill] sm:$0xff] %v11972_v34  ;;  %v10088_v57 = vpop.eup %10087  ;;  %v11974_v39 = vpop.f32.mrb[69].mxu0 }
 0x164   :  { %14370 = vst [vmem:[#allocation50_spill] sm:$0xff] %v11974_v39  ;;  %v11976_v49 = vpop.f32.mrb[69].mxu1  ;;  %v10090_v4 = vpop.eup %10089  ;;  %v9487_v55 = vpack.c.bf16 %v10088_v57, %v10080_v48 }
 0x165   :  { %14371 = vst [vmem:[#allocation51_spill] sm:$0xff] %v11976_v49  ;;  %v10092_v59 = vpop.eup %10091  ;;  %v9495_v51 = vpack.c.bf16 %v10090_v4, %v10082_v18  ;;  %v11978_v42 = vpop.f32.mrb[70].mxu0 }
 0x166   :  { %v10094_v61 = vpop.eup %10093  ;;  %14372 = vst [vmem:[#allocation52_spill] sm:$0xff] %v11978_v42  ;;  %v11980_v28 = vpop.f32.mrb[70].mxu1  ;;  %v9485_v60 = vpack.c.bf16 %v10092_v59, %v10084_v38 }
 0x167   :  { %14373 = vst [vmem:[#allocation53_spill] sm:$0xff] %v11980_v28  ;;  %v11982_v62 = vpop.f32.mrb[71].mxu0  ;;  %v11984_v32 = vpop.f32.mrb[71].mxu1  ;;  %v9493_v34 = vpack.c.bf16 %v10094_v61, %v10086_v50 }
 0x168   :  { %14374 = vst [vmem:[#allocation54_spill] sm:$0xff] %v11982_v62  ;;  %14375 = vst [vmem:[#allocation55_spill] sm:$0xff] %v11984_v32  ;;  %9486 = vmatprep.subr.bf16.mxu0 %v9485_v60 }
 0x169   :  { %9494 = vmatprep.subr.bf16.mxu1 %v9493_v34  ;;  %9488 = vmatpush1.bf16.msra.mxu0 %v9487_v55  ;;  %v1240_v49 = vpop.f32.mrb[72].mxu0  ;;  %v1353_v39 = vpop.f32.mrb[72].mxu1 }
 0x16a   :  { %9496 = vmatpush1.bf16.msra.mxu1 %v9495_v51  ;;  %v1241_v48 = vadd.f32 %v1240_v49, %v11638_v19  ;;  %v1354_v18 = vadd.f32 %v1353_v39, %v11638_v19  ;;  %v1242_v57 = vpop.f32.mrb[73].mxu0  ;;  %v1355_v4 = vpop.f32.mrb[73].mxu1 }
 0x16b   :  { %v1243_v28 = vadd.f32 %v1242_v57, %v11638_v19  ;;  %v1356_v59 = vadd.f32 %v1355_v4, %v11638_v19 }
 0x16c   :  { %9185 = vmatmul.mubr.msk.f32.vlgmr.msra.gmra.mrb[152].mxu0 %vm2202_vm2, %v11753_v33  ;;  %10095 = vtanh.f32 %v1241_v48 }
 0x16d   :  { %9189 = vmatmul.mubr.msk.f32.vlgmr.msra.gmra.mrb[152].mxu1 %vm2202_vm2, %v11753_v33  ;;  %2819 = vmatprep.mubr.f32.mxu0 %v14343_v63  ;;  %10097 = vtanh.f32 %v1354_v18  ;;  %v1246_v55 = vpop.f32.mrb[74].mxu0  ;;  %v1359_v38 = vpop.f32.mrb[74].mxu1 }
 0x16e   :  { %2908 = vmatprep.mubr.f32.mxu1 %v14343_v63  ;;  %10099 = vtanh.f32 %v1243_v28  ;;  %v1247_v50 = vadd.f32 %v1246_v55, %v11664_v36  ;;  %v1360_v34 = vadd.f32 %v1359_v38, %v11664_v36  ;;  %v1248_v39 = vpop.f32.mrb[75].mxu0  ;;  %v1361_v49 = vpop.f32.mrb[75].mxu1 }
 0x16f   :  { %10101 = vtanh.f32 %v1356_v59  ;;  %v1249_v51 = vadd.f32 %v1248_v39, %v11664_v36  ;;  %v1362_v61 = vadd.f32 %v1361_v49, %v11664_v36 }
 0x170   :  { %9186 = vmatmul.mubr.msk.f32.gmra.mrb[154].mxu0 %vm2202_vm2, %v11767_v29  ;;  %10103 = vtanh.f32 %v1247_v50 }
 0x171   :  { %9190 = vmatmul.mubr.msk.f32.gmra.mrb[154].mxu1 %vm2202_vm2, %v11767_v29  ;;  %2825 = vmatprep.mubr.f32.mxu0 %v14343_v63  ;;  %10105 = vtanh.f32 %v1360_v34  ;;  %v1252_v28 = vpop.f32.mrb[76].mxu0  ;;  %v1365_v60 = vpop.f32.mrb[76].mxu1 }
 0x172   :  { %2914 = vmatprep.mubr.f32.mxu1 %v14343_v63  ;;  %10107 = vtanh.f32 %v1249_v51  ;;  %v1253_v48 = vadd.f32 %v1252_v28, %v11666_v37  ;;  %v1366_v18 = vadd.f32 %v1365_v60, %v11666_v37  ;;  %v1254_v57 = vpop.f32.mrb[77].mxu0  ;;  %v1367_v4 = vpop.f32.mrb[77].mxu1 }
 0x173   :  { %10109 = vtanh.f32 %v1362_v61  ;;  %v1255_v59 = vadd.f32 %v1254_v57, %v11666_v37  ;;  %v1368_v55 = vadd.f32 %v1367_v4, %v11666_v37 }
 0x174   :  { %9187 = vmatmul.mubr.msk.f32.gmra.mrb[156].mxu0 %vm2202_vm2, %v11782_v43  ;;  %10111 = vtanh.f32 %v1253_v48 }
 0x175   :  { %9191 = vmatmul.mubr.msk.f32.gmra.mrb[156].mxu1 %vm2202_vm2, %v11782_v43  ;;  %2831 = vmatprep.mubr.f32.mxu0 %v14343_v63  ;;  %10113 = vtanh.f32 %v1366_v18  ;;  %v1258_v38 = vpop.f32.mrb[78].mxu0  ;;  %v1371_v50 = vpop.f32.mrb[78].mxu1 }
 0x176   :  { %2920 = vmatprep.mubr.f32.mxu1 %v14343_v63  ;;  %v10096_v34 = vpop.eup %10095  ;;  %10115 = vtanh.f32 %v1255_v59  ;;  %v1259_v39 = vadd.f32 %v1258_v38, %v11688_v52  ;;  %v1372_v49 = vadd.f32 %v1371_v50, %v11688_v52  ;;  %v1260_v51 = vpop.f32.mrb[79].mxu0 }
 0x177   :  { %v1373_v61 = vpop.f32.mrb[79].mxu1  ;;  %v10098_v28 = vpop.eup %10097  ;;  %10117 = vtanh.f32 %v1368_v55  ;;  %v1261_v60 = vadd.f32 %v1260_v51, %v11688_v52 }
 0x178   :  { %v1374_v48 = vadd.f32 %v1373_v61, %v11688_v52  ;;  %9188 = vmatmul.mubr.msk.f32.gmra.mrb[158].mxu0 %vm2202_vm2, %v11797_v58  ;;  %v10100_v18 = vpop.eup %10099  ;;  %10119 = vtanh.f32 %v1259_v39 }
 0x179   :  { %9192 = vmatmul.mubr.msk.f32.gmra.mrb[158].mxu1 %vm2202_vm2, %v11797_v58  ;;  %2991 = vmatprep.mubr.f32.mxu0 %v14343_v63  ;;  %v10102_v57 = vpop.eup %10101  ;;  %10121 = vtanh.f32 %v1372_v49  ;;  %v12025_v4 = vpop.f32.mrb[80].mxu0 }
 0x17a   :  { %14376 = vst [vmem:[#allocation56_spill] sm:$0xff] %v12025_v4  ;;  %v12027_v59 = vpop.f32.mrb[80].mxu1  ;;  %3080 = vmatprep.mubr.f32.mxu1 %v14343_v63  ;;  %v10104_v55 = vpop.eup %10103  ;;  %10123 = vtanh.f32 %v1261_v60 }
 0x17b   :  { %14377 = vst [vmem:[#allocation57_spill] sm:$0xff] %v12027_v59  ;;  %v12030_v38 = vpop.f32.mrb[81].mxu0  ;;  %v12032_v50 = vpop.f32.mrb[81].mxu1  ;;  %10125 = vtanh.f32 %v1374_v48  ;;  %v9499_v51 = vpack.c.bf16 %v10104_v55, %v10096_v34 }
 0x17c   :  { %14378 = vst [vmem:[#allocation58_spill] sm:$0xff] %v12030_v38  ;;  %14379 = vst [vmem:[#allocation59_spill] sm:$0xff] %v12032_v50  ;;  %v10106_v39 = vpop.eup %10105 }
 0x17d   :  { %v10108_v61 = vpop.eup %10107  ;;  %v9507_v32 = vpack.c.bf16 %v10106_v39, %v10098_v28  ;;  %v12034_v42 = vpop.f32.mrb[82].mxu0 }
 0x17e   :  { %v10110_v62 = vpop.eup %10109  ;;  %14380 = vst [vmem:[#allocation60_spill] sm:$0xff] %v12034_v42  ;;  %v12036_v49 = vpop.f32.mrb[82].mxu1  ;;  %v9497_v4 = vpack.c.bf16 %v10108_v61, %v10100_v18 }
 0x17f   :  { %14381 = vst [vmem:[#allocation61_spill] sm:$0xff] %v12036_v49  ;;  %v10112_v59 = vpop.eup %10111  ;;  %v12038_v31 = vpop.f32.mrb[83].mxu0  ;;  %v9505_v60 = vpack.c.bf16 %v10110_v62, %v10102_v57 }
 0x180   :  { %14382 = vst [vmem:[#allocation62_spill] sm:$0xff] %v12038_v31  ;;  %v12040_v2 = vpop.f32.mrb[83].mxu1  ;;  %v10114_v38 = vpop.eup %10113  ;;  %9498 = vmatprep.subr.bf16.mxu0 %v9497_v4 }
 0x181   :  { %14383 = vst [vmem:[#allocation63_spill] sm:$0xff] %v12040_v2  ;;  %v10116_v50 = vpop.eup %10115  ;;  %9506 = vmatprep.subr.bf16.mxu1 %v9505_v60  ;;  %9500 = vmatpush1.bf16.msra.mxu0 %v9499_v51  ;;  %v12042_v28 = vpop.f32.mrb[84].mxu0 }
 0x182   :  { %v10118_v34 = vpop.eup %10117  ;;  %9508 = vmatpush1.bf16.msra.mxu1 %v9507_v32  ;;  %14384 = vst [vmem:[#allocation64_spill] sm:$0xff] %v12042_v28  ;;  %v12044_v48 = vpop.f32.mrb[84].mxu1 }
 0x183   :  { %14385 = vst [vmem:[#allocation65_spill] sm:$0xff] %v12044_v48  ;;  %v10120_v55 = vpop.eup %10119  ;;  %v12046_v39 = vpop.f32.mrb[85].mxu0 }
 0x184   :  { %14386 = vst [vmem:[#allocation66_spill] sm:$0xff] %v12046_v39  ;;  %v12048_v18 = vpop.f32.mrb[85].mxu1  ;;  %v10122_v61 = vpop.eup %10121  ;;  %v9503_v31 = vpack.c.bf16 %v10120_v55, %v10112_v59 }
 0x185   :  { %14387 = vst [vmem:[#allocation67_spill] sm:$0xff] %v12048_v18  ;;  %v10124_v2 = vpop.eup %10123  ;;  %v9511_v62 = vpack.c.bf16 %v10122_v61, %v10114_v38  ;;  %v12050_v4 = vpop.f32.mrb[86].mxu0 }
 0x186   :  { %v10126_v57 = vpop.eup %10125  ;;  %14388 = vst [vmem:[#allocation68_spill] sm:$0xff] %v12050_v4  ;;  %v12052_v60 = vpop.f32.mrb[86].mxu1  ;;  %v9501_v51 = vpack.c.bf16 %v10124_v2, %v10116_v50 }
 0x187   :  { %14389 = vst [vmem:[#allocation69_spill] sm:$0xff] %v12052_v60  ;;  %v12054_v32 = vpop.f32.mrb[87].mxu0  ;;  %v12056_v28 = vpop.f32.mrb[87].mxu1  ;;  %v9509_v48 = vpack.c.bf16 %v10126_v57, %v10118_v34 }
 0x188   :  { %14390 = vst [vmem:[#allocation70_spill] sm:$0xff] %v12054_v32  ;;  %14391 = vst [vmem:[#allocation71_spill] sm:$0xff] %v12056_v28  ;;  %9502 = vmatprep.subr.bf16.mxu0 %v9501_v51 }
 0x189   :  { %9510 = vmatprep.subr.bf16.mxu1 %v9509_v48  ;;  %9504 = vmatpush1.bf16.msra.mxu0 %v9503_v31  ;;  %v1466_v18 = vpop.f32.mrb[88].mxu0  ;;  %v1579_v39 = vpop.f32.mrb[88].mxu1 }
 0x18a   :  { %9512 = vmatpush1.bf16.msra.mxu1 %v9511_v62  ;;  %v1467_v59 = vadd.f32 %v1466_v18, %v11638_v19  ;;  %v1580_v38 = vadd.f32 %v1579_v39, %v11638_v19  ;;  %v1468_v55 = vpop.f32.mrb[89].mxu0  ;;  %v1581_v61 = vpop.f32.mrb[89].mxu1 }
 0x18b   :  { %v1469_v60 = vadd.f32 %v1468_v55, %v11638_v19  ;;  %v1582_v2 = vadd.f32 %v1581_v61, %v11638_v19 }
 0x18c   :  { %9193 = vmatmul.mubr.msk.f32.vlgmr.msra.gmra.mrb[160].mxu0 %vm2202_vm2, %v11753_v33  ;;  %10127 = vtanh.f32 %v1467_v59 }
 0x18d   :  { %9197 = vmatmul.mubr.msk.f32.vlgmr.msra.gmra.mrb[160].mxu1 %vm2202_vm2, %v11753_v33  ;;  %2997 = vmatprep.mubr.f32.mxu0 %v14343_v63  ;;  %10129 = vtanh.f32 %v1580_v38  ;;  %v1472_v31 = vpop.f32.mrb[90].mxu0  ;;  %v1585_v50 = vpop.f32.mrb[90].mxu1 }
 0x18e   :  { %3086 = vmatprep.mubr.f32.mxu1 %v14343_v63  ;;  %10131 = vtanh.f32 %v1469_v60  ;;  %v1473_v34 = vadd.f32 %v1472_v31, %v11664_v36  ;;  %v1586_v48 = vadd.f32 %v1585_v50, %v11664_v36  ;;  %v1474_v39 = vpop.f32.mrb[91].mxu0  ;;  %v1587_v18 = vpop.f32.mrb[91].mxu1 }
 0x18f   :  { %10133 = vtanh.f32 %v1582_v2  ;;  %v1475_v62 = vadd.f32 %v1474_v39, %v11664_v36  ;;  %v1588_v57 = vadd.f32 %v1587_v18, %v11664_v36 }
 0x190   :  { %9194 = vmatmul.mubr.msk.f32.gmra.mrb[162].mxu0 %vm2202_vm2, %v11767_v29  ;;  %10135 = vtanh.f32 %v1473_v34 }
 0x191   :  { %9198 = vmatmul.mubr.msk.f32.gmra.mrb[162].mxu1 %vm2202_vm2, %v11767_v29  ;;  %3003 = vmatprep.mubr.f32.mxu0 %v14343_v63  ;;  %10137 = vtanh.f32 %v1586_v48  ;;  %v1478_v33 = vpop.f32.mrb[92].mxu0  ;;  %v1591_v60 = vpop.f32.mrb[92].mxu1 }
 0x192   :  { %3092 = vmatprep.mubr.f32.mxu1 %v14343_v63  ;;  %10139 = vtanh.f32 %v1475_v62  ;;  %v1479_v51 = vadd.f32 %v1478_v33, %v11666_v37  ;;  %v1592_v59 = vadd.f32 %v1591_v60, %v11666_v37  ;;  %v1480_v38 = vpop.f32.mrb[93].mxu0  ;;  %v1593_v55 = vpop.f32.mrb[93].mxu1 }
 0x193   :  { %10141 = vtanh.f32 %v1588_v57  ;;  %v1481_v61 = vadd.f32 %v1480_v38, %v11666_v37  ;;  %v1594_v2 = vadd.f32 %v1593_v55, %v11666_v37 }
 0x194   :  { %9195 = vmatmul.mubr.msk.f32.gmra.mrb[164].mxu0 %vm2202_vm2, %v11782_v43  ;;  %10143 = vtanh.f32 %v1479_v51 }
 0x195   :  { %9199 = vmatmul.mubr.msk.f32.gmra.mrb[164].mxu1 %vm2202_vm2, %v11782_v43  ;;  %3009 = vmatprep.mubr.f32.mxu0 %v14343_v63  ;;  %10145 = vtanh.f32 %v1592_v59  ;;  %v1484_v29 = vpop.f32.mrb[94].mxu0  ;;  %v1597_v31 = vpop.f32.mrb[94].mxu1 }
 0x196   :  { %3098 = vmatprep.mubr.f32.mxu1 %v14343_v63  ;;  %v10128_v50 = vpop.eup %10127  ;;  %10147 = vtanh.f32 %v1481_v61  ;;  %v1485_v34 = vadd.f32 %v1484_v29, %v11688_v52  ;;  %v1598_v48 = vadd.f32 %v1597_v31, %v11688_v52  ;;  %v1486_v39 = vpop.f32.mrb[95].mxu0 }
 0x197   :  { %v1599_v18 = vpop.f32.mrb[95].mxu1  ;;  %v10130_v62 = vpop.eup %10129  ;;  %10149 = vtanh.f32 %v1594_v2  ;;  %v1487_v57 = vadd.f32 %v1486_v39, %v11688_v52 }
 0x198   :  { %v1600_v43 = vadd.f32 %v1599_v18, %v11688_v52  ;;  %9196 = vmatmul.mubr.msk.f32.gmra.mrb[166].mxu0 %vm2202_vm2, %v11797_v58  ;;  %v10132_v33 = vpop.eup %10131  ;;  %10151 = vtanh.f32 %v1485_v34 }
 0x199   :  { %9200 = vmatmul.mubr.msk.f32.gmra.mrb[166].mxu1 %vm2202_vm2, %v11797_v58  ;;  %3169 = vmatprep.mubr.f32.mxu0 %v14343_v63  ;;  %v10134_v60 = vpop.eup %10133  ;;  %10153 = vtanh.f32 %v1598_v48  ;;  %v12097_v51 = vpop.f32.mrb[96].mxu0 }
 0x19a   :  { %14392 = vst [vmem:[#allocation72_spill] sm:$0xff] %v12097_v51  ;;  %v12099_v59 = vpop.f32.mrb[96].mxu1  ;;  %3258 = vmatprep.mubr.f32.mxu1 %v14343_v63  ;;  %v10136_v38 = vpop.eup %10135  ;;  %10155 = vtanh.f32 %v1487_v57 }
 0x19b   :  { %14393 = vst [vmem:[#allocation73_spill] sm:$0xff] %v12099_v59  ;;  %v12102_v55 = vpop.f32.mrb[97].mxu0  ;;  %v12104_v61 = vpop.f32.mrb[97].mxu1  ;;  %10157 = vtanh.f32 %v1600_v43  ;;  %v9515_v29 = vpack.c.bf16 %v10136_v38, %v10128_v50 }
 0x19c   :  { %14394 = vst [vmem:[#allocation74_spill] sm:$0xff] %v12102_v55  ;;  %14395 = vst [vmem:[#allocation75_spill] sm:$0xff] %v12104_v61  ;;  %v10138_v2 = vpop.eup %10137 }
 0x19d   :  { %v10140_v58 = vpop.eup %10139  ;;  %v9523_v31 = vpack.c.bf16 %v10138_v2, %v10130_v62  ;;  %v12106_v39 = vpop.f32.mrb[98].mxu0 }
 0x19e   :  { %v10142_v34 = vpop.eup %10141  ;;  %14396 = vst [vmem:[#allocation76_spill] sm:$0xff] %v12106_v39  ;;  %v12108_v48 = vpop.f32.mrb[98].mxu1  ;;  %v9513_v18 = vpack.c.bf16 %v10140_v58, %v10132_v33 }
 0x19f   :  { %14397 = vst [vmem:[#allocation77_spill] sm:$0xff] %v12108_v48  ;;  %v10144_v59 = vpop.eup %10143  ;;  %v12110_v51 = vpop.f32.mrb[99].mxu0  ;;  %v9521_v57 = vpack.c.bf16 %v10142_v34, %v10134_v60 }
 0x1a0   :  { %14398 = vst [vmem:[#allocation78_spill] sm:$0xff] %v12110_v51  ;;  %v12112_v28 = vpop.f32.mrb[99].mxu1  ;;  %v10146_v55 = vpop.eup %10145  ;;  %9514 = vmatprep.subr.bf16.mxu0 %v9513_v18 }
 0x1a1   :  { %14399 = vst [vmem:[#allocation79_spill] sm:$0xff] %v12112_v28  ;;  %v10148_v61 = vpop.eup %10147  ;;  %9522 = vmatprep.subr.bf16.mxu1 %v9521_v57  ;;  %9516 = vmatpush1.bf16.msra.mxu0 %v9515_v29  ;;  %v12114_v62 = vpop.f32.mrb[100].mxu0 }
 0x1a2   :  { %v10150_v50 = vpop.eup %10149  ;;  %9524 = vmatpush1.bf16.msra.mxu1 %v9523_v31  ;;  %14400 = vst [vmem:[#allocation80_spill] sm:$0xff] %v12114_v62  ;;  %v12116_v43 = vpop.f32.mrb[100].mxu1 }
 0x1a3   :  { %14401 = vst [vmem:[#allocation81_spill] sm:$0xff] %v12116_v43  ;;  %v10152_v38 = vpop.eup %10151  ;;  %v12118_v2 = vpop.f32.mrb[101].mxu0 }
 0x1a4   :  { %14402 = vst [vmem:[#allocation82_spill] sm:$0xff] %v12118_v2  ;;  %v12120_v33 = vpop.f32.mrb[101].mxu1  ;;  %v10154_v58 = vpop.eup %10153  ;;  %v9519_v51 = vpack.c.bf16 %v10152_v38, %v10144_v59 }
 0x1a5   :  { %14403 = vst [vmem:[#allocation83_spill] sm:$0xff] %v12120_v33  ;;  %v10156_v28 = vpop.eup %10155  ;;  %v9527_v60 = vpack.c.bf16 %v10154_v58, %v10146_v55  ;;  %v12122_v18 = vpop.f32.mrb[102].mxu0 }
 0x1a6   :  { %v10158_v34 = vpop.eup %10157  ;;  %14404 = vst [vmem:[#allocation84_spill] sm:$0xff] %v12122_v18  ;;  %v12124_v57 = vpop.f32.mrb[102].mxu1  ;;  %v9517_v29 = vpack.c.bf16 %v10156_v28, %v10148_v61  ;;  %v12137_v61 = vld [vmem:[%s14319_s2] sm:$0xff] }
 0x1a7   :  { %14405 = vst [vmem:[#allocation85_spill] sm:$0xff] %v12124_v57  ;;  %v12126_v31 = vpop.f32.mrb[103].mxu0  ;;  %v12128_v62 = vpop.f32.mrb[103].mxu1  ;;  %v9525_v43 = vpack.c.bf16 %v10158_v34, %v10150_v50 }
 0x1a8   :  { %14406 = vst [vmem:[#allocation86_spill] sm:$0xff] %v12126_v31  ;;  %14407 = vst [vmem:[#allocation87_spill] sm:$0xff] %v12128_v62  ;;  %9518 = vmatprep.subr.bf16.mxu0 %v9517_v29 }
 0x1a9   :  { %9526 = vmatprep.subr.bf16.mxu1 %v9525_v43  ;;  %9520 = vmatpush1.bf16.msra.mxu0 %v9519_v51  ;;  %v1692_v33 = vpop.f32.mrb[104].mxu0  ;;  %v1805_v2 = vpop.f32.mrb[104].mxu1 }
 0x1aa   :  { %9528 = vmatpush1.bf16.msra.mxu1 %v9527_v60  ;;  %v1693_v59 = vadd.f32 %v1692_v33, %v11638_v19  ;;  %v1806_v55 = vadd.f32 %v1805_v2, %v11638_v19  ;;  %v1694_v38 = vpop.f32.mrb[105].mxu0  ;;  %v1807_v58 = vpop.f32.mrb[105].mxu1 }
 0x1ab   :  { %v1695_v57 = vadd.f32 %v1694_v38, %v11638_v19  ;;  %v1808_v28 = vadd.f32 %v1807_v58, %v11638_v19 }
 0x1ac   :  { %9201 = vmatmul.mubr.msk.f32.vlgmr.msra.gmra.mrb[168].mxu0 %vm2202_vm2, %v12137_v61  ;;  %10159 = vtanh.f32 %v1693_v59  ;;  %v12152_v59 = vld [vmem:[%s14319_s2 + $0x8] sm:$0xff] }
 0x1ad   :  { %9205 = vmatmul.mubr.msk.f32.vlgmr.msra.gmra.mrb[168].mxu1 %vm2202_vm2, %v12137_v61  ;;  %3175 = vmatprep.mubr.f32.mxu0 %v14343_v63  ;;  %10161 = vtanh.f32 %v1806_v55  ;;  %v1698_v51 = vpop.f32.mrb[106].mxu0  ;;  %v1811_v50 = vpop.f32.mrb[106].mxu1 }
 0x1ae   :  { %3264 = vmatprep.mubr.f32.mxu1 %v14343_v63  ;;  %10163 = vtanh.f32 %v1695_v57  ;;  %v1699_v43 = vadd.f32 %v1698_v51, %v11664_v36  ;;  %v1812_v2 = vadd.f32 %v1811_v50, %v11664_v36  ;;  %v1700_v33 = vpop.f32.mrb[107].mxu0  ;;  %v1813_v60 = vpop.f32.mrb[107].mxu1 }
 0x1af   :  { %10165 = vtanh.f32 %v1808_v28  ;;  %v1701_v34 = vadd.f32 %v1700_v33, %v11664_v36  ;;  %v1814_v29 = vadd.f32 %v1813_v60, %v11664_v36 }
 0x1b0   :  { %9202 = vmatmul.mubr.msk.f32.gmra.mrb[170].mxu0 %vm2202_vm2, %v12152_v59  ;;  %10167 = vtanh.f32 %v1699_v43 }
 0x1b1   :  { %9206 = vmatmul.mubr.msk.f32.gmra.mrb[170].mxu1 %vm2202_vm2, %v12152_v59  ;;  %3181 = vmatprep.mubr.f32.mxu0 %v14343_v63  ;;  %10169 = vtanh.f32 %v1812_v2  ;;  %v1704_v57 = vpop.f32.mrb[108].mxu0  ;;  %v1817_v55 = vpop.f32.mrb[108].mxu1  ;;  %v12167_v2 = vld [vmem:[%s14319_s2 + $0x10] sm:$0xff] }
 0x1b2   :  { %3270 = vmatprep.mubr.f32.mxu1 %v14343_v63  ;;  %10171 = vtanh.f32 %v1701_v34  ;;  %v1705_v38 = vadd.f32 %v1704_v57, %v11666_v37  ;;  %v1818_v58 = vadd.f32 %v1817_v55, %v11666_v37  ;;  %v1706_v28 = vpop.f32.mrb[109].mxu0  ;;  %v1819_v51 = vpop.f32.mrb[109].mxu1 }
 0x1b3   :  { %10173 = vtanh.f32 %v1814_v29  ;;  %v1707_v50 = vadd.f32 %v1706_v28, %v11666_v37  ;;  %v1820_v43 = vadd.f32 %v1819_v51, %v11666_v37 }
 0x1b4   :  { %9203 = vmatmul.mubr.msk.f32.gmra.mrb[172].mxu0 %vm2202_vm2, %v12167_v2  ;;  %10175 = vtanh.f32 %v1705_v38 }
 0x1b5   :  { %9207 = vmatmul.mubr.msk.f32.gmra.mrb[172].mxu1 %vm2202_vm2, %v12167_v2  ;;  %3187 = vmatprep.mubr.f32.mxu0 %v14343_v63  ;;  %10177 = vtanh.f32 %v1818_v58  ;;  %v1710_v33 = vpop.f32.mrb[110].mxu0  ;;  %v1823_v60 = vpop.f32.mrb[110].mxu1  ;;  %v12182_v58 = vld [vmem:[%s14319_s2 + $0x18] sm:$0xff] }
 0x1b6   :  { %3276 = vmatprep.mubr.f32.mxu1 %v14343_v63  ;;  %v10160_v34 = vpop.eup %10159  ;;  %10179 = vtanh.f32 %v1707_v50  ;;  %v1711_v29 = vadd.f32 %v1710_v33, %v11688_v52  ;;  %v1824_v57 = vadd.f32 %v1823_v60, %v11688_v52  ;;  %v1712_v55 = vpop.f32.mrb[111].mxu0 }
 0x1b7   :  { %v1825_v28 = vpop.f32.mrb[111].mxu1  ;;  %v10162_v51 = vpop.eup %10161  ;;  %10181 = vtanh.f32 %v1820_v43  ;;  %v1713_v38 = vadd.f32 %v1712_v55, %v11688_v52 }
 0x1b8   :  { %v1826_v62 = vadd.f32 %v1825_v28, %v11688_v52  ;;  %9204 = vmatmul.mubr.msk.f32.gmra.mrb[174].mxu0 %vm2202_vm2, %v12182_v58  ;;  %v10164_v50 = vpop.eup %10163  ;;  %10183 = vtanh.f32 %v1711_v29 }
 0x1b9   :  { %9208 = vmatmul.mubr.msk.f32.gmra.mrb[174].mxu1 %vm2202_vm2, %v12182_v58  ;;  %3347 = vmatprep.mubr.f32.mxu0 %v14343_v63  ;;  %v10166_v43 = vpop.eup %10165  ;;  %10185 = vtanh.f32 %v1824_v57  ;;  %v12189_v33 = vpop.f32.mrb[112].mxu0 }
 0x1ba   :  { %14408 = vst [vmem:[#allocation88_spill] sm:$0xff] %v12189_v33  ;;  %v12191_v60 = vpop.f32.mrb[112].mxu1  ;;  %3436 = vmatprep.mubr.f32.mxu1 %v14343_v63  ;;  %v10168_v55 = vpop.eup %10167  ;;  %10187 = vtanh.f32 %v1713_v38 }
 0x1bb   :  { %14409 = vst [vmem:[#allocation89_spill] sm:$0xff] %v12191_v60  ;;  %v12194_v28 = vpop.f32.mrb[113].mxu0  ;;  %v12196_v31 = vpop.f32.mrb[113].mxu1  ;;  %10189 = vtanh.f32 %v1826_v62  ;;  %v9531_v18 = vpack.c.bf16 %v10168_v55, %v10160_v34 }
 0x1bc   :  { %14410 = vst [vmem:[#allocation90_spill] sm:$0xff] %v12194_v28  ;;  %14411 = vst [vmem:[#allocation91_spill] sm:$0xff] %v12196_v31  ;;  %v10170_v29 = vpop.eup %10169 }
 0x1bd   :  { %v10172_v48 = vpop.eup %10171  ;;  %v9539_v39 = vpack.c.bf16 %v10170_v29, %v10162_v51  ;;  %v12198_v4 = vpop.f32.mrb[114].mxu0 }
 0x1be   :  { %v10174_v32 = vpop.eup %10173  ;;  %14412 = vst [vmem:[#allocation92_spill] sm:$0xff] %v12198_v4  ;;  %v12200_v57 = vpop.f32.mrb[114].mxu1  ;;  %v9529_v33 = vpack.c.bf16 %v10172_v48, %v10164_v50 }
 0x1bf   :  { %14413 = vst [vmem:[#allocation93_spill] sm:$0xff] %v12200_v57  ;;  %v10176_v60 = vpop.eup %10175  ;;  %v12202_v49 = vpop.f32.mrb[115].mxu0  ;;  %v9537_v38 = vpack.c.bf16 %v10174_v32, %v10166_v43 }
 0x1c0   :  { %14414 = vst [vmem:[#allocation94_spill] sm:$0xff] %v12202_v49  ;;  %v12204_v42 = vpop.f32.mrb[115].mxu1  ;;  %v10178_v28 = vpop.eup %10177  ;;  %9530 = vmatprep.subr.bf16.mxu0 %v9529_v33 }
 0x1c1   :  { %14415 = vst [vmem:[#allocation95_spill] sm:$0xff] %v12204_v42  ;;  %v10180_v31 = vpop.eup %10179  ;;  %9538 = vmatprep.subr.bf16.mxu1 %v9537_v38  ;;  %9532 = vmatpush1.bf16.msra.mxu0 %v9531_v18  ;;  %v12206_v34 = vpop.f32.mrb[116].mxu0 }
 0x1c2   :  { %v10182_v62 = vpop.eup %10181  ;;  %9540 = vmatpush1.bf16.msra.mxu1 %v9539_v39  ;;  %14416 = vst [vmem:[#allocation96_spill] sm:$0xff] %v12206_v34  ;;  %v12208_v51 = vpop.f32.mrb[116].mxu1 }
 0x1c3   :  { %14417 = vst [vmem:[#allocation97_spill] sm:$0xff] %v12208_v51  ;;  %v10184_v55 = vpop.eup %10183  ;;  %v12210_v29 = vpop.f32.mrb[117].mxu0 }
 0x1c4   :  { %14418 = vst [vmem:[#allocation98_spill] sm:$0xff] %v12210_v29  ;;  %v12212_v48 = vpop.f32.mrb[117].mxu1  ;;  %v10186_v50 = vpop.eup %10185  ;;  %v9535_v49 = vpack.c.bf16 %v10184_v55, %v10176_v60 }
 0x1c5   :  { %14419 = vst [vmem:[#allocation99_spill] sm:$0xff] %v12212_v48  ;;  %v10188_v42 = vpop.eup %10187  ;;  %v9543_v32 = vpack.c.bf16 %v10186_v50, %v10178_v28  ;;  %v12214_v33 = vpop.f32.mrb[118].mxu0 }
 0x1c6   :  { %v10190_v43 = vpop.eup %10189  ;;  %14420 = vst [vmem:[#allocation100_spill] sm:$0xff] %v12214_v33  ;;  %v12216_v38 = vpop.f32.mrb[118].mxu1  ;;  %v9533_v18 = vpack.c.bf16 %v10188_v42, %v10180_v31 }
 0x1c7   :  { %14421 = vst [vmem:[#allocation101_spill] sm:$0xff] %v12216_v38  ;;  %v12218_v39 = vpop.f32.mrb[119].mxu0  ;;  %v12220_v34 = vpop.f32.mrb[119].mxu1  ;;  %v9541_v51 = vpack.c.bf16 %v10190_v43, %v10182_v62 }
 0x1c8   :  { %14422 = vst [vmem:[#allocation102_spill] sm:$0xff] %v12218_v39  ;;  %14423 = vst [vmem:[#allocation103_spill] sm:$0xff] %v12220_v34  ;;  %9534 = vmatprep.subr.bf16.mxu0 %v9533_v18 }
 0x1c9   :  { %9542 = vmatprep.subr.bf16.mxu1 %v9541_v51  ;;  %9536 = vmatpush1.bf16.msra.mxu0 %v9535_v49  ;;  %v1918_v48 = vpop.f32.mrb[120].mxu0  ;;  %v2031_v29 = vpop.f32.mrb[120].mxu1 }
 0x1ca   :  { %9544 = vmatpush1.bf16.msra.mxu1 %v9543_v32  ;;  %v1919_v60 = vadd.f32 %v1918_v48, %v11638_v19  ;;  %v2032_v28 = vadd.f32 %v2031_v29, %v11638_v19  ;;  %v1920_v55 = vpop.f32.mrb[121].mxu0  ;;  %v2033_v50 = vpop.f32.mrb[121].mxu1 }
 0x1cb   :  { %v1921_v38 = vadd.f32 %v1920_v55, %v11638_v19  ;;  %v2034_v42 = vadd.f32 %v2033_v50, %v11638_v19 }
 0x1cc   :  { %9209 = vmatmul.mubr.msk.f32.vlgmr.msra.gmra.mrb[176].mxu0 %vm2202_vm2, %v12137_v61  ;;  %10191 = vtanh.f32 %v1919_v60 }
 0x1cd   :  { %9213 = vmatmul.mubr.msk.f32.vlgmr.msra.gmra.mrb[176].mxu1 %vm2202_vm2, %v12137_v61  ;;  %3353 = vmatprep.mubr.f32.mxu0 %v14343_v63  ;;  %10193 = vtanh.f32 %v2032_v28  ;;  %v1924_v49 = vpop.f32.mrb[122].mxu0  ;;  %v2037_v31 = vpop.f32.mrb[122].mxu1 }
 0x1ce   :  { %3442 = vmatprep.mubr.f32.mxu1 %v14343_v63  ;;  %10195 = vtanh.f32 %v1921_v38  ;;  %v1925_v62 = vadd.f32 %v1924_v49, %v11664_v36  ;;  %v2038_v51 = vadd.f32 %v2037_v31, %v11664_v36  ;;  %v1926_v19 = vpop.f32.mrb[123].mxu0  ;;  %v2039_v29 = vpop.f32.mrb[123].mxu1 }
 0x1cf   :  { %10197 = vtanh.f32 %v2034_v42  ;;  %v1927_v48 = vadd.f32 %v1926_v19, %v11664_v36  ;;  %v2040_v32 = vadd.f32 %v2039_v29, %v11664_v36 }
 0x1d0   :  { %9210 = vmatmul.mubr.msk.f32.gmra.mrb[178].mxu0 %vm2202_vm2, %v12152_v59  ;;  %10199 = vtanh.f32 %v1925_v62 }
 0x1d1   :  { %9214 = vmatmul.mubr.msk.f32.gmra.mrb[178].mxu1 %vm2202_vm2, %v12152_v59  ;;  %3359 = vmatprep.mubr.f32.mxu0 %v14343_v63  ;;  %10201 = vtanh.f32 %v2038_v51  ;;  %v1930_v43 = vpop.f32.mrb[124].mxu0  ;;  %v2043_v38 = vpop.f32.mrb[124].mxu1 }
 0x1d2   :  { %3448 = vmatprep.mubr.f32.mxu1 %v14343_v63  ;;  %10203 = vtanh.f32 %v1927_v48  ;;  %v1931_v18 = vadd.f32 %v1930_v43, %v11666_v37  ;;  %v2044_v60 = vadd.f32 %v2043_v38, %v11666_v37  ;;  %v1932_v36 = vpop.f32.mrb[125].mxu0  ;;  %v2045_v28 = vpop.f32.mrb[125].mxu1 }
 0x1d3   :  { %10205 = vtanh.f32 %v2040_v32  ;;  %v1933_v55 = vadd.f32 %v1932_v36, %v11666_v37  ;;  %v2046_v50 = vadd.f32 %v2045_v28, %v11666_v37 }
 0x1d4   :  { %9211 = vmatmul.mubr.msk.f32.gmra.mrb[180].mxu0 %vm2202_vm2, %v12167_v2  ;;  %10207 = vtanh.f32 %v1931_v18 }
 0x1d5   :  { %9215 = vmatmul.mubr.msk.f32.gmra.mrb[180].mxu1 %vm2202_vm2, %v12167_v2  ;;  %3365 = vmatprep.mubr.f32.mxu0 %v14343_v63  ;;  %10209 = vtanh.f32 %v2044_v60  ;;  %v1936_v42 = vpop.f32.mrb[126].mxu0 }
 0x1d6   :  { %v2049_v49 = vpop.f32.mrb[126].mxu1  ;;  %3454 = vmatprep.mubr.f32.mxu1 %v14343_v63  ;;  %v10192_v31 = vpop.eup %10191  ;;  %10211 = vtanh.f32 %v1933_v55  ;;  %v1937_v62 = vadd.f32 %v1936_v42, %v11688_v52 }
 0x1d7   :  { %v2050_v37 = vadd.f32 %v2049_v49, %v11688_v52  ;;  %v1938_v51 = vpop.f32.mrb[127].mxu0  ;;  %v2051_v19 = vpop.f32.mrb[127].mxu1  ;;  %10213 = vtanh.f32 %v2046_v50 }
 0x1d8   :  { %v10194_v29 = vpop.eup %10193  ;;  %v1939_v48 = vadd.f32 %v1938_v51, %v11688_v52  ;;  %v2052_v32 = vadd.f32 %v2051_v19, %v11688_v52  ;;  %9212 = vmatmul.mubr.msk.f32.gmra.mrb[182].mxu0 %vm2202_vm2, %v12182_v58  ;;  %10215 = vtanh.f32 %v1937_v62  ;;  %v12262_v49 = vpop.permute.xlu0 %2184 }
 0x1d9   :  { %v10196_v43 = vpop.eup %10195  ;;  %9216 = vmatmul.mubr.msk.f32.gmra.mrb[182].mxu1 %vm2202_vm2, %v12182_v58  ;;  %3525 = vmatprep.mubr.f32.mxu0 %v14343_v63  ;;  %10217 = vtanh.f32 %v2050_v37 }
 0x1da   :  { %v10198_v38 = vpop.eup %10197  ;;  %3614 = vmatprep.mubr.f32.mxu1 %v14343_v63  ;;  %10219 = vtanh.f32 %v1939_v48 }
 0x1db   :  { %v10200_v18 = vpop.eup %10199  ;;  %10221 = vtanh.f32 %v2052_v32 }
 0x1dc   :  { %v10202_v60 = vpop.eup %10201  ;;  %v9547_v36 = vpack.c.bf16 %v10200_v18, %v10192_v31  ;;  %v12268_v18 = vpop.permute.xlu1 %2189 }
 0x1dd   :  { %v10204_v52 = vpop.eup %10203  ;;  %v9555_v28 = vpack.c.bf16 %v10202_v60, %v10194_v29  ;;  %v12274_v4 = vpop.permute.xlu0 %2194 }
 0x1de   :  { %v10206_v55 = vpop.eup %10205  ;;  %v9545_v50 = vpack.c.bf16 %v10204_v52, %v10196_v43 }
 0x1df   :  { %v10208_v42 = vpop.eup %10207  ;;  %v2281_v62 = vpop.f32.mrb[128].mxu0  ;;  %v9553_v51 = vpack.c.bf16 %v10206_v55, %v10198_v38 }
 0x1e0   :  { %v10210_v19 = vpop.eup %10209  ;;  %v2282_v34 = vadd.f32 %v2281_v62, %v12262_v49  ;;  %v2370_v37 = vpop.f32.mrb[128].mxu1  ;;  %9546 = vmatprep.subr.bf16.mxu0 %v9545_v50 }
 0x1e1   :  { %v2283_v39 = vpop.f32.mrb[129].mxu0  ;;  %v10212_v33 = vpop.eup %10211  ;;  %v2371_v48 = vadd.f32 %v2370_v37, %v12262_v49  ;;  %9554 = vmatprep.subr.bf16.mxu1 %v9553_v51  ;;  %9548 = vmatpush1.bf16.msra.mxu0 %v9547_v36 }
 0x1e2   :  { %v2284_v31 = vadd.f32 %v2283_v39, %v12262_v49  ;;  %v2372_v32 = vpop.f32.mrb[129].mxu1  ;;  %v10214_v29 = vpop.eup %10213  ;;  %10223 = vtanh.f32 %v2282_v34  ;;  %9556 = vmatpush1.bf16.msra.mxu1 %v9555_v28 }
 0x1e3   :  { %v2373_v43 = vadd.f32 %v2372_v32, %v12262_v49  ;;  %v10216_v38 = vpop.eup %10215  ;;  %10225 = vtanh.f32 %v2371_v48  ;;  %v2287_v60 = vpop.f32.mrb[130].mxu0 }
 0x1e4   :  { %v10218_v52 = vpop.eup %10217  ;;  %10227 = vtanh.f32 %v2284_v31  ;;  %v2288_v55 = vadd.f32 %v2287_v60, %v12268_v18  ;;  %v2376_v50 = vpop.f32.mrb[130].mxu1  ;;  %v9551_v39 = vpack.c.bf16 %v10216_v38, %v10208_v42 }
 0x1e5   :  { %v2289_v62 = vpop.f32.mrb[131].mxu0  ;;  %v10220_v37 = vpop.eup %10219  ;;  %10229 = vtanh.f32 %v2373_v43  ;;  %v2377_v36 = vadd.f32 %v2376_v50, %v12268_v18  ;;  %v9559_v28 = vpack.c.bf16 %v10218_v52, %v10210_v19 }
 0x1e6   :  { %v2290_v34 = vadd.f32 %v2289_v62, %v12268_v18  ;;  %v2378_v51 = vpop.f32.mrb[131].mxu1  ;;  %v10222_v32 = vpop.eup %10221  ;;  %10231 = vtanh.f32 %v2288_v55  ;;  %v9549_v57 = vpack.c.bf16 %v10220_v37, %v10212_v33 }
 0x1e7   :  { %v2379_v48 = vadd.f32 %v2378_v51, %v12268_v18  ;;  %10233 = vtanh.f32 %v2377_v36  ;;  %v2293_v31 = vpop.f32.mrb[132].mxu0  ;;  %v9557_v60 = vpack.c.bf16 %v10222_v32, %v10214_v29  ;;  %v12280_v55 = vpop.permute.xlu1 %2199 }
 0x1e8   :  { %10235 = vtanh.f32 %v2290_v34  ;;  %v2294_v42 = vadd.f32 %v2293_v31, %v12274_v4  ;;  %v2382_v43 = vpop.f32.mrb[132].mxu1  ;;  %v2295_v38 = vpop.f32.mrb[133].mxu0  ;;  %9550 = vmatprep.subr.bf16.mxu0 %v9549_v57 }
 0x1e9   :  { %10237 = vtanh.f32 %v2379_v48  ;;  %v2383_v50 = vadd.f32 %v2382_v43, %v12274_v4  ;;  %v2296_v19 = vadd.f32 %v2295_v38, %v12274_v4  ;;  %v2384_v52 = vpop.f32.mrb[133].mxu1  ;;  %9558 = vmatprep.subr.bf16.mxu1 %v9557_v60  ;;  %9552 = vmatpush1.bf16.msra.mxu0 %v9551_v39 }
 0x1ea   :  { %10239 = vtanh.f32 %v2294_v42  ;;  %v2385_v33 = vadd.f32 %v2384_v52, %v12274_v4  ;;  %9560 = vmatpush1.bf16.msra.mxu1 %v9559_v28 }
 0x1eb   :  { %10241 = vtanh.f32 %v2383_v50  ;;  %v2299_v29 = vpop.f32.mrb[134].mxu0 }
 0x1ec   :  { %v10224_v62 = vpop.eup %10223  ;;  %10243 = vtanh.f32 %v2296_v19  ;;  %v2300_v57 = vadd.f32 %v2299_v29, %v12280_v55  ;;  %v2388_v37 = vpop.f32.mrb[134].mxu1  ;;  %9217 = vmatmul.mubr.msk.f32.vlgmr.msra.gmra.mrb[184].mxu0 %vm2202_vm2, %v12137_v61 }
 0x1ed   :  { %v2301_v36 = vpop.f32.mrb[135].mxu0  ;;  %v10226_v34 = vpop.eup %10225  ;;  %10245 = vtanh.f32 %v2385_v33  ;;  %v2389_v39 = vadd.f32 %v2388_v37, %v12280_v55  ;;  %9221 = vmatmul.mubr.msk.f32.vlgmr.msra.gmra.mrb[184].mxu1 %vm2202_vm2, %v12137_v61  ;;  %3531 = vmatprep.mubr.f32.mxu0 %v14343_v63 }
 0x1ee   :  { %v2302_v51 = vadd.f32 %v2301_v36, %v12280_v55  ;;  %v2390_v28 = vpop.f32.mrb[135].mxu1  ;;  %v10228_v32 = vpop.eup %10227  ;;  %10247 = vtanh.f32 %v2300_v57  ;;  %3620 = vmatprep.mubr.f32.mxu1 %v14343_v63 }
 0x1ef   :  { %v2391_v48 = vadd.f32 %v2390_v28, %v12280_v55  ;;  %v10230_v31 = vpop.eup %10229  ;;  %10249 = vtanh.f32 %v2389_v39 }
 0x1f0   :  { %v10232_v60 = vpop.eup %10231  ;;  %10251 = vtanh.f32 %v2302_v51  ;;  %9218 = vmatmul.mubr.msk.f32.gmra.mrb[186].mxu0 %vm2202_vm2, %v12152_v59 }
 0x1f1   :  { %v10234_v42 = vpop.eup %10233  ;;  %10253 = vtanh.f32 %v2391_v48  ;;  %9222 = vmatmul.mubr.msk.f32.gmra.mrb[186].mxu1 %vm2202_vm2, %v12152_v59  ;;  %3537 = vmatprep.mubr.f32.mxu0 %v14343_v63  ;;  %v9563_v61 = vpack.c.bf16 %v10232_v60, %v10224_v62 }
 0x1f2   :  { %v10236_v43 = vpop.eup %10235  ;;  %3626 = vmatprep.mubr.f32.mxu1 %v14343_v63  ;;  %v9571_v38 = vpack.c.bf16 %v10234_v42, %v10226_v34 }
 0x1f3   :  { %v10238_v50 = vpop.eup %10237  ;;  %v9561_v19 = vpack.c.bf16 %v10236_v43, %v10228_v32  ;;  %v12313_v32 = vld [vmem:[%s14319_s2 + $0x20] sm:$0xff] }
 0x1f4   :  { %v10240_v52 = vpop.eup %10239  ;;  %9219 = vmatmul.mubr.msk.f32.gmra.mrb[188].mxu0 %vm2202_vm2, %v12167_v2  ;;  %v9569_v33 = vpack.c.bf16 %v10238_v50, %v10230_v31  ;;  %v12327_v50 = vld [vmem:[%s14319_s2 + $0x28] sm:$0xff] }
 0x1f5   :  { %v10242_v29 = vpop.eup %10241  ;;  %9223 = vmatmul.mubr.msk.f32.gmra.mrb[188].mxu1 %vm2202_vm2, %v12167_v2  ;;  %9562 = vmatprep.subr.bf16.mxu0 %v9561_v19 }
 0x1f6   :  { %v10244_v59 = vpop.eup %10243  ;;  %9570 = vmatprep.subr.bf16.mxu1 %v9569_v33  ;;  %9564 = vmatpush1.bf16.msra.mxu0 %v9563_v61 }
 0x1f7   :  { %v10246_v62 = vpop.eup %10245  ;;  %9572 = vmatpush1.bf16.msra.mxu1 %v9571_v38  ;;  %3543 = vmatprep.mubr.f32.mxu0 %v14343_v63 }
 0x1f8   :  { %v10248_v57 = vpop.eup %10247  ;;  %3632 = vmatprep.mubr.f32.mxu1 %v14343_v63  ;;  %9220 = vmatmul.mubr.msk.f32.gmra.mrb[190].mxu0 %vm2202_vm2, %v12182_v58 }
 0x1f9   :  { %v10250_v37 = vpop.eup %10249  ;;  %9224 = vmatmul.mubr.msk.f32.gmra.mrb[190].mxu1 %vm2202_vm2, %v12182_v58  ;;  %v9567_v36 = vpack.c.bf16 %v10248_v57, %v10240_v52  ;;  %3895 = vmatprep.mubr.f32.mxu0 %v14343_v63 }
 0x1fa   :  { %v10252_v2 = vpop.eup %10251  ;;  %v9575_v34 = vpack.c.bf16 %v10250_v37, %v10242_v29  ;;  %4008 = vmatprep.mubr.f32.mxu1 %v14343_v63 }
 0x1fb   :  { %v10254_v39 = vpop.eup %10253  ;;  %v9565_v51 = vpack.c.bf16 %v10252_v2, %v10244_v59 }
 0x1fc   :  { %v9573_v28 = vpack.c.bf16 %v10254_v39, %v10246_v62 }
 0x1fd   :  { %9566 = vmatprep.subr.bf16.mxu0 %v9565_v51 }
 0x1fe   :  { %9574 = vmatprep.subr.bf16.mxu1 %v9573_v28  ;;  %9568 = vmatpush1.bf16.msra.mxu0 %v9567_v36  ;;  %v12342_v36 = vld [vmem:[%s14319_s2 + $0x30] sm:$0xff] }
 0x1ff   :  { %9576 = vmatpush1.bf16.msra.mxu1 %v9575_v34  ;;  %v2459_v58 = vpop.f32.mrb[136].mxu0 }
 0x200   :  { %v2460_v48 = vadd.f32 %v2459_v58, %v12262_v49  ;;  %v2548_v31 = vpop.f32.mrb[136].mxu1  ;;  %v2461_v60 = vpop.f32.mrb[137].mxu0 }
 0x201   :  { %v2549_v42 = vadd.f32 %v2548_v31, %v12262_v49  ;;  %v2462_v61 = vadd.f32 %v2461_v60, %v12262_v49  ;;  %v2550_v43 = vpop.f32.mrb[137].mxu1  ;;  %9225 = vmatmul.mubr.msk.f32.vlgmr.msra.gmra.mrb[192].mxu0 %vm2202_vm2, %v12313_v32  ;;  %v12357_v60 = vld [vmem:[%s14319_s2 + $0x38] sm:$0xff] }
 0x202   :  { %10255 = vtanh.f32 %v2460_v48  ;;  %v2551_v38 = vadd.f32 %v2550_v43, %v12262_v49  ;;  %9233 = vmatmul.mubr.msk.f32.vlgmr.msra.gmra.mrb[192].mxu1 %vm2202_vm2, %v12313_v32  ;;  %3901 = vmatprep.mubr.f32.mxu0 %v14343_v63 }
 0x203   :  { %10257 = vtanh.f32 %v2549_v42  ;;  %v2465_v19 = vpop.f32.mrb[138].mxu0  ;;  %4014 = vmatprep.mubr.f32.mxu1 %v14343_v63 }
 0x204   :  { %10259 = vtanh.f32 %v2462_v61  ;;  %v2466_v52 = vadd.f32 %v2465_v19, %v12268_v18  ;;  %v2554_v33 = vpop.f32.mrb[138].mxu1  ;;  %v2467_v29 = vpop.f32.mrb[139].mxu0 }
 0x205   :  { %10261 = vtanh.f32 %v2551_v38  ;;  %v2555_v59 = vadd.f32 %v2554_v33, %v12268_v18  ;;  %v2468_v62 = vadd.f32 %v2467_v29, %v12268_v18  ;;  %v2556_v57 = vpop.f32.mrb[139].mxu1  ;;  %9226 = vmatmul.mubr.msk.f32.gmra.mrb[194].mxu0 %vm2202_vm2, %v12327_v50 }
 0x206   :  { %10263 = vtanh.f32 %v2466_v52  ;;  %v2557_v37 = vadd.f32 %v2556_v57, %v12268_v18  ;;  %9234 = vmatmul.mubr.msk.f32.gmra.mrb[194].mxu1 %vm2202_vm2, %v12327_v50  ;;  %3907 = vmatprep.mubr.f32.mxu0 %v14343_v63 }
 0x207   :  { %10265 = vtanh.f32 %v2555_v59  ;;  %v2471_v2 = vpop.f32.mrb[140].mxu0  ;;  %4020 = vmatprep.mubr.f32.mxu1 %v14343_v63 }
 0x208   :  { %10267 = vtanh.f32 %v2468_v62  ;;  %v2472_v34 = vadd.f32 %v2471_v2, %v12274_v4  ;;  %v2560_v39 = vpop.f32.mrb[140].mxu1  ;;  %v2473_v51 = vpop.f32.mrb[141].mxu0 }
 0x209   :  { %10269 = vtanh.f32 %v2557_v37  ;;  %v2561_v28 = vadd.f32 %v2560_v39, %v12274_v4  ;;  %v2474_v58 = vadd.f32 %v2473_v51, %v12274_v4  ;;  %v2562_v48 = vpop.f32.mrb[141].mxu1  ;;  %9227 = vmatmul.mubr.msk.f32.gmra.mrb[196].mxu0 %vm2202_vm2, %v12342_v36  ;;  %v12372_v37 = vld [vmem:[%s14319_s2 + $0x40] sm:$0xff] }
 0x20a   :  { %10271 = vtanh.f32 %v2472_v34  ;;  %v2563_v31 = vadd.f32 %v2562_v48, %v12274_v4  ;;  %9235 = vmatmul.mubr.msk.f32.gmra.mrb[196].mxu1 %vm2202_vm2, %v12342_v36  ;;  %3913 = vmatprep.mubr.f32.mxu0 %v14343_v63 }
 0x20b   :  { %10273 = vtanh.f32 %v2561_v28  ;;  %v2477_v42 = vpop.f32.mrb[142].mxu0  ;;  %4026 = vmatprep.mubr.f32.mxu1 %v14343_v63 }
 0x20c   :  { %v10256_v61 = vpop.eup %10255  ;;  %10275 = vtanh.f32 %v2474_v58  ;;  %v2478_v43 = vadd.f32 %v2477_v42, %v12280_v55  ;;  %v2566_v38 = vpop.f32.mrb[142].mxu1  ;;  %v12383_v58 = vld [vmem:[%s14319_s2 + $0x48] sm:$0xff] }
 0x20d   :  { %v2479_v19 = vpop.f32.mrb[143].mxu0  ;;  %v10258_v52 = vpop.eup %10257  ;;  %10277 = vtanh.f32 %v2563_v31  ;;  %v2567_v33 = vadd.f32 %v2566_v38, %v12280_v55  ;;  %9228 = vmatmul.mubr.msk.f32.gmra.mrb[198].mxu0 %vm2202_vm2, %v12357_v60 }
 0x20e   :  { %v2480_v29 = vadd.f32 %v2479_v19, %v12280_v55  ;;  %v2568_v59 = vpop.f32.mrb[143].mxu1  ;;  %v10260_v62 = vpop.eup %10259  ;;  %10279 = vtanh.f32 %v2478_v43  ;;  %9236 = vmatmul.mubr.msk.f32.gmra.mrb[198].mxu1 %vm2202_vm2, %v12357_v60  ;;  %3919 = vmatprep.mubr.f32.mxu0 %v14343_v63 }
 0x20f   :  { %v2569_v57 = vadd.f32 %v2568_v59, %v12280_v55  ;;  %v10262_v2 = vpop.eup %10261  ;;  %10281 = vtanh.f32 %v2567_v33  ;;  %4032 = vmatprep.mubr.f32.mxu1 %v14343_v63 }
 0x210   :  { %v10264_v34 = vpop.eup %10263  ;;  %10283 = vtanh.f32 %v2480_v29 }
 0x211   :  { %v10266_v39 = vpop.eup %10265  ;;  %10285 = vtanh.f32 %v2569_v57  ;;  %9229 = vmatmul.mubr.msk.f32.gmra.mrb[200].mxu0 %vm2202_vm2, %v12372_v37  ;;  %v9579_v51 = vpack.c.bf16 %v10264_v34, %v10256_v61 }
 0x212   :  { %v10268_v28 = vpop.eup %10267  ;;  %9237 = vmatmul.mubr.msk.f32.gmra.mrb[200].mxu1 %vm2202_vm2, %v12372_v37  ;;  %3925 = vmatprep.mubr.f32.mxu0 %v14343_v63  ;;  %v9587_v48 = vpack.c.bf16 %v10266_v39, %v10258_v52  ;;  %v12393_v52 = vld [vmem:[%s14319_s2 + $0x50] sm:$0xff] }
 0x213   :  { %v10270_v31 = vpop.eup %10269  ;;  %4038 = vmatprep.mubr.f32.mxu1 %v14343_v63  ;;  %v9577_v42 = vpack.c.bf16 %v10268_v28, %v10260_v62 }
 0x214   :  { %v10272_v43 = vpop.eup %10271  ;;  %v9585_v38 = vpack.c.bf16 %v10270_v31, %v10262_v2  ;;  %v12405_v2 = vld [vmem:[%s14319_s2 + $0x58] sm:$0xff] }
 0x215   :  { %v10274_v19 = vpop.eup %10273  ;;  %9230 = vmatmul.mubr.msk.f32.gmra.mrb[202].mxu0 %vm2202_vm2, %v12383_v58  ;;  %9578 = vmatprep.subr.bf16.mxu0 %v9577_v42 }
 0x216   :  { %v10276_v61 = vpop.eup %10275  ;;  %9238 = vmatmul.mubr.msk.f32.gmra.mrb[202].mxu1 %vm2202_vm2, %v12383_v58  ;;  %9586 = vmatprep.subr.bf16.mxu1 %v9585_v38 }
 0x217   :  { %v10278_v33 = vpop.eup %10277  ;;  %9580 = vmatpush1.bf16.msra.mxu0 %v9579_v51  ;;  %9588 = vmatpush1.bf16.msra.mxu1 %v9587_v48 }
 0x218   :  { %v10280_v29 = vpop.eup %10279  ;;  %3931 = vmatprep.mubr.f32.mxu0 %v14343_v63  ;;  %4044 = vmatprep.mubr.f32.mxu1 %v14343_v63 }
 0x219   :  { %v10282_v59 = vpop.eup %10281  ;;  %9231 = vmatmul.mubr.msk.f32.gmra.mrb[204].mxu0 %vm2202_vm2, %v12393_v52  ;;  %v9583_v62 = vpack.c.bf16 %v10280_v29, %v10272_v43 }
 0x21a   :  { %v10284_v57 = vpop.eup %10283  ;;  %9239 = vmatmul.mubr.msk.f32.gmra.mrb[204].mxu1 %vm2202_vm2, %v12393_v52  ;;  %3937 = vmatprep.mubr.f32.mxu0 %v14343_v63  ;;  %v9591_v34 = vpack.c.bf16 %v10282_v59, %v10274_v19 }
 0x21b   :  { %v10286_v39 = vpop.eup %10285  ;;  %4050 = vmatprep.mubr.f32.mxu1 %v14343_v63  ;;  %v9581_v51 = vpack.c.bf16 %v10284_v57, %v10276_v61 }
 0x21c   :  { %v9589_v28 = vpack.c.bf16 %v10286_v39, %v10278_v33 }
 0x21d   :  { %9232 = vmatmul.mubr.msk.f32.gmra.mrb[206].mxu0 %vm2202_vm2, %v12405_v2  ;;  %9582 = vmatprep.subr.bf16.mxu0 %v9581_v51 }
 0x21e   :  { %9240 = vmatmul.mubr.msk.f32.gmra.mrb[206].mxu1 %vm2202_vm2, %v12405_v2  ;;  %9590 = vmatprep.subr.bf16.mxu1 %v9589_v28 }
 0x21f   :  { %9584 = vmatpush1.bf16.msra.mxu0 %v9583_v62  ;;  %9592 = vmatpush1.bf16.msra.mxu1 %v9591_v34  ;;  %v2637_v48 = vpop.f32.mrb[144].mxu0 }
 0x220   :  { %v2638_v31 = vadd.f32 %v2637_v48, %v12262_v49  ;;  %v2726_v42 = vpop.f32.mrb[144].mxu1  ;;  %4121 = vmatprep.mubr.f32.mxu0 %v14343_v63  ;;  %4234 = vmatprep.mubr.f32.mxu1 %v14343_v63  ;;  %v2639_v43 = vpop.f32.mrb[145].mxu0 }
 0x221   :  { %v2727_v38 = vadd.f32 %v2726_v42, %v12262_v49  ;;  %v2640_v19 = vadd.f32 %v2639_v43, %v12262_v49  ;;  %v2728_v61 = vpop.f32.mrb[145].mxu1 }
 0x222   :  { %10287 = vtanh.f32 %v2638_v31  ;;  %v2729_v33 = vadd.f32 %v2728_v61, %v12262_v49  ;;  %9241 = vmatmul.mubr.msk.f32.vlgmr.msra.gmra.mrb[208].mxu0 %vm2202_vm2, %v12313_v32  ;;  %9249 = vmatmul.mubr.msk.f32.vlgmr.msra.gmra.mrb[208].mxu1 %vm2202_vm2, %v12313_v32 }
 0x223   :  { %10289 = vtanh.f32 %v2727_v38  ;;  %v2643_v29 = vpop.f32.mrb[146].mxu0  ;;  %4127 = vmatprep.mubr.f32.mxu0 %v14343_v63  ;;  %4240 = vmatprep.mubr.f32.mxu1 %v14343_v63 }
 0x224   :  { %10291 = vtanh.f32 %v2640_v19  ;;  %v2644_v59 = vadd.f32 %v2643_v29, %v12268_v18  ;;  %v2732_v62 = vpop.f32.mrb[146].mxu1  ;;  %v2645_v57 = vpop.f32.mrb[147].mxu0 }
 0x225   :  { %10293 = vtanh.f32 %v2729_v33  ;;  %v2733_v34 = vadd.f32 %v2732_v62, %v12268_v18  ;;  %v2646_v39 = vadd.f32 %v2645_v57, %v12268_v18  ;;  %v2734_v51 = vpop.f32.mrb[147].mxu1 }
 0x226   :  { %10295 = vtanh.f32 %v2644_v59  ;;  %v2735_v28 = vadd.f32 %v2734_v51, %v12268_v18  ;;  %9242 = vmatmul.mubr.msk.f32.gmra.mrb[210].mxu0 %vm2202_vm2, %v12327_v50  ;;  %9250 = vmatmul.mubr.msk.f32.gmra.mrb[210].mxu1 %vm2202_vm2, %v12327_v50 }
 0x227   :  { %10297 = vtanh.f32 %v2733_v34  ;;  %v2649_v48 = vpop.f32.mrb[148].mxu0  ;;  %4133 = vmatprep.mubr.f32.mxu0 %v14343_v63  ;;  %4246 = vmatprep.mubr.f32.mxu1 %v14343_v63 }
 0x228   :  { %10299 = vtanh.f32 %v2646_v39  ;;  %v2650_v31 = vadd.f32 %v2649_v48, %v12274_v4  ;;  %v2738_v42 = vpop.f32.mrb[148].mxu1  ;;  %v2651_v43 = vpop.f32.mrb[149].mxu0 }
 0x229   :  { %10301 = vtanh.f32 %v2735_v28  ;;  %v2739_v38 = vadd.f32 %v2738_v42, %v12274_v4  ;;  %v2652_v19 = vadd.f32 %v2651_v43, %v12274_v4  ;;  %v2740_v61 = vpop.f32.mrb[149].mxu1 }
 0x22a   :  { %10303 = vtanh.f32 %v2650_v31  ;;  %v2741_v33 = vadd.f32 %v2740_v61, %v12274_v4  ;;  %9243 = vmatmul.mubr.msk.f32.gmra.mrb[212].mxu0 %vm2202_vm2, %v12342_v36  ;;  %9251 = vmatmul.mubr.msk.f32.gmra.mrb[212].mxu1 %vm2202_vm2, %v12342_v36 }
 0x22b   :  { %10305 = vtanh.f32 %v2739_v38  ;;  %v2655_v29 = vpop.f32.mrb[150].mxu0  ;;  %4139 = vmatprep.mubr.f32.mxu0 %v14343_v63  ;;  %4252 = vmatprep.mubr.f32.mxu1 %v14343_v63 }
 0x22c   :  { %v10288_v59 = vpop.eup %10287  ;;  %10307 = vtanh.f32 %v2652_v19  ;;  %v2656_v62 = vadd.f32 %v2655_v29, %v12280_v55  ;;  %v2744_v57 = vpop.f32.mrb[150].mxu1 }
 0x22d   :  { %v2657_v34 = vpop.f32.mrb[151].mxu0  ;;  %v10290_v39 = vpop.eup %10289  ;;  %10309 = vtanh.f32 %v2741_v33  ;;  %v2745_v51 = vadd.f32 %v2744_v57, %v12280_v55 }
 0x22e   :  { %v2658_v28 = vadd.f32 %v2657_v34, %v12280_v55  ;;  %v2746_v48 = vpop.f32.mrb[151].mxu1  ;;  %v10292_v31 = vpop.eup %10291  ;;  %10311 = vtanh.f32 %v2656_v62  ;;  %9244 = vmatmul.mubr.msk.f32.gmra.mrb[214].mxu0 %vm2202_vm2, %v12357_v60  ;;  %9252 = vmatmul.mubr.msk.f32.gmra.mrb[214].mxu1 %vm2202_vm2, %v12357_v60 }
 0x22f   :  { %v2747_v42 = vadd.f32 %v2746_v48, %v12280_v55  ;;  %v10294_v43 = vpop.eup %10293  ;;  %10313 = vtanh.f32 %v2745_v51  ;;  %4145 = vmatprep.mubr.f32.mxu0 %v14343_v63  ;;  %4258 = vmatprep.mubr.f32.mxu1 %v14343_v63 }
 0x230   :  { %v10296_v38 = vpop.eup %10295  ;;  %10315 = vtanh.f32 %v2658_v28 }
 0x231   :  { %v10298_v19 = vpop.eup %10297  ;;  %10317 = vtanh.f32 %v2747_v42  ;;  %v9595_v61 = vpack.c.bf16 %v10296_v38, %v10288_v59 }
 0x232   :  { %v10300_v33 = vpop.eup %10299  ;;  %9245 = vmatmul.mubr.msk.f32.gmra.mrb[216].mxu0 %vm2202_vm2, %v12372_v37  ;;  %9253 = vmatmul.mubr.msk.f32.gmra.mrb[216].mxu1 %vm2202_vm2, %v12372_v37  ;;  %v9603_v29 = vpack.c.bf16 %v10298_v19, %v10290_v39 }
 0x233   :  { %v10302_v62 = vpop.eup %10301  ;;  %4151 = vmatprep.mubr.f32.mxu0 %v14343_v63  ;;  %4264 = vmatprep.mubr.f32.mxu1 %v14343_v63  ;;  %v9593_v57 = vpack.c.bf16 %v10300_v33, %v10292_v31 }
 0x234   :  { %v10304_v34 = vpop.eup %10303  ;;  %v9601_v51 = vpack.c.bf16 %v10302_v62, %v10294_v43 }
 0x235   :  { %v10306_v28 = vpop.eup %10305  ;;  %9594 = vmatprep.subr.bf16.mxu0 %v9593_v57 }
 0x236   :  { %v10308_v48 = vpop.eup %10307  ;;  %9246 = vmatmul.mubr.msk.f32.gmra.mrb[218].mxu0 %vm2202_vm2, %v12383_v58  ;;  %9254 = vmatmul.mubr.msk.f32.gmra.mrb[218].mxu1 %vm2202_vm2, %v12383_v58 }
 0x237   :  { %v10310_v59 = vpop.eup %10309  ;;  %9602 = vmatprep.subr.bf16.mxu1 %v9601_v51  ;;  %9596 = vmatpush1.bf16.msra.mxu0 %v9595_v61 }
 0x238   :  { %v10312_v39 = vpop.eup %10311  ;;  %9604 = vmatpush1.bf16.msra.mxu1 %v9603_v29  ;;  %4157 = vmatprep.mubr.f32.mxu0 %v14343_v63 }
 0x239   :  { %v10314_v42 = vpop.eup %10313  ;;  %4270 = vmatprep.mubr.f32.mxu1 %v14343_v63  ;;  %v9599_v31 = vpack.c.bf16 %v10312_v39, %v10304_v34 }
 0x23a   :  { %v10316_v43 = vpop.eup %10315  ;;  %9247 = vmatmul.mubr.msk.f32.gmra.mrb[220].mxu0 %vm2202_vm2, %v12393_v52  ;;  %9255 = vmatmul.mubr.msk.f32.gmra.mrb[220].mxu1 %vm2202_vm2, %v12393_v52  ;;  %v9607_v38 = vpack.c.bf16 %v10314_v42, %v10306_v28 }
 0x23b   :  { %v10318_v19 = vpop.eup %10317  ;;  %4163 = vmatprep.mubr.f32.mxu0 %v14343_v63  ;;  %4276 = vmatprep.mubr.f32.mxu1 %v14343_v63  ;;  %v9597_v61 = vpack.c.bf16 %v10316_v43, %v10308_v48 }
 0x23c   :  { %v9605_v33 = vpack.c.bf16 %v10318_v19, %v10310_v59 }
 0x23d   :  { %9598 = vmatprep.subr.bf16.mxu0 %v9597_v61 }
 0x23e   :  { %9248 = vmatmul.mubr.msk.f32.gmra.mrb[222].mxu0 %vm2202_vm2, %v12405_v2  ;;  %9256 = vmatmul.mubr.msk.f32.gmra.mrb[222].mxu1 %vm2202_vm2, %v12405_v2 }
 0x23f   :  { %9606 = vmatprep.subr.bf16.mxu1 %v9605_v33  ;;  %9600 = vmatpush1.bf16.msra.mxu0 %v9599_v31  ;;  %v2815_v29 = vpop.f32.mrb[152].mxu0 }
 0x240   :  { %9608 = vmatpush1.bf16.msra.mxu1 %v9607_v38  ;;  %v2816_v62 = vadd.f32 %v2815_v29, %v12262_v49  ;;  %v2904_v57 = vpop.f32.mrb[152].mxu1  ;;  %4347 = vmatprep.mubr.f32.mxu0 %v14343_v63  ;;  %v2817_v34 = vpop.f32.mrb[153].mxu0 }
 0x241   :  { %v2905_v51 = vadd.f32 %v2904_v57, %v12262_v49  ;;  %4460 = vmatprep.mubr.f32.mxu1 %v14343_v63  ;;  %v2818_v28 = vadd.f32 %v2817_v34, %v12262_v49  ;;  %v2906_v48 = vpop.f32.mrb[153].mxu1 }
 0x242   :  { %10319 = vtanh.f32 %v2816_v62  ;;  %v2907_v59 = vadd.f32 %v2906_v48, %v12262_v49  ;;  %9257 = vmatmul.mubr.msk.f32.vlgmr.msra.gmra.mrb[224].mxu0 %vm2202_vm2, %v12313_v32 }
 0x243   :  { %10321 = vtanh.f32 %v2905_v51  ;;  %9265 = vmatmul.mubr.msk.f32.vlgmr.msra.gmra.mrb[224].mxu1 %vm2202_vm2, %v12313_v32  ;;  %v2821_v39 = vpop.f32.mrb[154].mxu0  ;;  %4353 = vmatprep.mubr.f32.mxu0 %v14343_v63 }
 0x244   :  { %10323 = vtanh.f32 %v2818_v28  ;;  %v2822_v42 = vadd.f32 %v2821_v39, %v12268_v18  ;;  %v2910_v31 = vpop.f32.mrb[154].mxu1  ;;  %4466 = vmatprep.mubr.f32.mxu1 %v14343_v63  ;;  %v2823_v43 = vpop.f32.mrb[155].mxu0 }
 0x245   :  { %10325 = vtanh.f32 %v2907_v59  ;;  %v2911_v38 = vadd.f32 %v2910_v31, %v12268_v18  ;;  %v2824_v19 = vadd.f32 %v2823_v43, %v12268_v18  ;;  %v2912_v61 = vpop.f32.mrb[155].mxu1 }
 0x246   :  { %10327 = vtanh.f32 %v2822_v42  ;;  %v2913_v33 = vadd.f32 %v2912_v61, %v12268_v18  ;;  %9258 = vmatmul.mubr.msk.f32.gmra.mrb[226].mxu0 %vm2202_vm2, %v12327_v50 }
 0x247   :  { %10329 = vtanh.f32 %v2911_v38  ;;  %9266 = vmatmul.mubr.msk.f32.gmra.mrb[226].mxu1 %vm2202_vm2, %v12327_v50  ;;  %v2827_v29 = vpop.f32.mrb[156].mxu0  ;;  %4359 = vmatprep.mubr.f32.mxu0 %v14343_v63 }
 0x248   :  { %10331 = vtanh.f32 %v2824_v19  ;;  %v2828_v62 = vadd.f32 %v2827_v29, %v12274_v4  ;;  %v2916_v57 = vpop.f32.mrb[156].mxu1  ;;  %4472 = vmatprep.mubr.f32.mxu1 %v14343_v63  ;;  %v2829_v34 = vpop.f32.mrb[157].mxu0 }
 0x249   :  { %10333 = vtanh.f32 %v2913_v33  ;;  %v2917_v51 = vadd.f32 %v2916_v57, %v12274_v4  ;;  %v2830_v28 = vadd.f32 %v2829_v34, %v12274_v4  ;;  %v2918_v48 = vpop.f32.mrb[157].mxu1 }
 0x24a   :  { %10335 = vtanh.f32 %v2828_v62  ;;  %v2919_v59 = vadd.f32 %v2918_v48, %v12274_v4  ;;  %9259 = vmatmul.mubr.msk.f32.gmra.mrb[228].mxu0 %vm2202_vm2, %v12342_v36 }
 0x24b   :  { %10337 = vtanh.f32 %v2917_v51  ;;  %9267 = vmatmul.mubr.msk.f32.gmra.mrb[228].mxu1 %vm2202_vm2, %v12342_v36  ;;  %v2833_v39 = vpop.f32.mrb[158].mxu0  ;;  %4365 = vmatprep.mubr.f32.mxu0 %v14343_v63 }
 0x24c   :  { %v10320_v42 = vpop.eup %10319  ;;  %10339 = vtanh.f32 %v2830_v28  ;;  %v2834_v31 = vadd.f32 %v2833_v39, %v12280_v55  ;;  %v2922_v43 = vpop.f32.mrb[158].mxu1  ;;  %4478 = vmatprep.mubr.f32.mxu1 %v14343_v63 }
 0x24d   :  { %v2835_v38 = vpop.f32.mrb[159].mxu0  ;;  %v10322_v19 = vpop.eup %10321  ;;  %10341 = vtanh.f32 %v2919_v59  ;;  %v2923_v61 = vadd.f32 %v2922_v43, %v12280_v55 }
 0x24e   :  { %v2836_v33 = vadd.f32 %v2835_v38, %v12280_v55  ;;  %v2924_v29 = vpop.f32.mrb[159].mxu1  ;;  %v10324_v62 = vpop.eup %10323  ;;  %10343 = vtanh.f32 %v2834_v31  ;;  %9260 = vmatmul.mubr.msk.f32.gmra.mrb[230].mxu0 %vm2202_vm2, %v12357_v60 }
 0x24f   :  { %v2925_v57 = vadd.f32 %v2924_v29, %v12280_v55  ;;  %v10326_v34 = vpop.eup %10325  ;;  %10345 = vtanh.f32 %v2923_v61  ;;  %9268 = vmatmul.mubr.msk.f32.gmra.mrb[230].mxu1 %vm2202_vm2, %v12357_v60  ;;  %4371 = vmatprep.mubr.f32.mxu0 %v14343_v63 }
 0x250   :  { %v10328_v51 = vpop.eup %10327  ;;  %10347 = vtanh.f32 %v2836_v33  ;;  %4484 = vmatprep.mubr.f32.mxu1 %v14343_v63 }
 0x251   :  { %v10330_v28 = vpop.eup %10329  ;;  %10349 = vtanh.f32 %v2925_v57  ;;  %v9611_v48 = vpack.c.bf16 %v10328_v51, %v10320_v42 }
 0x252   :  { %v10332_v59 = vpop.eup %10331  ;;  %9261 = vmatmul.mubr.msk.f32.gmra.mrb[232].mxu0 %vm2202_vm2, %v12372_v37  ;;  %v9619_v39 = vpack.c.bf16 %v10330_v28, %v10322_v19 }
 0x253   :  { %v10334_v31 = vpop.eup %10333  ;;  %9269 = vmatmul.mubr.msk.f32.gmra.mrb[232].mxu1 %vm2202_vm2, %v12372_v37  ;;  %4377 = vmatprep.mubr.f32.mxu0 %v14343_v63  ;;  %v9609_v43 = vpack.c.bf16 %v10332_v59, %v10324_v62 }
 0x254   :  { %v10336_v38 = vpop.eup %10335  ;;  %4490 = vmatprep.mubr.f32.mxu1 %v14343_v63  ;;  %v9617_v61 = vpack.c.bf16 %v10334_v31, %v10326_v34 }
 0x255   :  { %v10338_v33 = vpop.eup %10337  ;;  %9610 = vmatprep.subr.bf16.mxu0 %v9609_v43 }
 0x256   :  { %v10340_v29 = vpop.eup %10339  ;;  %9262 = vmatmul.mubr.msk.f32.gmra.mrb[234].mxu0 %vm2202_vm2, %v12383_v58  ;;  %9618 = vmatprep.subr.bf16.mxu1 %v9617_v61 }
 0x257   :  { %v10342_v42 = vpop.eup %10341  ;;  %9270 = vmatmul.mubr.msk.f32.gmra.mrb[234].mxu1 %vm2202_vm2, %v12383_v58  ;;  %9612 = vmatpush1.bf16.msra.mxu0 %v9611_v48 }
 0x258   :  { %v10344_v19 = vpop.eup %10343  ;;  %9620 = vmatpush1.bf16.msra.mxu1 %v9619_v39  ;;  %4383 = vmatprep.mubr.f32.mxu0 %v14343_v63 }
 0x259   :  { %v10346_v62 = vpop.eup %10345  ;;  %4496 = vmatprep.mubr.f32.mxu1 %v14343_v63  ;;  %v9615_v57 = vpack.c.bf16 %v10344_v19, %v10336_v38 }
 0x25a   :  { %v10348_v34 = vpop.eup %10347  ;;  %9263 = vmatmul.mubr.msk.f32.gmra.mrb[236].mxu0 %vm2202_vm2, %v12393_v52  ;;  %v9623_v51 = vpack.c.bf16 %v10346_v62, %v10338_v33 }
 0x25b   :  { %v10350_v28 = vpop.eup %10349  ;;  %9271 = vmatmul.mubr.msk.f32.gmra.mrb[236].mxu1 %vm2202_vm2, %v12393_v52  ;;  %4389 = vmatprep.mubr.f32.mxu0 %v14343_v63  ;;  %v9613_v48 = vpack.c.bf16 %v10348_v34, %v10340_v29 }
 0x25c   :  { %4502 = vmatprep.mubr.f32.mxu1 %v14343_v63  ;;  %v9621_v59 = vpack.c.bf16 %v10350_v28, %v10342_v42 }
 0x25d   :  { %9614 = vmatprep.subr.bf16.mxu0 %v9613_v48 }
 0x25e   :  { %9264 = vmatmul.mubr.msk.f32.gmra.mrb[238].mxu0 %vm2202_vm2, %v12405_v2  ;;  %9622 = vmatprep.subr.bf16.mxu1 %v9621_v59 }
 0x25f   :  { %9272 = vmatmul.mubr.msk.f32.gmra.mrb[238].mxu1 %vm2202_vm2, %v12405_v2  ;;  %9616 = vmatpush1.bf16.msra.mxu0 %v9615_v57  ;;  %v2993_v39 = vpop.f32.mrb[160].mxu0 }
 0x260   :  { %9624 = vmatpush1.bf16.msra.mxu1 %v9623_v51  ;;  %v2994_v31 = vadd.f32 %v2993_v39, %v12262_v49  ;;  %v3082_v43 = vpop.f32.mrb[160].mxu1  ;;  %4573 = vmatprep.mubr.f32.mxu0 %v14343_v63  ;;  %v2995_v38 = vpop.f32.mrb[161].mxu0 }
 0x261   :  { %v3083_v61 = vadd.f32 %v3082_v43, %v12262_v49  ;;  %4686 = vmatprep.mubr.f32.mxu1 %v14343_v63  ;;  %v2996_v33 = vadd.f32 %v2995_v38, %v12262_v49  ;;  %v3084_v29 = vpop.f32.mrb[161].mxu1 }
 0x262   :  { %10351 = vtanh.f32 %v2994_v31  ;;  %v3085_v42 = vadd.f32 %v3084_v29, %v12262_v49  ;;  %9273 = vmatmul.mubr.msk.f32.vlgmr.msra.gmra.mrb[240].mxu0 %vm2202_vm2, %v12313_v32 }
 0x263   :  { %10353 = vtanh.f32 %v3083_v61  ;;  %9281 = vmatmul.mubr.msk.f32.vlgmr.msra.gmra.mrb[240].mxu1 %vm2202_vm2, %v12313_v32  ;;  %v2999_v19 = vpop.f32.mrb[162].mxu0  ;;  %4579 = vmatprep.mubr.f32.mxu0 %v14343_v63 }
 0x264   :  { %10355 = vtanh.f32 %v2996_v33  ;;  %v3000_v62 = vadd.f32 %v2999_v19, %v12268_v18  ;;  %v3088_v57 = vpop.f32.mrb[162].mxu1  ;;  %4692 = vmatprep.mubr.f32.mxu1 %v14343_v63  ;;  %v3001_v34 = vpop.f32.mrb[163].mxu0 }
 0x265   :  { %10357 = vtanh.f32 %v3085_v42  ;;  %v3089_v51 = vadd.f32 %v3088_v57, %v12268_v18  ;;  %v3002_v28 = vadd.f32 %v3001_v34, %v12268_v18  ;;  %v3090_v48 = vpop.f32.mrb[163].mxu1 }
 0x266   :  { %10359 = vtanh.f32 %v3000_v62  ;;  %v3091_v59 = vadd.f32 %v3090_v48, %v12268_v18  ;;  %9274 = vmatmul.mubr.msk.f32.gmra.mrb[242].mxu0 %vm2202_vm2, %v12327_v50 }
 0x267   :  { %10361 = vtanh.f32 %v3089_v51  ;;  %9282 = vmatmul.mubr.msk.f32.gmra.mrb[242].mxu1 %vm2202_vm2, %v12327_v50  ;;  %v3005_v39 = vpop.f32.mrb[164].mxu0  ;;  %4585 = vmatprep.mubr.f32.mxu0 %v14343_v63 }
 0x268   :  { %10363 = vtanh.f32 %v3002_v28  ;;  %v3006_v31 = vadd.f32 %v3005_v39, %v12274_v4  ;;  %v3094_v43 = vpop.f32.mrb[164].mxu1  ;;  %4698 = vmatprep.mubr.f32.mxu1 %v14343_v63  ;;  %v3007_v38 = vpop.f32.mrb[165].mxu0 }
 0x269   :  { %10365 = vtanh.f32 %v3091_v59  ;;  %v3095_v61 = vadd.f32 %v3094_v43, %v12274_v4  ;;  %v3008_v33 = vadd.f32 %v3007_v38, %v12274_v4  ;;  %v3096_v29 = vpop.f32.mrb[165].mxu1 }
 0x26a   :  { %10367 = vtanh.f32 %v3006_v31  ;;  %v3097_v42 = vadd.f32 %v3096_v29, %v12274_v4  ;;  %9275 = vmatmul.mubr.msk.f32.gmra.mrb[244].mxu0 %vm2202_vm2, %v12342_v36 }
 0x26b   :  { %10369 = vtanh.f32 %v3095_v61  ;;  %9283 = vmatmul.mubr.msk.f32.gmra.mrb[244].mxu1 %vm2202_vm2, %v12342_v36  ;;  %v3011_v19 = vpop.f32.mrb[166].mxu0  ;;  %4591 = vmatprep.mubr.f32.mxu0 %v14343_v63 }
 0x26c   :  { %v10352_v62 = vpop.eup %10351  ;;  %10371 = vtanh.f32 %v3008_v33  ;;  %v3012_v57 = vadd.f32 %v3011_v19, %v12280_v55  ;;  %v3100_v34 = vpop.f32.mrb[166].mxu1  ;;  %4704 = vmatprep.mubr.f32.mxu1 %v14343_v63 }
 0x26d   :  { %v3013_v51 = vpop.f32.mrb[167].mxu0  ;;  %v10354_v28 = vpop.eup %10353  ;;  %10373 = vtanh.f32 %v3097_v42  ;;  %v3101_v48 = vadd.f32 %v3100_v34, %v12280_v55 }
 0x26e   :  { %v3014_v59 = vadd.f32 %v3013_v51, %v12280_v55  ;;  %v3102_v39 = vpop.f32.mrb[167].mxu1  ;;  %v10356_v31 = vpop.eup %10355  ;;  %10375 = vtanh.f32 %v3012_v57  ;;  %9276 = vmatmul.mubr.msk.f32.gmra.mrb[246].mxu0 %vm2202_vm2, %v12357_v60 }
 0x26f   :  { %v3103_v43 = vadd.f32 %v3102_v39, %v12280_v55  ;;  %v10358_v38 = vpop.eup %10357  ;;  %10377 = vtanh.f32 %v3101_v48  ;;  %9284 = vmatmul.mubr.msk.f32.gmra.mrb[246].mxu1 %vm2202_vm2, %v12357_v60  ;;  %4597 = vmatprep.mubr.f32.mxu0 %v14343_v63 }
 0x270   :  { %v10360_v61 = vpop.eup %10359  ;;  %10379 = vtanh.f32 %v3014_v59  ;;  %4710 = vmatprep.mubr.f32.mxu1 %v14343_v63 }
 0x271   :  { %v10362_v33 = vpop.eup %10361  ;;  %10381 = vtanh.f32 %v3103_v43  ;;  %v9627_v29 = vpack.c.bf16 %v10360_v61, %v10352_v62 }
 0x272   :  { %v10364_v42 = vpop.eup %10363  ;;  %9277 = vmatmul.mubr.msk.f32.gmra.mrb[248].mxu0 %vm2202_vm2, %v12372_v37  ;;  %v9635_v19 = vpack.c.bf16 %v10362_v33, %v10354_v28 }
 0x273   :  { %v10366_v57 = vpop.eup %10365  ;;  %9285 = vmatmul.mubr.msk.f32.gmra.mrb[248].mxu1 %vm2202_vm2, %v12372_v37  ;;  %4603 = vmatprep.mubr.f32.mxu0 %v14343_v63  ;;  %v9625_v34 = vpack.c.bf16 %v10364_v42, %v10356_v31 }
 0x274   :  { %v10368_v51 = vpop.eup %10367  ;;  %4716 = vmatprep.mubr.f32.mxu1 %v14343_v63  ;;  %v9633_v48 = vpack.c.bf16 %v10366_v57, %v10358_v38 }
 0x275   :  { %v10370_v59 = vpop.eup %10369  ;;  %9626 = vmatprep.subr.bf16.mxu0 %v9625_v34 }
 0x276   :  { %v10372_v39 = vpop.eup %10371  ;;  %9278 = vmatmul.mubr.msk.f32.gmra.mrb[250].mxu0 %vm2202_vm2, %v12383_v58  ;;  %9634 = vmatprep.subr.bf16.mxu1 %v9633_v48 }
 0x277   :  { %v10374_v62 = vpop.eup %10373  ;;  %9286 = vmatmul.mubr.msk.f32.gmra.mrb[250].mxu1 %vm2202_vm2, %v12383_v58  ;;  %9628 = vmatpush1.bf16.msra.mxu0 %v9627_v29 }
 0x278   :  { %v10376_v28 = vpop.eup %10375  ;;  %9636 = vmatpush1.bf16.msra.mxu1 %v9635_v19  ;;  %4609 = vmatprep.mubr.f32.mxu0 %v14343_v63 }
 0x279   :  { %v10378_v31 = vpop.eup %10377  ;;  %4722 = vmatprep.mubr.f32.mxu1 %v14343_v63  ;;  %v9631_v43 = vpack.c.bf16 %v10376_v28, %v10368_v51 }
 0x27a   :  { %v10380_v38 = vpop.eup %10379  ;;  %9279 = vmatmul.mubr.msk.f32.gmra.mrb[252].mxu0 %vm2202_vm2, %v12393_v52  ;;  %v9639_v61 = vpack.c.bf16 %v10378_v31, %v10370_v59 }
 0x27b   :  { %v10382_v33 = vpop.eup %10381  ;;  %9287 = vmatmul.mubr.msk.f32.gmra.mrb[252].mxu1 %vm2202_vm2, %v12393_v52  ;;  %4615 = vmatprep.mubr.f32.mxu0 %v14343_v63  ;;  %v9629_v29 = vpack.c.bf16 %v10380_v38, %v10372_v39 }
 0x27c   :  { %4728 = vmatprep.mubr.f32.mxu1 %v14343_v63  ;;  %v9637_v42 = vpack.c.bf16 %v10382_v33, %v10374_v62 }
 0x27d   :  { %9630 = vmatprep.subr.bf16.mxu0 %v9629_v29 }
 0x27e   :  { %9280 = vmatmul.mubr.msk.f32.gmra.mrb[254].mxu0 %vm2202_vm2, %v12405_v2  ;;  %9638 = vmatprep.subr.bf16.mxu1 %v9637_v42 }
 0x27f   :  { %9288 = vmatmul.mubr.msk.f32.gmra.mrb[254].mxu1 %vm2202_vm2, %v12405_v2  ;;  %9632 = vmatpush1.bf16.msra.mxu0 %v9631_v43  ;;  %v3171_v19 = vpop.f32.mrb[168].mxu0 }
 0x280   :  { %9640 = vmatpush1.bf16.msra.mxu1 %v9639_v61  ;;  %v3172_v57 = vadd.f32 %v3171_v19, %v12262_v49  ;;  %v3260_v34 = vpop.f32.mrb[168].mxu1  ;;  %4799 = vmatprep.mubr.f32.mxu0 %v14343_v63  ;;  %v3173_v51 = vpop.f32.mrb[169].mxu0 }
 0x281   :  { %v3261_v48 = vadd.f32 %v3260_v34, %v12262_v49  ;;  %4912 = vmatprep.mubr.f32.mxu1 %v14343_v63  ;;  %v3174_v59 = vadd.f32 %v3173_v51, %v12262_v49  ;;  %v3262_v39 = vpop.f32.mrb[169].mxu1 }
 0x282   :  { %10383 = vtanh.f32 %v3172_v57  ;;  %v3263_v62 = vadd.f32 %v3262_v39, %v12262_v49  ;;  %9289 = vmatmul.mubr.msk.f32.vlgmr.msra.gmra.mrb[0].mxu0 %vm2202_vm2, %v12313_v32 }
 0x283   :  { %10385 = vtanh.f32 %v3261_v48  ;;  %9297 = vmatmul.mubr.msk.f32.vlgmr.msra.gmra.mrb[0].mxu1 %vm2202_vm2, %v12313_v32  ;;  %v3177_v28 = vpop.f32.mrb[170].mxu0  ;;  %4805 = vmatprep.mubr.f32.mxu0 %v14343_v63 }
 0x284   :  { %10387 = vtanh.f32 %v3174_v59  ;;  %v3178_v31 = vadd.f32 %v3177_v28, %v12268_v18  ;;  %v3266_v43 = vpop.f32.mrb[170].mxu1  ;;  %4918 = vmatprep.mubr.f32.mxu1 %v14343_v63  ;;  %v3179_v38 = vpop.f32.mrb[171].mxu0 }
 0x285   :  { %10389 = vtanh.f32 %v3263_v62  ;;  %v3267_v61 = vadd.f32 %v3266_v43, %v12268_v18  ;;  %v3180_v33 = vadd.f32 %v3179_v38, %v12268_v18  ;;  %v3268_v29 = vpop.f32.mrb[171].mxu1 }
 0x286   :  { %10391 = vtanh.f32 %v3178_v31  ;;  %v3269_v42 = vadd.f32 %v3268_v29, %v12268_v18  ;;  %9290 = vmatmul.mubr.msk.f32.gmra.mrb[2].mxu0 %vm2202_vm2, %v12327_v50 }
 0x287   :  { %10393 = vtanh.f32 %v3267_v61  ;;  %9298 = vmatmul.mubr.msk.f32.gmra.mrb[2].mxu1 %vm2202_vm2, %v12327_v50  ;;  %v3183_v32 = vpop.f32.mrb[172].mxu0  ;;  %4811 = vmatprep.mubr.f32.mxu0 %v14343_v63 }
 0x288   :  { %10395 = vtanh.f32 %v3180_v33  ;;  %v3184_v19 = vadd.f32 %v3183_v32, %v12274_v4  ;;  %v3272_v57 = vpop.f32.mrb[172].mxu1  ;;  %4924 = vmatprep.mubr.f32.mxu1 %v14343_v63  ;;  %v3185_v34 = vpop.f32.mrb[173].mxu0 }
 0x289   :  { %10397 = vtanh.f32 %v3269_v42  ;;  %v3273_v51 = vadd.f32 %v3272_v57, %v12274_v4  ;;  %v3186_v48 = vadd.f32 %v3185_v34, %v12274_v4  ;;  %v3274_v59 = vpop.f32.mrb[173].mxu1 }
 0x28a   :  { %10399 = vtanh.f32 %v3184_v19  ;;  %v3275_v39 = vadd.f32 %v3274_v59, %v12274_v4  ;;  %9291 = vmatmul.mubr.msk.f32.gmra.mrb[4].mxu0 %vm2202_vm2, %v12342_v36 }
 0x28b   :  { %10401 = vtanh.f32 %v3273_v51  ;;  %9299 = vmatmul.mubr.msk.f32.gmra.mrb[4].mxu1 %vm2202_vm2, %v12342_v36  ;;  %v3189_v50 = vpop.f32.mrb[174].mxu0  ;;  %4817 = vmatprep.mubr.f32.mxu0 %v14343_v63 }
 0x28c   :  { %v10384_v62 = vpop.eup %10383  ;;  %10403 = vtanh.f32 %v3186_v48  ;;  %v3190_v28 = vadd.f32 %v3189_v50, %v12280_v55  ;;  %v3278_v31 = vpop.f32.mrb[174].mxu1  ;;  %4930 = vmatprep.mubr.f32.mxu1 %v14343_v63 }
 0x28d   :  { %v3191_v43 = vpop.f32.mrb[175].mxu0  ;;  %v10386_v38 = vpop.eup %10385  ;;  %10405 = vtanh.f32 %v3275_v39  ;;  %v3279_v61 = vadd.f32 %v3278_v31, %v12280_v55 }
 0x28e   :  { %v3192_v33 = vadd.f32 %v3191_v43, %v12280_v55  ;;  %v3280_v29 = vpop.f32.mrb[175].mxu1  ;;  %v10388_v42 = vpop.eup %10387  ;;  %10407 = vtanh.f32 %v3190_v28  ;;  %9292 = vmatmul.mubr.msk.f32.gmra.mrb[6].mxu0 %vm2202_vm2, %v12357_v60 }
 0x28f   :  { %v3281_v36 = vadd.f32 %v3280_v29, %v12280_v55  ;;  %v10390_v32 = vpop.eup %10389  ;;  %10409 = vtanh.f32 %v3279_v61  ;;  %9300 = vmatmul.mubr.msk.f32.gmra.mrb[6].mxu1 %vm2202_vm2, %v12357_v60  ;;  %4823 = vmatprep.mubr.f32.mxu0 %v14343_v63 }
 0x290   :  { %v10392_v19 = vpop.eup %10391  ;;  %10411 = vtanh.f32 %v3192_v33  ;;  %4936 = vmatprep.mubr.f32.mxu1 %v14343_v63 }
 0x291   :  { %v10394_v57 = vpop.eup %10393  ;;  %10413 = vtanh.f32 %v3281_v36  ;;  %v9643_v34 = vpack.c.bf16 %v10392_v19, %v10384_v62 }
 0x292   :  { %v10396_v51 = vpop.eup %10395  ;;  %9293 = vmatmul.mubr.msk.f32.gmra.mrb[8].mxu0 %vm2202_vm2, %v12372_v37  ;;  %v9651_v48 = vpack.c.bf16 %v10394_v57, %v10386_v38 }
 0x293   :  { %v10398_v59 = vpop.eup %10397  ;;  %9301 = vmatmul.mubr.msk.f32.gmra.mrb[8].mxu1 %vm2202_vm2, %v12372_v37  ;;  %4829 = vmatprep.mubr.f32.mxu0 %v14343_v63  ;;  %v9641_v60 = vpack.c.bf16 %v10396_v51, %v10388_v42 }
 0x294   :  { %v10400_v39 = vpop.eup %10399  ;;  %4942 = vmatprep.mubr.f32.mxu1 %v14343_v63  ;;  %v9649_v50 = vpack.c.bf16 %v10398_v59, %v10390_v32 }
 0x295   :  { %v10402_v28 = vpop.eup %10401  ;;  %9642 = vmatprep.subr.bf16.mxu0 %v9641_v60 }
 0x296   :  { %v10404_v31 = vpop.eup %10403  ;;  %9294 = vmatmul.mubr.msk.f32.gmra.mrb[10].mxu0 %vm2202_vm2, %v12383_v58  ;;  %9650 = vmatprep.subr.bf16.mxu1 %v9649_v50 }
 0x297   :  { %v10406_v62 = vpop.eup %10405  ;;  %9302 = vmatmul.mubr.msk.f32.gmra.mrb[10].mxu1 %vm2202_vm2, %v12383_v58  ;;  %9644 = vmatpush1.bf16.msra.mxu0 %v9643_v34 }
 0x298   :  { %v10408_v37 = vpop.eup %10407  ;;  %9652 = vmatpush1.bf16.msra.mxu1 %v9651_v48  ;;  %4835 = vmatprep.mubr.f32.mxu0 %v14343_v63 }
 0x299   :  { %v10410_v43 = vpop.eup %10409  ;;  %4948 = vmatprep.mubr.f32.mxu1 %v14343_v63  ;;  %v9647_v38 = vpack.c.bf16 %v10408_v37, %v10400_v39 }
 0x29a   :  { %v10412_v61 = vpop.eup %10411  ;;  %9295 = vmatmul.mubr.msk.f32.gmra.mrb[12].mxu0 %vm2202_vm2, %v12393_v52  ;;  %v9655_v33 = vpack.c.bf16 %v10410_v43, %v10402_v28  ;;  %v12692_v43 = vld [vmem:[%s14319_s2 + $0x28] sm:$0xff] }
 0x29b   :  { %v10414_v29 = vpop.eup %10413  ;;  %9303 = vmatmul.mubr.msk.f32.gmra.mrb[12].mxu1 %vm2202_vm2, %v12393_v52  ;;  %4841 = vmatprep.mubr.f32.mxu0 %v14343_v63  ;;  %v9645_v58 = vpack.c.bf16 %v10412_v61, %v10404_v31 }
 0x29c   :  { %4954 = vmatprep.mubr.f32.mxu1 %v14343_v63  ;;  %v9653_v42 = vpack.c.bf16 %v10414_v29, %v10406_v62 }
 0x29d   :  { %9646 = vmatprep.subr.bf16.mxu0 %v9645_v58 }
 0x29e   :  { %9296 = vmatmul.mubr.msk.f32.gmra.mrb[14].mxu0 %vm2202_vm2, %v12405_v2  ;;  %9654 = vmatprep.subr.bf16.mxu1 %v9653_v42 }
 0x29f   :  { %9304 = vmatmul.mubr.msk.f32.gmra.mrb[14].mxu1 %vm2202_vm2, %v12405_v2  ;;  %9648 = vmatpush1.bf16.msra.mxu0 %v9647_v38  ;;  %v3349_v36 = vpop.f32.mrb[176].mxu0  ;;  %v12677_v2 = vld [vmem:[%s14319_s2 + $0x20] sm:$0xff] }
 0x2a0   :  { %9656 = vmatpush1.bf16.msra.mxu1 %v9655_v33  ;;  %v3350_v32 = vadd.f32 %v3349_v36, %v12262_v49  ;;  %v3438_v52 = vpop.f32.mrb[176].mxu1  ;;  %5025 = vmatprep.mubr.f32.mxu0 %v14343_v63  ;;  %v3351_v19 = vpop.f32.mrb[177].mxu0 }
 0x2a1   :  { %v3439_v57 = vadd.f32 %v3438_v52, %v12262_v49  ;;  %5138 = vmatprep.mubr.f32.mxu1 %v14343_v63  ;;  %v3352_v34 = vadd.f32 %v3351_v19, %v12262_v49  ;;  %v3440_v51 = vpop.f32.mrb[177].mxu1  ;;  %v12707_v52 = vld [vmem:[%s14319_s2 + $0x30] sm:$0xff] }
 0x2a2   :  { %10415 = vtanh.f32 %v3350_v32  ;;  %v3441_v48 = vadd.f32 %v3440_v51, %v12262_v49  ;;  %9305 = vmatmul.mubr.msk.f32.vlgmr.msra.gmra.mrb[16].mxu0 %vm2202_vm2, %v12677_v2 }
 0x2a3   :  { %10417 = vtanh.f32 %v3439_v57  ;;  %9313 = vmatmul.mubr.msk.f32.vlgmr.msra.gmra.mrb[16].mxu1 %vm2202_vm2, %v12677_v2  ;;  %v3355_v59 = vpop.f32.mrb[178].mxu0  ;;  %5031 = vmatprep.mubr.f32.mxu0 %v14343_v63 }
 0x2a4   :  { %10419 = vtanh.f32 %v3352_v34  ;;  %v3356_v60 = vadd.f32 %v3355_v59, %v12268_v18  ;;  %v3444_v39 = vpop.f32.mrb[178].mxu1  ;;  %5144 = vmatprep.mubr.f32.mxu1 %v14343_v63  ;;  %v3357_v50 = vpop.f32.mrb[179].mxu0 }
 0x2a5   :  { %10421 = vtanh.f32 %v3441_v48  ;;  %v3445_v28 = vadd.f32 %v3444_v39, %v12268_v18  ;;  %v3358_v31 = vadd.f32 %v3357_v50, %v12268_v18  ;;  %v3446_v62 = vpop.f32.mrb[179].mxu1 }
 0x2a6   :  { %10423 = vtanh.f32 %v3356_v60  ;;  %v3447_v37 = vadd.f32 %v3446_v62, %v12268_v18  ;;  %9306 = vmatmul.mubr.msk.f32.gmra.mrb[18].mxu0 %vm2202_vm2, %v12692_v43  ;;  %v12722_v62 = vld [vmem:[%s14319_s2 + $0x38] sm:$0xff] }
 0x2a7   :  { %10425 = vtanh.f32 %v3445_v28  ;;  %9314 = vmatmul.mubr.msk.f32.gmra.mrb[18].mxu1 %vm2202_vm2, %v12692_v43  ;;  %v3361_v38 = vpop.f32.mrb[180].mxu0  ;;  %5037 = vmatprep.mubr.f32.mxu0 %v14343_v63 }
 0x2a8   :  { %10427 = vtanh.f32 %v3358_v31  ;;  %v3362_v61 = vadd.f32 %v3361_v38, %v12274_v4  ;;  %v3450_v33 = vpop.f32.mrb[180].mxu1  ;;  %5150 = vmatprep.mubr.f32.mxu1 %v14343_v63  ;;  %v3363_v29 = vpop.f32.mrb[181].mxu0 }
 0x2a9   :  { %10429 = vtanh.f32 %v3447_v37  ;;  %v3451_v58 = vadd.f32 %v3450_v33, %v12274_v4  ;;  %v3364_v42 = vadd.f32 %v3363_v29, %v12274_v4  ;;  %v3452_v36 = vpop.f32.mrb[181].mxu1 }
 0x2aa   :  { %10431 = vtanh.f32 %v3362_v61  ;;  %v3453_v32 = vadd.f32 %v3452_v36, %v12274_v4  ;;  %9307 = vmatmul.mubr.msk.f32.gmra.mrb[20].mxu0 %vm2202_vm2, %v12707_v52 }
 0x2ab   :  { %10433 = vtanh.f32 %v3451_v58  ;;  %9315 = vmatmul.mubr.msk.f32.gmra.mrb[20].mxu1 %vm2202_vm2, %v12707_v52  ;;  %v3367_v19 = vpop.f32.mrb[182].mxu0  ;;  %5043 = vmatprep.mubr.f32.mxu0 %v14343_v63  ;;  %v12733_v58 = vld [vmem:[%s14319_s2 + $0x40] sm:$0xff] }
 0x2ac   :  { %v10416_v57 = vpop.eup %10415  ;;  %10435 = vtanh.f32 %v3364_v42  ;;  %v3368_v34 = vadd.f32 %v3367_v19, %v12280_v55  ;;  %v3456_v51 = vpop.f32.mrb[182].mxu1  ;;  %5156 = vmatprep.mubr.f32.mxu1 %v14343_v63 }
 0x2ad   :  { %v3369_v48 = vpop.f32.mrb[183].mxu0  ;;  %v10418_v59 = vpop.eup %10417  ;;  %10437 = vtanh.f32 %v3453_v32  ;;  %v3457_v60 = vadd.f32 %v3456_v51, %v12280_v55 }
 0x2ae   :  { %v3370_v39 = vadd.f32 %v3369_v48, %v12280_v55  ;;  %v3458_v50 = vpop.f32.mrb[183].mxu1  ;;  %v10420_v28 = vpop.eup %10419  ;;  %10439 = vtanh.f32 %v3368_v34  ;;  %9308 = vmatmul.mubr.msk.f32.gmra.mrb[22].mxu0 %vm2202_vm2, %v12722_v62  ;;  %v12744_v48 = vld [vmem:[%s14319_s2 + $0x48] sm:$0xff] }
 0x2af   :  { %v3459_v31 = vadd.f32 %v3458_v50, %v12280_v55  ;;  %v10422_v37 = vpop.eup %10421  ;;  %10441 = vtanh.f32 %v3457_v60  ;;  %9316 = vmatmul.mubr.msk.f32.gmra.mrb[22].mxu1 %vm2202_vm2, %v12722_v62  ;;  %5049 = vmatprep.mubr.f32.mxu0 %v14343_v63 }
 0x2b0   :  { %v10424_v38 = vpop.eup %10423  ;;  %10443 = vtanh.f32 %v3370_v39  ;;  %5162 = vmatprep.mubr.f32.mxu1 %v14343_v63 }
 0x2b1   :  { %v10426_v61 = vpop.eup %10425  ;;  %10445 = vtanh.f32 %v3459_v31  ;;  %v9659_v33 = vpack.c.bf16 %v10424_v38, %v10416_v57  ;;  %v12755_v31 = vld [vmem:[%s14319_s2 + $0x50] sm:$0xff] }
 0x2b2   :  { %v10428_v29 = vpop.eup %10427  ;;  %9309 = vmatmul.mubr.msk.f32.gmra.mrb[24].mxu0 %vm2202_vm2, %v12733_v58  ;;  %v9667_v42 = vpack.c.bf16 %v10426_v61, %v10418_v59 }
 0x2b3   :  { %v10430_v36 = vpop.eup %10429  ;;  %9317 = vmatmul.mubr.msk.f32.gmra.mrb[24].mxu1 %vm2202_vm2, %v12733_v58  ;;  %5055 = vmatprep.mubr.f32.mxu0 %v14343_v63  ;;  %v9657_v32 = vpack.c.bf16 %v10428_v29, %v10420_v28  ;;  %v12766_v29 = vld [vmem:[%s14319_s2 + $0x58] sm:$0xff] }
 0x2b4   :  { %v10432_v19 = vpop.eup %10431  ;;  %5168 = vmatprep.mubr.f32.mxu1 %v14343_v63  ;;  %v9665_v57 = vpack.c.bf16 %v10430_v36, %v10422_v37 }
 0x2b5   :  { %v10434_v34 = vpop.eup %10433  ;;  %9658 = vmatprep.subr.bf16.mxu0 %v9657_v32 }
 0x2b6   :  { %v10436_v51 = vpop.eup %10435  ;;  %9310 = vmatmul.mubr.msk.f32.gmra.mrb[26].mxu0 %vm2202_vm2, %v12744_v48  ;;  %9666 = vmatprep.subr.bf16.mxu1 %v9665_v57 }
 0x2b7   :  { %v10438_v59 = vpop.eup %10437  ;;  %9318 = vmatmul.mubr.msk.f32.gmra.mrb[26].mxu1 %vm2202_vm2, %v12744_v48  ;;  %9660 = vmatpush1.bf16.msra.mxu0 %v9659_v33 }
 0x2b8   :  { %v10440_v60 = vpop.eup %10439  ;;  %9668 = vmatpush1.bf16.msra.mxu1 %v9667_v42  ;;  %5061 = vmatprep.mubr.f32.mxu0 %v14343_v63 }
 0x2b9   :  { %v10442_v39 = vpop.eup %10441  ;;  %5174 = vmatprep.mubr.f32.mxu1 %v14343_v63  ;;  %v9663_v50 = vpack.c.bf16 %v10440_v60, %v10432_v19 }
 0x2ba   :  { %v10444_v28 = vpop.eup %10443  ;;  %9311 = vmatmul.mubr.msk.f32.gmra.mrb[28].mxu0 %vm2202_vm2, %v12755_v31  ;;  %v9671_v37 = vpack.c.bf16 %v10442_v39, %v10434_v34 }
 0x2bb   :  { %v10446_v38 = vpop.eup %10445  ;;  %9319 = vmatmul.mubr.msk.f32.gmra.mrb[28].mxu1 %vm2202_vm2, %v12755_v31  ;;  %5067 = vmatprep.mubr.f32.mxu0 %v14343_v63  ;;  %v9661_v61 = vpack.c.bf16 %v10444_v28, %v10436_v51 }
 0x2bc   :  { %5180 = vmatprep.mubr.f32.mxu1 %v14343_v63  ;;  %v9669_v33 = vpack.c.bf16 %v10446_v38, %v10438_v59 }
 0x2bd   :  { %9662 = vmatprep.subr.bf16.mxu0 %v9661_v61 }
 0x2be   :  { %9312 = vmatmul.mubr.msk.f32.gmra.mrb[30].mxu0 %vm2202_vm2, %v12766_v29  ;;  %9670 = vmatprep.subr.bf16.mxu1 %v9669_v33 }
 0x2bf   :  { %9320 = vmatmul.mubr.msk.f32.gmra.mrb[30].mxu1 %vm2202_vm2, %v12766_v29  ;;  %9664 = vmatpush1.bf16.msra.mxu0 %v9663_v50  ;;  %v3527_v42 = vpop.f32.mrb[184].mxu0 }
 0x2c0   :  { %9672 = vmatpush1.bf16.msra.mxu1 %v9671_v37  ;;  %v3528_v36 = vadd.f32 %v3527_v42, %v12262_v49  ;;  %v3616_v32 = vpop.f32.mrb[184].mxu1  ;;  %5251 = vmatprep.mubr.f32.mxu0 %v14343_v63  ;;  %v3529_v19 = vpop.f32.mrb[185].mxu0 }
 0x2c1   :  { %v3617_v57 = vadd.f32 %v3616_v32, %v12262_v49  ;;  %5364 = vmatprep.mubr.f32.mxu1 %v14343_v63  ;;  %v3530_v34 = vadd.f32 %v3529_v19, %v12262_v49  ;;  %v3618_v51 = vpop.f32.mrb[185].mxu1 }
 0x2c2   :  { %10447 = vtanh.f32 %v3528_v36  ;;  %v3619_v59 = vadd.f32 %v3618_v51, %v12262_v49  ;;  %9321 = vmatmul.mubr.msk.f32.vlgmr.msra.gmra.mrb[32].mxu0 %vm2202_vm2, %v12677_v2 }
 0x2c3   :  { %10449 = vtanh.f32 %v3617_v57  ;;  %9329 = vmatmul.mubr.msk.f32.vlgmr.msra.gmra.mrb[32].mxu1 %vm2202_vm2, %v12677_v2  ;;  %v3533_v60 = vpop.f32.mrb[186].mxu0  ;;  %5257 = vmatprep.mubr.f32.mxu0 %v14343_v63 }
 0x2c4   :  { %10451 = vtanh.f32 %v3530_v34  ;;  %v3534_v39 = vadd.f32 %v3533_v60, %v12268_v18  ;;  %v3622_v50 = vpop.f32.mrb[186].mxu1  ;;  %5370 = vmatprep.mubr.f32.mxu1 %v14343_v63  ;;  %v3535_v28 = vpop.f32.mrb[187].mxu0 }
 0x2c5   :  { %10453 = vtanh.f32 %v3619_v59  ;;  %v3623_v49 = vadd.f32 %v3622_v50, %v12268_v18  ;;  %v3536_v37 = vadd.f32 %v3535_v28, %v12268_v18  ;;  %v3624_v38 = vpop.f32.mrb[187].mxu1  ;;  %v12797_v34 = vpop.permute.xlu0 %86 }
 0x2c6   :  { %10455 = vtanh.f32 %v3534_v39  ;;  %v3625_v61 = vadd.f32 %v3624_v38, %v12268_v18  ;;  %9322 = vmatmul.mubr.msk.f32.gmra.mrb[34].mxu0 %vm2202_vm2, %v12692_v43 }
 0x2c7   :  { %10457 = vtanh.f32 %v3623_v49  ;;  %9330 = vmatmul.mubr.msk.f32.gmra.mrb[34].mxu1 %vm2202_vm2, %v12692_v43  ;;  %v3539_v33 = vpop.f32.mrb[188].mxu0  ;;  %5263 = vmatprep.mubr.f32.mxu0 %v14343_v63 }
 0x2c8   :  { %10459 = vtanh.f32 %v3536_v37  ;;  %v3540_v42 = vadd.f32 %v3539_v33, %v12274_v4  ;;  %v3628_v36 = vpop.f32.mrb[188].mxu1  ;;  %5376 = vmatprep.mubr.f32.mxu1 %v14343_v63  ;;  %v3541_v32 = vpop.f32.mrb[189].mxu0 }
 0x2c9   :  { %10461 = vtanh.f32 %v3625_v61  ;;  %v3629_v18 = vadd.f32 %v3628_v36, %v12274_v4  ;;  %v3542_v19 = vadd.f32 %v3541_v32, %v12274_v4  ;;  %v3630_v57 = vpop.f32.mrb[189].mxu1  ;;  %v12811_v33 = vpop.permute.xlu1 %91 }
 0x2ca   :  { %10463 = vtanh.f32 %v3540_v42  ;;  %v3631_v51 = vadd.f32 %v3630_v57, %v12274_v4  ;;  %9323 = vmatmul.mubr.msk.f32.gmra.mrb[36].mxu0 %vm2202_vm2, %v12707_v52 }
 0x2cb   :  { %10465 = vtanh.f32 %v3629_v18  ;;  %9331 = vmatmul.mubr.msk.f32.gmra.mrb[36].mxu1 %vm2202_vm2, %v12707_v52  ;;  %v3545_v59 = vpop.f32.mrb[190].mxu0  ;;  %5269 = vmatprep.mubr.f32.mxu0 %v14343_v63  ;;  %v12819_v18 = vpop.permute.xlu0 %3769 }
 0x2cc   :  { %v12805_v60 = vpop.eup %10447  ;;  %10467 = vtanh.f32 %v3542_v19  ;;  %v3546_v39 = vadd.f32 %v3545_v59, %v12280_v55  ;;  %v3634_v50 = vpop.f32.mrb[190].mxu1  ;;  %5382 = vmatprep.mubr.f32.mxu1 %v14343_v63 }
 0x2cd   :  { %v3547_v28 = vpop.f32.mrb[191].mxu0  ;;  %v10450_v4 = vpop.eup %10449  ;;  %10469 = vtanh.f32 %v3631_v51  ;;  %v3635_v49 = vadd.f32 %v3634_v50, %v12280_v55 }
 0x2ce   :  { %v3548_v37 = vadd.f32 %v3547_v28, %v12280_v55  ;;  %v3636_v38 = vpop.f32.mrb[191].mxu1  ;;  %v10452_v61 = vpop.eup %10451  ;;  %10471 = vtanh.f32 %v3546_v39  ;;  %9324 = vmatmul.mubr.msk.f32.gmra.mrb[38].mxu0 %vm2202_vm2, %v12722_v62  ;;  %v313_v28 = vadd.f32 %v11596_v3, %v12797_v34  ;;  %v319_v3 = vadd.f32 %v11610_v9, %v12811_v33 }
 0x2cf   :  { %v3637_v42 = vadd.f32 %v3636_v38, %v12280_v55  ;;  %v10454_v36 = vpop.eup %10453  ;;  %10473 = vtanh.f32 %v3635_v49  ;;  %9332 = vmatmul.mubr.msk.f32.gmra.mrb[38].mxu1 %vm2202_vm2, %v12722_v62  ;;  %5275 = vmatprep.mubr.f32.mxu0 %v14343_v63  ;;  %v315_v49 = vadd.f32 %v11600_v7, %v12797_v34  ;;  %v12848_v46 = vpop.permute.xlu0 %96 }
 0x2d0   :  { %v10456_v32 = vpop.eup %10455  ;;  %10475 = vtanh.f32 %v3548_v37  ;;  %5388 = vmatprep.mubr.f32.mxu1 %v14343_v63  ;;  %v12836_v37 = vpop.permute.xlu1 %3774 }
 0x2d1   :  { %v10458_v19 = vpop.eup %10457  ;;  %10477 = vtanh.f32 %v3637_v42  ;;  %v9675_v55 = vpack.c.bf16 %v10456_v32, %v12805_v60  ;;  %v426_v60 = vadd.f32 %v11598_v6, %v12797_v34  ;;  %v432_v6 = vadd.f32 %v11612_v10, %v12811_v33 }
 0x2d2   :  { %v10460_v57 = vpop.eup %10459  ;;  %9325 = vmatmul.mubr.msk.f32.gmra.mrb[40].mxu0 %vm2202_vm2, %v12733_v58  ;;  %v9683_v51 = vpack.c.bf16 %v10458_v19, %v10450_v4  ;;  %v434_v10 = vadd.f32 %v11616_v12, %v12811_v33 }
 0x2d3   :  { %v10462_v59 = vpop.eup %10461  ;;  %9333 = vmatmul.mubr.msk.f32.gmra.mrb[40].mxu1 %vm2202_vm2, %v12733_v58  ;;  %5281 = vmatprep.mubr.f32.mxu0 %v14343_v63  ;;  %v9673_v39 = vpack.c.bf16 %v10460_v57, %v10452_v61  ;;  %v428_v61 = vadd.f32 %v11602_v8, %v12797_v34 }
 0x2d4   :  { %v12828_v50 = vpop.eup %10463  ;;  %v3897_v4 = vpop.f32.mrb[192].mxu0  ;;  %5394 = vmatprep.mubr.f32.mxu1 %v14343_v63  ;;  %v9681_v38 = vpack.c.bf16 %v10462_v59, %v10454_v36  ;;  %v321_v36 = vadd.f32 %v11614_v11, %v12811_v33 }
 0x2d5   :  { %v12839_v42 = vpop.eup %10465  ;;  %v3898_v32 = vadd.f32 %v3897_v4, %v12819_v18  ;;  %v4010_v7 = vpop.f32.mrb[192].mxu1  ;;  %9674 = vmatprep.subr.bf16.mxu0 %v9673_v39 }
 0x2d6   :  { %v3899_v19 = vpop.f32.mrb[193].mxu0  ;;  %v10468_v57 = vpop.eup %10467  ;;  %v4011_v59 = vadd.f32 %v4010_v7, %v12819_v18  ;;  %9326 = vmatmul.mubr.msk.f32.gmra.mrb[42].mxu0 %vm2202_vm2, %v12744_v48  ;;  %9682 = vmatprep.subr.bf16.mxu1 %v9681_v38  ;;  %v325_v7 = vadd.f32 %v11624_v14, %v12848_v46 }
 0x2d7   :  { %v3900_v8 = vadd.f32 %v3899_v19, %v12819_v18  ;;  %v4012_v41 = vpop.f32.mrb[193].mxu1  ;;  %v10470_v9 = vpop.eup %10469  ;;  %v5639_v39 = vmul.f32 %v3898_v32, %v313_v28  ;;  %9334 = vmatmul.mubr.msk.f32.gmra.mrb[42].mxu1 %vm2202_vm2, %v12744_v48  ;;  %9676 = vmatpush1.bf16.msra.mxu0 %v9675_v55 }
 0x2d8   :  { %v4013_v4 = vadd.f32 %v4012_v41, %v12819_v18  ;;  %v10472_v11 = vpop.eup %10471  ;;  %v5641_v19 = vmul.f32 %v4011_v59, %v426_v60  ;;  %9684 = vmatpush1.bf16.msra.mxu1 %v9683_v51  ;;  %v3903_v21 = vpop.f32.mrb[194].mxu0  ;;  %5287 = vmatprep.mubr.f32.mxu0 %v14343_v63 }
 0x2d9   :  { %v5640_v27 = vmul.f32 %v3900_v8, %v315_v49  ;;  %v10474_v38 = vpop.eup %10473  ;;  %10479 = vtanh.f32 %v5639_v39  ;;  %v3904_v28 = vadd.f32 %v3903_v21, %v12836_v37  ;;  %v4016_v41 = vpop.f32.mrb[194].mxu1  ;;  %5400 = vmatprep.mubr.f32.mxu1 %v14343_v63  ;;  %v9679_v55 = vpack.c.bf16 %v10472_v11, %v12828_v50 }
 0x2da   :  { %v5642_v12 = vmul.f32 %v4013_v4, %v428_v61  ;;  %v3905_v32 = vpop.f32.mrb[195].mxu0  ;;  %v10476_v56 = vpop.eup %10475  ;;  %10481 = vtanh.f32 %v5641_v19  ;;  %v4017_v14 = vadd.f32 %v4016_v41, %v12836_v37  ;;  %9327 = vmatmul.mubr.msk.f32.gmra.mrb[44].mxu0 %vm2202_vm2, %v12755_v31  ;;  %v9687_v21 = vpack.c.bf16 %v10474_v38, %v12839_v42 }
 0x2db   :  { %v12867_v54 = vpop.permute.xlu1 %101  ;;  %v3906_v51 = vadd.f32 %v3905_v32, %v12836_v37  ;;  %v4018_v60 = vpop.f32.mrb[195].mxu1  ;;  %10483 = vtanh.f32 %v5640_v27  ;;  %v5671_v61 = vmul.f32 %v3904_v28, %v319_v3  ;;  %9335 = vmatmul.mubr.msk.f32.gmra.mrb[44].mxu1 %vm2202_vm2, %v12755_v31  ;;  %5293 = vmatprep.mubr.f32.mxu0 %v14343_v63  ;;  %v9677_v50 = vpack.c.bf16 %v10476_v56, %v10468_v57 }
 0x2dc   :  { %v10478_v49 = vpop.eup %10477  ;;  %v4019_v59 = vadd.f32 %v4018_v60, %v12836_v37  ;;  %v12878_v8 = vpop.permute.xlu0 %3779  ;;  %10485 = vtanh.f32 %v5642_v12  ;;  %v5673_v39 = vmul.f32 %v4017_v14, %v432_v6  ;;  %5406 = vmatprep.mubr.f32.mxu1 %v14343_v63  ;;  %v438_v27 = vadd.f32 %v11626_v15, %v12848_v46 }
 0x2dd   :  { %v5672_v4 = vmul.f32 %v3906_v51, %v321_v36  ;;  %v3909_v11 = vpop.f32.mrb[196].mxu0  ;;  %v9685_v42 = vpack.c.bf16 %v10478_v49, %v10470_v9  ;;  %10487 = vtanh.f32 %v5671_v61  ;;  %v4022_v38 = vpop.f32.mrb[196].mxu1  ;;  %9678 = vmatprep.subr.bf16.mxu0 %v9677_v50  ;;  %v327_v56 = vadd.f32 %v11628_v16, %v12848_v46 }
 0x2de   :  { %v5674_v3 = vmul.f32 %v4019_v59, %v434_v10  ;;  %v3910_v19 = vadd.f32 %v3909_v11, %v12878_v8  ;;  %v3911_v28 = vpop.f32.mrb[197].mxu0  ;;  %10489 = vtanh.f32 %v5673_v39  ;;  %v4023_v6 = vadd.f32 %v4022_v38, %v12878_v8  ;;  %v4024_v36 = vpop.f32.mrb[197].mxu1  ;;  %9328 = vmatmul.mubr.msk.f32.gmra.mrb[46].mxu0 %vm2202_vm2, %v12766_v29 }
 0x2df   :  { %v3912_v57 = vadd.f32 %v3911_v28, %v12878_v8  ;;  %9686 = vmatprep.subr.bf16.mxu1 %v9685_v42  ;;  %v440_v15 = vadd.f32 %v11630_v17, %v12848_v46  ;;  %10491 = vtanh.f32 %v5672_v4  ;;  %v4025_v10 = vadd.f32 %v4024_v36, %v12878_v8  ;;  %9336 = vmatmul.mubr.msk.f32.gmra.mrb[46].mxu1 %vm2202_vm2, %v12766_v29  ;;  %v12897_v12 = vpop.permute.xlu1 %3784 }
 0x2e0   :  { %v5703_v9 = vmul.f32 %v3910_v19, %v325_v7  ;;  %9680 = vmatpush1.bf16.msra.mxu0 %v9679_v55  ;;  %v331_v16 = vadd.f32 %v11640_v20, %v12867_v54  ;;  %10493 = vtanh.f32 %v5674_v3  ;;  %v5705_v41 = vmul.f32 %v4023_v6, %v438_v27  ;;  %9688 = vmatpush1.bf16.msra.mxu1 %v9687_v21  ;;  %v3915_v14 = vpop.f32.mrb[198].mxu0 }
 0x2e1   :  { %v5704_v32 = vmul.f32 %v3912_v57, %v327_v56  ;;  %5477 = vmatprep.mubr.f32.mxu0 %v14343_v63  ;;  %v444_v17 = vadd.f32 %v11642_v22, %v12867_v54  ;;  %v5706_v7 = vmul.f32 %v4025_v10, %v440_v15  ;;  %v3916_v51 = vadd.f32 %v3915_v14, %v12897_v12  ;;  %v4028_v55 = vpop.f32.mrb[198].mxu1  ;;  %v3917_v20 = vpop.f32.mrb[199].mxu0 }
 0x2e2   :  { %10495 = vtanh.f32 %v5703_v9  ;;  %5590 = vmatprep.mubr.f32.mxu1 %v14343_v63  ;;  %v333_v60 = vadd.f32 %v11644_v23, %v12867_v54  ;;  %v4029_v21 = vadd.f32 %v4028_v55, %v12897_v12  ;;  %v3918_v49 = vadd.f32 %v3917_v20, %v12897_v12  ;;  %v4030_v61 = vpop.f32.mrb[199].mxu1 }
 0x2e3   :  { %10497 = vtanh.f32 %v5705_v41  ;;  %9337 = vmatmul.mubr.msk.f32.vlgmr.msra.gmra.mrb[48].mxu0 %vm2202_vm2, %v12677_v2  ;;  %v10480_v22 = vpop.eup %10479  ;;  %v446_v59 = vadd.f32 %v11646_v25, %v12867_v54  ;;  %v5735_v50 = vmul.f32 %v3916_v51, %v331_v16  ;;  %v4031_v39 = vadd.f32 %v4030_v61, %v12897_v12  ;;  %9345 = vmatmul.mubr.msk.f32.vlgmr.msra.gmra.mrb[48].mxu1 %vm2202_vm2, %v12677_v2 }
 0x2e4   :  { %10499 = vtanh.f32 %v5704_v32  ;;  %5483 = vmatprep.mubr.f32.mxu0 %v14343_v63  ;;  %v10482_v23 = vpop.eup %10481  ;;  %v5737_v4 = vmul.f32 %v4029_v21, %v444_v17  ;;  %v5736_v11 = vmul.f32 %v3918_v49, %v333_v60  ;;  %v12916_v42 = vpop.f32.mrb[200].mxu0  ;;  %5596 = vmatprep.mubr.f32.mxu1 %v14343_v63 }
 0x2e5   :  { %10501 = vtanh.f32 %v5706_v7  ;;  %v10484_v27 = vpop.eup %10483  ;;  %v5738_v25 = vmul.f32 %v4031_v39, %v446_v59  ;;  %v12919_v3 = vpop.f32.mrb[200].mxu1 }
 0x2e6   :  { %10503 = vtanh.f32 %v5735_v50  ;;  %v12921_v19 = vpop.f32.mrb[201].mxu0  ;;  %v10486_v38 = vpop.eup %10485 }
 0x2e7   :  { %10505 = vtanh.f32 %v5737_v4  ;;  %v12923_v2 = vpop.f32.mrb[201].mxu1  ;;  %9338 = vmatmul.mubr.msk.f32.gmra.mrb[50].mxu0 %vm2202_vm2, %v12692_v43  ;;  %v10488_v28 = vpop.eup %10487  ;;  %9346 = vmatmul.mubr.msk.f32.gmra.mrb[50].mxu1 %vm2202_vm2, %v12692_v43 }
 0x2e8   :  { %10507 = vtanh.f32 %v5736_v11  ;;  %5489 = vmatprep.mubr.f32.mxu0 %v14343_v63  ;;  %v10490_v56 = vpop.eup %10489  ;;  %v12930_v6 = vpop.f32.mrb[202].mxu0  ;;  %5602 = vmatprep.mubr.f32.mxu1 %v14343_v63  ;;  %v9691_v57 = vpack.c.bf16 %v10488_v28, %v10480_v22 }
 0x2e9   :  { %10509 = vtanh.f32 %v5738_v25  ;;  %v10492_v36 = vpop.eup %10491  ;;  %v12933_v15 = vpop.f32.mrb[202].mxu1  ;;  %v9699_v10 = vpack.c.bf16 %v10490_v56, %v10482_v23  ;;  %v539_v25 = vadd.f32 %v11700_v0, %v12797_v34  ;;  %v654_v0 = vadd.f32 %v11706_v26, %v12797_v34 }
 0x2ea   :  { %v12935_v9 = vpop.f32.mrb[203].mxu0  ;;  %v10494_v16 = vpop.eup %10493  ;;  %v9689_v43 = vpack.c.bf16 %v10492_v36, %v10484_v27 }
 0x2eb   :  { %v12937_v41 = vpop.f32.mrb[203].mxu1  ;;  %9339 = vmatmul.mubr.msk.f32.gmra.mrb[52].mxu0 %vm2202_vm2, %v12707_v52  ;;  %9347 = vmatmul.mubr.msk.f32.gmra.mrb[52].mxu1 %vm2202_vm2, %v12707_v52  ;;  %v9697_v14 = vpack.c.bf16 %v10494_v16, %v10486_v38  ;;  %v652_v38 = vadd.f32 %v11702_v1, %v12797_v34 }
 0x2ec   :  { %v10496_v32 = vpop.eup %10495  ;;  %5495 = vmatprep.mubr.f32.mxu0 %v14343_v63  ;;  %9690 = vmatprep.subr.bf16.mxu0 %v9689_v43  ;;  %v12944_v7 = vpop.f32.mrb[204].mxu0 }
 0x2ed   :  { %v10498_v17 = vpop.eup %10497  ;;  %5608 = vmatprep.mubr.f32.mxu1 %v14343_v63  ;;  %9698 = vmatprep.subr.bf16.mxu1 %v9697_v14  ;;  %v12947_v55 = vpop.f32.mrb[204].mxu1  ;;  %v545_v14 = vadd.f32 %v11714_v5, %v12811_v33  ;;  %v660_v5 = vadd.f32 %v11720_v13, %v12811_v33  ;;  %v664_v13 = vadd.f32 %v11729_v45, %v12848_v46 }
 0x2ee   :  { %v10500_v51 = vpop.eup %10499  ;;  %9692 = vmatpush1.bf16.msra.mxu0 %v9691_v57  ;;  %v12949_v20 = vpop.f32.mrb[205].mxu0  ;;  %9700 = vmatpush1.bf16.msra.mxu1 %v9699_v10  ;;  %v541_v57 = vadd.f32 %v11704_v24, %v12797_v34  ;;  %v666_v45 = vadd.f32 %v11734_v30, %v12848_v46 }
 0x2ef   :  { %v10502_v60 = vpop.eup %10501  ;;  %v12951_v21 = vpop.f32.mrb[205].mxu1  ;;  %9340 = vmatmul.mubr.msk.f32.gmra.mrb[54].mxu0 %vm2202_vm2, %v12722_v62  ;;  %9348 = vmatmul.mubr.msk.f32.gmra.mrb[54].mxu1 %vm2202_vm2, %v12722_v62 }
 0x2f0   :  { %v10504_v52 = vpop.eup %10503  ;;  %5501 = vmatprep.mubr.f32.mxu0 %v14343_v63  ;;  %v12958_v61 = vpop.f32.mrb[206].mxu0  ;;  %5614 = vmatprep.mubr.f32.mxu1 %v14343_v63 }
 0x2f1   :  { %v10506_v49 = vpop.eup %10505  ;;  %v9695_v22 = vpack.c.bf16 %v10504_v52, %v10496_v32  ;;  %v12961_v50 = vpop.f32.mrb[206].mxu1 }
 0x2f2   :  { %v10508_v59 = vpop.eup %10507  ;;  %v12963_v39 = vpop.f32.mrb[207].mxu0  ;;  %v9703_v23 = vpack.c.bf16 %v10506_v49, %v10498_v17  ;;  %v658_v17 = vadd.f32 %v11716_v35, %v12811_v33  ;;  %v547_v49 = vadd.f32 %v11718_v40, %v12811_v33  ;;  %v551_v40 = vadd.f32 %v11727_v44, %v12848_v46 }
 0x2f3   :  { %v10510_v4 = vpop.eup %10509  ;;  %v12965_v11 = vpop.f32.mrb[207].mxu1  ;;  %9341 = vmatmul.mubr.msk.f32.gmra.mrb[56].mxu0 %vm2202_vm2, %v12733_v58  ;;  %v9693_v62 = vpack.c.bf16 %v10508_v59, %v10500_v51  ;;  %9349 = vmatmul.mubr.msk.f32.gmra.mrb[56].mxu1 %vm2202_vm2, %v12733_v58 }
 0x2f4   :  { %v9701_v27 = vpack.c.bf16 %v10510_v4, %v10502_v60  ;;  %5507 = vmatprep.mubr.f32.mxu0 %v14343_v63  ;;  %5620 = vmatprep.mubr.f32.mxu1 %v14343_v63 }
 0x2f5   :  { %9694 = vmatprep.subr.bf16.mxu0 %v9693_v62  ;;  %v4123_v28 = vpop.f32.mrb[208].mxu0  ;;  %v4236_v56 = vpop.f32.mrb[208].mxu1 }
 0x2f6   :  { %9702 = vmatprep.subr.bf16.mxu1 %v9701_v27  ;;  %9696 = vmatpush1.bf16.msra.mxu0 %v9695_v22  ;;  %v4124_v58 = vadd.f32 %v4123_v28, %v12819_v18  ;;  %v4237_v36 = vadd.f32 %v4236_v56, %v12819_v18  ;;  %v4125_v10 = vpop.f32.mrb[209].mxu0  ;;  %v4238_v16 = vpop.f32.mrb[209].mxu1 }
 0x2f7   :  { %9704 = vmatpush1.bf16.msra.mxu1 %v9703_v23  ;;  %9342 = vmatmul.mubr.msk.f32.gmra.mrb[58].mxu0 %vm2202_vm2, %v12744_v48  ;;  %v4126_v1 = vadd.f32 %v4125_v10, %v12819_v18  ;;  %v4239_v43 = vadd.f32 %v4238_v16, %v12819_v18 }
 0x2f8   :  { %9350 = vmatmul.mubr.msk.f32.gmra.mrb[58].mxu1 %vm2202_vm2, %v12744_v48  ;;  %5513 = vmatprep.mubr.f32.mxu0 %v14343_v63  ;;  %v5643_v24 = vmul.f32 %v4124_v58, %v539_v25  ;;  %v5645_v32 = vmul.f32 %v4237_v36, %v652_v38 }
 0x2f9   :  { %5626 = vmatprep.mubr.f32.mxu1 %v14343_v63  ;;  %v5644_v26 = vmul.f32 %v4126_v1, %v541_v57  ;;  %v5646_v51 = vmul.f32 %v4239_v43, %v654_v0  ;;  %v4129_v60 = vpop.f32.mrb[210].mxu0  ;;  %v4242_v52 = vpop.f32.mrb[210].mxu1  ;;  %v557_v0 = vadd.f32 %v11742_v53, %v12867_v54  ;;  %v14424_v43 = vld [vmem:[#allocation5_spill] sm:$0xff] }
 0x2fa   :  { %10511 = vtanh.f32 %v5643_v24  ;;  %v4130_v48 = vadd.f32 %v4129_v60, %v12836_v37  ;;  %v4243_v22 = vadd.f32 %v4242_v52, %v12836_v37  ;;  %v4131_v59 = vpop.f32.mrb[211].mxu0  ;;  %v4244_v23 = vpop.f32.mrb[211].mxu1  ;;  %v670_v24 = vadd.f32 %v14424_v43, %v12867_v54 }
 0x2fb   :  { %9343 = vmatmul.mubr.msk.f32.gmra.mrb[60].mxu0 %vm2202_vm2, %v12755_v31  ;;  %10513 = vtanh.f32 %v5645_v32  ;;  %v4132_v35 = vadd.f32 %v4131_v59, %v12836_v37  ;;  %v4245_v4 = vadd.f32 %v4244_v23, %v12836_v37 }
 0x2fc   :  { %9351 = vmatmul.mubr.msk.f32.gmra.mrb[60].mxu1 %vm2202_vm2, %v12755_v31  ;;  %5519 = vmatprep.mubr.f32.mxu0 %v14343_v63  ;;  %10515 = vtanh.f32 %v5644_v26  ;;  %v5675_v62 = vmul.f32 %v4130_v48, %v545_v14  ;;  %v5677_v27 = vmul.f32 %v4243_v22, %v658_v17  ;;  %v553_v31 = vadd.f32 %v11732_v47, %v12848_v46  ;;  %v13029_v47 = vld [vmem:[%s14319_s2 + $0x60] sm:$0xff]  ;;  %v14425_v26 = vld [vmem:[#allocation6_spill] sm:$0xff]  ;;  %v14426_v48 = vld [vmem:[#allocation7_spill] sm:$0xff] }
 0x2fd   :  { %5632 = vmatprep.mubr.f32.mxu1 %v14343_v63  ;;  %10517 = vtanh.f32 %v5646_v51  ;;  %v5676_v25 = vmul.f32 %v4132_v35, %v547_v49  ;;  %v5678_v38 = vmul.f32 %v4245_v4, %v660_v5  ;;  %v4135_v28 = vpop.f32.mrb[212].mxu0  ;;  %v4248_v56 = vpop.f32.mrb[212].mxu1  ;;  %v559_v51 = vadd.f32 %v14425_v26, %v12867_v54  ;;  %v13052_v5 = vld [vmem:[%s14319_s2 + $0x68] sm:$0xff] }
 0x2fe   :  { %10519 = vtanh.f32 %v5675_v62  ;;  %v4136_v57 = vadd.f32 %v4135_v28, %v12878_v8  ;;  %v4249_v44 = vadd.f32 %v4248_v56, %v12878_v8  ;;  %v4137_v58 = vpop.f32.mrb[213].mxu0  ;;  %v4250_v36 = vpop.f32.mrb[213].mxu1  ;;  %v672_v22 = vadd.f32 %v14426_v48, %v12867_v54 }
 0x2ff   :  { %9344 = vmatmul.mubr.msk.f32.gmra.mrb[62].mxu0 %vm2202_vm2, %v12766_v29  ;;  %10521 = vtanh.f32 %v5677_v27  ;;  %v4138_v10 = vadd.f32 %v4137_v58, %v12878_v8  ;;  %v4251_v16 = vadd.f32 %v4250_v36, %v12878_v8 }
 0x300   :  { %9352 = vmatmul.mubr.msk.f32.gmra.mrb[62].mxu1 %vm2202_vm2, %v12766_v29  ;;  %5991 = vmatprep.mubr.f32.mxu0 %v14343_v63  ;;  %10523 = vtanh.f32 %v5676_v25  ;;  %v5707_v30 = vmul.f32 %v4136_v57, %v551_v40  ;;  %v5709_v1 = vmul.f32 %v4249_v44, %v664_v13  ;;  %v13071_v44 = vld [vmem:[%s14319_s2 + $0x70] sm:$0xff] }
 0x301   :  { %6080 = vmatprep.mubr.f32.mxu1 %v14343_v63  ;;  %10525 = vtanh.f32 %v5678_v38  ;;  %v5708_v29 = vmul.f32 %v4138_v10, %v553_v31  ;;  %v5710_v32 = vmul.f32 %v4251_v16, %v666_v45  ;;  %v4141_v14 = vpop.f32.mrb[214].mxu0  ;;  %v4254_v17 = vpop.f32.mrb[214].mxu1 }
 0x302   :  { %10527 = vtanh.f32 %v5707_v30  ;;  %v4142_v60 = vadd.f32 %v4141_v14, %v12897_v12  ;;  %v4255_v53 = vadd.f32 %v4254_v17, %v12897_v12  ;;  %v4143_v52 = vpop.f32.mrb[215].mxu0  ;;  %v4256_v49 = vpop.f32.mrb[215].mxu1  ;;  %v13091_v17 = vld [vmem:[%s14319_s2 + $0x78] sm:$0xff] }
 0x303   :  { %9353 = vmatmul.mubr.msk.f32.vlgmr.msra.gmra.mrb[64].mxu0 %vm2202_vm2, %v13029_v47  ;;  %10529 = vtanh.f32 %v5709_v1  ;;  %v4144_v59 = vadd.f32 %v4143_v52, %v12897_v12  ;;  %v4257_v23 = vadd.f32 %v4256_v49, %v12897_v12 }
 0x304   :  { %9357 = vmatmul.mubr.msk.f32.vlgmr.msra.gmra.mrb[64].mxu1 %vm2202_vm2, %v13029_v47  ;;  %5997 = vmatprep.mubr.f32.mxu0 %v14343_v63  ;;  %v10512_v35 = vpop.eup %10511  ;;  %10531 = vtanh.f32 %v5708_v29  ;;  %v5739_v4 = vmul.f32 %v4142_v60, %v557_v0  ;;  %v5741_v40 = vmul.f32 %v4255_v53, %v670_v24 }
 0x305   :  { %6086 = vmatprep.mubr.f32.mxu1 %v14343_v63  ;;  %v10514_v62 = vpop.eup %10513  ;;  %10533 = vtanh.f32 %v5710_v32  ;;  %v5740_v27 = vmul.f32 %v4144_v59, %v559_v51  ;;  %v5742_v13 = vmul.f32 %v4257_v23, %v672_v22  ;;  %v13055_v25 = vpop.f32.mrb[216].mxu0 }
 0x306   :  { %v13057_v38 = vpop.f32.mrb[216].mxu1  ;;  %v10516_v28 = vpop.eup %10515  ;;  %10535 = vtanh.f32 %v5739_v4 }
 0x307   :  { %v13059_v56 = vpop.f32.mrb[217].mxu0  ;;  %v13061_v31 = vpop.f32.mrb[217].mxu1  ;;  %9354 = vmatmul.mubr.msk.f32.gmra.mrb[66].mxu0 %vm2202_vm2, %v13052_v5  ;;  %10537 = vtanh.f32 %v5741_v40 }
 0x308   :  { %v10518_v57 = vpop.eup %10517  ;;  %9358 = vmatmul.mubr.msk.f32.gmra.mrb[66].mxu1 %vm2202_vm2, %v13052_v5  ;;  %6003 = vmatprep.mubr.f32.mxu0 %v14343_v63  ;;  %10539 = vtanh.f32 %v5740_v27 }
 0x309   :  { %v10520_v58 = vpop.eup %10519  ;;  %6092 = vmatprep.mubr.f32.mxu1 %v14343_v63  ;;  %10541 = vtanh.f32 %v5742_v13  ;;  %v13074_v45 = vpop.f32.mrb[218].mxu0 }
 0x30a   :  { %v10522_v36 = vpop.eup %10521  ;;  %v13076_v10 = vpop.f32.mrb[218].mxu1  ;;  %v9707_v16 = vpack.c.bf16 %v10520_v58, %v10512_v35 }
 0x30b   :  { %v10524_v0 = vpop.eup %10523  ;;  %v13078_v30 = vpop.f32.mrb[219].mxu0  ;;  %9355 = vmatmul.mubr.msk.f32.gmra.mrb[68].mxu0 %vm2202_vm2, %v13071_v44  ;;  %v9715_v43 = vpack.c.bf16 %v10522_v36, %v10514_v62 }
 0x30c   :  { %v13080_v1 = vpop.f32.mrb[219].mxu1  ;;  %v10526_v24 = vpop.eup %10525  ;;  %9359 = vmatmul.mubr.msk.f32.gmra.mrb[68].mxu1 %vm2202_vm2, %v13071_v44  ;;  %v9705_v29 = vpack.c.bf16 %v10524_v0, %v10516_v28  ;;  %6009 = vmatprep.mubr.f32.mxu0 %v14343_v63 }
 0x30d   :  { %v10528_v32 = vpop.eup %10527  ;;  %v9713_v14 = vpack.c.bf16 %v10526_v24, %v10518_v57  ;;  %6098 = vmatprep.mubr.f32.mxu1 %v14343_v63  ;;  %v13093_v51 = vpop.f32.mrb[220].mxu0 }
 0x30e   :  { %v10530_v26 = vpop.eup %10529  ;;  %9706 = vmatprep.subr.bf16.mxu0 %v9705_v29  ;;  %v13095_v60 = vpop.f32.mrb[220].mxu1 }
 0x30f   :  { %v10532_v53 = vpop.eup %10531  ;;  %9714 = vmatprep.subr.bf16.mxu1 %v9713_v14  ;;  %9708 = vmatpush1.bf16.msra.mxu0 %v9707_v16  ;;  %v13097_v52 = vpop.f32.mrb[221].mxu0  ;;  %v14429_v16 = vld [vmem:[#allocation8_spill] sm:$0xff] }
 0x310   :  { %v13099_v49 = vpop.f32.mrb[221].mxu1  ;;  %v10534_v48 = vpop.eup %10533  ;;  %9716 = vmatpush1.bf16.msra.mxu1 %v9715_v43  ;;  %9356 = vmatmul.mubr.msk.f32.gmra.mrb[70].mxu0 %vm2202_vm2, %v13091_v17  ;;  %v765_v0 = vadd.f32 %v14429_v16, %v12797_v34 }
 0x311   :  { %v10536_v22 = vpop.eup %10535  ;;  %9360 = vmatmul.mubr.msk.f32.gmra.mrb[70].mxu1 %vm2202_vm2, %v13091_v17  ;;  %6169 = vmatprep.mubr.f32.mxu0 %v14343_v63  ;;  %v13106_v23 = vpop.f32.mrb[222].mxu0 }
 0x312   :  { %v10538_v59 = vpop.eup %10537  ;;  %v13108_v35 = vpop.f32.mrb[222].mxu1  ;;  %v9711_v4 = vpack.c.bf16 %v10536_v22, %v10528_v32  ;;  %6258 = vmatprep.mubr.f32.mxu1 %v14343_v63  ;;  %v14430_v32 = vld [vmem:[#allocation9_spill] sm:$0xff]  ;;  %v14431_v22 = vld [vmem:[#allocation10_spill] sm:$0xff] }
 0x313   :  { %v10540_v40 = vpop.eup %10539  ;;  %v13111_v62 = vpop.f32.mrb[223].mxu0  ;;  %v9719_v13 = vpack.c.bf16 %v10538_v59, %v10530_v26  ;;  %v878_v14 = vadd.f32 %v14430_v32, %v12797_v34  ;;  %v767_v26 = vadd.f32 %v14431_v22, %v12797_v34 }
 0x314   :  { %14427 = vst [vmem:[#allocation5_spill] sm:$0xff] %v13111_v62  ;;  %v13113_v27 = vpop.f32.mrb[223].mxu1  ;;  %v10542_v28 = vpop.eup %10541  ;;  %v9709_v57 = vpack.c.bf16 %v10540_v40, %v10532_v53  ;;  %v14432_v40 = vld [vmem:[#allocation11_spill] sm:$0xff] }
 0x315   :  { %14428 = vst [vmem:[#allocation6_spill] sm:$0xff] %v13113_v27  ;;  %v9717_v58 = vpack.c.bf16 %v10542_v28, %v10534_v48  ;;  %v4349_v36 = vpop.f32.mrb[224].mxu0  ;;  %v880_v28 = vadd.f32 %v14432_v40, %v12797_v34 }
 0x316   :  { %9710 = vmatprep.subr.bf16.mxu0 %v9709_v57  ;;  %v4350_v43 = vadd.f32 %v4349_v36, %v12819_v18  ;;  %v4462_v24 = vpop.f32.mrb[224].mxu1  ;;  %v4351_v29 = vpop.f32.mrb[225].mxu0 }
 0x317   :  { %9718 = vmatprep.subr.bf16.mxu1 %v9717_v58  ;;  %9712 = vmatpush1.bf16.msra.mxu0 %v9711_v4  ;;  %v4463_v53 = vadd.f32 %v4462_v24, %v12819_v18  ;;  %v4352_v48 = vadd.f32 %v4351_v29, %v12819_v18  ;;  %v4464_v59 = vpop.f32.mrb[225].mxu1  ;;  %v14433_v4 = vld [vmem:[#allocation12_spill] sm:$0xff] }
 0x318   :  { %9720 = vmatpush1.bf16.msra.mxu1 %v9719_v13  ;;  %v5647_v57 = vmul.f32 %v4350_v43, %v765_v0  ;;  %v4465_v58 = vadd.f32 %v4464_v59, %v12819_v18  ;;  %v771_v36 = vadd.f32 %v14433_v4, %v12811_v33  ;;  %v14434_v13 = vld [vmem:[#allocation13_spill] sm:$0xff] }
 0x319   :  { %v5649_v16 = vmul.f32 %v4463_v53, %v878_v14  ;;  %v5648_v32 = vmul.f32 %v4352_v48, %v767_v26  ;;  %v4355_v22 = vpop.f32.mrb[226].mxu0  ;;  %v884_v24 = vadd.f32 %v14434_v13, %v12811_v33  ;;  %v14435_v14 = vld [vmem:[#allocation14_spill] sm:$0xff] }
 0x31a   :  { %9361 = vmatmul.mubr.msk.f32.vlgmr.msra.gmra.mrb[72].mxu0 %vm2202_vm2, %v13029_v47  ;;  %10543 = vtanh.f32 %v5647_v57  ;;  %v5650_v29 = vmul.f32 %v4465_v58, %v880_v28  ;;  %v4356_v0 = vadd.f32 %v4355_v22, %v12836_v37  ;;  %v4468_v43 = vpop.f32.mrb[226].mxu1  ;;  %v4357_v59 = vpop.f32.mrb[227].mxu0  ;;  %v773_v26 = vadd.f32 %v14435_v14, %v12811_v33  ;;  %v14436_v28 = vld [vmem:[#allocation15_spill] sm:$0xff]  ;;  %v14437_v22 = vld [vmem:[#allocation16_spill] sm:$0xff] }
 0x31b   :  { %9365 = vmatmul.mubr.msk.f32.vlgmr.msra.gmra.mrb[72].mxu1 %vm2202_vm2, %v13029_v47  ;;  %6175 = vmatprep.mubr.f32.mxu0 %v14343_v63  ;;  %10545 = vtanh.f32 %v5649_v16  ;;  %v4469_v53 = vadd.f32 %v4468_v43, %v12836_v37  ;;  %v4358_v48 = vadd.f32 %v4357_v59, %v12836_v37  ;;  %v4470_v40 = vpop.f32.mrb[227].mxu1  ;;  %v886_v57 = vadd.f32 %v14436_v28, %v12811_v33  ;;  %v14438_v59 = vld [vmem:[#allocation17_spill] sm:$0xff] }
 0x31c   :  { %6264 = vmatprep.mubr.f32.mxu1 %v14343_v63  ;;  %10547 = vtanh.f32 %v5648_v32  ;;  %v5679_v58 = vmul.f32 %v4356_v0, %v771_v36  ;;  %v4471_v4 = vadd.f32 %v4470_v40, %v12836_v37  ;;  %v777_v13 = vadd.f32 %v14437_v22, %v12848_v46  ;;  %v14440_v40 = vld [vmem:[#allocation19_spill] sm:$0xff] }
 0x31d   :  { %10549 = vtanh.f32 %v5650_v29  ;;  %v5681_v14 = vmul.f32 %v4469_v53, %v884_v24  ;;  %v5680_v16 = vmul.f32 %v4358_v48, %v773_v26  ;;  %v4361_v43 = vpop.f32.mrb[228].mxu0  ;;  %v890_v27 = vadd.f32 %v14438_v59, %v12848_v46  ;;  %v14439_v24 = vld [vmem:[#allocation18_spill] sm:$0xff] }
 0x31e   :  { %9362 = vmatmul.mubr.msk.f32.gmra.mrb[74].mxu0 %vm2202_vm2, %v13052_v5  ;;  %10551 = vtanh.f32 %v5679_v58  ;;  %v5682_v62 = vmul.f32 %v4471_v4, %v886_v57  ;;  %v4362_v36 = vadd.f32 %v4361_v43, %v12878_v8  ;;  %v4474_v32 = vpop.f32.mrb[228].mxu1  ;;  %v4363_v0 = vpop.f32.mrb[229].mxu0  ;;  %v779_v29 = vadd.f32 %v14439_v24, %v12848_v46  ;;  %v14441_v4 = vld [vmem:[#allocation20_spill] sm:$0xff] }
 0x31f   :  { %9366 = vmatmul.mubr.msk.f32.gmra.mrb[74].mxu1 %vm2202_vm2, %v13052_v5  ;;  %6181 = vmatprep.mubr.f32.mxu0 %v14343_v63  ;;  %10553 = vtanh.f32 %v5681_v14  ;;  %v4475_v26 = vadd.f32 %v4474_v32, %v12878_v8  ;;  %v4364_v53 = vadd.f32 %v4363_v0, %v12878_v8  ;;  %v4476_v48 = vpop.f32.mrb[229].mxu1  ;;  %v892_v28 = vadd.f32 %v14440_v40, %v12848_v46  ;;  %v14442_v32 = vld [vmem:[#allocation21_spill] sm:$0xff]  ;;  %v14444_v40 = vld [vmem:[#allocation23_spill] sm:$0xff] }
 0x320   :  { %6270 = vmatprep.mubr.f32.mxu1 %v14343_v63  ;;  %10555 = vtanh.f32 %v5680_v16  ;;  %v5711_v57 = vmul.f32 %v4362_v36, %v777_v13  ;;  %v4477_v58 = vadd.f32 %v4476_v48, %v12878_v8  ;;  %v783_v22 = vadd.f32 %v14441_v4, %v12867_v54 }
 0x321   :  { %10557 = vtanh.f32 %v5682_v62  ;;  %v5713_v43 = vmul.f32 %v4475_v26, %v890_v27  ;;  %v5712_v14 = vmul.f32 %v4364_v53, %v779_v29  ;;  %v4367_v59 = vpop.f32.mrb[230].mxu0  ;;  %v896_v0 = vadd.f32 %v14442_v32, %v12867_v54  ;;  %v14443_v62 = vld [vmem:[#allocation22_spill] sm:$0xff] }
 0x322   :  { %9363 = vmatmul.mubr.msk.f32.gmra.mrb[76].mxu0 %vm2202_vm2, %v13071_v44  ;;  %10559 = vtanh.f32 %v5711_v57  ;;  %v5714_v24 = vmul.f32 %v4477_v58, %v892_v28  ;;  %v4368_v13 = vadd.f32 %v4367_v59, %v12897_v12  ;;  %v4480_v16 = vpop.f32.mrb[230].mxu1  ;;  %v4369_v36 = vpop.f32.mrb[231].mxu0  ;;  %v785_v27 = vadd.f32 %v14443_v62, %v12867_v54 }
 0x323   :  { %9367 = vmatmul.mubr.msk.f32.gmra.mrb[76].mxu1 %vm2202_vm2, %v13071_v44  ;;  %6187 = vmatprep.mubr.f32.mxu0 %v14343_v63  ;;  %10561 = vtanh.f32 %v5713_v43  ;;  %v4481_v29 = vadd.f32 %v4480_v16, %v12897_v12  ;;  %v4370_v26 = vadd.f32 %v4369_v36, %v12897_v12  ;;  %v4482_v53 = vpop.f32.mrb[231].mxu1  ;;  %v898_v28 = vadd.f32 %v14444_v40, %v12867_v54 }
 0x324   :  { %6276 = vmatprep.mubr.f32.mxu1 %v14343_v63  ;;  %v10544_v48 = vpop.eup %10543  ;;  %10563 = vtanh.f32 %v5712_v14  ;;  %v5743_v57 = vmul.f32 %v4368_v13, %v783_v22  ;;  %v4483_v58 = vadd.f32 %v4482_v53, %v12897_v12 }
 0x325   :  { %v10546_v4 = vpop.eup %10545  ;;  %10565 = vtanh.f32 %v5714_v24  ;;  %v5745_v59 = vmul.f32 %v4481_v29, %v896_v0  ;;  %v5744_v32 = vmul.f32 %v4370_v26, %v785_v27  ;;  %v13183_v43 = vpop.f32.mrb[232].mxu0 }
 0x326   :  { %9364 = vmatmul.mubr.msk.f32.gmra.mrb[78].mxu0 %vm2202_vm2, %v13091_v17  ;;  %14445 = vst [vmem:[#allocation7_spill] sm:$0xff] %v13183_v43  ;;  %v10548_v16 = vpop.eup %10547  ;;  %10567 = vtanh.f32 %v5743_v57  ;;  %v5746_v36 = vmul.f32 %v4483_v58, %v898_v28  ;;  %v13187_v62 = vpop.f32.mrb[232].mxu1 }
 0x327   :  { %9368 = vmatmul.mubr.msk.f32.gmra.mrb[78].mxu1 %vm2202_vm2, %v13091_v17  ;;  %14446 = vst [vmem:[#allocation8_spill] sm:$0xff] %v13187_v62  ;;  %v13189_v22 = vpop.f32.mrb[233].mxu0  ;;  %6347 = vmatprep.mubr.f32.mxu0 %v14343_v63  ;;  %v10550_v14 = vpop.eup %10549  ;;  %10569 = vtanh.f32 %v5745_v59 }
 0x328   :  { %14447 = vst [vmem:[#allocation9_spill] sm:$0xff] %v13189_v22  ;;  %v13192_v0 = vpop.f32.mrb[233].mxu1  ;;  %6436 = vmatprep.mubr.f32.mxu1 %v14343_v63  ;;  %v10552_v24 = vpop.eup %10551  ;;  %10571 = vtanh.f32 %v5744_v32 }
 0x329   :  { %14448 = vst [vmem:[#allocation10_spill] sm:$0xff] %v13192_v0  ;;  %v10554_v13 = vpop.eup %10553  ;;  %10573 = vtanh.f32 %v5746_v36  ;;  %v13195_v27 = vpop.f32.mrb[234].mxu0  ;;  %v9723_v29 = vpack.c.bf16 %v10552_v24, %v10544_v48 }
 0x32a   :  { %14449 = vst [vmem:[#allocation11_spill] sm:$0xff] %v13195_v27  ;;  %v10556_v26 = vpop.eup %10555  ;;  %v13197_v53 = vpop.f32.mrb[234].mxu1  ;;  %v9731_v28 = vpack.c.bf16 %v10554_v13, %v10546_v4 }
 0x32b   :  { %14450 = vst [vmem:[#allocation12_spill] sm:$0xff] %v13197_v53  ;;  %v13199_v40 = vpop.f32.mrb[235].mxu0  ;;  %v10558_v57 = vpop.eup %10557  ;;  %v9721_v59 = vpack.c.bf16 %v10556_v26, %v10548_v16 }
 0x32c   :  { %14451 = vst [vmem:[#allocation13_spill] sm:$0xff] %v13199_v40  ;;  %v13201_v58 = vpop.f32.mrb[235].mxu1  ;;  %v10560_v0 = vpop.eup %10559  ;;  %v9729_v22 = vpack.c.bf16 %v10558_v57, %v10550_v14 }
 0x32d   :  { %14452 = vst [vmem:[#allocation14_spill] sm:$0xff] %v13201_v58  ;;  %v10562_v62 = vpop.eup %10561  ;;  %9722 = vmatprep.subr.bf16.mxu0 %v9721_v59  ;;  %v13203_v32 = vpop.f32.mrb[236].mxu0 }
 0x32e   :  { %14453 = vst [vmem:[#allocation15_spill] sm:$0xff] %v13203_v32  ;;  %v10564_v36 = vpop.eup %10563  ;;  %9730 = vmatprep.subr.bf16.mxu1 %v9729_v22  ;;  %v13205_v27 = vpop.f32.mrb[236].mxu1  ;;  %9724 = vmatpush1.bf16.msra.mxu0 %v9723_v29 }
 0x32f   :  { %14454 = vst [vmem:[#allocation16_spill] sm:$0xff] %v13205_v27  ;;  %v13207_v48 = vpop.f32.mrb[237].mxu0  ;;  %v10566_v24 = vpop.eup %10565  ;;  %9732 = vmatpush1.bf16.msra.mxu1 %v9731_v28 }
 0x330   :  { %14455 = vst [vmem:[#allocation17_spill] sm:$0xff] %v13207_v48  ;;  %v13209_v4 = vpop.f32.mrb[237].mxu1  ;;  %v10568_v13 = vpop.eup %10567 }
 0x331   :  { %14456 = vst [vmem:[#allocation18_spill] sm:$0xff] %v13209_v4  ;;  %v10570_v58 = vpop.eup %10569  ;;  %v13211_v16 = vpop.f32.mrb[238].mxu0  ;;  %v9727_v14 = vpack.c.bf16 %v10568_v13, %v10560_v0  ;;  %v14461_v4 = vld [vmem:[#allocation24_spill] sm:$0xff] }
 0x332   :  { %14457 = vst [vmem:[#allocation19_spill] sm:$0xff] %v13211_v16  ;;  %v10572_v26 = vpop.eup %10571  ;;  %v13213_v57 = vpop.f32.mrb[238].mxu1  ;;  %v9735_v22 = vpack.c.bf16 %v10570_v58, %v10562_v62  ;;  %v991_v40 = vadd.f32 %v14461_v4, %v12797_v34  ;;  %v14463_v62 = vld [vmem:[#allocation26_spill] sm:$0xff]  ;;  %v14464_v4 = vld [vmem:[#allocation27_spill] sm:$0xff] }
 0x333   :  { %14458 = vst [vmem:[#allocation20_spill] sm:$0xff] %v13213_v57  ;;  %v13215_v59 = vpop.f32.mrb[239].mxu0  ;;  %v10574_v32 = vpop.eup %10573  ;;  %v9725_v29 = vpack.c.bf16 %v10572_v26, %v10564_v36  ;;  %v14462_v57 = vld [vmem:[#allocation25_spill] sm:$0xff]  ;;  %v993_v58 = vadd.f32 %v14463_v62, %v12797_v34 }
 0x334   :  { %14459 = vst [vmem:[#allocation21_spill] sm:$0xff] %v13215_v59  ;;  %v13217_v27 = vpop.f32.mrb[239].mxu1  ;;  %v9733_v48 = vpack.c.bf16 %v10574_v32, %v10566_v24  ;;  %v1104_v59 = vadd.f32 %v14462_v57, %v12797_v34 }
 0x335   :  { %14460 = vst [vmem:[#allocation22_spill] sm:$0xff] %v13217_v27  ;;  %9726 = vmatprep.subr.bf16.mxu0 %v9725_v29  ;;  %v4575_v28 = vpop.f32.mrb[240].mxu0 }
 0x336   :  { %9734 = vmatprep.subr.bf16.mxu1 %v9733_v48  ;;  %v4576_v16 = vadd.f32 %v4575_v28, %v12819_v18  ;;  %v4688_v0 = vpop.f32.mrb[240].mxu1  ;;  %9728 = vmatpush1.bf16.msra.mxu0 %v9727_v14  ;;  %v4577_v13 = vpop.f32.mrb[241].mxu0  ;;  %v1106_v48 = vadd.f32 %v14464_v4, %v12797_v34  ;;  %v14465_v14 = vld [vmem:[#allocation28_spill] sm:$0xff] }
 0x337   :  { %v4689_v36 = vadd.f32 %v4688_v0, %v12819_v18  ;;  %9736 = vmatpush1.bf16.msra.mxu1 %v9735_v22  ;;  %v4578_v32 = vadd.f32 %v4577_v13, %v12819_v18  ;;  %v4690_v24 = vpop.f32.mrb[241].mxu1  ;;  %v997_v28 = vadd.f32 %v14465_v14, %v12811_v33  ;;  %v14466_v22 = vld [vmem:[#allocation29_spill] sm:$0xff] }
 0x338   :  { %v5651_v26 = vmul.f32 %v4576_v16, %v991_v40  ;;  %v4691_v29 = vadd.f32 %v4690_v24, %v12819_v18  ;;  %v1110_v0 = vadd.f32 %v14466_v22, %v12811_v33 }
 0x339   :  { %v5653_v27 = vmul.f32 %v4689_v36, %v1104_v59  ;;  %v5652_v57 = vmul.f32 %v4578_v32, %v993_v58  ;;  %9369 = vmatmul.mubr.msk.f32.vlgmr.msra.gmra.mrb[80].mxu0 %vm2202_vm2, %v13029_v47  ;;  %v4581_v62 = vpop.f32.mrb[242].mxu0  ;;  %v14467_v59 = vld [vmem:[#allocation30_spill] sm:$0xff] }
 0x33a   :  { %10575 = vtanh.f32 %v5651_v26  ;;  %v5654_v13 = vmul.f32 %v4691_v29, %v1106_v48  ;;  %9373 = vmatmul.mubr.msk.f32.vlgmr.msra.gmra.mrb[80].mxu1 %vm2202_vm2, %v13029_v47  ;;  %v4582_v40 = vadd.f32 %v4581_v62, %v12836_v37  ;;  %v4694_v16 = vpop.f32.mrb[242].mxu1  ;;  %v4583_v24 = vpop.f32.mrb[243].mxu0  ;;  %6353 = vmatprep.mubr.f32.mxu0 %v14343_v63  ;;  %v999_v58 = vadd.f32 %v14467_v59, %v12811_v33  ;;  %v14468_v48 = vld [vmem:[#allocation31_spill] sm:$0xff]  ;;  %v14469_v62 = vld [vmem:[#allocation32_spill] sm:$0xff] }
 0x33b   :  { %10577 = vtanh.f32 %v5653_v27  ;;  %v4695_v36 = vadd.f32 %v4694_v16, %v12836_v37  ;;  %v4584_v32 = vadd.f32 %v4583_v24, %v12836_v37  ;;  %v4696_v4 = vpop.f32.mrb[243].mxu1  ;;  %6442 = vmatprep.mubr.f32.mxu1 %v14343_v63  ;;  %v1112_v26 = vadd.f32 %v14468_v48, %v12811_v33  ;;  %v14470_v24 = vld [vmem:[#allocation33_spill] sm:$0xff] }
 0x33c   :  { %10579 = vtanh.f32 %v5652_v57  ;;  %v5683_v29 = vmul.f32 %v4582_v40, %v997_v28  ;;  %v4697_v14 = vadd.f32 %v4696_v4, %v12836_v37  ;;  %v1003_v22 = vadd.f32 %v14469_v62, %v12848_v46  ;;  %v14472_v4 = vld [vmem:[#allocation35_spill] sm:$0xff] }
 0x33d   :  { %10581 = vtanh.f32 %v5654_v13  ;;  %v5685_v59 = vmul.f32 %v4695_v36, %v1110_v0  ;;  %v5684_v27 = vmul.f32 %v4584_v32, %v999_v58  ;;  %9370 = vmatmul.mubr.msk.f32.gmra.mrb[82].mxu0 %vm2202_vm2, %v13052_v5  ;;  %v4587_v16 = vpop.f32.mrb[244].mxu0  ;;  %v1116_v53 = vadd.f32 %v14470_v24, %v12848_v46  ;;  %v14471_v0 = vld [vmem:[#allocation34_spill] sm:$0xff] }
 0x33e   :  { %10583 = vtanh.f32 %v5683_v29  ;;  %v5686_v43 = vmul.f32 %v4697_v14, %v1112_v26  ;;  %9374 = vmatmul.mubr.msk.f32.gmra.mrb[82].mxu1 %vm2202_vm2, %v13052_v5  ;;  %v4588_v28 = vadd.f32 %v4587_v16, %v12878_v8  ;;  %v4700_v57 = vpop.f32.mrb[244].mxu1  ;;  %v4589_v40 = vpop.f32.mrb[245].mxu0  ;;  %6359 = vmatprep.mubr.f32.mxu0 %v14343_v63  ;;  %v1005_v13 = vadd.f32 %v14471_v0, %v12848_v46  ;;  %v14473_v14 = vld [vmem:[#allocation36_spill] sm:$0xff] }
 0x33f   :  { %10585 = vtanh.f32 %v5685_v59  ;;  %v4701_v58 = vadd.f32 %v4700_v57, %v12878_v8  ;;  %v4590_v36 = vadd.f32 %v4589_v40, %v12878_v8  ;;  %v4702_v32 = vpop.f32.mrb[245].mxu1  ;;  %6448 = vmatprep.mubr.f32.mxu1 %v14343_v63  ;;  %v1118_v48 = vadd.f32 %v14472_v4, %v12848_v46  ;;  %v14474_v57 = vld [vmem:[#allocation37_spill] sm:$0xff]  ;;  %v14476_v4 = vld [vmem:[#allocation39_spill] sm:$0xff] }
 0x340   :  { %10587 = vtanh.f32 %v5684_v27  ;;  %v5715_v26 = vmul.f32 %v4588_v28, %v1003_v22  ;;  %v4703_v29 = vadd.f32 %v4702_v32, %v12878_v8  ;;  %v1009_v62 = vadd.f32 %v14473_v14, %v12867_v54 }
 0x341   :  { %10589 = vtanh.f32 %v5686_v43  ;;  %v5717_v16 = vmul.f32 %v4701_v58, %v1116_v53  ;;  %v5716_v59 = vmul.f32 %v4590_v36, %v1005_v13  ;;  %9371 = vmatmul.mubr.msk.f32.gmra.mrb[84].mxu0 %vm2202_vm2, %v13071_v44  ;;  %v4593_v24 = vpop.f32.mrb[246].mxu0  ;;  %v1122_v40 = vadd.f32 %v14474_v57, %v12867_v54  ;;  %v14475_v43 = vld [vmem:[#allocation38_spill] sm:$0xff] }
 0x342   :  { %10591 = vtanh.f32 %v5715_v26  ;;  %v5718_v0 = vmul.f32 %v4703_v29, %v1118_v48  ;;  %9375 = vmatmul.mubr.msk.f32.gmra.mrb[84].mxu1 %vm2202_vm2, %v13071_v44  ;;  %v4594_v22 = vadd.f32 %v4593_v24, %v12897_v12  ;;  %v4706_v27 = vpop.f32.mrb[246].mxu1  ;;  %v4595_v28 = vpop.f32.mrb[247].mxu0  ;;  %6365 = vmatprep.mubr.f32.mxu0 %v14343_v63  ;;  %v1011_v53 = vadd.f32 %v14475_v43, %v12867_v54 }
 0x343   :  { %10593 = vtanh.f32 %v5717_v16  ;;  %v4707_v13 = vadd.f32 %v4706_v27, %v12897_v12  ;;  %v4596_v58 = vadd.f32 %v4595_v28, %v12897_v12  ;;  %v4708_v36 = vpop.f32.mrb[247].mxu1  ;;  %6454 = vmatprep.mubr.f32.mxu1 %v14343_v63  ;;  %v1124_v48 = vadd.f32 %v14476_v4, %v12867_v54 }
 0x344   :  { %v10576_v32 = vpop.eup %10575  ;;  %10595 = vtanh.f32 %v5716_v59  ;;  %v5747_v26 = vmul.f32 %v4594_v22, %v1009_v62  ;;  %v4709_v29 = vadd.f32 %v4708_v36, %v12897_v12 }
 0x345   :  { %v10578_v14 = vpop.eup %10577  ;;  %10597 = vtanh.f32 %v5718_v0  ;;  %v5749_v24 = vmul.f32 %v4707_v13, %v1122_v40  ;;  %v5748_v57 = vmul.f32 %v4596_v58, %v1011_v53  ;;  %9372 = vmatmul.mubr.msk.f32.gmra.mrb[86].mxu0 %vm2202_vm2, %v13091_v17  ;;  %v13287_v16 = vpop.f32.mrb[248].mxu0 }
 0x346   :  { %14477 = vst [vmem:[#allocation23_spill] sm:$0xff] %v13287_v16  ;;  %v10580_v27 = vpop.eup %10579  ;;  %10599 = vtanh.f32 %v5747_v26  ;;  %v5750_v28 = vmul.f32 %v4709_v29, %v1124_v48  ;;  %9376 = vmatmul.mubr.msk.f32.gmra.mrb[86].mxu1 %vm2202_vm2, %v13091_v17  ;;  %v13291_v43 = vpop.f32.mrb[248].mxu1  ;;  %6525 = vmatprep.mubr.f32.mxu0 %v14343_v63 }
 0x347   :  { %14478 = vst [vmem:[#allocation24_spill] sm:$0xff] %v13291_v43  ;;  %v13293_v62 = vpop.f32.mrb[249].mxu0  ;;  %v10582_v59 = vpop.eup %10581  ;;  %10601 = vtanh.f32 %v5749_v24  ;;  %6614 = vmatprep.mubr.f32.mxu1 %v14343_v63 }
 0x348   :  { %14479 = vst [vmem:[#allocation25_spill] sm:$0xff] %v13293_v62  ;;  %v13296_v40 = vpop.f32.mrb[249].mxu1  ;;  %v10584_v0 = vpop.eup %10583  ;;  %10603 = vtanh.f32 %v5748_v57 }
 0x349   :  { %14480 = vst [vmem:[#allocation26_spill] sm:$0xff] %v13296_v40  ;;  %v10586_v22 = vpop.eup %10585  ;;  %10605 = vtanh.f32 %v5750_v28  ;;  %v13299_v53 = vpop.f32.mrb[250].mxu0  ;;  %v9739_v13 = vpack.c.bf16 %v10584_v0, %v10576_v32 }
 0x34a   :  { %14481 = vst [vmem:[#allocation27_spill] sm:$0xff] %v13299_v53  ;;  %v10588_v58 = vpop.eup %10587  ;;  %v13301_v36 = vpop.f32.mrb[250].mxu1  ;;  %v9747_v48 = vpack.c.bf16 %v10586_v22, %v10578_v14 }
 0x34b   :  { %14482 = vst [vmem:[#allocation28_spill] sm:$0xff] %v13301_v36  ;;  %v13303_v4 = vpop.f32.mrb[251].mxu0  ;;  %v10590_v26 = vpop.eup %10589  ;;  %v9737_v24 = vpack.c.bf16 %v10588_v58, %v10580_v27 }
 0x34c   :  { %14483 = vst [vmem:[#allocation29_spill] sm:$0xff] %v13303_v4  ;;  %v13305_v29 = vpop.f32.mrb[251].mxu1  ;;  %v10592_v40 = vpop.eup %10591  ;;  %v9745_v62 = vpack.c.bf16 %v10590_v26, %v10582_v59 }
 0x34d   :  { %14484 = vst [vmem:[#allocation30_spill] sm:$0xff] %v13305_v29  ;;  %v10594_v43 = vpop.eup %10593  ;;  %9738 = vmatprep.subr.bf16.mxu0 %v9737_v24  ;;  %v13307_v57 = vpop.f32.mrb[252].mxu0 }
 0x34e   :  { %14485 = vst [vmem:[#allocation31_spill] sm:$0xff] %v13307_v57  ;;  %v10596_v28 = vpop.eup %10595  ;;  %9746 = vmatprep.subr.bf16.mxu1 %v9745_v62  ;;  %v13309_v53 = vpop.f32.mrb[252].mxu1  ;;  %9740 = vmatpush1.bf16.msra.mxu0 %v9739_v13 }
 0x34f   :  { %14486 = vst [vmem:[#allocation32_spill] sm:$0xff] %v13309_v53  ;;  %v13311_v32 = vpop.f32.mrb[253].mxu0  ;;  %v10598_v0 = vpop.eup %10597  ;;  %9748 = vmatpush1.bf16.msra.mxu1 %v9747_v48 }
 0x350   :  { %14487 = vst [vmem:[#allocation33_spill] sm:$0xff] %v13311_v32  ;;  %v13313_v14 = vpop.f32.mrb[253].mxu1  ;;  %v10600_v22 = vpop.eup %10599 }
 0x351   :  { %14488 = vst [vmem:[#allocation34_spill] sm:$0xff] %v13313_v14  ;;  %v10602_v29 = vpop.eup %10601  ;;  %v13315_v27 = vpop.f32.mrb[254].mxu0  ;;  %v9743_v59 = vpack.c.bf16 %v10600_v22, %v10592_v40  ;;  %v14493_v14 = vld [vmem:[#allocation40_spill] sm:$0xff] }
 0x352   :  { %14489 = vst [vmem:[#allocation35_spill] sm:$0xff] %v13315_v27  ;;  %v10604_v58 = vpop.eup %10603  ;;  %v13317_v26 = vpop.f32.mrb[254].mxu1  ;;  %v9751_v62 = vpack.c.bf16 %v10602_v29, %v10594_v43  ;;  %v1217_v4 = vadd.f32 %v14493_v14, %v12797_v34  ;;  %v14495_v43 = vld [vmem:[#allocation42_spill] sm:$0xff]  ;;  %v14496_v14 = vld [vmem:[#allocation43_spill] sm:$0xff] }
 0x353   :  { %14490 = vst [vmem:[#allocation36_spill] sm:$0xff] %v13317_v26  ;;  %v13319_v24 = vpop.f32.mrb[255].mxu0  ;;  %v10606_v57 = vpop.eup %10605  ;;  %v9741_v13 = vpack.c.bf16 %v10604_v58, %v10596_v28  ;;  %v14494_v26 = vld [vmem:[#allocation41_spill] sm:$0xff]  ;;  %v1219_v29 = vadd.f32 %v14495_v43, %v12797_v34 }
 0x354   :  { %14491 = vst [vmem:[#allocation37_spill] sm:$0xff] %v13319_v24  ;;  %v13321_v53 = vpop.f32.mrb[255].mxu1  ;;  %v9749_v32 = vpack.c.bf16 %v10606_v57, %v10598_v0  ;;  %v1330_v24 = vadd.f32 %v14494_v26, %v12797_v34 }
 0x355   :  { %14492 = vst [vmem:[#allocation38_spill] sm:$0xff] %v13321_v53  ;;  %9742 = vmatprep.subr.bf16.mxu0 %v9741_v13  ;;  %v4801_v48 = vpop.f32.mrb[0].mxu0 }
 0x356   :  { %9750 = vmatprep.subr.bf16.mxu1 %v9749_v32  ;;  %v4802_v27 = vadd.f32 %v4801_v48, %v12819_v18  ;;  %v4914_v40 = vpop.f32.mrb[0].mxu1  ;;  %9744 = vmatpush1.bf16.msra.mxu0 %v9743_v59  ;;  %v4803_v22 = vpop.f32.mrb[1].mxu0  ;;  %v1332_v32 = vadd.f32 %v14496_v14, %v12797_v34  ;;  %v14497_v59 = vld [vmem:[#allocation44_spill] sm:$0xff] }
 0x357   :  { %v4915_v28 = vadd.f32 %v4914_v40, %v12819_v18  ;;  %9752 = vmatpush1.bf16.msra.mxu1 %v9751_v62  ;;  %v4804_v57 = vadd.f32 %v4803_v22, %v12819_v18  ;;  %v4916_v0 = vpop.f32.mrb[1].mxu1  ;;  %v1223_v48 = vadd.f32 %v14497_v59, %v12811_v33  ;;  %v14498_v62 = vld [vmem:[#allocation45_spill] sm:$0xff]  ;;  %v14501_v59 = vld [vmem:[#allocation48_spill] sm:$0xff] }
 0x358   :  { %v5655_v58 = vmul.f32 %v4802_v27, %v1217_v4  ;;  %v4917_v13 = vadd.f32 %v4916_v0, %v12819_v18  ;;  %v1336_v40 = vadd.f32 %v14498_v62, %v12811_v33 }
 0x359   :  { %v5657_v53 = vmul.f32 %v4915_v28, %v1330_v24  ;;  %v5656_v26 = vmul.f32 %v4804_v57, %v1219_v29  ;;  %9377 = vmatmul.mubr.msk.f32.vlgmr.msra.gmra.mrb[88].mxu0 %vm2202_vm2, %v13029_v47  ;;  %v4807_v43 = vpop.f32.mrb[2].mxu0  ;;  %v14499_v24 = vld [vmem:[#allocation46_spill] sm:$0xff] }
 0x35a   :  { %10607 = vtanh.f32 %v5655_v58  ;;  %v5658_v22 = vmul.f32 %v4917_v13, %v1332_v32  ;;  %9381 = vmatmul.mubr.msk.f32.vlgmr.msra.gmra.mrb[88].mxu1 %vm2202_vm2, %v13029_v47  ;;  %v4808_v4 = vadd.f32 %v4807_v43, %v12836_v37  ;;  %v4920_v27 = vpop.f32.mrb[2].mxu1  ;;  %v4809_v0 = vpop.f32.mrb[3].mxu0  ;;  %6531 = vmatprep.mubr.f32.mxu0 %v14343_v63  ;;  %v1225_v29 = vadd.f32 %v14499_v24, %v12811_v33  ;;  %v14500_v32 = vld [vmem:[#allocation47_spill] sm:$0xff] }
 0x35b   :  { %10609 = vtanh.f32 %v5657_v53  ;;  %v4921_v28 = vadd.f32 %v4920_v27, %v12836_v37  ;;  %v4810_v57 = vadd.f32 %v4809_v0, %v12836_v37  ;;  %v4922_v14 = vpop.f32.mrb[3].mxu1  ;;  %6620 = vmatprep.mubr.f32.mxu1 %v14343_v63  ;;  %v1338_v47 = vadd.f32 %v14500_v32, %v12811_v33  ;;  %v14502_v0 = vld [vmem:[#allocation49_spill] sm:$0xff] }
 0x35c   :  { %10611 = vtanh.f32 %v5656_v26  ;;  %v5687_v58 = vmul.f32 %v4808_v4, %v1223_v48  ;;  %v4923_v13 = vadd.f32 %v4922_v14, %v12836_v37  ;;  %v1229_v43 = vadd.f32 %v14501_v59, %v12848_v46  ;;  %v14504_v14 = vld [vmem:[#allocation51_spill] sm:$0xff] }
 0x35d   :  { %10613 = vtanh.f32 %v5658_v22  ;;  %v5689_v62 = vmul.f32 %v4921_v28, %v1336_v40  ;;  %v5688_v53 = vmul.f32 %v4810_v57, %v1225_v29  ;;  %9378 = vmatmul.mubr.msk.f32.gmra.mrb[90].mxu0 %vm2202_vm2, %v13052_v5  ;;  %v4813_v27 = vpop.f32.mrb[4].mxu0  ;;  %v1342_v24 = vadd.f32 %v14502_v0, %v12848_v46  ;;  %v14503_v40 = vld [vmem:[#allocation50_spill] sm:$0xff]  ;;  %v14506_v0 = vld [vmem:[#allocation53_spill] sm:$0xff] }
 0x35e   :  { %10615 = vtanh.f32 %v5687_v58  ;;  %v5690_v36 = vmul.f32 %v4923_v13, %v1338_v47  ;;  %9382 = vmatmul.mubr.msk.f32.gmra.mrb[90].mxu1 %vm2202_vm2, %v13052_v5  ;;  %v4814_v48 = vadd.f32 %v4813_v27, %v12878_v8  ;;  %v4926_v26 = vpop.f32.mrb[4].mxu1  ;;  %v4815_v4 = vpop.f32.mrb[5].mxu0  ;;  %6537 = vmatprep.mubr.f32.mxu0 %v14343_v63  ;;  %v1231_v22 = vadd.f32 %v14503_v40, %v12848_v46  ;;  %v14505_v58 = vld [vmem:[#allocation52_spill] sm:$0xff] }
 0x35f   :  { %10617 = vtanh.f32 %v5689_v62  ;;  %v4927_v29 = vadd.f32 %v4926_v26, %v12878_v8  ;;  %v4816_v28 = vadd.f32 %v4815_v4, %v12878_v8  ;;  %v4928_v57 = vpop.f32.mrb[5].mxu1  ;;  %6626 = vmatprep.mubr.f32.mxu1 %v14343_v63  ;;  %v1344_v5 = vadd.f32 %v14504_v14, %v12848_v46 }
 0x360   :  { %10619 = vtanh.f32 %v5688_v53  ;;  %v5719_v32 = vmul.f32 %v4814_v48, %v1229_v43  ;;  %v4929_v47 = vadd.f32 %v4928_v57, %v12878_v8  ;;  %v1235_v13 = vadd.f32 %v14505_v58, %v12867_v54 }
 0x361   :  { %10621 = vtanh.f32 %v5690_v36  ;;  %v5721_v59 = vmul.f32 %v4927_v29, %v1342_v24  ;;  %v5720_v62 = vmul.f32 %v4816_v28, %v1231_v22  ;;  %9379 = vmatmul.mubr.msk.f32.gmra.mrb[92].mxu0 %vm2202_vm2, %v13071_v44  ;;  %v4819_v27 = vpop.f32.mrb[6].mxu0  ;;  %v1348_v26 = vadd.f32 %v14506_v0, %v12867_v54  ;;  %v14507_v36 = vld [vmem:[#allocation54_spill] sm:$0xff] }
 0x362   :  { %10623 = vtanh.f32 %v5719_v32  ;;  %v5722_v4 = vmul.f32 %v4929_v47, %v1344_v5  ;;  %9383 = vmatmul.mubr.msk.f32.gmra.mrb[92].mxu1 %vm2202_vm2, %v13071_v44  ;;  %v4820_v43 = vadd.f32 %v4819_v27, %v12897_v12  ;;  %v4932_v53 = vpop.f32.mrb[6].mxu1  ;;  %v4821_v48 = vpop.f32.mrb[7].mxu0  ;;  %6543 = vmatprep.mubr.f32.mxu0 %v14343_v63  ;;  %v1237_v24 = vadd.f32 %v14507_v36, %v12867_v54  ;;  %v14508_v44 = vld [vmem:[#allocation55_spill] sm:$0xff] }
 0x363   :  { %10625 = vtanh.f32 %v5721_v59  ;;  %v4933_v40 = vadd.f32 %v4932_v53, %v12897_v12  ;;  %v4822_v22 = vadd.f32 %v4821_v48, %v12897_v12  ;;  %v4934_v29 = vpop.f32.mrb[7].mxu1  ;;  %6632 = vmatprep.mubr.f32.mxu1 %v14343_v63  ;;  %v1350_v57 = vadd.f32 %v14508_v44, %v12867_v54 }
 0x364   :  { %v10608_v28 = vpop.eup %10607  ;;  %10627 = vtanh.f32 %v5720_v62  ;;  %v5751_v14 = vmul.f32 %v4820_v43, %v1235_v13  ;;  %v4935_v5 = vadd.f32 %v4934_v29, %v12897_v12 }
 0x365   :  { %v10610_v32 = vpop.eup %10609  ;;  %10629 = vtanh.f32 %v5722_v4  ;;  %v5753_v47 = vmul.f32 %v4933_v40, %v1348_v26  ;;  %v5752_v58 = vmul.f32 %v4822_v22, %v1237_v24  ;;  %9380 = vmatmul.mubr.msk.f32.gmra.mrb[94].mxu0 %vm2202_vm2, %v13091_v17  ;;  %v13391_v59 = vpop.f32.mrb[8].mxu0 }
 0x366   :  { %14509 = vst [vmem:[#allocation39_spill] sm:$0xff] %v13391_v59  ;;  %v10612_v27 = vpop.eup %10611  ;;  %10631 = vtanh.f32 %v5751_v14  ;;  %v5754_v0 = vmul.f32 %v4935_v5, %v1350_v57  ;;  %9384 = vmatmul.mubr.msk.f32.gmra.mrb[94].mxu1 %vm2202_vm2, %v13091_v17  ;;  %v13395_v53 = vpop.f32.mrb[8].mxu1  ;;  %6703 = vmatprep.mubr.f32.mxu0 %v14343_v63 }
 0x367   :  { %14510 = vst [vmem:[#allocation40_spill] sm:$0xff] %v13395_v53  ;;  %v13397_v13 = vpop.f32.mrb[9].mxu0  ;;  %v10614_v62 = vpop.eup %10613  ;;  %10633 = vtanh.f32 %v5753_v47  ;;  %6792 = vmatprep.mubr.f32.mxu1 %v14343_v63 }
 0x368   :  { %14511 = vst [vmem:[#allocation41_spill] sm:$0xff] %v13397_v13  ;;  %v13400_v26 = vpop.f32.mrb[9].mxu1  ;;  %v10616_v4 = vpop.eup %10615  ;;  %10635 = vtanh.f32 %v5752_v58 }
 0x369   :  { %14512 = vst [vmem:[#allocation42_spill] sm:$0xff] %v13400_v26  ;;  %v10618_v43 = vpop.eup %10617  ;;  %10637 = vtanh.f32 %v5754_v0  ;;  %v13403_v48 = vpop.f32.mrb[10].mxu0  ;;  %v9755_v36 = vpack.c.bf16 %v10616_v4, %v10608_v28 }
 0x36a   :  { %14513 = vst [vmem:[#allocation43_spill] sm:$0xff] %v13403_v48  ;;  %v10620_v17 = vpop.eup %10619  ;;  %v13405_v24 = vpop.f32.mrb[10].mxu1  ;;  %v9763_v22 = vpack.c.bf16 %v10618_v43, %v10610_v32 }
 0x36b   :  { %14514 = vst [vmem:[#allocation44_spill] sm:$0xff] %v13405_v24  ;;  %v13407_v40 = vpop.f32.mrb[11].mxu0  ;;  %v10622_v29 = vpop.eup %10621  ;;  %v9753_v57 = vpack.c.bf16 %v10620_v17, %v10612_v27 }
 0x36c   :  { %14515 = vst [vmem:[#allocation45_spill] sm:$0xff] %v13407_v40  ;;  %v13409_v44 = vpop.f32.mrb[11].mxu1  ;;  %v10624_v14 = vpop.eup %10623  ;;  %v9761_v5 = vpack.c.bf16 %v10622_v29, %v10614_v62 }
 0x36d   :  { %14516 = vst [vmem:[#allocation46_spill] sm:$0xff] %v13409_v44  ;;  %v10626_v47 = vpop.eup %10625  ;;  %9754 = vmatprep.subr.bf16.mxu0 %v9753_v57  ;;  %v13411_v58 = vpop.f32.mrb[12].mxu0 }
 0x36e   :  { %14517 = vst [vmem:[#allocation47_spill] sm:$0xff] %v13411_v58  ;;  %v10628_v0 = vpop.eup %10627  ;;  %9762 = vmatprep.subr.bf16.mxu1 %v9761_v5  ;;  %v13413_v48 = vpop.f32.mrb[12].mxu1  ;;  %9756 = vmatpush1.bf16.msra.mxu0 %v9755_v36 }
 0x36f   :  { %14518 = vst [vmem:[#allocation48_spill] sm:$0xff] %v13413_v48  ;;  %v13415_v28 = vpop.f32.mrb[13].mxu0  ;;  %v10630_v4 = vpop.eup %10629  ;;  %9764 = vmatpush1.bf16.msra.mxu1 %v9763_v22 }
 0x370   :  { %14519 = vst [vmem:[#allocation49_spill] sm:$0xff] %v13415_v28  ;;  %v13417_v32 = vpop.f32.mrb[13].mxu1  ;;  %v10632_v43 = vpop.eup %10631 }
 0x371   :  { %14520 = vst [vmem:[#allocation50_spill] sm:$0xff] %v13417_v32  ;;  %v10634_v44 = vpop.eup %10633  ;;  %v13419_v27 = vpop.f32.mrb[14].mxu0  ;;  %v9759_v62 = vpack.c.bf16 %v10632_v43, %v10624_v14  ;;  %v14525_v32 = vld [vmem:[#allocation56_spill] sm:$0xff] }
 0x372   :  { %14521 = vst [vmem:[#allocation51_spill] sm:$0xff] %v13419_v27  ;;  %v10636_v17 = vpop.eup %10635  ;;  %v13421_v29 = vpop.f32.mrb[14].mxu1  ;;  %v9767_v5 = vpack.c.bf16 %v10634_v44, %v10626_v47  ;;  %v1443_v40 = vadd.f32 %v14525_v32, %v12797_v34  ;;  %v14527_v44 = vld [vmem:[#allocation58_spill] sm:$0xff]  ;;  %v14528_v32 = vld [vmem:[#allocation59_spill] sm:$0xff] }
 0x373   :  { %14522 = vst [vmem:[#allocation52_spill] sm:$0xff] %v13421_v29  ;;  %v13423_v57 = vpop.f32.mrb[15].mxu0  ;;  %v10638_v58 = vpop.eup %10637  ;;  %v9757_v36 = vpack.c.bf16 %v10636_v17, %v10628_v0  ;;  %v14526_v29 = vld [vmem:[#allocation57_spill] sm:$0xff]  ;;  %v1445_v47 = vadd.f32 %v14527_v44, %v12797_v34 }
 0x374   :  { %14523 = vst [vmem:[#allocation53_spill] sm:$0xff] %v13423_v57  ;;  %v13425_v48 = vpop.f32.mrb[15].mxu1  ;;  %v9765_v28 = vpack.c.bf16 %v10638_v58, %v10630_v4  ;;  %v1556_v57 = vadd.f32 %v14526_v29, %v12797_v34  ;;  %v13444_v44 = vld [vmem:[%s14319_s2 + $0x60] sm:$0xff] }
 0x375   :  { %14524 = vst [vmem:[#allocation54_spill] sm:$0xff] %v13425_v48  ;;  %9758 = vmatprep.subr.bf16.mxu0 %v9757_v36  ;;  %v5027_v22 = vpop.f32.mrb[16].mxu0 }
 0x376   :  { %9766 = vmatprep.subr.bf16.mxu1 %v9765_v28  ;;  %v5028_v27 = vadd.f32 %v5027_v22, %v12819_v18  ;;  %v5140_v14 = vpop.f32.mrb[16].mxu1  ;;  %9760 = vmatpush1.bf16.msra.mxu0 %v9759_v62  ;;  %v5029_v43 = vpop.f32.mrb[17].mxu0  ;;  %v1558_v28 = vadd.f32 %v14528_v32, %v12797_v34  ;;  %v14529_v62 = vld [vmem:[#allocation60_spill] sm:$0xff] }
 0x377   :  { %v5141_v0 = vadd.f32 %v5140_v14, %v12819_v18  ;;  %9768 = vmatpush1.bf16.msra.mxu1 %v9767_v5  ;;  %v5030_v58 = vadd.f32 %v5029_v43, %v12819_v18  ;;  %v5142_v4 = vpop.f32.mrb[17].mxu1  ;;  %v1449_v22 = vadd.f32 %v14529_v62, %v12811_v33  ;;  %v14530_v14 = vld [vmem:[#allocation61_spill] sm:$0xff] }
 0x378   :  { %v5659_v17 = vmul.f32 %v5028_v27, %v1443_v40  ;;  %v5143_v36 = vadd.f32 %v5142_v4, %v12819_v18  ;;  %v1562_v43 = vadd.f32 %v14530_v14, %v12811_v33  ;;  %v14533_v14 = vld [vmem:[#allocation64_spill] sm:$0xff] }
 0x379   :  { %v5661_v48 = vmul.f32 %v5141_v0, %v1556_v57  ;;  %v5660_v29 = vmul.f32 %v5030_v58, %v1445_v47  ;;  %9385 = vmatmul.mubr.msk.f32.vlgmr.msra.gmra.mrb[96].mxu0 %vm2202_vm2, %v13444_v44  ;;  %v5033_v5 = vpop.f32.mrb[18].mxu0  ;;  %v14531_v0 = vld [vmem:[#allocation62_spill] sm:$0xff]  ;;  %v1455_v24 = vadd.f32 %v14533_v14, %v12848_v46 }
 0x37a   :  { %10639 = vtanh.f32 %v5659_v17  ;;  %v5662_v40 = vmul.f32 %v5143_v36, %v1558_v28  ;;  %9389 = vmatmul.mubr.msk.f32.vlgmr.msra.gmra.mrb[96].mxu1 %vm2202_vm2, %v13444_v44  ;;  %v5034_v27 = vadd.f32 %v5033_v5, %v12836_v37  ;;  %v5146_v57 = vpop.f32.mrb[18].mxu1  ;;  %v5035_v47 = vpop.f32.mrb[19].mxu0  ;;  %6709 = vmatprep.mubr.f32.mxu0 %v14343_v63  ;;  %v1451_v58 = vadd.f32 %v14531_v0, %v12811_v33  ;;  %v14532_v28 = vld [vmem:[#allocation63_spill] sm:$0xff] }
 0x37b   :  { %10641 = vtanh.f32 %v5661_v48  ;;  %v5147_v4 = vadd.f32 %v5146_v57, %v12836_v37  ;;  %v5036_v32 = vadd.f32 %v5035_v47, %v12836_v37  ;;  %v5148_v62 = vpop.f32.mrb[19].mxu1  ;;  %6798 = vmatprep.mubr.f32.mxu1 %v14343_v63  ;;  %v1564_v17 = vadd.f32 %v14532_v28, %v12811_v33  ;;  %v13467_v57 = vld [vmem:[%s14319_s2 + $0x68] sm:$0xff] }
 0x37c   :  { %10643 = vtanh.f32 %v5660_v29  ;;  %v5691_v36 = vmul.f32 %v5034_v27, %v1449_v22  ;;  %v5149_v5 = vadd.f32 %v5148_v62, %v12836_v37  ;;  %v14534_v29 = vld [vmem:[#allocation65_spill] sm:$0xff] }
 0x37d   :  { %10645 = vtanh.f32 %v5662_v40  ;;  %v5693_v0 = vmul.f32 %v5147_v4, %v1562_v43  ;;  %v5692_v48 = vmul.f32 %v5036_v32, %v1451_v58  ;;  %9386 = vmatmul.mubr.msk.f32.gmra.mrb[98].mxu0 %vm2202_vm2, %v13467_v57  ;;  %v5039_v47 = vpop.f32.mrb[20].mxu0  ;;  %v1568_v22 = vadd.f32 %v14534_v29, %v12848_v46  ;;  %v14535_v4 = vld [vmem:[#allocation66_spill] sm:$0xff]  ;;  %v14537_v29 = vld [vmem:[#allocation68_spill] sm:$0xff] }
 0x37e   :  { %10647 = vtanh.f32 %v5691_v36  ;;  %v5694_v27 = vmul.f32 %v5149_v5, %v1564_v17  ;;  %9390 = vmatmul.mubr.msk.f32.gmra.mrb[98].mxu1 %vm2202_vm2, %v13467_v57  ;;  %v5040_v43 = vadd.f32 %v5039_v47, %v12878_v8  ;;  %v5152_v40 = vpop.f32.mrb[20].mxu1  ;;  %v5041_v58 = vpop.f32.mrb[21].mxu0  ;;  %6715 = vmatprep.mubr.f32.mxu0 %v14343_v63  ;;  %v1457_v32 = vadd.f32 %v14535_v4, %v12848_v46  ;;  %v14536_v17 = vld [vmem:[#allocation67_spill] sm:$0xff] }
 0x37f   :  { %10649 = vtanh.f32 %v5693_v0  ;;  %v5153_v62 = vadd.f32 %v5152_v40, %v12878_v8  ;;  %v5042_v28 = vadd.f32 %v5041_v58, %v12878_v8  ;;  %v5154_v14 = vpop.f32.mrb[21].mxu1  ;;  %6804 = vmatprep.mubr.f32.mxu1 %v14343_v63  ;;  %v1570_v36 = vadd.f32 %v14536_v17, %v12848_v46  ;;  %v13490_v40 = vld [vmem:[%s14319_s2 + $0x70] sm:$0xff] }
 0x380   :  { %10651 = vtanh.f32 %v5692_v48  ;;  %v5723_v5 = vmul.f32 %v5040_v43, %v1455_v24  ;;  %v5155_v47 = vadd.f32 %v5154_v14, %v12878_v8  ;;  %v1461_v26 = vadd.f32 %v14537_v29, %v12867_v54  ;;  %v14538_v48 = vld [vmem:[#allocation69_spill] sm:$0xff] }
 0x381   :  { %10653 = vtanh.f32 %v5694_v27  ;;  %v5725_v4 = vmul.f32 %v5153_v62, %v1568_v22  ;;  %v5724_v0 = vmul.f32 %v5042_v28, %v1457_v32  ;;  %9387 = vmatmul.mubr.msk.f32.gmra.mrb[100].mxu0 %vm2202_vm2, %v13490_v40  ;;  %v5045_v58 = vpop.f32.mrb[22].mxu0  ;;  %v1574_v24 = vadd.f32 %v14538_v48, %v12867_v54  ;;  %v14539_v62 = vld [vmem:[#allocation70_spill] sm:$0xff] }
 0x382   :  { %10655 = vtanh.f32 %v5723_v5  ;;  %v5726_v43 = vmul.f32 %v5155_v47, %v1570_v36  ;;  %9391 = vmatmul.mubr.msk.f32.gmra.mrb[100].mxu1 %vm2202_vm2, %v13490_v40  ;;  %v5046_v22 = vadd.f32 %v5045_v58, %v12897_v12  ;;  %v5158_v27 = vpop.f32.mrb[22].mxu1  ;;  %v5047_v32 = vpop.f32.mrb[23].mxu0  ;;  %6721 = vmatprep.mubr.f32.mxu0 %v14343_v63  ;;  %v1463_v28 = vadd.f32 %v14539_v62, %v12867_v54  ;;  %v14540_v5 = vld [vmem:[#allocation71_spill] sm:$0xff] }
 0x383   :  { %10657 = vtanh.f32 %v5725_v4  ;;  %v5159_v14 = vadd.f32 %v5158_v27, %v12897_v12  ;;  %v5048_v17 = vadd.f32 %v5047_v32, %v12897_v12  ;;  %v5160_v29 = vpop.f32.mrb[23].mxu1  ;;  %6810 = vmatprep.mubr.f32.mxu1 %v14343_v63  ;;  %v1576_v47 = vadd.f32 %v14540_v5, %v12867_v54  ;;  %v13511_v4 = vld [vmem:[%s14319_s2 + $0x78] sm:$0xff] }
 0x384   :  { %v10640_v36 = vpop.eup %10639  ;;  %10659 = vtanh.f32 %v5724_v0  ;;  %v5755_v58 = vmul.f32 %v5046_v22, %v1461_v26  ;;  %v5161_v48 = vadd.f32 %v5160_v29, %v12897_v12 }
 0x385   :  { %v10642_v13 = vpop.eup %10641  ;;  %10661 = vtanh.f32 %v5726_v43  ;;  %v5757_v53 = vmul.f32 %v5159_v14, %v1574_v24  ;;  %v5756_v62 = vmul.f32 %v5048_v17, %v1463_v28  ;;  %9388 = vmatmul.mubr.msk.f32.gmra.mrb[102].mxu0 %vm2202_vm2, %v13511_v4  ;;  %v13515_v27 = vpop.f32.mrb[24].mxu0 }
 0x386   :  { %14541 = vst [vmem:[#allocation55_spill] sm:$0xff] %v13515_v27  ;;  %v10644_v32 = vpop.eup %10643  ;;  %10663 = vtanh.f32 %v5755_v58  ;;  %v5758_v0 = vmul.f32 %v5161_v48, %v1576_v47  ;;  %9392 = vmatmul.mubr.msk.f32.gmra.mrb[102].mxu1 %vm2202_vm2, %v13511_v4  ;;  %v13519_v26 = vpop.f32.mrb[24].mxu1  ;;  %6881 = vmatprep.mubr.f32.mxu0 %v14343_v63 }
 0x387   :  { %14542 = vst [vmem:[#allocation56_spill] sm:$0xff] %v13519_v26  ;;  %v13521_v24 = vpop.f32.mrb[25].mxu0  ;;  %v10646_v43 = vpop.eup %10645  ;;  %10665 = vtanh.f32 %v5757_v53  ;;  %6970 = vmatprep.mubr.f32.mxu1 %v14343_v63 }
 0x388   :  { %14543 = vst [vmem:[#allocation57_spill] sm:$0xff] %v13521_v24  ;;  %v13524_v22 = vpop.f32.mrb[25].mxu1  ;;  %v10648_v28 = vpop.eup %10647  ;;  %10667 = vtanh.f32 %v5756_v62 }
 0x389   :  { %14544 = vst [vmem:[#allocation58_spill] sm:$0xff] %v13524_v22  ;;  %v10650_v14 = vpop.eup %10649  ;;  %10669 = vtanh.f32 %v5758_v0  ;;  %v13527_v17 = vpop.f32.mrb[26].mxu0  ;;  %v9771_v29 = vpack.c.bf16 %v10648_v28, %v10640_v36 }
 0x38a   :  { %14545 = vst [vmem:[#allocation59_spill] sm:$0xff] %v13527_v17  ;;  %v10652_v5 = vpop.eup %10651  ;;  %v13529_v47 = vpop.f32.mrb[26].mxu1  ;;  %v9779_v48 = vpack.c.bf16 %v10650_v14, %v10642_v13 }
 0x38b   :  { %14546 = vst [vmem:[#allocation60_spill] sm:$0xff] %v13529_v47  ;;  %v13531_v58 = vpop.f32.mrb[27].mxu0  ;;  %v10654_v24 = vpop.eup %10653  ;;  %v9769_v53 = vpack.c.bf16 %v10652_v5, %v10644_v32 }
 0x38c   :  { %14547 = vst [vmem:[#allocation61_spill] sm:$0xff] %v13531_v58  ;;  %v13533_v26 = vpop.f32.mrb[27].mxu1  ;;  %v10656_v22 = vpop.eup %10655  ;;  %v9777_v27 = vpack.c.bf16 %v10654_v24, %v10646_v43 }
 0x38d   :  { %14548 = vst [vmem:[#allocation62_spill] sm:$0xff] %v13533_v26  ;;  %v10658_v59 = vpop.eup %10657  ;;  %9770 = vmatprep.subr.bf16.mxu0 %v9769_v53  ;;  %v13535_v62 = vpop.f32.mrb[28].mxu0 }
 0x38e   :  { %14549 = vst [vmem:[#allocation63_spill] sm:$0xff] %v13535_v62  ;;  %v10660_v0 = vpop.eup %10659  ;;  %9778 = vmatprep.subr.bf16.mxu1 %v9777_v27  ;;  %v13537_v17 = vpop.f32.mrb[28].mxu1  ;;  %9772 = vmatpush1.bf16.msra.mxu0 %v9771_v29 }
 0x38f   :  { %14550 = vst [vmem:[#allocation64_spill] sm:$0xff] %v13537_v17  ;;  %v13539_v36 = vpop.f32.mrb[29].mxu0  ;;  %v10662_v28 = vpop.eup %10661  ;;  %9780 = vmatpush1.bf16.msra.mxu1 %v9779_v48 }
 0x390   :  { %14551 = vst [vmem:[#allocation65_spill] sm:$0xff] %v13539_v36  ;;  %v13541_v13 = vpop.f32.mrb[29].mxu1  ;;  %v10664_v14 = vpop.eup %10663 }
 0x391   :  { %14552 = vst [vmem:[#allocation66_spill] sm:$0xff] %v13541_v13  ;;  %v10666_v26 = vpop.eup %10665  ;;  %v13543_v32 = vpop.f32.mrb[30].mxu0  ;;  %v9775_v24 = vpack.c.bf16 %v10664_v14, %v10656_v22  ;;  %v14557_v13 = vld [vmem:[#allocation72_spill] sm:$0xff] }
 0x392   :  { %14553 = vst [vmem:[#allocation67_spill] sm:$0xff] %v13543_v32  ;;  %v10668_v43 = vpop.eup %10667  ;;  %v13545_v5 = vpop.f32.mrb[30].mxu1  ;;  %v9783_v27 = vpack.c.bf16 %v10666_v26, %v10658_v59  ;;  %v1669_v58 = vadd.f32 %v14557_v13, %v12797_v34  ;;  %v14559_v59 = vld [vmem:[#allocation74_spill] sm:$0xff]  ;;  %v14560_v13 = vld [vmem:[#allocation75_spill] sm:$0xff] }
 0x393   :  { %14554 = vst [vmem:[#allocation68_spill] sm:$0xff] %v13545_v5  ;;  %v13547_v53 = vpop.f32.mrb[31].mxu0  ;;  %v10670_v62 = vpop.eup %10669  ;;  %v9773_v29 = vpack.c.bf16 %v10668_v43, %v10660_v0  ;;  %v14558_v5 = vld [vmem:[#allocation73_spill] sm:$0xff]  ;;  %v1671_v26 = vadd.f32 %v14559_v59, %v12797_v34 }
 0x394   :  { %14555 = vst [vmem:[#allocation69_spill] sm:$0xff] %v13547_v53  ;;  %v13549_v17 = vpop.f32.mrb[31].mxu1  ;;  %v9781_v36 = vpack.c.bf16 %v10670_v62, %v10662_v28  ;;  %v1782_v53 = vadd.f32 %v14558_v5, %v12797_v34 }
 0x395   :  { %14556 = vst [vmem:[#allocation70_spill] sm:$0xff] %v13549_v17  ;;  %9774 = vmatprep.subr.bf16.mxu0 %v9773_v29  ;;  %v5253_v48 = vpop.f32.mrb[32].mxu0 }
 0x396   :  { %9782 = vmatprep.subr.bf16.mxu1 %v9781_v36  ;;  %v5254_v32 = vadd.f32 %v5253_v48, %v12819_v18  ;;  %v5366_v22 = vpop.f32.mrb[32].mxu1  ;;  %9776 = vmatpush1.bf16.msra.mxu0 %v9775_v24  ;;  %v5255_v14 = vpop.f32.mrb[33].mxu0  ;;  %v1784_v36 = vadd.f32 %v14560_v13, %v12797_v34  ;;  %v14561_v24 = vld [vmem:[#allocation76_spill] sm:$0xff] }
 0x397   :  { %v5367_v0 = vadd.f32 %v5366_v22, %v12819_v18  ;;  %9784 = vmatpush1.bf16.msra.mxu1 %v9783_v27  ;;  %v5256_v62 = vadd.f32 %v5255_v14, %v12819_v18  ;;  %v5368_v28 = vpop.f32.mrb[33].mxu1  ;;  %v1675_v48 = vadd.f32 %v14561_v24, %v12811_v33  ;;  %v14562_v27 = vld [vmem:[#allocation77_spill] sm:$0xff] }
 0x398   :  { %v5663_v43 = vmul.f32 %v5254_v32, %v1669_v58  ;;  %v5369_v29 = vadd.f32 %v5368_v28, %v12819_v18  ;;  %v1788_v22 = vadd.f32 %v14562_v27, %v12811_v33 }
 0x399   :  { %v5665_v17 = vmul.f32 %v5367_v0, %v1782_v53  ;;  %v5664_v5 = vmul.f32 %v5256_v62, %v1671_v26  ;;  %9393 = vmatmul.mubr.msk.f32.vlgmr.msra.gmra.mrb[104].mxu0 %vm2202_vm2, %v13444_v44  ;;  %v5259_v59 = vpop.f32.mrb[34].mxu0  ;;  %v14563_v53 = vld [vmem:[#allocation78_spill] sm:$0xff] }
 0x39a   :  { %10671 = vtanh.f32 %v5663_v43  ;;  %v5666_v14 = vmul.f32 %v5369_v29, %v1784_v36  ;;  %9397 = vmatmul.mubr.msk.f32.vlgmr.msra.gmra.mrb[104].mxu1 %vm2202_vm2, %v13444_v44  ;;  %v5260_v58 = vadd.f32 %v5259_v59, %v12836_v37  ;;  %v5372_v32 = vpop.f32.mrb[34].mxu1  ;;  %v5261_v28 = vpop.f32.mrb[35].mxu0  ;;  %6887 = vmatprep.mubr.f32.mxu0 %v14343_v63  ;;  %v1677_v26 = vadd.f32 %v14563_v53, %v12811_v33  ;;  %v14564_v36 = vld [vmem:[#allocation79_spill] sm:$0xff]  ;;  %v14565_v59 = vld [vmem:[#allocation80_spill] sm:$0xff] }
 0x39b   :  { %10673 = vtanh.f32 %v5665_v17  ;;  %v5373_v0 = vadd.f32 %v5372_v32, %v12836_v37  ;;  %v5262_v62 = vadd.f32 %v5261_v28, %v12836_v37  ;;  %v5374_v13 = vpop.f32.mrb[35].mxu1  ;;  %6976 = vmatprep.mubr.f32.mxu1 %v14343_v63  ;;  %v1790_v43 = vadd.f32 %v14564_v36, %v12811_v33  ;;  %v14566_v28 = vld [vmem:[#allocation81_spill] sm:$0xff] }
 0x39c   :  { %10675 = vtanh.f32 %v5664_v5  ;;  %v5695_v29 = vmul.f32 %v5260_v58, %v1675_v48  ;;  %v5375_v24 = vadd.f32 %v5374_v13, %v12836_v37  ;;  %v1681_v27 = vadd.f32 %v14565_v59, %v12848_v46  ;;  %v14568_v13 = vld [vmem:[#allocation83_spill] sm:$0xff] }
 0x39d   :  { %10677 = vtanh.f32 %v5666_v14  ;;  %v5697_v53 = vmul.f32 %v5373_v0, %v1788_v22  ;;  %v5696_v17 = vmul.f32 %v5262_v62, %v1677_v26  ;;  %9394 = vmatmul.mubr.msk.f32.gmra.mrb[106].mxu0 %vm2202_vm2, %v13467_v57  ;;  %v5265_v32 = vpop.f32.mrb[36].mxu0  ;;  %v1794_v47 = vadd.f32 %v14566_v28, %v12848_v46  ;;  %v14567_v22 = vld [vmem:[#allocation82_spill] sm:$0xff] }
 0x39e   :  { %10679 = vtanh.f32 %v5695_v29  ;;  %v5698_v16 = vmul.f32 %v5375_v24, %v1790_v43  ;;  %9398 = vmatmul.mubr.msk.f32.gmra.mrb[106].mxu1 %vm2202_vm2, %v13467_v57  ;;  %v5266_v48 = vadd.f32 %v5265_v32, %v12878_v8  ;;  %v5378_v5 = vpop.f32.mrb[36].mxu1  ;;  %v5267_v58 = vpop.f32.mrb[37].mxu0  ;;  %6893 = vmatprep.mubr.f32.mxu0 %v14343_v63  ;;  %v1683_v14 = vadd.f32 %v14567_v22, %v12848_v46  ;;  %v14569_v24 = vld [vmem:[#allocation84_spill] sm:$0xff] }
 0x39f   :  { %10681 = vtanh.f32 %v5697_v53  ;;  %v5379_v26 = vadd.f32 %v5378_v5, %v12878_v8  ;;  %v5268_v0 = vadd.f32 %v5267_v58, %v12878_v8  ;;  %v5380_v62 = vpop.f32.mrb[37].mxu1  ;;  %6982 = vmatprep.mubr.f32.mxu1 %v14343_v63  ;;  %v1796_v36 = vadd.f32 %v14568_v13, %v12848_v46  ;;  %v14570_v5 = vld [vmem:[#allocation85_spill] sm:$0xff]  ;;  %v14572_v13 = vld [vmem:[#allocation87_spill] sm:$0xff] }
 0x3a0   :  { %10683 = vtanh.f32 %v5696_v17  ;;  %v5727_v43 = vmul.f32 %v5266_v48, %v1681_v27  ;;  %v5381_v29 = vadd.f32 %v5380_v62, %v12878_v8  ;;  %v1687_v59 = vadd.f32 %v14569_v24, %v12867_v54 }
 0x3a1   :  { %10685 = vtanh.f32 %v5698_v16  ;;  %v5729_v32 = vmul.f32 %v5379_v26, %v1794_v47  ;;  %v5728_v53 = vmul.f32 %v5268_v0, %v1683_v14  ;;  %9395 = vmatmul.mubr.msk.f32.gmra.mrb[108].mxu0 %vm2202_vm2, %v13490_v40  ;;  %v5271_v28 = vpop.f32.mrb[38].mxu0  ;;  %v1800_v58 = vadd.f32 %v14570_v5, %v12867_v54  ;;  %v14571_v16 = vld [vmem:[#allocation86_spill] sm:$0xff] }
 0x3a2   :  { %10687 = vtanh.f32 %v5727_v43  ;;  %v5730_v22 = vmul.f32 %v5381_v29, %v1796_v36  ;;  %9399 = vmatmul.mubr.msk.f32.gmra.mrb[108].mxu1 %vm2202_vm2, %v13490_v40  ;;  %v5272_v27 = vadd.f32 %v5271_v28, %v12897_v12  ;;  %v5384_v17 = vpop.f32.mrb[38].mxu1  ;;  %v5273_v48 = vpop.f32.mrb[39].mxu0  ;;  %6899 = vmatprep.mubr.f32.mxu0 %v14343_v63  ;;  %v1689_v47 = vadd.f32 %v14571_v16, %v12867_v54 }
 0x3a3   :  { %10689 = vtanh.f32 %v5729_v32  ;;  %v5385_v14 = vadd.f32 %v5384_v17, %v12897_v12  ;;  %v5274_v26 = vadd.f32 %v5273_v48, %v12897_v12  ;;  %v5386_v0 = vpop.f32.mrb[39].mxu1  ;;  %6988 = vmatprep.mubr.f32.mxu1 %v14343_v63  ;;  %v1802_v36 = vadd.f32 %v14572_v13, %v12867_v54 }
 0x3a4   :  { %v10672_v62 = vpop.eup %10671  ;;  %10691 = vtanh.f32 %v5728_v53  ;;  %v5759_v43 = vmul.f32 %v5272_v27, %v1687_v59  ;;  %v5387_v29 = vadd.f32 %v5386_v0, %v12897_v12 }
 0x3a5   :  { %v10674_v24 = vpop.eup %10673  ;;  %10693 = vtanh.f32 %v5730_v22  ;;  %v5761_v28 = vmul.f32 %v5385_v14, %v1800_v58  ;;  %v5760_v5 = vmul.f32 %v5274_v26, %v1689_v47  ;;  %9396 = vmatmul.mubr.msk.f32.gmra.mrb[110].mxu0 %vm2202_vm2, %v13511_v4  ;;  %v13619_v32 = vpop.f32.mrb[40].mxu0 }
 0x3a6   :  { %v10676_v17 = vpop.eup %10675  ;;  %10695 = vtanh.f32 %v5759_v43  ;;  %v5762_v48 = vmul.f32 %v5387_v29, %v1802_v36  ;;  %9400 = vmatmul.mubr.msk.f32.gmra.mrb[110].mxu1 %vm2202_vm2, %v13511_v4  ;;  %v13623_v16 = vpop.f32.mrb[40].mxu1  ;;  %7059 = vmatprep.mubr.f32.mxu0 %v14343_v63 }
 0x3a7   :  { %14573 = vst [vmem:[#allocation71_spill] sm:$0xff] %v13623_v16  ;;  %v13625_v59 = vpop.f32.mrb[41].mxu0  ;;  %v10678_v53 = vpop.eup %10677  ;;  %10697 = vtanh.f32 %v5761_v28  ;;  %7148 = vmatprep.mubr.f32.mxu1 %v14343_v63 }
 0x3a8   :  { %14574 = vst [vmem:[#allocation72_spill] sm:$0xff] %v13625_v59  ;;  %v13628_v58 = vpop.f32.mrb[41].mxu1  ;;  %v10680_v22 = vpop.eup %10679  ;;  %10699 = vtanh.f32 %v5760_v5 }
 0x3a9   :  { %14575 = vst [vmem:[#allocation73_spill] sm:$0xff] %v13628_v58  ;;  %v10682_v27 = vpop.eup %10681  ;;  %10701 = vtanh.f32 %v5762_v48  ;;  %v13631_v47 = vpop.f32.mrb[42].mxu0  ;;  %v9787_v14 = vpack.c.bf16 %v10680_v22, %v10672_v62 }
 0x3aa   :  { %14576 = vst [vmem:[#allocation74_spill] sm:$0xff] %v13631_v47  ;;  %v10684_v26 = vpop.eup %10683  ;;  %v13633_v0 = vpop.f32.mrb[42].mxu1  ;;  %v9795_v36 = vpack.c.bf16 %v10682_v27, %v10674_v24 }
 0x3ab   :  { %v13635_v13 = vpop.f32.mrb[43].mxu0  ;;  %v10686_v43 = vpop.eup %10685  ;;  %v9785_v28 = vpack.c.bf16 %v10684_v26, %v10676_v17 }
 0x3ac   :  { %14577 = vst [vmem:[#allocation75_spill] sm:$0xff] %v13635_v13  ;;  %v13637_v29 = vpop.f32.mrb[43].mxu1  ;;  %v10688_v58 = vpop.eup %10687  ;;  %v9793_v59 = vpack.c.bf16 %v10686_v43, %v10678_v53 }
 0x3ad   :  { %14578 = vst [vmem:[#allocation76_spill] sm:$0xff] %v13637_v29  ;;  %v10690_v16 = vpop.eup %10689  ;;  %9786 = vmatprep.subr.bf16.mxu0 %v9785_v28  ;;  %v13639_v5 = vpop.f32.mrb[44].mxu0 }
 0x3ae   :  { %14579 = vst [vmem:[#allocation77_spill] sm:$0xff] %v13639_v5  ;;  %v10692_v48 = vpop.eup %10691  ;;  %9794 = vmatprep.subr.bf16.mxu1 %v9793_v59  ;;  %v13641_v47 = vpop.f32.mrb[44].mxu1  ;;  %9788 = vmatpush1.bf16.msra.mxu0 %v9787_v14 }
 0x3af   :  { %14580 = vst [vmem:[#allocation78_spill] sm:$0xff] %v13641_v47  ;;  %v13643_v62 = vpop.f32.mrb[45].mxu0  ;;  %v10694_v22 = vpop.eup %10693  ;;  %9796 = vmatpush1.bf16.msra.mxu1 %v9795_v36 }
 0x3b0   :  { %14581 = vst [vmem:[#allocation79_spill] sm:$0xff] %v13643_v62  ;;  %v13645_v24 = vpop.f32.mrb[45].mxu1  ;;  %v10696_v27 = vpop.eup %10695 }
 0x3b1   :  { %14582 = vst [vmem:[#allocation80_spill] sm:$0xff] %v13645_v24  ;;  %v10698_v29 = vpop.eup %10697  ;;  %v13647_v17 = vpop.f32.mrb[46].mxu0  ;;  %v9791_v53 = vpack.c.bf16 %v10696_v27, %v10688_v58  ;;  %v14587_v24 = vld [vmem:[#allocation88_spill] sm:$0xff] }
 0x3b2   :  { %14583 = vst [vmem:[#allocation81_spill] sm:$0xff] %v13647_v17  ;;  %v10700_v26 = vpop.eup %10699  ;;  %v13649_v43 = vpop.f32.mrb[46].mxu1  ;;  %v9799_v59 = vpack.c.bf16 %v10698_v29, %v10690_v16  ;;  %v1895_v13 = vadd.f32 %v14587_v24, %v12797_v34  ;;  %v14589_v16 = vld [vmem:[#allocation90_spill] sm:$0xff]  ;;  %v14590_v24 = vld [vmem:[#allocation91_spill] sm:$0xff] }
 0x3b3   :  { %14584 = vst [vmem:[#allocation82_spill] sm:$0xff] %v13649_v43  ;;  %v13651_v28 = vpop.f32.mrb[47].mxu0  ;;  %v10702_v5 = vpop.eup %10701  ;;  %v9789_v14 = vpack.c.bf16 %v10700_v26, %v10692_v48  ;;  %v14588_v43 = vld [vmem:[#allocation89_spill] sm:$0xff]  ;;  %v1897_v29 = vadd.f32 %v14589_v16, %v12797_v34 }
 0x3b4   :  { %14585 = vst [vmem:[#allocation83_spill] sm:$0xff] %v13651_v28  ;;  %v13653_v47 = vpop.f32.mrb[47].mxu1  ;;  %v9797_v62 = vpack.c.bf16 %v10702_v5, %v10694_v22  ;;  %v2008_v28 = vadd.f32 %v14588_v43, %v12797_v34 }
 0x3b5   :  { %14586 = vst [vmem:[#allocation84_spill] sm:$0xff] %v13653_v47  ;;  %9790 = vmatprep.subr.bf16.mxu0 %v9789_v14 }
 0x3b6   :  { %v5479_v36 = vpop.f32.mrb[48].mxu0  ;;  %9798 = vmatprep.subr.bf16.mxu1 %v9797_v62  ;;  %v5592_v58 = vpop.f32.mrb[48].mxu1  ;;  %9792 = vmatpush1.bf16.msra.mxu0 %v9791_v53  ;;  %v2010_v62 = vadd.f32 %v14590_v24, %v12797_v34  ;;  %v14591_v53 = vld [vmem:[#allocation92_spill] sm:$0xff] }
 0x3b7   :  { %v5480_v17 = vadd.f32 %v5479_v36, %v12819_v18  ;;  %v5481_v27 = vpop.f32.mrb[49].mxu0  ;;  %v5593_v48 = vadd.f32 %v5592_v58, %v12819_v18  ;;  %9800 = vmatpush1.bf16.msra.mxu1 %v9799_v59  ;;  %v5594_v22 = vpop.f32.mrb[49].mxu1  ;;  %v1901_v36 = vadd.f32 %v14591_v53, %v12811_v33  ;;  %v14592_v59 = vld [vmem:[#allocation93_spill] sm:$0xff] }
 0x3b8   :  { %v5482_v5 = vadd.f32 %v5481_v27, %v12819_v18  ;;  %v5595_v14 = vadd.f32 %v5594_v22, %v12819_v18  ;;  %v2014_v58 = vadd.f32 %v14592_v59, %v12811_v33  ;;  %v14594_v22 = vld [vmem:[#allocation95_spill] sm:$0xff] }
 0x3b9   :  { %v5667_v26 = vmul.f32 %v5480_v17, %v1895_v13  ;;  %v5669_v47 = vmul.f32 %v5593_v48, %v2008_v28  ;;  %9401 = vmatmul.mubr.msk.f32.vlgmr.msra.gmra.mrb[112].mxu0 %vm2202_vm2, %v13444_v44  ;;  %v14593_v17 = vld [vmem:[#allocation94_spill] sm:$0xff]  ;;  %v2016_v24 = vadd.f32 %v14594_v22, %v12811_v33 }
 0x3ba   :  { %v5668_v43 = vmul.f32 %v5482_v5, %v1897_v29  ;;  %v5485_v16 = vpop.f32.mrb[50].mxu0  ;;  %v5670_v27 = vmul.f32 %v5595_v14, %v2010_v62  ;;  %9405 = vmatmul.mubr.msk.f32.vlgmr.msra.gmra.mrb[112].mxu1 %vm2202_vm2, %v13444_v44  ;;  %v5598_v18 = vpop.f32.mrb[50].mxu1  ;;  %7065 = vmatprep.mubr.f32.mxu0 %v14343_v63  ;;  %v1903_v28 = vadd.f32 %v14593_v17, %v12811_v33  ;;  %v14595_v14 = vld [vmem:[#allocation96_spill] sm:$0xff] }
 0x3bb   :  { %10703 = vtanh.f32 %v5667_v26  ;;  %v5486_v34 = vadd.f32 %v5485_v16, %v12836_v37  ;;  %v5487_v13 = vpop.f32.mrb[51].mxu0  ;;  %v5599_v29 = vadd.f32 %v5598_v18, %v12836_v37  ;;  %v5600_v5 = vpop.f32.mrb[51].mxu1  ;;  %7154 = vmatprep.mubr.f32.mxu1 %v14343_v63  ;;  %v1907_v53 = vadd.f32 %v14595_v14, %v12848_v46  ;;  %v14596_v18 = vld [vmem:[#allocation97_spill] sm:$0xff] }
 0x3bc   :  { %10705 = vtanh.f32 %v5669_v47  ;;  %v5488_v48 = vadd.f32 %v5487_v13, %v12836_v37  ;;  %v5601_v26 = vadd.f32 %v5600_v5, %v12836_v37  ;;  %v2020_v13 = vadd.f32 %v14596_v18, %v12848_v46 }
 0x3bd   :  { %10707 = vtanh.f32 %v5668_v43  ;;  %v5699_v62 = vmul.f32 %v5486_v34, %v1901_v36  ;;  %v5701_v16 = vmul.f32 %v5599_v29, %v2014_v58  ;;  %9402 = vmatmul.mubr.msk.f32.gmra.mrb[114].mxu0 %vm2202_vm2, %v13467_v57  ;;  %v14597_v43 = vld [vmem:[#allocation98_spill] sm:$0xff]  ;;  %v14598_v29 = vld [vmem:[#allocation99_spill] sm:$0xff] }
 0x3be   :  { %10709 = vtanh.f32 %v5670_v27  ;;  %v5700_v47 = vmul.f32 %v5488_v48, %v1903_v28  ;;  %v5491_v59 = vpop.f32.mrb[52].mxu0  ;;  %v5702_v17 = vmul.f32 %v5601_v26, %v2016_v24  ;;  %9406 = vmatmul.mubr.msk.f32.gmra.mrb[114].mxu1 %vm2202_vm2, %v13467_v57  ;;  %v5604_v37 = vpop.f32.mrb[52].mxu1  ;;  %7071 = vmatprep.mubr.f32.mxu0 %v14343_v63  ;;  %v1909_v58 = vadd.f32 %v14597_v43, %v12848_v46  ;;  %v14599_v24 = vld [vmem:[#allocation100_spill] sm:$0xff] }
 0x3bf   :  { %10711 = vtanh.f32 %v5699_v62  ;;  %v5492_v33 = vadd.f32 %v5491_v59, %v12878_v8  ;;  %v5493_v36 = vpop.f32.mrb[53].mxu0  ;;  %v5605_v27 = vadd.f32 %v5604_v37, %v12878_v8  ;;  %v5606_v28 = vpop.f32.mrb[53].mxu1  ;;  %7160 = vmatprep.mubr.f32.mxu1 %v14343_v63  ;;  %v2022_v48 = vadd.f32 %v14598_v29, %v12848_v46  ;;  %v14600_v59 = vld [vmem:[#allocation101_spill] sm:$0xff] }
 0x3c0   :  { %10713 = vtanh.f32 %v5701_v16  ;;  %v5494_v34 = vadd.f32 %v5493_v36, %v12878_v8  ;;  %v5607_v22 = vadd.f32 %v5606_v28, %v12878_v8  ;;  %v1913_v62 = vadd.f32 %v14599_v24, %v12867_v54 }
 0x3c1   :  { %10715 = vtanh.f32 %v5700_v47  ;;  %v5731_v5 = vmul.f32 %v5492_v33, %v1907_v53  ;;  %v5733_v26 = vmul.f32 %v5605_v27, %v2020_v13  ;;  %9403 = vmatmul.mubr.msk.f32.gmra.mrb[116].mxu0 %vm2202_vm2, %v13490_v40  ;;  %v2026_v18 = vadd.f32 %v14600_v59, %v12867_v54  ;;  %v14601_v47 = vld [vmem:[#allocation102_spill] sm:$0xff] }
 0x3c2   :  { %10717 = vtanh.f32 %v5702_v17  ;;  %v5732_v14 = vmul.f32 %v5494_v34, %v1909_v58  ;;  %v5497_v16 = vpop.f32.mrb[54].mxu0  ;;  %v5734_v37 = vmul.f32 %v5607_v22, %v2022_v48  ;;  %9407 = vmatmul.mubr.msk.f32.gmra.mrb[116].mxu1 %vm2202_vm2, %v13490_v40  ;;  %v5610_v8 = vpop.f32.mrb[54].mxu1  ;;  %7077 = vmatprep.mubr.f32.mxu0 %v14343_v63  ;;  %v1915_v13 = vadd.f32 %v14601_v47, %v12867_v54  ;;  %v14602_v58 = vld [vmem:[#allocation103_spill] sm:$0xff] }
 0x3c3   :  { %10719 = vtanh.f32 %v5731_v5  ;;  %v5498_v46 = vadd.f32 %v5497_v16, %v12897_v12  ;;  %v5499_v53 = vpop.f32.mrb[55].mxu0  ;;  %v5611_v17 = vadd.f32 %v5610_v8, %v12897_v12  ;;  %v5612_v36 = vpop.f32.mrb[55].mxu1  ;;  %7166 = vmatprep.mubr.f32.mxu1 %v14343_v63  ;;  %v2028_v27 = vadd.f32 %v14602_v58, %v12867_v54 }
 0x3c4   :  { %10721 = vtanh.f32 %v5733_v26  ;;  %v5500_v33 = vadd.f32 %v5499_v53, %v12897_v12  ;;  %v5613_v28 = vadd.f32 %v5612_v36, %v12897_v12 }
 0x3c5   :  { %v10704_v43 = vpop.eup %10703  ;;  %10723 = vtanh.f32 %v5732_v14  ;;  %v5763_v34 = vmul.f32 %v5498_v46, %v1913_v62  ;;  %v5765_v48 = vmul.f32 %v5611_v17, %v2026_v18  ;;  %9404 = vmatmul.mubr.msk.f32.gmra.mrb[118].mxu0 %vm2202_vm2, %v13511_v4  ;;  %v13741_v17 = vpop.permute.xlu0 %3789 }
 0x3c6   :  { %v10706_v29 = vpop.eup %10705  ;;  %10725 = vtanh.f32 %v5734_v37  ;;  %v5764_v5 = vmul.f32 %v5500_v33, %v1915_v13  ;;  %v13723_v22 = vpop.f32.mrb[56].mxu0  ;;  %v5766_v26 = vmul.f32 %v5613_v28, %v2028_v27  ;;  %9408 = vmatmul.mubr.msk.f32.gmra.mrb[118].mxu1 %vm2202_vm2, %v13511_v4  ;;  %7237 = vmatprep.mubr.f32.mxu0 %v14343_v63 }
 0x3c7   :  { %v10708_v24 = vpop.eup %10707  ;;  %10727 = vtanh.f32 %v5763_v34  ;;  %v13727_v54 = vpop.f32.mrb[56].mxu1  ;;  %7326 = vmatprep.mubr.f32.mxu1 %v14343_v63 }
 0x3c8   :  { %v13729_v62 = vpop.f32.mrb[57].mxu0  ;;  %v10710_v12 = vpop.eup %10709  ;;  %10729 = vtanh.f32 %v5765_v48 }
 0x3c9   :  { %v13732_v14 = vpop.f32.mrb[57].mxu1  ;;  %v10712_v16 = vpop.eup %10711  ;;  %10731 = vtanh.f32 %v5764_v5 }
 0x3ca   :  { %v10714_v59 = vpop.eup %10713  ;;  %10733 = vtanh.f32 %v5766_v26  ;;  %v13735_v18 = vpop.f32.mrb[58].mxu0  ;;  %v9803_v37 = vpack.c.bf16 %v10712_v16, %v10704_v43 }
 0x3cb   :  { %v10716_v46 = vpop.eup %10715  ;;  %v13737_v8 = vpop.f32.mrb[58].mxu1  ;;  %v9811_v47 = vpack.c.bf16 %v10714_v59, %v10706_v29 }
 0x3cc   :  { %14603 = vst [vmem:[#allocation85_spill] sm:$0xff] %v13737_v8  ;;  %v13739_v53 = vpop.f32.mrb[59].mxu0  ;;  %v10718_v13 = vpop.eup %10717  ;;  %v9801_v36 = vpack.c.bf16 %v10716_v46, %v10708_v24  ;;  %v3922_v8 = vadd.f32 %v12916_v42, %v13741_v17 }
 0x3cd   :  { %14604 = vst [vmem:[#allocation86_spill] sm:$0xff] %v13739_v53  ;;  %v13743_v33 = vpop.f32.mrb[59].mxu1  ;;  %v10720_v58 = vpop.eup %10719  ;;  %v9809_v27 = vpack.c.bf16 %v10718_v13, %v10710_v12 }
 0x3ce   :  { %14605 = vst [vmem:[#allocation87_spill] sm:$0xff] %v13743_v33  ;;  %v10722_v34 = vpop.eup %10721  ;;  %9802 = vmatprep.subr.bf16.mxu0 %v9801_v36  ;;  %v13745_v28 = vpop.f32.mrb[60].mxu0 }
 0x3cf   :  { %14606 = vst [vmem:[#allocation88_spill] sm:$0xff] %v13745_v28  ;;  %v10724_v48 = vpop.eup %10723  ;;  %9810 = vmatprep.subr.bf16.mxu1 %v9809_v27  ;;  %v13747_v43 = vpop.f32.mrb[60].mxu1  ;;  %9804 = vmatpush1.bf16.msra.mxu0 %v9803_v37 }
 0x3d0   :  { %14607 = vst [vmem:[#allocation89_spill] sm:$0xff] %v13747_v43  ;;  %v13749_v5 = vpop.f32.mrb[61].mxu0  ;;  %v10726_v29 = vpop.eup %10725  ;;  %9812 = vmatpush1.bf16.msra.mxu1 %v9811_v47 }
 0x3d1   :  { %14608 = vst [vmem:[#allocation90_spill] sm:$0xff] %v13749_v5  ;;  %v13751_v26 = vpop.permute.xlu1 %3794  ;;  %v13753_v16 = vpop.f32.mrb[61].mxu1 }
 0x3d2   :  { %14609 = vst [vmem:[#allocation91_spill] sm:$0xff] %v13753_v16  ;;  %v10728_v24 = vpop.eup %10727  ;;  %v13755_v12 = vpop.permute.xlu0 %5897 }
 0x3d3   :  { %v10730_v59 = vpop.eup %10729  ;;  %v13757_v46 = vpop.f32.mrb[62].mxu0  ;;  %v9807_v13 = vpack.c.bf16 %v10728_v24, %v10720_v58 }
 0x3d4   :  { %v10732_v36 = vpop.eup %10731  ;;  %v13759_v27 = vpop.f32.mrb[62].mxu1  ;;  %v9815_v37 = vpack.c.bf16 %v10730_v59, %v10722_v34  ;;  %v4035_v34 = vadd.f32 %v12919_v3, %v13741_v17 }
 0x3d5   :  { %14610 = vst [vmem:[#allocation92_spill] sm:$0xff] %v13759_v27  ;;  %v13761_v43 = vpop.f32.mrb[63].mxu0  ;;  %v10734_v5 = vpop.eup %10733  ;;  %v9805_v33 = vpack.c.bf16 %v10732_v36, %v10724_v48  ;;  %v3924_v48 = vadd.f32 %v12921_v19, %v13741_v17 }
 0x3d6   :  { %14611 = vst [vmem:[#allocation93_spill] sm:$0xff] %v13761_v43  ;;  %v13763_v28 = vpop.f32.mrb[63].mxu1  ;;  %v9813_v47 = vpack.c.bf16 %v10734_v5, %v10726_v29  ;;  %v13765_v53 = vpop.permute.xlu1 %5902  ;;  %v4037_v29 = vadd.f32 %v12923_v2, %v13741_v17 }
 0x3d7   :  { %9806 = vmatprep.subr.bf16.mxu0 %v9805_v33  ;;  %v5993_v16 = vpop.f32.mrb[64].mxu0  ;;  %v6082_v24 = vpop.f32.mrb[64].mxu1 }
 0x3d8   :  { %9814 = vmatprep.subr.bf16.mxu1 %v9813_v47  ;;  %v5994_v58 = vadd.f32 %v5993_v16, %v13755_v12  ;;  %9808 = vmatpush1.bf16.msra.mxu0 %v9807_v13  ;;  %v5995_v27 = vpop.f32.mrb[65].mxu0  ;;  %v13770_v43 = vpop.permute.xlu0 %3799  ;;  %v6083_v33 = vadd.f32 %v6082_v24, %v13755_v12  ;;  %v3928_v13 = vadd.f32 %v12930_v6, %v13751_v26 }
 0x3d9   :  { %9816 = vmatpush1.bf16.msra.mxu1 %v9815_v37  ;;  %v5996_v5 = vadd.f32 %v5995_v27, %v13755_v12  ;;  %v6084_v42 = vpop.f32.mrb[65].mxu1  ;;  %v4041_v37 = vadd.f32 %v12933_v15, %v13751_v26  ;;  %v3930_v6 = vadd.f32 %v12935_v9, %v13751_v26  ;;  %v3934_v9 = vadd.f32 %v12944_v7, %v13770_v43 }
 0x3da   :  { %v7351_v16 = vmul.f32 %v5994_v58, %v3922_v8  ;;  %v6085_v59 = vadd.f32 %v6084_v42, %v13755_v12  ;;  %v7353_v36 = vmul.f32 %v6083_v33, %v4035_v34  ;;  %v5999_v19 = vpop.f32.mrb[66].mxu0  ;;  %v13796_v34 = vpop.permute.xlu1 %3804  ;;  %v3936_v7 = vadd.f32 %v12949_v20, %v13770_v43 }
 0x3db   :  { %v7352_v3 = vmul.f32 %v5996_v5, %v3924_v48  ;;  %9409 = vmatmul.mubr.msk.f32.vlgmr.msra.gmra.mrb[120].mxu0 %vm2202_vm2, %v13444_v44  ;;  %v6000_v2 = vadd.f32 %v5999_v19, %v13765_v53  ;;  %v6088_v8 = vpop.f32.mrb[66].mxu1  ;;  %v6001_v47 = vpop.f32.mrb[67].mxu0 }
 0x3dc   :  { %10735 = vtanh.f32 %v7351_v16  ;;  %v7354_v27 = vmul.f32 %v6085_v59, %v4037_v29  ;;  %9413 = vmatmul.mubr.msk.f32.vlgmr.msra.gmra.mrb[120].mxu1 %vm2202_vm2, %v13444_v44  ;;  %7243 = vmatprep.mubr.f32.mxu0 %v14343_v63  ;;  %v6089_v58 = vadd.f32 %v6088_v8, %v13765_v53  ;;  %v6002_v24 = vadd.f32 %v6001_v47, %v13765_v53  ;;  %v6090_v15 = vpop.f32.mrb[67].mxu1  ;;  %v13801_v5 = vpop.permute.xlu0 %5907 }
 0x3dd   :  { %10737 = vtanh.f32 %v7353_v36  ;;  %7332 = vmatprep.mubr.f32.mxu1 %v14343_v63  ;;  %v4043_v44 = vadd.f32 %v12937_v41, %v13751_v26  ;;  %v7383_v48 = vmul.f32 %v6000_v2, %v3928_v13  ;;  %v6091_v33 = vadd.f32 %v6090_v15, %v13765_v53 }
 0x3de   :  { %10739 = vtanh.f32 %v7352_v3  ;;  %v7385_v42 = vmul.f32 %v6089_v58, %v4041_v37  ;;  %v7384_v29 = vmul.f32 %v6002_v24, %v3930_v6  ;;  %v6005_v16 = vpop.f32.mrb[68].mxu0  ;;  %v4047_v59 = vadd.f32 %v12947_v55, %v13770_v43  ;;  %v13823_v20 = vpop.permute.xlu1 %5912 }
 0x3df   :  { %10741 = vtanh.f32 %v7354_v27  ;;  %9410 = vmatmul.mubr.msk.f32.gmra.mrb[122].mxu0 %vm2202_vm2, %v13467_v57  ;;  %v7386_v41 = vmul.f32 %v6091_v33, %v4043_v44  ;;  %v6006_v13 = vadd.f32 %v6005_v16, %v13801_v5  ;;  %v6094_v36 = vpop.f32.mrb[68].mxu1  ;;  %v6007_v3 = vpop.f32.mrb[69].mxu0  ;;  %v4053_v24 = vadd.f32 %v12961_v50, %v13796_v34 }
 0x3e0   :  { %10743 = vtanh.f32 %v7383_v48  ;;  %9414 = vmatmul.mubr.msk.f32.gmra.mrb[122].mxu1 %vm2202_vm2, %v13467_v57  ;;  %7249 = vmatprep.mubr.f32.mxu0 %v14343_v63  ;;  %v6095_v19 = vadd.f32 %v6094_v36, %v13801_v5  ;;  %v6008_v37 = vadd.f32 %v6007_v3, %v13801_v5  ;;  %v6096_v55 = vpop.f32.mrb[69].mxu1  ;;  %v4049_v57 = vadd.f32 %v12951_v21, %v13770_v43 }
 0x3e1   :  { %10745 = vtanh.f32 %v7385_v42  ;;  %7338 = vmatprep.mubr.f32.mxu1 %v14343_v63  ;;  %v7415_v27 = vmul.f32 %v6006_v13, %v3934_v9  ;;  %v6097_v2 = vadd.f32 %v6096_v55, %v13801_v5  ;;  %v3940_v21 = vadd.f32 %v12958_v61, %v13796_v34 }
 0x3e2   :  { %10747 = vtanh.f32 %v7384_v29  ;;  %v7417_v8 = vmul.f32 %v6095_v19, %v4047_v59  ;;  %v7416_v47 = vmul.f32 %v6008_v37, %v3936_v7  ;;  %v4055_v50 = vadd.f32 %v12965_v11, %v13796_v34 }
 0x3e3   :  { %10749 = vtanh.f32 %v7386_v41  ;;  %9411 = vmatmul.mubr.msk.f32.gmra.mrb[124].mxu0 %vm2202_vm2, %v13490_v40  ;;  %v7418_v6 = vmul.f32 %v6097_v2, %v4049_v57  ;;  %v6011_v58 = vpop.f32.mrb[70].mxu0 }
 0x3e4   :  { %9415 = vmatmul.mubr.msk.f32.gmra.mrb[124].mxu1 %vm2202_vm2, %v13490_v40  ;;  %7255 = vmatprep.mubr.f32.mxu0 %v14343_v63  ;;  %10751 = vtanh.f32 %v7415_v27  ;;  %v6012_v15 = vadd.f32 %v6011_v58, %v13823_v20  ;;  %v6100_v44 = vpop.f32.mrb[70].mxu1  ;;  %v6013_v48 = vpop.f32.mrb[71].mxu0  ;;  %v3942_v40 = vadd.f32 %v12963_v39, %v13796_v34  ;;  %v4150_v58 = vadd.f32 %v13059_v56, %v13741_v17 }
 0x3e5   :  { %7344 = vmatprep.mubr.f32.mxu1 %v14343_v63  ;;  %10753 = vtanh.f32 %v7417_v8  ;;  %v6101_v9 = vadd.f32 %v6100_v44, %v13823_v20  ;;  %v6014_v42 = vadd.f32 %v6013_v48, %v13823_v20  ;;  %v6102_v61 = vpop.f32.mrb[71].mxu1 }
 0x3e6   :  { %v10736_v33 = vpop.eup %10735  ;;  %10755 = vtanh.f32 %v7416_v47  ;;  %v7447_v16 = vmul.f32 %v6012_v15, %v3940_v21  ;;  %v6103_v59 = vadd.f32 %v6102_v61, %v13823_v20  ;;  %v4263_v21 = vadd.f32 %v13061_v31, %v13741_v17 }
 0x3e7   :  { %v10738_v29 = vpop.eup %10737  ;;  %9412 = vmatmul.mubr.msk.f32.gmra.mrb[126].mxu0 %vm2202_vm2, %v13511_v4  ;;  %10757 = vtanh.f32 %v7418_v6  ;;  %v7449_v39 = vmul.f32 %v6101_v9, %v4053_v24  ;;  %v7448_v13 = vmul.f32 %v6014_v42, %v3942_v40  ;;  %v4261_v6 = vadd.f32 %v13057_v38, %v13741_v17 }
 0x3e8   :  { %v10740_v41 = vpop.eup %10739  ;;  %9416 = vmatmul.mubr.msk.f32.gmra.mrb[126].mxu1 %vm2202_vm2, %v13511_v4  ;;  %7679 = vmatprep.mubr.f32.mxu0 %v14343_v63  ;;  %10759 = vtanh.f32 %v7447_v16  ;;  %v7450_v3 = vmul.f32 %v6103_v59, %v4055_v50  ;;  %v4148_v4 = vadd.f32 %v13055_v25, %v13741_v17  ;;  %v4154_v25 = vadd.f32 %v13074_v45, %v13751_v26 }
 0x3e9   :  { %v10742_v36 = vpop.eup %10741  ;;  %7750 = vmatprep.mubr.f32.mxu1 %v14343_v63  ;;  %10761 = vtanh.f32 %v7449_v39  ;;  %v4267_v31 = vadd.f32 %v13076_v10, %v13751_v26  ;;  %v4156_v9 = vadd.f32 %v13078_v30, %v13751_v26  ;;  %v4269_v45 = vadd.f32 %v13080_v1, %v13751_v26 }
 0x3ea   :  { %v10744_v11 = vpop.eup %10743  ;;  %10763 = vtanh.f32 %v7448_v13  ;;  %v4160_v50 = vadd.f32 %v13093_v51, %v13770_v43  ;;  %v4273_v10 = vadd.f32 %v13095_v60, %v13770_v43 }
 0x3eb   :  { %v10746_v7 = vpop.eup %10745  ;;  %v9819_v19 = vpack.c.bf16 %v10744_v11, %v10736_v33  ;;  %10765 = vtanh.f32 %v7450_v3 }
 0x3ec   :  { %v10748_v37 = vpop.eup %10747  ;;  %v9827_v55 = vpack.c.bf16 %v10746_v7, %v10738_v29 }
 0x3ed   :  { %v10750_v57 = vpop.eup %10749  ;;  %v9817_v27 = vpack.c.bf16 %v10748_v37, %v10740_v41  ;;  %v6171_v2 = vpop.f32.mrb[72].mxu0 }
 0x3ee   :  { %v9825_v8 = vpack.c.bf16 %v10750_v57, %v10742_v36  ;;  %v13849_v47 = vpop.eup %10751  ;;  %v6172_v24 = vadd.f32 %v6171_v2, %v13755_v12  ;;  %v6260_v15 = vpop.f32.mrb[72].mxu1 }
 0x3ef   :  { %v6173_v44 = vpop.f32.mrb[73].mxu0  ;;  %9818 = vmatprep.subr.bf16.mxu0 %v9817_v27  ;;  %v13858_v48 = vpop.eup %10753  ;;  %v6261_v33 = vadd.f32 %v6260_v15, %v13755_v12 }
 0x3f0   :  { %v6174_v38 = vadd.f32 %v6173_v44, %v13755_v12  ;;  %v6262_v40 = vpop.f32.mrb[73].mxu1  ;;  %9826 = vmatprep.subr.bf16.mxu1 %v9825_v8  ;;  %9820 = vmatpush1.bf16.msra.mxu0 %v9819_v19  ;;  %v10756_v56 = vpop.eup %10755  ;;  %v7355_v42 = vmul.f32 %v6172_v24, %v4148_v4  ;;  %v4162_v44 = vadd.f32 %v13097_v52, %v13770_v43  ;;  %v13892_v52 = vld [vmem:[%s14319_s2 + $0x80] sm:$0xff] }
 0x3f1   :  { %v6263_v61 = vadd.f32 %v6262_v40, %v13755_v12  ;;  %9828 = vmatpush1.bf16.msra.mxu1 %v9827_v55  ;;  %v10758_v29 = vpop.eup %10757  ;;  %v7357_v16 = vmul.f32 %v6261_v33, %v4261_v6  ;;  %v6177_v41 = vpop.f32.mrb[74].mxu0 }
 0x3f2   :  { %v7356_v59 = vmul.f32 %v6174_v38, %v4150_v58  ;;  %v10760_v39 = vpop.eup %10759  ;;  %10767 = vtanh.f32 %v7355_v42  ;;  %v6178_v13 = vadd.f32 %v6177_v41, %v13765_v53  ;;  %v6266_v36 = vpop.f32.mrb[74].mxu1  ;;  %v4275_v38 = vadd.f32 %v13099_v49, %v13770_v43 }
 0x3f3   :  { %v7358_v30 = vmul.f32 %v6263_v61, %v4263_v21  ;;  %v6179_v3 = vpop.f32.mrb[75].mxu0  ;;  %v10762_v11 = vpop.eup %10761  ;;  %10769 = vtanh.f32 %v7357_v16  ;;  %v6267_v1 = vadd.f32 %v6266_v36, %v13765_v53  ;;  %v9823_v19 = vpack.c.bf16 %v10760_v39, %v13849_v47 }
 0x3f4   :  { %v6180_v7 = vadd.f32 %v6179_v3, %v13765_v53  ;;  %v6268_v51 = vpop.f32.mrb[75].mxu1  ;;  %v10764_v37 = vpop.eup %10763  ;;  %10771 = vtanh.f32 %v7356_v59  ;;  %v7387_v55 = vmul.f32 %v6178_v13, %v4154_v25  ;;  %v9831_v57 = vpack.c.bf16 %v10762_v11, %v13858_v48  ;;  %v14612_v59 = vld [vmem:[#allocation5_spill] sm:$0xff] }
 0x3f5   :  { %v6269_v60 = vadd.f32 %v6268_v51, %v13765_v53  ;;  %v10766_v27 = vpop.eup %10765  ;;  %10773 = vtanh.f32 %v7358_v30  ;;  %v7389_v4 = vmul.f32 %v6267_v1, %v4267_v31  ;;  %v6183_v8 = vpop.f32.mrb[76].mxu0  ;;  %v9821_v6 = vpack.c.bf16 %v10764_v37, %v10756_v56 }
 0x3f6   :  { %v7388_v2 = vmul.f32 %v6180_v7, %v4156_v9  ;;  %10775 = vtanh.f32 %v7387_v55  ;;  %v6184_v21 = vadd.f32 %v6183_v8, %v13801_v5  ;;  %v6272_v24 = vpop.f32.mrb[76].mxu1  ;;  %v6185_v15 = vpop.f32.mrb[77].mxu0  ;;  %v9829_v47 = vpack.c.bf16 %v10766_v27, %v10758_v29 }
 0x3f7   :  { %v7390_v58 = vmul.f32 %v6269_v60, %v4269_v45  ;;  %10777 = vtanh.f32 %v7389_v4  ;;  %v6273_v25 = vadd.f32 %v6272_v24, %v13801_v5  ;;  %v6186_v48 = vadd.f32 %v6185_v15, %v13801_v5  ;;  %v6274_v33 = vpop.f32.mrb[77].mxu1  ;;  %9822 = vmatprep.subr.bf16.mxu0 %v9821_v6 }
 0x3f8   :  { %10779 = vtanh.f32 %v7388_v2  ;;  %v7419_v40 = vmul.f32 %v6184_v21, %v4160_v50  ;;  %v6275_v56 = vadd.f32 %v6274_v33, %v13801_v5  ;;  %9830 = vmatprep.subr.bf16.mxu1 %v9829_v47  ;;  %9824 = vmatpush1.bf16.msra.mxu0 %v9823_v19  ;;  %v4166_v31 = vadd.f32 %v13106_v23, %v13796_v34 }
 0x3f9   :  { %10781 = vtanh.f32 %v7390_v58  ;;  %v7421_v9 = vmul.f32 %v6273_v25, %v4273_v10  ;;  %v7420_v42 = vmul.f32 %v6186_v48, %v4162_v44  ;;  %9832 = vmatpush1.bf16.msra.mxu1 %v9831_v57  ;;  %v6189_v61 = vpop.f32.mrb[78].mxu0  ;;  %v4279_v49 = vadd.f32 %v13108_v35, %v13796_v34  ;;  %v14613_v35 = vld [vmem:[#allocation6_spill] sm:$0xff] }
 0x3fa   :  { %10783 = vtanh.f32 %v7419_v40  ;;  %v7422_v29 = vmul.f32 %v6275_v56, %v4275_v38  ;;  %v6190_v45 = vadd.f32 %v6189_v61, %v13823_v20  ;;  %v6278_v50 = vpop.f32.mrb[78].mxu1  ;;  %v6191_v16 = vpop.f32.mrb[79].mxu0  ;;  %v4168_v41 = vadd.f32 %v14612_v59, %v13796_v34 }
 0x3fb   :  { %10785 = vtanh.f32 %v7421_v9  ;;  %v6279_v23 = vadd.f32 %v6278_v50, %v13823_v20  ;;  %v6192_v39 = vadd.f32 %v6191_v16, %v13823_v20  ;;  %v6280_v10 = vpop.f32.mrb[79].mxu1  ;;  %9417 = vmatmul.mubr.msk.f32.vlgmr.msra.gmra.mrb[128].mxu0 %vm2202_vm2, %v13892_v52  ;;  %v4281_v13 = vadd.f32 %v14613_v35, %v13796_v34  ;;  %v14614_v9 = vld [vmem:[#allocation7_spill] sm:$0xff]  ;;  %v14616_v16 = vld [vmem:[#allocation9_spill] sm:$0xff] }
 0x3fc   :  { %v10768_v30 = vpop.eup %10767  ;;  %10787 = vtanh.f32 %v7420_v42  ;;  %v7451_v36 = vmul.f32 %v6190_v45, %v4166_v31  ;;  %v6281_v3 = vadd.f32 %v6280_v10, %v13823_v20  ;;  %9418 = vmatmul.mubr.msk.f32.vlgmr.msra.gmra.mrb[128].mxu1 %vm2202_vm2, %v13892_v52  ;;  %7821 = vmatprep.mubr.f32.mxu0 %v14343_v63  ;;  %v4374_v42 = vadd.f32 %v14614_v9, %v13741_v17  ;;  %v14615_v45 = vld [vmem:[#allocation8_spill] sm:$0xff]  ;;  %v14617_v10 = vld [vmem:[#allocation10_spill] sm:$0xff] }
 0x3fd   :  { %v10770_v11 = vpop.eup %10769  ;;  %10789 = vtanh.f32 %v7422_v29  ;;  %v7453_v1 = vmul.f32 %v6279_v23, %v4279_v49  ;;  %v7452_v7 = vmul.f32 %v6192_v39, %v4168_v41  ;;  %7892 = vmatprep.mubr.f32.mxu1 %v14343_v63  ;;  %v4487_v50 = vadd.f32 %v14615_v45, %v13741_v17 }
 0x3fe   :  { %v10772_v51 = vpop.eup %10771  ;;  %10791 = vtanh.f32 %v7451_v36  ;;  %v7454_v19 = vmul.f32 %v6281_v3, %v4281_v13  ;;  %v4376_v59 = vadd.f32 %v14616_v16, %v13741_v17  ;;  %v14618_v36 = vld [vmem:[#allocation11_spill] sm:$0xff]  ;;  %v14625_v16 = vld [vmem:[#allocation18_spill] sm:$0xff] }
 0x3ff   :  { %v10774_v37 = vpop.eup %10773  ;;  %10793 = vtanh.f32 %v7453_v1  ;;  %v4380_v3 = vadd.f32 %v14618_v36, %v13751_v26  ;;  %v14627_v36 = vld [vmem:[#allocation20_spill] sm:$0xff] }
 0x400   :  { %v10776_v55 = vpop.eup %10775  ;;  %10795 = vtanh.f32 %v7452_v7 }
 0x401   :  { %v10778_v60 = vpop.eup %10777  ;;  %10797 = vtanh.f32 %v7454_v19  ;;  %v9835_v57 = vpack.c.bf16 %v10776_v55, %v10768_v30  ;;  %v4489_v30 = vadd.f32 %v14617_v10, %v13741_v17 }
 0x402   :  { %v10780_v27 = vpop.eup %10779  ;;  %v9843_v4 = vpack.c.bf16 %v10778_v60, %v10770_v11 }
 0x403   :  { %v10782_v2 = vpop.eup %10781  ;;  %v9833_v8 = vpack.c.bf16 %v10780_v27, %v10772_v51  ;;  %v14619_v51 = vld [vmem:[#allocation12_spill] sm:$0xff]  ;;  %v14620_v27 = vld [vmem:[#allocation13_spill] sm:$0xff] }
 0x404   :  { %v10784_v6 = vpop.eup %10783  ;;  %v9841_v58 = vpack.c.bf16 %v10782_v2, %v10774_v37  ;;  %v4493_v19 = vadd.f32 %v14619_v51, %v13751_v26 }
 0x405   :  { %v10786_v21 = vpop.eup %10785  ;;  %9834 = vmatprep.subr.bf16.mxu0 %v9833_v8 }
 0x406   :  { %v10788_v24 = vpop.eup %10787  ;;  %9842 = vmatprep.subr.bf16.mxu1 %v9841_v58  ;;  %9836 = vmatpush1.bf16.msra.mxu0 %v9835_v57  ;;  %v14621_v58 = vld [vmem:[#allocation14_spill] sm:$0xff] }
 0x407   :  { %v10790_v15 = vpop.eup %10789  ;;  %9844 = vmatpush1.bf16.msra.mxu1 %v9843_v4  ;;  %v4382_v4 = vadd.f32 %v14620_v27, %v13751_v26 }
 0x408   :  { %v10792_v47 = vpop.eup %10791 }
 0x409   :  { %v10794_v44 = vpop.eup %10793  ;;  %v9839_v25 = vpack.c.bf16 %v10792_v47, %v10784_v6  ;;  %v14622_v47 = vld [vmem:[#allocation15_spill] sm:$0xff] }
 0x40a   :  { %v10796_v48 = vpop.eup %10795  ;;  %v9847_v33 = vpack.c.bf16 %v10794_v44, %v10786_v21  ;;  %v4495_v21 = vadd.f32 %v14621_v58, %v13751_v26  ;;  %v4386_v44 = vadd.f32 %v14622_v47, %v13770_v43 }
 0x40b   :  { %v10798_v38 = vpop.eup %10797  ;;  %v9837_v40 = vpack.c.bf16 %v10796_v48, %v10788_v24 }
 0x40c   :  { %v9845_v56 = vpack.c.bf16 %v10798_v38, %v10790_v15  ;;  %v6349_v31 = vpop.f32.mrb[80].mxu0  ;;  %v14623_v38 = vld [vmem:[#allocation16_spill] sm:$0xff] }
 0x40d   :  { %9838 = vmatprep.subr.bf16.mxu0 %v9837_v40  ;;  %v6350_v61 = vadd.f32 %v6349_v31, %v13755_v12  ;;  %v6438_v49 = vpop.f32.mrb[80].mxu1  ;;  %v6351_v29 = vpop.f32.mrb[81].mxu0  ;;  %v4499_v40 = vadd.f32 %v14623_v38, %v13770_v43 }
 0x40e   :  { %9846 = vmatprep.subr.bf16.mxu1 %v9845_v56  ;;  %9840 = vmatpush1.bf16.msra.mxu0 %v9839_v25  ;;  %v6439_v41 = vadd.f32 %v6438_v49, %v13755_v12  ;;  %v6352_v23 = vadd.f32 %v6351_v29, %v13755_v12  ;;  %v6440_v39 = vpop.f32.mrb[81].mxu1 }
 0x40f   :  { %9848 = vmatpush1.bf16.msra.mxu1 %v9847_v33  ;;  %v7359_v35 = vmul.f32 %v6350_v61, %v4374_v42  ;;  %v6441_v13 = vadd.f32 %v6440_v39, %v13755_v12  ;;  %v14624_v61 = vld [vmem:[#allocation17_spill] sm:$0xff]  ;;  %v14626_v39 = vld [vmem:[#allocation19_spill] sm:$0xff] }
 0x410   :  { %v7361_v11 = vmul.f32 %v6439_v41, %v4487_v50  ;;  %v7360_v1 = vmul.f32 %v6352_v23, %v4376_v59  ;;  %v6355_v7 = vpop.f32.mrb[82].mxu0  ;;  %v4388_v49 = vadd.f32 %v14624_v61, %v13770_v43  ;;  %v4501_v59 = vadd.f32 %v14625_v16, %v13770_v43 }
 0x411   :  { %9419 = vmatmul.mubr.msk.f32.vlgmr.msra.gmra.mrb[130].mxu0 %vm2202_vm2, %v13892_v52  ;;  %10799 = vtanh.f32 %v7359_v35  ;;  %v7362_v37 = vmul.f32 %v6441_v13, %v4489_v30  ;;  %v6356_v55 = vadd.f32 %v6355_v7, %v13765_v53  ;;  %v6444_v60 = vpop.f32.mrb[82].mxu1  ;;  %v6357_v57 = vpop.f32.mrb[83].mxu0  ;;  %v4392_v10 = vadd.f32 %v14626_v39, %v13796_v34 }
 0x412   :  { %9420 = vmatmul.mubr.msk.f32.vlgmr.msra.gmra.mrb[130].mxu1 %vm2202_vm2, %v13892_v52  ;;  %7963 = vmatprep.mubr.f32.mxu0 %v14343_v63  ;;  %10801 = vtanh.f32 %v7361_v11  ;;  %v6445_v2 = vadd.f32 %v6444_v60, %v13765_v53  ;;  %v6358_v8 = vadd.f32 %v6357_v57, %v13765_v53  ;;  %v6446_v6 = vpop.f32.mrb[83].mxu1 }
 0x413   :  { %8034 = vmatprep.mubr.f32.mxu1 %v14343_v63  ;;  %10803 = vtanh.f32 %v7360_v1  ;;  %v7391_v24 = vmul.f32 %v6356_v55, %v4380_v3  ;;  %v6447_v15 = vadd.f32 %v6446_v6, %v13765_v53  ;;  %v4505_v3 = vadd.f32 %v14627_v36, %v13796_v34 }
 0x414   :  { %10805 = vtanh.f32 %v7362_v37  ;;  %v7393_v25 = vmul.f32 %v6445_v2, %v4493_v19  ;;  %v7392_v48 = vmul.f32 %v6358_v8, %v4382_v4  ;;  %v6361_v33 = vpop.f32.mrb[84].mxu0  ;;  %v14628_v19 = vld [vmem:[#allocation21_spill] sm:$0xff]  ;;  %v14629_v4 = vld [vmem:[#allocation22_spill] sm:$0xff] }
 0x415   :  { %10807 = vtanh.f32 %v7391_v24  ;;  %v7394_v56 = vmul.f32 %v6447_v15, %v4495_v21  ;;  %v6362_v31 = vadd.f32 %v6361_v33, %v13801_v5  ;;  %v6450_v9 = vpop.f32.mrb[84].mxu1  ;;  %v6363_v42 = vpop.f32.mrb[85].mxu0  ;;  %v4394_v37 = vadd.f32 %v14628_v19, %v13796_v34 }
 0x416   :  { %10809 = vtanh.f32 %v7393_v25  ;;  %v6451_v29 = vadd.f32 %v6450_v9, %v13801_v5  ;;  %v6364_v45 = vadd.f32 %v6363_v42, %v13801_v5  ;;  %v6452_v50 = vpop.f32.mrb[85].mxu1  ;;  %v4507_v2 = vadd.f32 %v14629_v4, %v13796_v34 }
 0x417   :  { %10811 = vtanh.f32 %v7392_v48  ;;  %v7423_v41 = vmul.f32 %v6362_v31, %v4386_v44  ;;  %v6453_v23 = vadd.f32 %v6452_v50, %v13801_v5 }
 0x418   :  { %10813 = vtanh.f32 %v7394_v56  ;;  %v7425_v30 = vmul.f32 %v6451_v29, %v4499_v40  ;;  %v7424_v35 = vmul.f32 %v6364_v45, %v4388_v49  ;;  %v6367_v13 = vpop.f32.mrb[86].mxu0 }
 0x419   :  { %10815 = vtanh.f32 %v7423_v41  ;;  %v7426_v11 = vmul.f32 %v6453_v23, %v4501_v59  ;;  %v6368_v1 = vadd.f32 %v6367_v13, %v13823_v20  ;;  %v6456_v7 = vpop.f32.mrb[86].mxu1  ;;  %v6369_v51 = vpop.f32.mrb[87].mxu0 }
 0x41a   :  { %10817 = vtanh.f32 %v7425_v30  ;;  %v6457_v55 = vadd.f32 %v6456_v7, %v13823_v20  ;;  %v6370_v60 = vadd.f32 %v6369_v51, %v13823_v20  ;;  %v6458_v57 = vpop.f32.mrb[87].mxu1  ;;  %v14632_v51 = vld [vmem:[#allocation25_spill] sm:$0xff] }
 0x41b   :  { %v10800_v27 = vpop.eup %10799  ;;  %10819 = vtanh.f32 %v7424_v35  ;;  %v7455_v8 = vmul.f32 %v6368_v1, %v4392_v10  ;;  %v6459_v6 = vadd.f32 %v6458_v57, %v13823_v20  ;;  %v14630_v35 = vld [vmem:[#allocation23_spill] sm:$0xff]  ;;  %v14631_v1 = vld [vmem:[#allocation24_spill] sm:$0xff]  ;;  %v4602_v19 = vadd.f32 %v14632_v51, %v13741_v17  ;;  %v14633_v57 = vld [vmem:[#allocation26_spill] sm:$0xff] }
 0x41c   :  { %v10802_v58 = vpop.eup %10801  ;;  %10821 = vtanh.f32 %v7426_v11  ;;  %v7457_v21 = vmul.f32 %v6457_v55, %v4505_v3  ;;  %v7456_v24 = vmul.f32 %v6370_v60, %v4394_v37  ;;  %v4600_v13 = vadd.f32 %v14630_v35, %v13741_v17  ;;  %v14641_v51 = vld [vmem:[#allocation34_spill] sm:$0xff] }
 0x41d   :  { %v10804_v15 = vpop.eup %10803  ;;  %10823 = vtanh.f32 %v7455_v8  ;;  %v7458_v47 = vmul.f32 %v6459_v6, %v4507_v2  ;;  %v4713_v7 = vadd.f32 %v14631_v1, %v13741_v17  ;;  %v14634_v8 = vld [vmem:[#allocation27_spill] sm:$0xff] }
 0x41e   :  { %v10806_v44 = vpop.eup %10805  ;;  %10825 = vtanh.f32 %v7457_v21  ;;  %v4606_v6 = vadd.f32 %v14634_v8, %v13751_v26  ;;  %v14643_v8 = vld [vmem:[#allocation36_spill] sm:$0xff] }
 0x41f   :  { %v10808_v25 = vpop.eup %10807  ;;  %10827 = vtanh.f32 %v7456_v24 }
 0x420   :  { %v10810_v48 = vpop.eup %10809  ;;  %10829 = vtanh.f32 %v7458_v47  ;;  %v9851_v33 = vpack.c.bf16 %v10808_v25, %v10800_v27  ;;  %v4715_v27 = vadd.f32 %v14633_v57, %v13741_v17 }
 0x421   :  { %v10812_v38 = vpop.eup %10811  ;;  %v9859_v40 = vpack.c.bf16 %v10810_v48, %v10802_v58 }
 0x422   :  { %v10814_v56 = vpop.eup %10813  ;;  %v9849_v31 = vpack.c.bf16 %v10812_v38, %v10804_v15  ;;  %v14635_v15 = vld [vmem:[#allocation28_spill] sm:$0xff]  ;;  %v14636_v38 = vld [vmem:[#allocation29_spill] sm:$0xff] }
 0x423   :  { %v10816_v9 = vpop.eup %10815  ;;  %v9857_v42 = vpack.c.bf16 %v10814_v56, %v10806_v44  ;;  %v4719_v47 = vadd.f32 %v14635_v15, %v13751_v26 }
 0x424   :  { %v10818_v61 = vpop.eup %10817  ;;  %9850 = vmatprep.subr.bf16.mxu0 %v9849_v31 }
 0x425   :  { %v10820_v49 = vpop.eup %10819  ;;  %9858 = vmatprep.subr.bf16.mxu1 %v9857_v42  ;;  %9852 = vmatpush1.bf16.msra.mxu0 %v9851_v33  ;;  %v14637_v42 = vld [vmem:[#allocation30_spill] sm:$0xff] }
 0x426   :  { %v10822_v29 = vpop.eup %10821  ;;  %9860 = vmatpush1.bf16.msra.mxu1 %v9859_v40  ;;  %v4608_v40 = vadd.f32 %v14636_v38, %v13751_v26 }
 0x427   :  { %v10824_v45 = vpop.eup %10823 }
 0x428   :  { %v10826_v50 = vpop.eup %10825  ;;  %v9855_v16 = vpack.c.bf16 %v10824_v45, %v10816_v9  ;;  %v14638_v45 = vld [vmem:[#allocation31_spill] sm:$0xff] }
 0x429   :  { %v10828_v59 = vpop.eup %10827  ;;  %v9863_v41 = vpack.c.bf16 %v10826_v50, %v10818_v61  ;;  %v4721_v61 = vadd.f32 %v14637_v42, %v13751_v26  ;;  %v4612_v50 = vadd.f32 %v14638_v45, %v13770_v43 }
 0x42a   :  { %v10830_v23 = vpop.eup %10829  ;;  %v9853_v39 = vpack.c.bf16 %v10828_v59, %v10820_v49 }
 0x42b   :  { %v9861_v10 = vpack.c.bf16 %v10830_v23, %v10822_v29  ;;  %v14639_v23 = vld [vmem:[#allocation32_spill] sm:$0xff] }
 0x42c   :  { %9854 = vmatprep.subr.bf16.mxu0 %v9853_v39  ;;  %v6527_v30 = vpop.f32.mrb[88].mxu0  ;;  %v4725_v39 = vadd.f32 %v14639_v23, %v13770_v43 }
 0x42d   :  { %9862 = vmatprep.subr.bf16.mxu1 %v9861_v10  ;;  %v6528_v36 = vadd.f32 %v6527_v30, %v13755_v12  ;;  %v6616_v3 = vpop.f32.mrb[88].mxu1  ;;  %9856 = vmatpush1.bf16.msra.mxu0 %v9855_v16  ;;  %v6529_v11 = vpop.f32.mrb[89].mxu0 }
 0x42e   :  { %v6617_v37 = vadd.f32 %v6616_v3, %v13755_v12  ;;  %9864 = vmatpush1.bf16.msra.mxu1 %v9863_v41  ;;  %v6530_v55 = vadd.f32 %v6529_v11, %v13755_v12  ;;  %v6618_v60 = vpop.f32.mrb[89].mxu1 }
 0x42f   :  { %v7363_v4 = vmul.f32 %v6528_v36, %v4600_v13  ;;  %v6619_v2 = vadd.f32 %v6618_v60, %v13755_v12  ;;  %v14640_v36 = vld [vmem:[#allocation33_spill] sm:$0xff]  ;;  %v14642_v60 = vld [vmem:[#allocation35_spill] sm:$0xff] }
 0x430   :  { %v7365_v58 = vmul.f32 %v6617_v37, %v4713_v7  ;;  %v7364_v21 = vmul.f32 %v6530_v55, %v4602_v19  ;;  %9421 = vmatmul.mubr.msk.f32.vlgmr.msra.gmra.mrb[132].mxu0 %vm2202_vm2, %v13892_v52  ;;  %v6533_v24 = vpop.f32.mrb[90].mxu0  ;;  %v4614_v3 = vadd.f32 %v14640_v36, %v13770_v43  ;;  %v4727_v19 = vadd.f32 %v14641_v51, %v13770_v43 }
 0x431   :  { %10831 = vtanh.f32 %v7363_v4  ;;  %v7366_v44 = vmul.f32 %v6619_v2, %v4715_v27  ;;  %9422 = vmatmul.mubr.msk.f32.vlgmr.msra.gmra.mrb[132].mxu1 %vm2202_vm2, %v13892_v52  ;;  %v6534_v25 = vadd.f32 %v6533_v24, %v13765_v53  ;;  %v6622_v48 = vpop.f32.mrb[90].mxu1  ;;  %v6535_v33 = vpop.f32.mrb[91].mxu0  ;;  %8105 = vmatprep.mubr.f32.mxu0 %v14343_v63  ;;  %v4618_v57 = vadd.f32 %v14642_v60, %v13796_v34 }
 0x432   :  { %10833 = vtanh.f32 %v7365_v58  ;;  %v6623_v56 = vadd.f32 %v6622_v48, %v13765_v53  ;;  %v6536_v31 = vadd.f32 %v6535_v33, %v13765_v53  ;;  %v6624_v9 = vpop.f32.mrb[91].mxu1  ;;  %8176 = vmatprep.mubr.f32.mxu1 %v14343_v63 }
 0x433   :  { %10835 = vtanh.f32 %v7364_v21  ;;  %v7395_v49 = vmul.f32 %v6534_v25, %v4606_v6  ;;  %v6625_v29 = vadd.f32 %v6624_v9, %v13765_v53  ;;  %v4731_v6 = vadd.f32 %v14643_v8, %v13796_v34 }
 0x434   :  { %10837 = vtanh.f32 %v7366_v44  ;;  %v7397_v16 = vmul.f32 %v6623_v56, %v4719_v47  ;;  %v7396_v59 = vmul.f32 %v6536_v31, %v4608_v40  ;;  %v6539_v41 = vpop.f32.mrb[92].mxu0  ;;  %v14644_v47 = vld [vmem:[#allocation37_spill] sm:$0xff]  ;;  %v14645_v40 = vld [vmem:[#allocation38_spill] sm:$0xff] }
 0x435   :  { %10839 = vtanh.f32 %v7395_v49  ;;  %v7398_v10 = vmul.f32 %v6625_v29, %v4721_v61  ;;  %v6540_v30 = vadd.f32 %v6539_v41, %v13801_v5  ;;  %v6628_v35 = vpop.f32.mrb[92].mxu1  ;;  %v6541_v13 = vpop.f32.mrb[93].mxu0  ;;  %v4620_v44 = vadd.f32 %v14644_v47, %v13796_v34 }
 0x436   :  { %10841 = vtanh.f32 %v7397_v16  ;;  %v6629_v11 = vadd.f32 %v6628_v35, %v13801_v5  ;;  %v6542_v1 = vadd.f32 %v6541_v13, %v13801_v5  ;;  %v6630_v7 = vpop.f32.mrb[93].mxu1  ;;  %v4733_v56 = vadd.f32 %v14645_v40, %v13796_v34 }
 0x437   :  { %10843 = vtanh.f32 %v7396_v59  ;;  %v7427_v37 = vmul.f32 %v6540_v30, %v4612_v50  ;;  %v6631_v55 = vadd.f32 %v6630_v7, %v13801_v5 }
 0x438   :  { %10845 = vtanh.f32 %v7398_v10  ;;  %v7429_v27 = vmul.f32 %v6629_v11, %v4725_v39  ;;  %v7428_v4 = vmul.f32 %v6542_v1, %v4614_v3  ;;  %v6545_v2 = vpop.f32.mrb[94].mxu0 }
 0x439   :  { %10847 = vtanh.f32 %v7427_v37  ;;  %v7430_v58 = vmul.f32 %v6631_v55, %v4727_v19  ;;  %v6546_v21 = vadd.f32 %v6545_v2, %v13823_v20  ;;  %v6634_v24 = vpop.f32.mrb[94].mxu1  ;;  %v6547_v15 = vpop.f32.mrb[95].mxu0 }
 0x43a   :  { %10849 = vtanh.f32 %v7429_v27  ;;  %v6635_v25 = vadd.f32 %v6634_v24, %v13823_v20  ;;  %v6548_v48 = vadd.f32 %v6547_v15, %v13823_v20  ;;  %v6636_v33 = vpop.f32.mrb[95].mxu1  ;;  %v14648_v15 = vld [vmem:[#allocation41_spill] sm:$0xff] }
 0x43b   :  { %v10832_v38 = vpop.eup %10831  ;;  %10851 = vtanh.f32 %v7428_v4  ;;  %v7459_v31 = vmul.f32 %v6546_v21, %v4618_v57  ;;  %v6637_v9 = vadd.f32 %v6636_v33, %v13823_v20  ;;  %v14646_v4 = vld [vmem:[#allocation39_spill] sm:$0xff]  ;;  %v14647_v21 = vld [vmem:[#allocation40_spill] sm:$0xff]  ;;  %v4828_v47 = vadd.f32 %v14648_v15, %v13741_v17  ;;  %v14649_v33 = vld [vmem:[#allocation42_spill] sm:$0xff] }
 0x43c   :  { %v10834_v42 = vpop.eup %10833  ;;  %10853 = vtanh.f32 %v7430_v58  ;;  %v7461_v61 = vmul.f32 %v6635_v25, %v4731_v6  ;;  %v7460_v49 = vmul.f32 %v6548_v48, %v4620_v44  ;;  %v4826_v2 = vadd.f32 %v14646_v4, %v13741_v17  ;;  %v14657_v15 = vld [vmem:[#allocation50_spill] sm:$0xff] }
 0x43d   :  { %v10836_v29 = vpop.eup %10835  ;;  %10855 = vtanh.f32 %v7459_v31  ;;  %v7462_v45 = vmul.f32 %v6637_v9, %v4733_v56  ;;  %v4939_v24 = vadd.f32 %v14647_v21, %v13741_v17  ;;  %v14650_v31 = vld [vmem:[#allocation43_spill] sm:$0xff] }
 0x43e   :  { %v10838_v50 = vpop.eup %10837  ;;  %10857 = vtanh.f32 %v7461_v61  ;;  %v4832_v9 = vadd.f32 %v14650_v31, %v13751_v26  ;;  %v14659_v31 = vld [vmem:[#allocation52_spill] sm:$0xff] }
 0x43f   :  { %v10840_v16 = vpop.eup %10839  ;;  %10859 = vtanh.f32 %v7460_v49 }
 0x440   :  { %v10842_v59 = vpop.eup %10841  ;;  %10861 = vtanh.f32 %v7462_v45  ;;  %v9867_v41 = vpack.c.bf16 %v10840_v16, %v10832_v38  ;;  %v4941_v38 = vadd.f32 %v14649_v33, %v13741_v17 }
 0x441   :  { %v10844_v23 = vpop.eup %10843  ;;  %v9875_v39 = vpack.c.bf16 %v10842_v59, %v10834_v42 }
 0x442   :  { %v10846_v10 = vpop.eup %10845  ;;  %v9865_v30 = vpack.c.bf16 %v10844_v23, %v10836_v29  ;;  %v14651_v29 = vld [vmem:[#allocation44_spill] sm:$0xff]  ;;  %v14652_v23 = vld [vmem:[#allocation45_spill] sm:$0xff] }
 0x443   :  { %v10848_v35 = vpop.eup %10847  ;;  %v9873_v13 = vpack.c.bf16 %v10846_v10, %v10838_v50  ;;  %v4945_v45 = vadd.f32 %v14651_v29, %v13751_v26 }
 0x444   :  { %v10850_v36 = vpop.eup %10849  ;;  %9866 = vmatprep.subr.bf16.mxu0 %v9865_v30 }
 0x445   :  { %v10852_v3 = vpop.eup %10851  ;;  %9874 = vmatprep.subr.bf16.mxu1 %v9873_v13  ;;  %9868 = vmatpush1.bf16.msra.mxu0 %v9867_v41  ;;  %v14653_v13 = vld [vmem:[#allocation46_spill] sm:$0xff] }
 0x446   :  { %v10854_v11 = vpop.eup %10853  ;;  %9876 = vmatpush1.bf16.msra.mxu1 %v9875_v39  ;;  %v4834_v39 = vadd.f32 %v14652_v23, %v13751_v26 }
 0x447   :  { %v10856_v1 = vpop.eup %10855 }
 0x448   :  { %v10858_v7 = vpop.eup %10857  ;;  %v9871_v51 = vpack.c.bf16 %v10856_v1, %v10848_v35  ;;  %v14654_v1 = vld [vmem:[#allocation47_spill] sm:$0xff] }
 0x449   :  { %v10860_v19 = vpop.eup %10859  ;;  %v9879_v37 = vpack.c.bf16 %v10858_v7, %v10850_v36  ;;  %v4947_v36 = vadd.f32 %v14653_v13, %v13751_v26  ;;  %v4838_v7 = vadd.f32 %v14654_v1, %v13770_v43 }
 0x44a   :  { %v10862_v55 = vpop.eup %10861  ;;  %v9869_v60 = vpack.c.bf16 %v10860_v19, %v10852_v3 }
 0x44b   :  { %v9877_v57 = vpack.c.bf16 %v10862_v55, %v10854_v11  ;;  %v14655_v55 = vld [vmem:[#allocation48_spill] sm:$0xff] }
 0x44c   :  { %9870 = vmatprep.subr.bf16.mxu0 %v9869_v60  ;;  %v6705_v27 = vpop.f32.mrb[96].mxu0  ;;  %v4951_v60 = vadd.f32 %v14655_v55, %v13770_v43 }
 0x44d   :  { %9878 = vmatprep.subr.bf16.mxu1 %v9877_v57  ;;  %v6706_v8 = vadd.f32 %v6705_v27, %v13755_v12  ;;  %v6794_v6 = vpop.f32.mrb[96].mxu1  ;;  %9872 = vmatpush1.bf16.msra.mxu0 %v9871_v51  ;;  %v6707_v58 = vpop.f32.mrb[97].mxu0 }
 0x44e   :  { %v6795_v44 = vadd.f32 %v6794_v6, %v13755_v12  ;;  %9880 = vmatpush1.bf16.msra.mxu1 %v9879_v37  ;;  %v6708_v25 = vadd.f32 %v6707_v58, %v13755_v12  ;;  %v6796_v48 = vpop.f32.mrb[97].mxu1 }
 0x44f   :  { %v7367_v40 = vmul.f32 %v6706_v8, %v4826_v2  ;;  %v6797_v56 = vadd.f32 %v6796_v48, %v13755_v12  ;;  %v14656_v8 = vld [vmem:[#allocation49_spill] sm:$0xff]  ;;  %v14658_v48 = vld [vmem:[#allocation51_spill] sm:$0xff] }
 0x450   :  { %v7369_v42 = vmul.f32 %v6795_v44, %v4939_v24  ;;  %v7368_v61 = vmul.f32 %v6708_v25, %v4828_v47  ;;  %9423 = vmatmul.mubr.msk.f32.vlgmr.msra.gmra.mrb[134].mxu0 %vm2202_vm2, %v13892_v52  ;;  %v6711_v49 = vpop.f32.mrb[98].mxu0  ;;  %v4840_v6 = vadd.f32 %v14656_v8, %v13770_v43  ;;  %v4953_v47 = vadd.f32 %v14657_v15, %v13770_v43 }
 0x451   :  { %10863 = vtanh.f32 %v7367_v40  ;;  %v7370_v50 = vmul.f32 %v6797_v56, %v4941_v38  ;;  %9424 = vmatmul.mubr.msk.f32.vlgmr.msra.gmra.mrb[134].mxu1 %vm2202_vm2, %v13892_v52  ;;  %v6712_v16 = vadd.f32 %v6711_v49, %v13765_v53  ;;  %v6800_v59 = vpop.f32.mrb[98].mxu1  ;;  %v6713_v41 = vpop.f32.mrb[99].mxu0  ;;  %8247 = vmatprep.mubr.f32.mxu0 %v14343_v63  ;;  %v4844_v33 = vadd.f32 %v14658_v48, %v13796_v34 }
 0x452   :  { %10865 = vtanh.f32 %v7369_v42  ;;  %v6801_v10 = vadd.f32 %v6800_v59, %v13765_v53  ;;  %v6714_v30 = vadd.f32 %v6713_v41, %v13765_v53  ;;  %v6802_v35 = vpop.f32.mrb[99].mxu1  ;;  %8318 = vmatprep.mubr.f32.mxu1 %v14343_v63 }
 0x453   :  { %10867 = vtanh.f32 %v7368_v61  ;;  %v7399_v3 = vmul.f32 %v6712_v16, %v4832_v9  ;;  %v6803_v11 = vadd.f32 %v6802_v35, %v13765_v53  ;;  %v4957_v9 = vadd.f32 %v14659_v31, %v13796_v34 }
 0x454   :  { %10869 = vtanh.f32 %v7370_v50  ;;  %v7401_v51 = vmul.f32 %v6801_v10, %v4945_v45  ;;  %v7400_v19 = vmul.f32 %v6714_v30, %v4834_v39  ;;  %v6717_v37 = vpop.f32.mrb[100].mxu0  ;;  %v14660_v45 = vld [vmem:[#allocation53_spill] sm:$0xff]  ;;  %v14661_v39 = vld [vmem:[#allocation54_spill] sm:$0xff] }
 0x455   :  { %10871 = vtanh.f32 %v7399_v3  ;;  %v7402_v57 = vmul.f32 %v6803_v11, %v4947_v36  ;;  %v6718_v27 = vadd.f32 %v6717_v37, %v13801_v5  ;;  %v6806_v4 = vpop.f32.mrb[100].mxu1  ;;  %v6719_v2 = vpop.f32.mrb[101].mxu0  ;;  %v4846_v50 = vadd.f32 %v14660_v45, %v13796_v34 }
 0x456   :  { %10873 = vtanh.f32 %v7401_v51  ;;  %v6807_v58 = vadd.f32 %v6806_v4, %v13801_v5  ;;  %v6720_v21 = vadd.f32 %v6719_v2, %v13801_v5  ;;  %v6808_v24 = vpop.f32.mrb[101].mxu1  ;;  %v4959_v10 = vadd.f32 %v14661_v39, %v13796_v34 }
 0x457   :  { %10875 = vtanh.f32 %v7400_v19  ;;  %v7431_v44 = vmul.f32 %v6718_v27, %v4838_v7  ;;  %v6809_v25 = vadd.f32 %v6808_v24, %v13801_v5 }
 0x458   :  { %10877 = vtanh.f32 %v7402_v57  ;;  %v7433_v38 = vmul.f32 %v6807_v58, %v4951_v60  ;;  %v7432_v40 = vmul.f32 %v6720_v21, %v4840_v6  ;;  %v6723_v56 = vpop.f32.mrb[102].mxu0 }
 0x459   :  { %10879 = vtanh.f32 %v7431_v44  ;;  %v7434_v42 = vmul.f32 %v6809_v25, %v4953_v47  ;;  %v6724_v61 = vadd.f32 %v6723_v56, %v13823_v20  ;;  %v6812_v49 = vpop.f32.mrb[102].mxu1  ;;  %v6725_v29 = vpop.f32.mrb[103].mxu0 }
 0x45a   :  { %10881 = vtanh.f32 %v7433_v38  ;;  %v6813_v16 = vadd.f32 %v6812_v49, %v13823_v20  ;;  %v6726_v59 = vadd.f32 %v6725_v29, %v13823_v20  ;;  %v6814_v41 = vpop.f32.mrb[103].mxu1  ;;  %v14664_v29 = vld [vmem:[#allocation57_spill] sm:$0xff] }
 0x45b   :  { %v10864_v23 = vpop.eup %10863  ;;  %10883 = vtanh.f32 %v7432_v40  ;;  %v7463_v30 = vmul.f32 %v6724_v61, %v4844_v33  ;;  %v6815_v35 = vadd.f32 %v6814_v41, %v13823_v20  ;;  %v14662_v40 = vld [vmem:[#allocation55_spill] sm:$0xff]  ;;  %v14663_v61 = vld [vmem:[#allocation56_spill] sm:$0xff]  ;;  %v5054_v45 = vadd.f32 %v14664_v29, %v13741_v17  ;;  %v14665_v41 = vld [vmem:[#allocation58_spill] sm:$0xff] }
 0x45c   :  { %v10866_v13 = vpop.eup %10865  ;;  %10885 = vtanh.f32 %v7434_v42  ;;  %v7465_v36 = vmul.f32 %v6813_v16, %v4957_v9  ;;  %v7464_v3 = vmul.f32 %v6726_v59, %v4846_v50  ;;  %v5052_v56 = vadd.f32 %v14662_v40, %v13741_v17 }
 0x45d   :  { %v10868_v11 = vpop.eup %10867  ;;  %10887 = vtanh.f32 %v7463_v30  ;;  %v7466_v1 = vmul.f32 %v6815_v35, %v4959_v10  ;;  %v5165_v49 = vadd.f32 %v14663_v61, %v13741_v17  ;;  %v14666_v30 = vld [vmem:[#allocation59_spill] sm:$0xff] }
 0x45e   :  { %v10870_v7 = vpop.eup %10869  ;;  %10889 = vtanh.f32 %v7465_v36  ;;  %v5058_v35 = vadd.f32 %v14666_v30, %v13751_v26 }
 0x45f   :  { %v10872_v51 = vpop.eup %10871  ;;  %10891 = vtanh.f32 %v7464_v3 }
 0x460   :  { %v10874_v19 = vpop.eup %10873  ;;  %10893 = vtanh.f32 %v7466_v1  ;;  %v9883_v37 = vpack.c.bf16 %v10872_v51, %v10864_v23  ;;  %v5167_v23 = vadd.f32 %v14665_v41, %v13741_v17 }
 0x461   :  { %v10876_v55 = vpop.eup %10875  ;;  %v9891_v60 = vpack.c.bf16 %v10874_v19, %v10866_v13 }
 0x462   :  { %v10878_v57 = vpop.eup %10877  ;;  %v9881_v27 = vpack.c.bf16 %v10876_v55, %v10868_v11  ;;  %v14667_v11 = vld [vmem:[#allocation60_spill] sm:$0xff]  ;;  %v14668_v55 = vld [vmem:[#allocation61_spill] sm:$0xff] }
 0x463   :  { %v10880_v4 = vpop.eup %10879  ;;  %v9889_v2 = vpack.c.bf16 %v10878_v57, %v10870_v7  ;;  %v5171_v1 = vadd.f32 %v14667_v11, %v13751_v26  ;;  %v14676_v11 = vld [vmem:[#allocation69_spill] sm:$0xff] }
 0x464   :  { %v10882_v8 = vpop.eup %10881  ;;  %9882 = vmatprep.subr.bf16.mxu0 %v9881_v27 }
 0x465   :  { %v10884_v6 = vpop.eup %10883  ;;  %9890 = vmatprep.subr.bf16.mxu1 %v9889_v2  ;;  %9884 = vmatpush1.bf16.msra.mxu0 %v9883_v37  ;;  %v14669_v2 = vld [vmem:[#allocation62_spill] sm:$0xff] }
 0x466   :  { %v10886_v58 = vpop.eup %10885  ;;  %9892 = vmatpush1.bf16.msra.mxu1 %v9891_v60  ;;  %v5060_v60 = vadd.f32 %v14668_v55, %v13751_v26  ;;  %v14677_v55 = vld [vmem:[#allocation70_spill] sm:$0xff] }
 0x467   :  { %v10888_v21 = vpop.eup %10887 }
 0x468   :  { %v10890_v24 = vpop.eup %10889  ;;  %v9887_v15 = vpack.c.bf16 %v10888_v21, %v10880_v4 }
 0x469   :  { %v10892_v47 = vpop.eup %10891  ;;  %v9895_v44 = vpack.c.bf16 %v10890_v24, %v10882_v8 }
 0x46a   :  { %v10894_v25 = vpop.eup %10893  ;;  %v9885_v48 = vpack.c.bf16 %v10892_v47, %v10884_v6 }
 0x46b   :  { %v9893_v33 = vpack.c.bf16 %v10894_v25, %v10886_v58  ;;  %v14670_v58 = vld [vmem:[#allocation63_spill] sm:$0xff] }
 0x46c   :  { %9886 = vmatprep.subr.bf16.mxu0 %v9885_v48  ;;  %v6883_v38 = vpop.f32.mrb[104].mxu0  ;;  %v5064_v21 = vadd.f32 %v14670_v58, %v13770_v43 }
 0x46d   :  { %9894 = vmatprep.subr.bf16.mxu1 %v9893_v33  ;;  %v6884_v31 = vadd.f32 %v6883_v38, %v13755_v12  ;;  %v6972_v9 = vpop.f32.mrb[104].mxu1  ;;  %9888 = vmatpush1.bf16.msra.mxu0 %v9887_v15  ;;  %v6885_v42 = vpop.f32.mrb[105].mxu0 }
 0x46e   :  { %v6973_v50 = vadd.f32 %v6972_v9, %v13755_v12  ;;  %9896 = vmatpush1.bf16.msra.mxu1 %v9895_v44  ;;  %v6886_v16 = vadd.f32 %v6885_v42, %v13755_v12  ;;  %v6974_v59 = vpop.f32.mrb[105].mxu1  ;;  %v14671_v44 = vld [vmem:[#allocation64_spill] sm:$0xff] }
 0x46f   :  { %v7371_v39 = vmul.f32 %v6884_v31, %v5052_v56  ;;  %v6975_v10 = vadd.f32 %v6974_v59, %v13755_v12  ;;  %v5177_v25 = vadd.f32 %v14671_v44, %v13770_v43  ;;  %v14672_v56 = vld [vmem:[#allocation65_spill] sm:$0xff] }
 0x470   :  { %v7373_v13 = vmul.f32 %v6973_v50, %v5165_v49  ;;  %v7372_v36 = vmul.f32 %v6886_v16, %v5054_v45  ;;  %9425 = vmatmul.mubr.msk.f32.vlgmr.msra.gmra.mrb[136].mxu0 %vm2202_vm2, %v13892_v52  ;;  %v6889_v3 = vpop.f32.mrb[106].mxu0  ;;  %v5066_v31 = vadd.f32 %v14672_v56, %v13770_v43  ;;  %v14673_v49 = vld [vmem:[#allocation66_spill] sm:$0xff]  ;;  %v14674_v16 = vld [vmem:[#allocation67_spill] sm:$0xff] }
 0x471   :  { %10895 = vtanh.f32 %v7371_v39  ;;  %v7374_v7 = vmul.f32 %v6975_v10, %v5167_v23  ;;  %9426 = vmatmul.mubr.msk.f32.vlgmr.msra.gmra.mrb[136].mxu1 %vm2202_vm2, %v13892_v52  ;;  %v6890_v51 = vadd.f32 %v6889_v3, %v13765_v53  ;;  %v6978_v19 = vpop.f32.mrb[106].mxu1  ;;  %v6891_v37 = vpop.f32.mrb[107].mxu0  ;;  %8389 = vmatprep.mubr.f32.mxu0 %v14343_v63  ;;  %v5173_v52 = vadd.f32 %v14669_v2, %v13751_v26  ;;  %v14675_v10 = vld [vmem:[#allocation68_spill] sm:$0xff] }
 0x472   :  { %10897 = vtanh.f32 %v7373_v13  ;;  %v6979_v57 = vadd.f32 %v6978_v19, %v13765_v53  ;;  %v6892_v27 = vadd.f32 %v6891_v37, %v13765_v53  ;;  %v6980_v4 = vpop.f32.mrb[107].mxu1  ;;  %8460 = vmatprep.mubr.f32.mxu1 %v14343_v63  ;;  %v5179_v29 = vadd.f32 %v14673_v49, %v13770_v43 }
 0x473   :  { %10899 = vtanh.f32 %v7372_v36  ;;  %v7403_v8 = vmul.f32 %v6890_v51, %v5058_v35  ;;  %v6981_v6 = vadd.f32 %v6980_v4, %v13765_v53  ;;  %v5070_v59 = vadd.f32 %v14674_v16, %v13796_v34 }
 0x474   :  { %10901 = vtanh.f32 %v7374_v7  ;;  %v7405_v24 = vmul.f32 %v6979_v57, %v5171_v1  ;;  %v7404_v15 = vmul.f32 %v6892_v27, %v5060_v60  ;;  %v6895_v47 = vpop.f32.mrb[108].mxu0  ;;  %v5183_v30 = vadd.f32 %v14675_v10, %v13796_v34 }
 0x475   :  { %10903 = vtanh.f32 %v7403_v8  ;;  %v7406_v48 = vmul.f32 %v6981_v6, %v5173_v52  ;;  %v6896_v33 = vadd.f32 %v6895_v47, %v13801_v5  ;;  %v6984_v38 = vpop.f32.mrb[108].mxu1  ;;  %v6897_v40 = vpop.f32.mrb[109].mxu0  ;;  %v5072_v1 = vadd.f32 %v14676_v11, %v13796_v34 }
 0x476   :  { %10905 = vtanh.f32 %v7405_v24  ;;  %v6985_v9 = vadd.f32 %v6984_v38, %v13801_v5  ;;  %v6898_v42 = vadd.f32 %v6897_v40, %v13801_v5  ;;  %v6986_v61 = vpop.f32.mrb[109].mxu1  ;;  %v5185_v60 = vadd.f32 %v14677_v55, %v13796_v34 }
 0x477   :  { %10907 = vtanh.f32 %v7404_v15  ;;  %v7435_v45 = vmul.f32 %v6896_v33, %v5064_v21  ;;  %v6987_v50 = vadd.f32 %v6986_v61, %v13801_v5 }
 0x478   :  { %10909 = vtanh.f32 %v7406_v48  ;;  %v7437_v41 = vmul.f32 %v6985_v9, %v5177_v25  ;;  %v7436_v23 = vmul.f32 %v6898_v42, %v5066_v31  ;;  %v6901_v39 = vpop.f32.mrb[110].mxu0 }
 0x479   :  { %10911 = vtanh.f32 %v7435_v45  ;;  %v7438_v35 = vmul.f32 %v6987_v50, %v5179_v29  ;;  %v6902_v13 = vadd.f32 %v6901_v39, %v13823_v20  ;;  %v6990_v36 = vpop.f32.mrb[110].mxu1  ;;  %v6903_v3 = vpop.f32.mrb[111].mxu0 }
 0x47a   :  { %10913 = vtanh.f32 %v7437_v41  ;;  %v6991_v7 = vadd.f32 %v6990_v36, %v13823_v20  ;;  %v6904_v51 = vadd.f32 %v6903_v3, %v13823_v20  ;;  %v6992_v19 = vpop.f32.mrb[111].mxu1  ;;  %v5278_v41 = vadd.f32 %v13619_v32, %v13741_v17  ;;  %v14680_v32 = vld [vmem:[#allocation73_spill] sm:$0xff] }
 0x47b   :  { %v10896_v37 = vpop.eup %10895  ;;  %10915 = vtanh.f32 %v7436_v23  ;;  %v7467_v57 = vmul.f32 %v6902_v13, %v5070_v59  ;;  %v6993_v27 = vadd.f32 %v6992_v19, %v13823_v20  ;;  %v14679_v13 = vld [vmem:[#allocation72_spill] sm:$0xff] }
 0x47c   :  { %v10898_v4 = vpop.eup %10897  ;;  %10917 = vtanh.f32 %v7438_v35  ;;  %v7469_v2 = vmul.f32 %v6991_v7, %v5183_v30  ;;  %v7468_v52 = vmul.f32 %v6904_v51, %v5072_v1  ;;  %v14678_v30 = vld [vmem:[#allocation71_spill] sm:$0xff]  ;;  %v5280_v36 = vadd.f32 %v14679_v13, %v13741_v17 }
 0x47d   :  { %v10900_v8 = vpop.eup %10899  ;;  %10919 = vtanh.f32 %v7467_v57  ;;  %v7470_v6 = vmul.f32 %v6993_v27, %v5185_v60  ;;  %v5391_v35 = vadd.f32 %v14678_v30, %v13741_v17  ;;  %v5393_v7 = vadd.f32 %v14680_v32, %v13741_v17  ;;  %v14145_v27 = vld [vmem:[%s14319_s2 + $0x80] sm:$0xff]  ;;  %s11035_s2 = smov [#allocation2]  }
 0x47e   :  { %v10902_v58 = vpop.eup %10901  ;;  %10921 = vtanh.f32 %v7469_v2  ;;  %v5397_v2 = vadd.f32 %v13633_v0, %v13751_v26  ;;  %s8993_s15 = sshll.u32 %s11035_s2, 4  ;;  %s8994_s15 = int_to_ptr.vmem [resolvable:$true] %s8993_s15 }
 0x47f   :  { %v10904_v21 = vpop.eup %10903  ;;  %10923 = vtanh.f32 %v7468_v52  ;;  %s11008_s16 = scalar_lea.vmem %s8994_s15, 512  ;;  %p11013_p1 = scmp.lt.s32.totalorder %s8994_s15, %s8994_s15 }
 0x480   :  { %v10906_v24 = vpop.eup %10905  ;;  %10925 = vtanh.f32 %v7470_v6  ;;  %v9899_v15 = vpack.c.bf16 %v10904_v21, %v10896_v37  ;;  %v14681_v37 = vld [vmem:[#allocation74_spill] sm:$0xff]  ;;  %v14682_v21 = vld [vmem:[#allocation75_spill] sm:$0xff]  ;;  %p11009_p0 = scmp.ne.s32.totalorder %s8994_s15, %s11008_s16  ;;  %p11014_p2 = scmp.lt.s32.totalorder %s11008_s16, %s11008_s16 }
 0x481   :  { %v10908_v47 = vpop.eup %10907  ;;  %v9907_v44 = vpack.c.bf16 %v10906_v24, %v10898_v4  ;;  %v5284_v55 = vadd.f32 %v14681_v37, %v13751_v26  ;;  %v5286_v24 = vadd.f32 %v14682_v21, %v13751_v26 }
 0x482   :  { %v10910_v25 = vpop.eup %10909  ;;  %v9897_v48 = vpack.c.bf16 %v10908_v47, %v10900_v8  ;;  %p11015_p3 = por %p11014_p2, %p11013_p1 }
 0x483   :  { %v10912_v33 = vpop.eup %10911  ;;  %v9905_v38 = vpack.c.bf16 %v10910_v25, %v10902_v58 }
 0x484   :  { %v10914_v40 = vpop.eup %10913  ;;  %9898 = vmatprep.subr.bf16.mxu0 %v9897_v48  ;;  %p11016_p4 = pnand %p11015_p3, %p11009_p0 }
 0x485   :  { %v10916_v56 = vpop.eup %10915  ;;  %9906 = vmatprep.subr.bf16.mxu1 %v9905_v38  ;;  %9900 = vmatpush1.bf16.msra.mxu0 %v9899_v15  ;;  %v14684_v38 = vld [vmem:[#allocation77_spill] sm:$0xff] }
 0x486   :  { %v10918_v31 = vpop.eup %10917  ;;  %9908 = vmatpush1.bf16.msra.mxu1 %v9907_v44  ;;  %v14683_v44 = vld [vmem:[#allocation76_spill] sm:$0xff] }
 0x487   :  { %v10920_v9 = vpop.eup %10919  ;;  %v5399_v25 = vadd.f32 %v14683_v44, %v13751_v26 }
 0x488   :  { %v10922_v42 = vpop.eup %10921  ;;  %v9903_v61 = vpack.c.bf16 %v10920_v9, %v10912_v33 }
 0x489   :  { %v10924_v49 = vpop.eup %10923  ;;  %v9911_v29 = vpack.c.bf16 %v10922_v42, %v10914_v40  ;;  %v5290_v40 = vadd.f32 %v14684_v38, %v13770_v43  ;;  %v14685_v42 = vld [vmem:[#allocation78_spill] sm:$0xff] }
 0x48a   :  { %v10926_v45 = vpop.eup %10925  ;;  %v9901_v50 = vpack.c.bf16 %v10924_v49, %v10916_v56 }
 0x48b   :  { %v9909_v16 = vpack.c.bf16 %v10926_v45, %v10918_v31 }
 0x48c   :  { %9902 = vmatprep.subr.bf16.mxu0 %v9901_v50  ;;  %v7061_v59 = vpop.f32.mrb[112].mxu0 }
 0x48d   :  { %9910 = vmatprep.subr.bf16.mxu1 %v9909_v16  ;;  %v7062_v23 = vadd.f32 %v7061_v59, %v13755_v12  ;;  %v7150_v39 = vpop.f32.mrb[112].mxu1  ;;  %9904 = vmatpush1.bf16.msra.mxu0 %v9903_v61  ;;  %v7063_v10 = vpop.f32.mrb[113].mxu0  ;;  %v5403_v61 = vadd.f32 %v14685_v42, %v13770_v43  ;;  %v14686_v16 = vld [vmem:[#allocation79_spill] sm:$0xff] }
 0x48e   :  { %v7151_v3 = vadd.f32 %v7150_v39, %v13755_v12  ;;  %9912 = vmatpush1.bf16.msra.mxu1 %v9911_v29  ;;  %v7064_v11 = vadd.f32 %v7063_v10, %v13755_v12  ;;  %v7152_v1 = vpop.f32.mrb[113].mxu1  ;;  %v5292_v59 = vadd.f32 %v14686_v16, %v13770_v43  ;;  %v14687_v10 = vld [vmem:[#allocation80_spill] sm:$0xff] }
 0x48f   :  { %v7375_v51 = vmul.f32 %v7062_v23, %v5278_v41  ;;  %v7153_v19 = vadd.f32 %v7152_v1, %v13755_v12  ;;  %v5405_v30 = vadd.f32 %v14687_v10, %v13770_v43 }
 0x490   :  { %v7377_v60 = vmul.f32 %v7151_v3, %v5391_v35  ;;  %v7376_v57 = vmul.f32 %v7064_v11, %v5280_v36  ;;  %9427 = vmatmul.mubr.msk.f32.vlgmr.msra.gmra.mrb[138].mxu0 %vm2202_vm2, %v14145_v27  ;;  %v7067_v4 = vpop.f32.mrb[114].mxu0  ;;  %v14688_v36 = vld [vmem:[#allocation81_spill] sm:$0xff] }
 0x491   :  { %10927 = vtanh.f32 %v7375_v51  ;;  %v7378_v52 = vmul.f32 %v7153_v19, %v5393_v7  ;;  %9428 = vmatmul.mubr.msk.f32.vlgmr.msra.gmra.mrb[138].mxu1 %vm2202_vm2, %v14145_v27  ;;  %v7068_v8 = vadd.f32 %v7067_v4, %v13765_v53  ;;  %v7156_v6 = vpop.f32.mrb[114].mxu1  ;;  %v7069_v58 = vpop.f32.mrb[115].mxu0  ;;  %8531 = vmatprep.mubr.f32.mxu0 %v14343_v63  ;;  %v5296_v3 = vadd.f32 %v14688_v36, %v13796_v34  ;;  %v14689_v7 = vld [vmem:[#allocation82_spill] sm:$0xff] }
 0x492   :  { %10929 = vtanh.f32 %v7377_v60  ;;  %v7157_v15 = vadd.f32 %v7156_v6, %v13765_v53  ;;  %v7070_v47 = vadd.f32 %v7069_v58, %v13765_v53  ;;  %v7158_v0 = vpop.f32.mrb[115].mxu1  ;;  %8602 = vmatprep.mubr.f32.mxu1 %v14343_v63  ;;  %v5409_v51 = vadd.f32 %v14689_v7, %v13796_v34  ;;  %v14691_v58 = vld [vmem:[#allocation84_spill] sm:$0xff] }
 0x493   :  { %10931 = vtanh.f32 %v7376_v57  ;;  %v7407_v48 = vmul.f32 %v7068_v8, %v5284_v55  ;;  %v7159_v33 = vadd.f32 %v7158_v0, %v13765_v53  ;;  %v14690_v57 = vld [vmem:[#allocation83_spill] sm:$0xff]  ;;  %v5411_v21 = vadd.f32 %v14691_v58, %v13796_v34 }
 0x494   :  { %10933 = vtanh.f32 %v7378_v52  ;;  %v7409_v56 = vmul.f32 %v7157_v15, %v5397_v2  ;;  %v7408_v31 = vmul.f32 %v7070_v47, %v5286_v24  ;;  %v7073_v9 = vpop.f32.mrb[116].mxu0  ;;  %v5298_v4 = vadd.f32 %v14690_v57, %v13796_v34 }
 0x495   :  { %10935 = vtanh.f32 %v7407_v48  ;;  %v7410_v49 = vmul.f32 %v7159_v33, %v5399_v25  ;;  %v7074_v29 = vadd.f32 %v7073_v9, %v13801_v5  ;;  %v7162_v45 = vpop.f32.mrb[116].mxu1  ;;  %v7075_v50 = vpop.f32.mrb[117].mxu0  ;;  %v5617_v7 = vadd.f32 %v13727_v54, %v13741_v17 }
 0x496   :  { %10937 = vtanh.f32 %v7409_v56  ;;  %v7163_v41 = vadd.f32 %v7162_v45, %v13801_v5  ;;  %v7076_v23 = vadd.f32 %v7075_v50, %v13801_v5  ;;  %v7164_v39 = vpop.f32.mrb[117].mxu1 }
 0x497   :  { %10939 = vtanh.f32 %v7408_v31  ;;  %v7439_v35 = vmul.f32 %v7074_v29, %v5290_v40  ;;  %v7165_v13 = vadd.f32 %v7164_v39, %v13801_v5 }
 0x498   :  { %10941 = vtanh.f32 %v7410_v49  ;;  %v7441_v11 = vmul.f32 %v7163_v41, %v5403_v61  ;;  %v7440_v1 = vmul.f32 %v7076_v23, %v5292_v59  ;;  %v7079_v32 = vpop.f32.mrb[118].mxu0 }
 0x499   :  { %10943 = vtanh.f32 %v7439_v35  ;;  %v7442_v19 = vmul.f32 %v7165_v13, %v5405_v30  ;;  %v7080_v37 = vadd.f32 %v7079_v32, %v13823_v20  ;;  %v7168_v55 = vpop.f32.mrb[118].mxu1  ;;  %v7081_v60 = vpop.f32.mrb[119].mxu0 }
 0x49a   :  { %10945 = vtanh.f32 %v7441_v11  ;;  %v7169_v2 = vadd.f32 %v7168_v55, %v13823_v20  ;;  %v7082_v52 = vadd.f32 %v7081_v60, %v13823_v20  ;;  %v7170_v8 = vpop.f32.mrb[119].mxu1 }
 0x49b   :  { %v10928_v6 = vpop.eup %10927  ;;  %10947 = vtanh.f32 %v7440_v1  ;;  %v7471_v24 = vmul.f32 %v7080_v37, %v5296_v3  ;;  %v7171_v15 = vadd.f32 %v7170_v8, %v13823_v20  ;;  %v5504_v3 = vadd.f32 %v13723_v22, %v13741_v17 }
 0x49c   :  { %v10930_v47 = vpop.eup %10929  ;;  %10949 = vtanh.f32 %v7442_v19  ;;  %v7473_v0 = vmul.f32 %v7169_v2, %v5409_v51  ;;  %v7472_v44 = vmul.f32 %v7082_v52, %v5298_v4  ;;  %v5506_v51 = vadd.f32 %v13729_v62, %v13741_v17  ;;  %v14692_v52 = vld [vmem:[#allocation85_spill] sm:$0xff] }
 0x49d   :  { %v10932_v25 = vpop.eup %10931  ;;  %10951 = vtanh.f32 %v7471_v24  ;;  %v7474_v48 = vmul.f32 %v7171_v15, %v5411_v21  ;;  %v5619_v22 = vadd.f32 %v13732_v14, %v13741_v17  ;;  %v5510_v4 = vadd.f32 %v13735_v18, %v13751_v26  ;;  %v14693_v18 = vld [vmem:[#allocation86_spill] sm:$0xff] }
 0x49e   :  { %v10934_v33 = vpop.eup %10933  ;;  %10953 = vtanh.f32 %v7473_v0  ;;  %v5623_v8 = vadd.f32 %v14692_v52, %v13751_v26  ;;  %v5512_v58 = vadd.f32 %v14693_v18, %v13751_v26 }
 0x49f   :  { %v10936_v38 = vpop.eup %10935  ;;  %10955 = vtanh.f32 %v7472_v44 }
 0x4a0   :  { %v10938_v40 = vpop.eup %10937  ;;  %10957 = vtanh.f32 %v7474_v48  ;;  %v9915_v56 = vpack.c.bf16 %v10936_v38, %v10928_v6  ;;  %v14695_v48 = vld [vmem:[#allocation88_spill] sm:$0xff] }
 0x4a1   :  { %v10940_v31 = vpop.eup %10939  ;;  %v9923_v9 = vpack.c.bf16 %v10938_v40, %v10930_v47  ;;  %v14694_v47 = vld [vmem:[#allocation87_spill] sm:$0xff] }
 0x4a2   :  { %v10942_v42 = vpop.eup %10941  ;;  %v9913_v61 = vpack.c.bf16 %v10940_v31, %v10932_v25  ;;  %v5625_v0 = vadd.f32 %v14694_v47, %v13751_v26  ;;  %v14696_v31 = vld [vmem:[#allocation89_spill] sm:$0xff] }
 0x4a3   :  { %v10944_v49 = vpop.eup %10943  ;;  %v9921_v29 = vpack.c.bf16 %v10942_v42, %v10934_v33  ;;  %v5516_v33 = vadd.f32 %v14695_v48, %v13770_v43 }
 0x4a4   :  { %v10946_v45 = vpop.eup %10945  ;;  %9914 = vmatprep.subr.bf16.mxu0 %v9913_v61 }
 0x4a5   :  { %v10948_v50 = vpop.eup %10947  ;;  %9922 = vmatprep.subr.bf16.mxu1 %v9921_v29  ;;  %9916 = vmatpush1.bf16.msra.mxu0 %v9915_v56 }
 0x4a6   :  { %v10950_v16 = vpop.eup %10949  ;;  %9924 = vmatpush1.bf16.msra.mxu1 %v9923_v9  ;;  %v5629_v9 = vadd.f32 %v14696_v31, %v13770_v43 }
 0x4a7   :  { %v10952_v59 = vpop.eup %10951 }
 0x4a8   :  { %v10954_v41 = vpop.eup %10953  ;;  %v9919_v23 = vpack.c.bf16 %v10952_v59, %v10944_v49  ;;  %v14697_v49 = vld [vmem:[#allocation90_spill] sm:$0xff] }
 0x4a9   :  { %v10956_v39 = vpop.eup %10955  ;;  %v9927_v10 = vpack.c.bf16 %v10954_v41, %v10946_v45  ;;  %v5518_v29 = vadd.f32 %v14697_v49, %v13770_v43 }
 0x4aa   :  { %v10958_v30 = vpop.eup %10957  ;;  %v9917_v35 = vpack.c.bf16 %v10956_v39, %v10948_v50  ;;  %v5522_v39 = vadd.f32 %v13757_v46, %v13796_v34 }
 0x4ab   :  { %v9925_v13 = vpack.c.bf16 %v10958_v30, %v10950_v16  ;;  %v14698_v16 = vld [vmem:[#allocation91_spill] sm:$0xff] }
 0x4ac   :  { %9918 = vmatprep.subr.bf16.mxu0 %v9917_v35  ;;  %v5631_v59 = vadd.f32 %v14698_v16, %v13770_v43 }
 0x4ad   :  { %9926 = vmatprep.subr.bf16.mxu1 %v9925_v13  ;;  %9920 = vmatpush1.bf16.msra.mxu0 %v9919_v23  ;;  %v14699_v13 = vld [vmem:[#allocation92_spill] sm:$0xff] }
 0x4ae   :  { %v7239_v36 = vpop.f32.mrb[120].mxu0  ;;  %9928 = vmatpush1.bf16.msra.mxu1 %v9927_v10 }
 0x4af   :  { %v7240_v11 = vadd.f32 %v7239_v36, %v13755_v12  ;;  %v7328_v1 = vpop.f32.mrb[120].mxu1  ;;  %v7241_v32 = vpop.f32.mrb[121].mxu0  ;;  %v5635_v36 = vadd.f32 %v14699_v13, %v13796_v34 }
 0x4b0   :  { %v7329_v19 = vadd.f32 %v7328_v1, %v13755_v12  ;;  %v7242_v37 = vadd.f32 %v7241_v32, %v13755_v12  ;;  %v7330_v55 = vpop.f32.mrb[121].mxu1  ;;  %9429 = vmatmul.mubr.msk.f32.vlgmr.msra.gmra.mrb[140].mxu0 %vm2202_vm2, %v14145_v27  ;;  %v14700_v32 = vld [vmem:[#allocation93_spill] sm:$0xff] }
 0x4b1   :  { %v7379_v60 = vmul.f32 %v7240_v11, %v5504_v3  ;;  %v7331_v57 = vadd.f32 %v7330_v55, %v13755_v12  ;;  %9430 = vmatmul.mubr.msk.f32.vlgmr.msra.gmra.mrb[140].mxu1 %vm2202_vm2, %v14145_v27  ;;  %8673 = vmatprep.mubr.f32.mxu0 %v14343_v63 }
 0x4b2   :  { %v7381_v2 = vmul.f32 %v7329_v19, %v5617_v7  ;;  %v7380_v54 = vmul.f32 %v7242_v37, %v5506_v51  ;;  %v7245_v62 = vpop.f32.mrb[122].mxu0  ;;  %8744 = vmatprep.mubr.f32.mxu1 %v14343_v63  ;;  %v5524_v7 = vadd.f32 %v14700_v32, %v13796_v34  ;;  %v5637_v37 = vadd.f32 %v13763_v28, %v13796_v34 }
 0x4b3   :  { %10959 = vtanh.f32 %v7379_v60  ;;  %v7382_v6 = vmul.f32 %v7331_v57, %v5619_v22  ;;  %v7246_v14 = vadd.f32 %v7245_v62, %v13765_v53  ;;  %v7334_v17 = vpop.f32.mrb[122].mxu1  ;;  %v7247_v12 = vpop.f32.mrb[123].mxu0 }
 0x4b4   :  { %10961 = vtanh.f32 %v7381_v2  ;;  %v7335_v21 = vadd.f32 %v7334_v17, %v13765_v53  ;;  %v7248_v24 = vadd.f32 %v7247_v12, %v13765_v53  ;;  %v7336_v15 = vpop.f32.mrb[123].mxu1 }
 0x4b5   :  { %10963 = vtanh.f32 %v7380_v54  ;;  %v7411_v44 = vmul.f32 %v7246_v14, %v5510_v4  ;;  %v7337_v25 = vadd.f32 %v7336_v15, %v13765_v53  ;;  %v11034_v15 = vmov 1966171168  }
 0x4b6   :  { %10965 = vtanh.f32 %v7382_v6  ;;  %v7413_v38 = vmul.f32 %v7335_v21, %v5623_v8  ;;  %v7412_v40 = vmul.f32 %v7248_v24, %v5512_v58  ;;  %v7251_v56 = vpop.f32.mrb[124].mxu0  ;;  %v8788_v47 = vunpack.c.l.s4 %v11034_v15 }
 0x4b7   :  { %10967 = vtanh.f32 %v7411_v44  ;;  %v7414_v42 = vmul.f32 %v7337_v25, %v5625_v0  ;;  %v7252_v63 = vadd.f32 %v7251_v56, %v13801_v5  ;;  %v7340_v61 = vpop.f32.mrb[124].mxu1  ;;  %v7253_v26 = vpop.f32.mrb[125].mxu0  ;;  %v8790_v0 = vlaneseq }
 0x4b8   :  { %10969 = vtanh.f32 %v7413_v38  ;;  %v7341_v53 = vadd.f32 %v7340_v61, %v13801_v5  ;;  %v7254_v45 = vadd.f32 %v7253_v26, %v13801_v5  ;;  %v7342_v50 = vpop.f32.mrb[125].mxu1  ;;  %v8789_v31 = vunpack.c.0.s8 %v8788_v47 }
 0x4b9   :  { %10971 = vtanh.f32 %v7412_v40  ;;  %v7443_v41 = vmul.f32 %v7252_v63, %v5516_v33  ;;  %v7343_v23 = vadd.f32 %v7342_v50, %v13801_v5 }
 0x4ba   :  { %10973 = vtanh.f32 %v7414_v42  ;;  %v7445_v10 = vmul.f32 %v7341_v53, %v5629_v9  ;;  %v7444_v30 = vmul.f32 %v7254_v45, %v5518_v29  ;;  %v7257_v35 = vpop.f32.mrb[126].mxu0  ;;  %v8791_v9 = vshrl.u32 %v8790_v0, 7  ;;  %v14241_v42 = vpop.permute.xlu0 %7609 }
 0x4bb   :  { %10975 = vtanh.f32 %v7443_v41  ;;  %v7446_v3 = vmul.f32 %v7343_v23, %v5631_v59  ;;  %v7258_v11 = vadd.f32 %v7257_v35, %v13823_v20  ;;  %v7346_v1 = vpop.f32.mrb[126].mxu1  ;;  %v7259_v43 = vpop.f32.mrb[127].mxu0 }
 0x4bc   :  { %10977 = vtanh.f32 %v7445_v10  ;;  %v7347_v5 = vadd.f32 %v7346_v1, %v13823_v20  ;;  %v7260_v46 = vadd.f32 %v7259_v43, %v13823_v20  ;;  %v7348_v51 = vpop.f32.mrb[127].mxu1  ;;  %v14246_v45 = vsub.s32 %v8789_v31, %v8791_v9 }
 0x4bd   :  { %v10960_v19 = vpop.eup %10959  ;;  %10979 = vtanh.f32 %v7444_v30  ;;  %v7475_v55 = vmul.f32 %v7258_v11, %v5522_v39  ;;  %v7349_v22 = vadd.f32 %v7348_v51, %v13823_v20 }
 0x4be   :  { %v10962_v60 = vpop.eup %10961  ;;  %10981 = vtanh.f32 %v7446_v3  ;;  %v7477_v57 = vmul.f32 %v7347_v5, %v5635_v36  ;;  %v7476_v4 = vmul.f32 %v7260_v46, %v5524_v7 }
 0x4bf   :  { %v10964_v2 = vpop.eup %10963  ;;  %10983 = vtanh.f32 %v7475_v55  ;;  %v7478_v54 = vmul.f32 %v7349_v22, %v5637_v37 }
 0x4c0   :  { %v10966_v62 = vpop.eup %10965  ;;  %10985 = vtanh.f32 %v7477_v57 }
 0x4c1   :  { %v10968_v52 = vpop.eup %10967  ;;  %10987 = vtanh.f32 %v7476_v4 }
 0x4c2   :  { %v10970_v8 = vpop.eup %10969  ;;  %10989 = vtanh.f32 %v7478_v54  ;;  %v9931_v6 = vpack.c.bf16 %v10968_v52, %v10960_v19 }
 0x4c3   :  { %v10972_v14 = vpop.eup %10971  ;;  %v9939_v28 = vpack.c.bf16 %v10970_v8, %v10962_v60 }
 0x4c4   :  { %v10974_v34 = vpop.eup %10973  ;;  %v9929_v17 = vpack.c.bf16 %v10972_v14, %v10964_v2 }
 0x4c5   :  { %v10976_v12 = vpop.eup %10975  ;;  %v9937_v20 = vpack.c.bf16 %v10974_v34, %v10966_v62 }
 0x4c6   :  { %v10978_v18 = vpop.eup %10977  ;;  %9930 = vmatprep.subr.bf16.mxu0 %v9929_v17 }
 0x4c7   :  { %v10980_v58 = vpop.eup %10979  ;;  %9938 = vmatprep.subr.bf16.mxu1 %v9937_v20  ;;  %9932 = vmatpush1.bf16.msra.mxu0 %v9931_v6 }
 0x4c8   :  { %v10982_v21 = vpop.eup %10981  ;;  %9940 = vmatpush1.bf16.msra.mxu1 %v9939_v28 }
 0x4c9   :  { %v10984_v24 = vpop.eup %10983 }
 0x4ca   :  { %v10986_v44 = vpop.eup %10985  ;;  %v9935_v25 = vpack.c.bf16 %v10984_v24, %v10976_v12 }
 0x4cb   :  { %v10988_v48 = vpop.eup %10987  ;;  %v9943_v33 = vpack.c.bf16 %v10986_v44, %v10978_v18 }
 0x4cc   :  { %v10990_v38 = vpop.eup %10989  ;;  %v9933_v40 = vpack.c.bf16 %v10988_v48, %v10980_v58 }
 0x4cd   :  { %v9941_v56 = vpack.c.bf16 %v10990_v38, %v10982_v21 }
 0x4ce   :  { %9934 = vmatprep.subr.bf16.mxu0 %v9933_v40  ;;  %v7681_v63 = vpop.f32.mrb[128].mxu0 }
 0x4cf   :  { %9942 = vmatprep.subr.bf16.mxu1 %v9941_v56  ;;  %9936 = vmatpush1.bf16.msra.mxu0 %v9935_v25  ;;  %v7682_v61 = vadd.f32 %v7681_v63, %v14241_v42  ;;  %v7752_v26 = vpop.f32.mrb[128].mxu1  ;;  %v7683_v49 = vpop.f32.mrb[129].mxu0 }
 0x4d0   :  { %9944 = vmatpush1.bf16.msra.mxu1 %v9943_v33  ;;  %v7753_v29 = vadd.f32 %v7752_v26, %v14241_v42  ;;  %v7684_v53 = vadd.f32 %v7683_v49, %v14241_v42  ;;  %v7754_v50 = vpop.f32.mrb[129].mxu1 }
 0x4d1   :  { %v7755_v16 = vadd.f32 %v7754_v50, %v14241_v42 }
 0x4d2   :  { %9431 = vmatmul.mubr.msk.f32.vlgmr.msra.gmra.mrb[142].mxu0 %vm2202_vm2, %v14145_v27  ;;  %v8783_v59 = vcombine.low %v7682_v61, %v7684_v53 }
 0x4d3   :  { %9432 = vmatmul.mubr.msk.f32.vlgmr.msra.gmra.mrb[142].mxu1 %vm2202_vm2, %v14145_v27  ;;  %v8784_v41 = vcombine.low %v7753_v29, %v7755_v16 }
 0x4d4   :  { %v8793_v23 = vrot.slane %v8783_v59, %v14246_v45 }
 0x4d5   :  { %v8800_v39 = vrot.slane %v8784_v41, %v14246_v45 }
 0x4d7   :  { %v8815_v10 = vcombine.low %v8793_v23, %v8800_v39 }
 0x4d9   :  { %v8823_v51 = vrot.slane %v8815_v10, %v14246_v45 }
 0x4e4   :  { %v7823_v30 = vpop.f32.mrb[130].mxu0 }
 0x4e5   :  { %v7824_v35 = vadd.f32 %v7823_v30, %v14241_v42  ;;  %v7894_v13 = vpop.f32.mrb[130].mxu1  ;;  %v7825_v36 = vpop.f32.mrb[131].mxu0 }
 0x4e6   :  { %v7895_v3 = vadd.f32 %v7894_v13, %v14241_v42  ;;  %v7826_v11 = vadd.f32 %v7825_v36, %v14241_v42  ;;  %v7896_v1 = vpop.f32.mrb[131].mxu1 }
 0x4e7   :  { %v7897_v43 = vadd.f32 %v7896_v1, %v14241_v42 }
 0x4e8   :  { %v8785_v32 = vcombine.low %v7824_v35, %v7826_v11 }
 0x4e9   :  { %v8786_v27 = vcombine.low %v7895_v3, %v7897_v43 }
 0x4ea   :  { %v8807_v7 = vrot.slane %v8785_v32, %v14246_v45 }
 0x4eb   :  { %v8814_v5 = vrot.slane %v8786_v27, %v14246_v45 }
 0x4ed   :  { %v8816_v46 = vcombine.low %v8807_v7, %v8814_v5 }
 0x4ef   :  { %v8830_v19 = vrot.slane %v8816_v46, %v14246_v45 }
 0x4f1   :  { %v8831_v37 = vcombine.low %v8823_v51, %v8830_v19 }
 0x4f3   :  { %8983 = vst [vmem:[#allocation2] sm:$0xff] %v8831_v37 }
 0x503   :  { %v7965_v55 = vpop.f32.mrb[132].mxu0 }
 0x504   :  { %v7966_v22 = vadd.f32 %v7965_v55, %v14241_v42  ;;  %v8036_v60 = vpop.f32.mrb[132].mxu1  ;;  %v7967_v57 = vpop.f32.mrb[133].mxu0 }
 0x505   :  { %v8037_v4 = vadd.f32 %v8036_v60, %v14241_v42  ;;  %v7968_v2 = vadd.f32 %v7967_v57, %v14241_v42  ;;  %v8038_v54 = vpop.f32.mrb[133].mxu1 }
 0x506   :  { %v8039_v62 = vadd.f32 %v8038_v54, %v14241_v42 }
 0x507   :  { %v8832_v52 = vcombine.low %v7966_v22, %v7968_v2 }
 0x508   :  { %v8833_v8 = vcombine.low %v8037_v4, %v8039_v62 }
 0x509   :  { %v8842_v6 = vrot.slane %v8832_v52, %v14246_v45 }
 0x50a   :  { %v8849_v14 = vrot.slane %v8833_v8, %v14246_v45 }
 0x50c   :  { %v8864_v28 = vcombine.low %v8842_v6, %v8849_v14 }
 0x50e   :  { %v8872_v48 = vrot.slane %v8864_v28, %v14246_v45 }
 0x523   :  { %v8107_v34 = vpop.f32.mrb[134].mxu0 }
 0x524   :  { %v8108_v17 = vadd.f32 %v8107_v34, %v14241_v42  ;;  %v8178_v12 = vpop.f32.mrb[134].mxu1  ;;  %v8109_v20 = vpop.f32.mrb[135].mxu0 }
 0x525   :  { %v8179_v18 = vadd.f32 %v8178_v12, %v14241_v42  ;;  %v8110_v58 = vadd.f32 %v8109_v20, %v14241_v42  ;;  %v8180_v21 = vpop.f32.mrb[135].mxu1 }
 0x526   :  { %v8181_v24 = vadd.f32 %v8180_v21, %v14241_v42 }
 0x527   :  { %v8834_v15 = vcombine.low %v8108_v17, %v8110_v58 }
 0x528   :  { %v8835_v47 = vcombine.low %v8179_v18, %v8181_v24 }
 0x529   :  { %v8856_v0 = vrot.slane %v8834_v15, %v14246_v45 }
 0x52a   :  { %v8863_v44 = vrot.slane %v8835_v47, %v14246_v45 }
 0x52c   :  { %v8865_v25 = vcombine.low %v8856_v0, %v8863_v44 }
 0x52e   :  { %v8879_v33 = vrot.slane %v8865_v25, %v14246_v45 }
 0x530   :  { %v8880_v38 = vcombine.low %v8872_v48, %v8879_v33 }
 0x532   :  { %8984 = vst [vmem:[#allocation2 + $0x8] sm:$0xff] %v8880_v38 }
 0x543   :  { %v8249_v40 = vpop.f32.mrb[136].mxu0 }
 0x544   :  { %v8250_v56 = vadd.f32 %v8249_v40, %v14241_v42  ;;  %v8320_v31 = vpop.f32.mrb[136].mxu1  ;;  %v8251_v9 = vpop.f32.mrb[137].mxu0 }
 0x545   :  { %v8321_v63 = vadd.f32 %v8320_v31, %v14241_v42  ;;  %v8252_v61 = vadd.f32 %v8251_v9, %v14241_v42  ;;  %v8322_v26 = vpop.f32.mrb[137].mxu1 }
 0x546   :  { %v8323_v49 = vadd.f32 %v8322_v26, %v14241_v42 }
 0x547   :  { %v8881_v29 = vcombine.low %v8250_v56, %v8252_v61 }
 0x548   :  { %v8882_v53 = vcombine.low %v8321_v63, %v8323_v49 }
 0x549   :  { %v8891_v50 = vrot.slane %v8881_v29, %v14246_v45 }
 0x54a   :  { %v8898_v16 = vrot.slane %v8882_v53, %v14246_v45 }
 0x54c   :  { %v8913_v59 = vcombine.low %v8891_v50, %v8898_v16 }
 0x54e   :  { %v8921_v27 = vrot.slane %v8913_v59, %v14246_v45 }
 0x563   :  { %v8391_v41 = vpop.f32.mrb[138].mxu0 }
 0x564   :  { %v8392_v23 = vadd.f32 %v8391_v41, %v14241_v42  ;;  %v8462_v39 = vpop.f32.mrb[138].mxu1  ;;  %v8393_v10 = vpop.f32.mrb[139].mxu0 }
 0x565   :  { %v8463_v30 = vadd.f32 %v8462_v39, %v14241_v42  ;;  %v8394_v35 = vadd.f32 %v8393_v10, %v14241_v42  ;;  %v8464_v13 = vpop.f32.mrb[139].mxu1 }
 0x566   :  { %v8465_v36 = vadd.f32 %v8464_v13, %v14241_v42 }
 0x567   :  { %v8883_v3 = vcombine.low %v8392_v23, %v8394_v35 }
 0x568   :  { %v8884_v11 = vcombine.low %v8463_v30, %v8465_v36 }
 0x569   :  { %v8905_v1 = vrot.slane %v8883_v3, %v14246_v45 }
 0x56a   :  { %v8912_v43 = vrot.slane %v8884_v11, %v14246_v45 }
 0x56c   :  { %v8914_v32 = vcombine.low %v8905_v1, %v8912_v43 }
 0x56e   :  { %v8928_v7 = vrot.slane %v8914_v32, %v14246_v45 }
 0x570   :  { %v8929_v5 = vcombine.low %v8921_v27, %v8928_v7 }
 0x572   :  { %8985 = vst [vmem:[#allocation2 + $0x10] sm:$0xff] %v8929_v5 }
 0x583   :  { %v8533_v46 = vpop.f32.mrb[140].mxu0 }
 0x584   :  { %v8534_v51 = vadd.f32 %v8533_v46, %v14241_v42  ;;  %v8604_v19 = vpop.f32.mrb[140].mxu1  ;;  %v8535_v37 = vpop.f32.mrb[141].mxu0 }
 0x585   :  { %v8605_v55 = vadd.f32 %v8604_v19, %v14241_v42  ;;  %v8536_v22 = vadd.f32 %v8535_v37, %v14241_v42  ;;  %v8606_v60 = vpop.f32.mrb[141].mxu1 }
 0x586   :  { %v8607_v57 = vadd.f32 %v8606_v60, %v14241_v42 }
 0x587   :  { %v8930_v4 = vcombine.low %v8534_v51, %v8536_v22 }
 0x588   :  { %v8931_v2 = vcombine.low %v8605_v55, %v8607_v57 }
 0x589   :  { %v8940_v54 = vrot.slane %v8930_v4, %v14246_v45 }
 0x58a   :  { %v8947_v62 = vrot.slane %v8931_v2, %v14246_v45 }
 0x58c   :  { %v8962_v52 = vcombine.low %v8940_v54, %v8947_v62 }
 0x58e   :  { %v8970_v47 = vrot.slane %v8962_v52, %v14246_v45 }
 0x5a5   :  { %v8675_v8 = vpop.f32.mrb[142].mxu0 }
 0x5a6   :  { %v8676_v6 = vadd.f32 %v8675_v8, %v14241_v42  ;;  %v8746_v14 = vpop.f32.mrb[142].mxu1  ;;  %v8677_v28 = vpop.f32.mrb[143].mxu0 }
 0x5a7   :  { %v8747_v34 = vadd.f32 %v8746_v14, %v14241_v42  ;;  %v8678_v17 = vadd.f32 %v8677_v28, %v14241_v42  ;;  %v8748_v12 = vpop.f32.mrb[143].mxu1 }
 0x5a8   :  { %v8749_v20 = vadd.f32 %v8748_v12, %v14241_v42 }
 0x5a9   :  { %v8932_v18 = vcombine.low %v8676_v6, %v8678_v17 }
 0x5aa   :  { %v8933_v58 = vcombine.low %v8747_v34, %v8749_v20 }
 0x5ab   :  { %v8954_v21 = vrot.slane %v8932_v18, %v14246_v45 }
 0x5ac   :  { %v8961_v24 = vrot.slane %v8933_v58, %v14246_v45 }
 0x5ae   :  { %v8963_v15 = vcombine.low %v8954_v21, %v8961_v24 }
 0x5b0   :  { %v8977_v0 = vrot.slane %v8963_v15, %v14246_v45 }
 0x5b2   :  { %v8978_v44 = vcombine.low %v8970_v47, %v8977_v0 }
 0x5b4   :  { %8986 = vst [vmem:[#allocation2 + $0x18] sm:$0xff] %v8978_v44 }
 0x5b5   :  { %11019 = shalt.err (!%p11016_p4)
}
 0x5b6   :  { %s11020_s18 = scalar_lea.hbm %s14321_s4, 512 }
 0x5b7   :  { %p11021_p5 = scmp.ne.s32.totalorder %s14321_s4, %s11020_s18  ;;  %p11024_p6 = scmp.lt.u32.totalorder %s11020_s18, %s14321_s4 }
 0x5b9   :  { %p11026_p7 = pnand %p11024_p6, %p11021_p5 }
 0x5bb   :  { %11029 = shalt.err (!%p11026_p7)
}
 0x5bc   :  { %8996 = dma.vmem_to_hbm [thread:$0]  %s8994_s15, 512, %s14321_s4, [#allocation3]  }
 0x5bd   :  { %11030 = dma.done.wait [#allocation3], 512  }
 0x5be   :  { %11031 = vsyncadd [#allocation3], 4294966784 }
 0x5bf   :  { %9000 = vsyncpa [#allocation3], 1 }

</bundles_post_ra>
